<compile_context>
chip_gen: v6e
topology: v6e:2x2x1
jax: 0.10.0
libtpu: 0.0.40
codegen_flags: <defaults>
</compile_context>

<pallas_src>
import math

import jax
import jax.numpy as jnp
from jax.experimental import pallas as pl
from jax.experimental.pallas import tpu as pltpu


# ----------------------------------------------------------------------------
# glue: window + DFT phase tables (deterministic "parameters")
# ----------------------------------------------------------------------------
def _window(window_mode: str, L: int) -> jnp.ndarray:
    n = jnp.arange(L, dtype=jnp.float32)
    if window_mode == "hamming":            # torch default periodic=True
        return 0.54 - 0.46 * jnp.cos(2.0 * math.pi * n / L)
    elif window_mode == "hanning":
        return 0.5 - 0.5 * jnp.cos(2.0 * math.pi * n / L)
    elif window_mode == "blackman":
        return (0.42 - 0.5 * jnp.cos(2.0 * math.pi * n / L)
                + 0.08 * jnp.cos(4.0 * math.pi * n / L))
    else:
        # TODO(synk): bartlett / kaiser windows not implemented; fall back to hamming.
        return 0.54 - 0.46 * jnp.cos(2.0 * math.pi * n / L)


def _phase(rows: int, cols: int, N: int) -> jnp.ndarray:
    # integer (r*c mod N) keeps the float32 phase accurate for large indices
    r = jnp.arange(rows, dtype=jnp.int32)[:, None]
    c = jnp.arange(cols, dtype=jnp.int32)[None, :]
    return ((r * c) % N).astype(jnp.float32) * (2.0 * math.pi / N)


def _round_up(x: int, m: int) -> int:
    return ((x + m - 1) // m) * m


# ----------------------------------------------------------------------------
# Pallas kernel: one grid step == one 256-row tile of (channel*frame) rows
# ----------------------------------------------------------------------------
def _make_kernel(Hp: int, Lq: int, eps: float):
    def kernel(frames_ref, cs_ref, icos_ref, ecos_ref, ceps_ref, env_ref):
        cdt = cs_ref.dtype

        # fused re/im half-spectrum forward DFT (window folded into cs):
        # one MXU matmul, lane-aligned split of the halves.
        xs = jnp.dot(frames_ref[...], cs_ref[...],
                     preferred_element_type=jnp.float32)               # (TR, 2*Hp)
        re = xs[:, :Hp]
        im = xs[:, Hp:]
        log_mag = 0.5 * jnp.log(re * re + im * im + eps)               # (TR, Hp)

        # half cepstrum = real(IFFT(log|X|)) for quefrencies 0..N/2; the 1/N
        # scaling and Hermitian x2 weights are baked into the (Hp, Hp) table.
        ceps = jnp.dot(log_mag.astype(cdt), icos_ref[...],
                       preferred_element_type=jnp.float32)             # (TR, Hp)
        ceps_ref[...] = ceps

        # envelope = exp(real(FFT(liftered cepstrum))[:N//2+1]); only the kept
        # low quefrencies contribute (symmetric 2x weights baked into ecos),
        # so the contraction is a lane-aligned Lq-wide slice, not N.
        env_ref[...] = jnp.exp(jnp.dot(ceps[:, :Lq].astype(cdt), ecos_ref[...],
                                       preferred_element_type=jnp.float32))
    return kernel


# ----------------------------------------------------------------------------
# wrapper: framing (glue) + pallas_call + mirror / pitch in plain JAX
# ----------------------------------------------------------------------------
def cepstrum_forward(waveform: jnp.ndarray, sample_rate: int, *,
                     window_mode: str = "hamming", frame_length_ms: int = 32,
                     shift_length_ms: int = 8, fft_point: int = 2 ** 10,
                     liftering_order_ms: int = 2, threshold: float = 0.1,
                     row_tile: int = 256, compute_dtype=jnp.bfloat16):
    C, S = waveform.shape
    L = int(frame_length_ms * sample_rate / 1000)
    shift = int(L / 4) if shift_length_ms == 8 else int(shift_length_ms * sample_rate / 1000)
    N = fft_point
    while N < L * 2:
        N *= 2
    lift = int(liftering_order_ms * sample_rate / 1000)
    F = math.ceil((S - L) / shift + 1)
    H = N // 2 + 1                            # Hermitian half-spectrum width
    Hp = _round_up(H, 128)                    # lane-dense padded width (513 -> 640)
    Lp = max(128, _round_up(L, 128))          # 128-aligned contraction dim
    Lq = min(_round_up(lift + 1, 128), Hp)    # kept-quefrency (liftering) width
    # TODO(synk): lift >= N//2 (liftering keeps everything) is not handled specially.

    # ---- framing: zero-pad tail, gather frames, flatten channel x frame rows ----
    padded_len = (F - 1) * shift + L
    padded = jnp.zeros((C, padded_len), jnp.float32).at[:, :S].set(
        waveform.astype(jnp.float32))
    idx = jnp.arange(F)[:, None] * shift + jnp.arange(L)[None, :]
    frames = padded[:, idx].reshape(C * F, L)                          # (R, L)
    R = C * F
    G = (R + row_tile - 1) // row_tile
    Rp = G * row_tile
    # pad rows to a tile multiple and columns to 128-aligned; cast to MXU dtype
    frames_p = jnp.zeros((Rp, Lp), compute_dtype).at[:R, :L].set(
        frames.astype(compute_dtype))

    win = _window(window_mode, L)

    # ---- DFT tables (Hermitian-half, lane-padded, window + weights baked in) ----
    cos_f = jnp.cos(_phase(L, H, N)) * win[:, None]                    # (L, H)
    sin_f = jnp.sin(_phase(L, H, N)) * win[:, None]                    # (L, H)
    cs = jnp.zeros((Lp, 2 * Hp), jnp.float32)
    cs = cs.at[:L, :H].set(cos_f).at[:L, Hp:Hp + H].set(sin_f)         # cos | sin

    k = jnp.arange(H, dtype=jnp.float32)
    wk = jnp.where((k == 0) | (k == N // 2), 1.0, 2.0) / N             # Hermitian weights
    icos = jnp.zeros((Hp, Hp), jnp.float32).at[:H, :H].set(
        jnp.cos(_phase(H, H, N)) * wk[:, None])                        # half-ceps IDFT

    q = jnp.arange(Lq, dtype=jnp.float32)
    wq = jnp.where(q <= lift,
                   jnp.where((q == 0) | (q == N // 2), 1.0, 2.0),
                   0.0)                                                # keep + symmetric x2
    ecos = jnp.zeros((Lq, Hp), jnp.float32).at[:, :H].set(
        jnp.cos(_phase(Lq, H, N)) * wq[:, None])                       # compact envelope DFT

    cs = cs.astype(compute_dtype)
    icos = icos.astype(compute_dtype)
    ecos = ecos.astype(compute_dtype)

    kernel = _make_kernel(Hp, Lq, 1e-30)

    def _const_spec(shape):
        # constant across the grid -> single-buffered (no wasted double buffer)
        return pl.BlockSpec(shape, lambda r: (0, 0), pipeline_mode=pl.Buffered(1))

    ceps_rows, env_rows = pl.pallas_call(
        kernel,
        out_shape=(jax.ShapeDtypeStruct((Rp, Hp), jnp.float32),
                   jax.ShapeDtypeStruct((Rp, Hp), jnp.float32)),
        grid_spec=pltpu.PrefetchScalarGridSpec(
            num_scalar_prefetch=0,
            grid=(G,),
            in_specs=[
                pl.BlockSpec((row_tile, Lp), lambda r: (r, 0)),   # frame rows (pipelined)
                _const_spec((Lp, 2 * Hp)),                        # fused cos|sin forward DFT
                _const_spec((Hp, Hp)),                            # half-cepstrum IDFT
                _const_spec((Lq, Hp)),                            # compact liftered envelope DFT
            ],
            out_specs=[
                pl.BlockSpec((row_tile, Hp), lambda r: (r, 0)),   # half-cepstrum rows
                pl.BlockSpec((row_tile, Hp), lambda r: (r, 0)),   # envelope rows (lane-dense)
            ]),
        # TODO(synk): on v7x, confirm the row-tile axis is sharded across both
        # TensorCores; if not, switch to pltpu.CORE_PARALLEL / core_map.
        compiler_params=pltpu.CompilerParams(
            dimension_semantics=("parallel",),
            vmem_limit_bytes=48 * 1024 * 1024),                   # within v7x 64 MiB physical
    )(frames_p, cs, icos, ecos)

    # reconstruct the full N-wide cepstrum from the half via even symmetry
    half = ceps_rows[:R, :H]                                           # (R, N/2+1)
    full = jnp.concatenate([half, half[:, 1:N // 2][:, ::-1]], axis=-1)  # (R, N)
    cepstrums = full.reshape(C, F, N)
    envelopes = env_rows[:R, :H].reshape(C, F, H)

    # pitch: peak cepstrum value beyond the liftering order, thresholded
    # (plain JAX; matches the reference's value-based pitch formula).
    peak = jnp.max(cepstrums[..., lift:], axis=-1)
    pitches = jnp.where(peak >= threshold,
                        sample_rate / (peak * 1000.0),
                        jnp.zeros_like(peak))
    return cepstrums, pitches, envelopes


if __name__ == "__main__":
    key = jax.random.PRNGKey(0)
    channels, samples, sample_rate = 2, 128, 1000   # -> L=32, shift=8, N=1024, F=13
    waveform = jax.random.normal(key, (channels, samples), dtype=jnp.float32)

    cepstrums, pitches, envelopes = cepstrum_forward(waveform, sample_rate)
    jax.block_until_ready((cepstrums, pitches, envelopes))

    assert cepstrums.shape == (2, 13, 1024)
    assert pitches.shape == (2, 13)
    assert envelopes.shape == (2, 13, 513)
    assert bool(jnp.all(jnp.isfinite(cepstrums)))
    assert bool(jnp.all(jnp.isfinite(envelopes)))
    print("KERNEL_OK")
</pallas_src>

<mosaic_0001>
module attributes {stable_mosaic.version = 11 : i64} {
  func.func @kernel(%arg0: i32, %arg1: memref<256x128xbf16, #tpu.memory_space<vmem>>, %arg2: memref<128x1280xbf16, #tpu.memory_space<vmem>>, %arg3: memref<640x640xbf16, #tpu.memory_space<vmem>>, %arg4: memref<128x640xbf16, #tpu.memory_space<vmem>>, %arg5: memref<256x640xf32, #tpu.memory_space<vmem>>, %arg6: memref<256x640xf32, #tpu.memory_space<vmem>>) attributes {dimension_semantics = [#tpu.dimension_semantics<parallel>], iteration_bounds = array<i64: 1>, scalar_prefetch = 0 : i64, scratch_operands = 0 : i64, tpu.core_type = #tpu.core_type<tc>, window_params = [{transform_indices = @transform_0, window_bounds = array<i64: 256, 128>}, {pipeline_mode = #tpu.pipeline_mode<synchronous>, transform_indices = @transform_1, window_bounds = array<i64: 128, 1280>}, {pipeline_mode = #tpu.pipeline_mode<synchronous>, transform_indices = @transform_2, window_bounds = array<i64: 640, 640>}, {pipeline_mode = #tpu.pipeline_mode<synchronous>, transform_indices = @transform_3, window_bounds = array<i64: 128, 640>}, {transform_indices = @transform_4, window_bounds = array<i64: 256, 640>}, {transform_indices = @transform_5, window_bounds = array<i64: 256, 640>}]} {
    %c0 = arith.constant 0 : index
    %c0_0 = arith.constant 0 : index
    %0 = vector.load %arg1[%c0, %c0_0] : memref<256x128xbf16, #tpu.memory_space<vmem>>, vector<256x128xbf16>
    %c0_1 = arith.constant 0 : index
    %c0_2 = arith.constant 0 : index
    %1 = vector.load %arg2[%c0_1, %c0_2] : memref<128x1280xbf16, #tpu.memory_space<vmem>>, vector<128x1280xbf16>
    %cst = arith.constant dense<0.000000e+00> : vector<256x1280xf32>
    %2 = tpu.matmul %0, %1, %cst {dimension_numbers = #tpu.dot_dimension_numbers<[1], [0], [0], [1], [0, 0, 1, 1], [], []>} : vector<256x128xbf16>, vector<128x1280xbf16>, vector<256x1280xf32> -> vector<256x1280xf32>
    %3 = vector.extract_strided_slice %2 {offsets = [0, 0], sizes = [256, 640], strides = [1, 1]} : vector<256x1280xf32> to vector<256x640xf32>
    %4 = vector.extract_strided_slice %2 {offsets = [0, 640], sizes = [256, 640], strides = [1, 1]} : vector<256x1280xf32> to vector<256x640xf32>
    %5 = arith.mulf %3, %3 : vector<256x640xf32>
    %6 = arith.mulf %4, %4 : vector<256x640xf32>
    %7 = arith.addf %5, %6 : vector<256x640xf32>
    %cst_3 = arith.constant 1.000000e-30 : f32
    %8 = vector.broadcast %cst_3 : f32 to vector<256x640xf32>
    %9 = arith.addf %7, %8 : vector<256x640xf32>
    %10 = math.log %9 : vector<256x640xf32>
    %cst_4 = arith.constant 5.000000e-01 : f32
    %11 = vector.broadcast %cst_4 : f32 to vector<256x640xf32>
    %12 = arith.mulf %11, %10 : vector<256x640xf32>
    %13 = arith.truncf %12 : vector<256x640xf32> to vector<256x640xbf16>
    %c0_5 = arith.constant 0 : index
    %c0_6 = arith.constant 0 : index
    %14 = vector.load %arg3[%c0_5, %c0_6] : memref<640x640xbf16, #tpu.memory_space<vmem>>, vector<640x640xbf16>
    %cst_7 = arith.constant dense<0.000000e+00> : vector<256x640xf32>
    %15 = tpu.matmul %13, %14, %cst_7 {dimension_numbers = #tpu.dot_dimension_numbers<[1], [0], [0], [1], [0, 0, 1, 1], [], []>} : vector<256x640xbf16>, vector<640x640xbf16>, vector<256x640xf32> -> vector<256x640xf32>
    %c0_8 = arith.constant 0 : index
    %c0_9 = arith.constant 0 : index
    %16 = vector.load %arg5[%c0_8, %c0_9] : memref<256x640xf32, #tpu.memory_space<vmem>>, vector<256x640xf32>
    tpu.vector_store %arg5[%c0_8, %c0_9], %15 {strides = array<i32>} : memref<256x640xf32, #tpu.memory_space<vmem>>, vector<256x640xf32>,
    %17 = vector.extract_strided_slice %15 {offsets = [0, 0], sizes = [256, 128], strides = [1, 1]} : vector<256x640xf32> to vector<256x128xf32>
    %18 = arith.truncf %17 : vector<256x128xf32> to vector<256x128xbf16>
    %c0_10 = arith.constant 0 : index
    %c0_11 = arith.constant 0 : index
    %19 = vector.load %arg4[%c0_10, %c0_11] : memref<128x640xbf16, #tpu.memory_space<vmem>>, vector<128x640xbf16>
    %cst_12 = arith.constant dense<0.000000e+00> : vector<256x640xf32>
    %20 = tpu.matmul %18, %19, %cst_12 {dimension_numbers = #tpu.dot_dimension_numbers<[1], [0], [0], [1], [0, 0, 1, 1], [], []>} : vector<256x128xbf16>, vector<128x640xbf16>, vector<256x640xf32> -> vector<256x640xf32>
    %21 = math.exp %20 : vector<256x640xf32>
    %c0_13 = arith.constant 0 : index
    %c0_14 = arith.constant 0 : index
    %22 = vector.load %arg6[%c0_13, %c0_14] : memref<256x640xf32, #tpu.memory_space<vmem>>, vector<256x640xf32>
    tpu.vector_store %arg6[%c0_13, %c0_14], %21 {strides = array<i32>} : memref<256x640xf32, #tpu.memory_space<vmem>>, vector<256x640xf32>,
    return
  }
  func.func @transform_0(%arg0: i32) -> (i32, i32) {
    %c0_i32 = arith.constant 0 : i32
    %c0_i32_0 = arith.constant 0 : i32
    return %arg0, %c0_i32 : i32, i32
  }
  func.func @transform_1(%arg0: i32) -> (i32, i32) {
    %c0_i32 = arith.constant 0 : i32
    %c0_i32_0 = arith.constant 0 : i32
    %c0_i32_1 = arith.constant 0 : i32
    return %c0_i32, %c0_i32_0 : i32, i32
  }
  func.func @transform_2(%arg0: i32) -> (i32, i32) {
    %c0_i32 = arith.constant 0 : i32
    %c0_i32_0 = arith.constant 0 : i32
    %c0_i32_1 = arith.constant 0 : i32
    return %c0_i32, %c0_i32_0 : i32, i32
  }
  func.func @transform_3(%arg0: i32) -> (i32, i32) {
    %c0_i32 = arith.constant 0 : i32
    %c0_i32_0 = arith.constant 0 : i32
    %c0_i32_1 = arith.constant 0 : i32
    return %c0_i32, %c0_i32_0 : i32, i32
  }
  func.func @transform_4(%arg0: i32) -> (i32, i32) {
    %c0_i32 = arith.constant 0 : i32
    %c0_i32_0 = arith.constant 0 : i32
    return %arg0, %c0_i32 : i32, i32
  }
  func.func @transform_5(%arg0: i32) -> (i32, i32) {
    %c0_i32 = arith.constant 0 : i32
    %c0_i32_0 = arith.constant 0 : i32
    return %arg0, %c0_i32 : i32, i32
  }
}

</mosaic_0001>

<bundles_post_ra>
// kernel: tpu_custom_call.1
= control target key start
LH: loop header
LB: loop body
LE: loop exit
PB: predicated region body
PF: predicated region fallthrough
CT: control target
= control target key end

     0   :  { %11 = vsyncpa [#allocation3], 0  ;;  %s12298_s0 = inlined_call_operand.hbm [shape: bf16[256,128], index: 0, kind: input, shape index: {}]   ;;  %s12299_s1 = inlined_call_operand.hbm [shape: bf16[128,1280], index: 1, kind: input, shape index: {}]   ;;  %s12300_s2 = inlined_call_operand.hbm [shape: bf16[640,640], index: 2, kind: input, shape index: {}]   ;;  %s12301_s3 = inlined_call_operand.hbm [shape: bf16[128,640], index: 3, kind: input, shape index: {}]   ;;  %s12302_s4 = inlined_call_operand.hbm [shape: f32[256,640], index: 4, kind: output, shape index: {0}]   ;;  %s12303_s5 = inlined_call_operand.hbm [shape: f32[256,640], index: 5, kind: output, shape index: {1}]  }
   0x1   :  { %12 = vsyncpa [#allocation6], 0 }
   0x2   :  { %13 = vsyncpa [#allocation9], 0 }
   0x3   :  { %14 = vsyncpa [#allocation4], 0 }
   0x4   :  { %15 = vsyncpa [#allocation12], 0  ;;  %s9240_s18 = smov [#allocation5]  }
   0x5   :  { %s33_s19 = sshll.u32 %s9240_s18, 4  ;;  %s34_s19 = int_to_ptr.vmem [resolvable:$true] %s33_s19 }
   0x6   :  { %s9118_s20 = scalar_lea.vmem %s34_s19, 10240  ;;  %p9123_p1 = scmp.lt.s32.totalorder %s34_s19, %s34_s19 }
   0x7   :  { %p9119_p0 = scmp.ne.s32.totalorder %s34_s19, %s9118_s20  ;;  %p9124_p2 = scmp.lt.s32.totalorder %s9118_s20, %s9118_s20 }
   0x9   :  { %p9125_p3 = por %p9124_p2, %p9123_p1 }
   0xb   :  { %p9126_p4 = pnand %p9125_p3, %p9119_p0 }
   0xd   :  { %9129 = shalt.err (!%p9126_p4)
}
   0xe   :  { %s9241_s21 = smov 640   ;;  %s9242_s22 = smov 40  }
   0xf   :  { %39 = dma.hbm_to_vmem [thread:$0]  %s12299_s1, 10240, %s34_s19, [#allocation6], %s9241_s21, %s9241_s21, %s9242_s22  }
  0x10   :  { %s9243_s25 = smov [#allocation2]  }
  0x11   :  { %s21_s26 = sshll.u32 %s9243_s25, 4  ;;  %s22_s26 = int_to_ptr.vmem [resolvable:$true] %s21_s26 }
  0x12   :  { %s9138_s27 = scalar_lea.vmem %s22_s26, 2048  ;;  %p9143_p6 = scmp.lt.s32.totalorder %s22_s26, %s22_s26 }
  0x13   :  { %p9139_p5 = scmp.ne.s32.totalorder %s22_s26, %s9138_s27  ;;  %p9144_p7 = scmp.lt.s32.totalorder %s9138_s27, %s9138_s27 }
  0x15   :  { %p9145_p8 = por %p9144_p7, %p9143_p6 }
  0x17   :  { %p9146_p9 = pnand %p9145_p8, %p9139_p5 }
  0x19   :  { %9149 = shalt.err (!%p9146_p9)
}
  0x1a   :  { %s9244_s28 = smov 64   ;;  %s9245_s29 = smov 4  }
  0x1b   :  { %27 = dma.hbm_to_vmem [thread:$0]  %s12298_s0, 2048, %s22_s26, [#allocation3], %s9244_s28, %s9244_s28, %s9245_s29  }
  0x1c   :  { %s9246_s7 = smov [#allocation7]  }
  0x1d   :  { %s45_s8 = sshll.u32 %s9246_s7, 4  ;;  %s46_s8 = int_to_ptr.vmem [resolvable:$true] %s45_s8 }
  0x1e   :  { %s9158_s1 = scalar_lea.vmem %s46_s8, 25600  ;;  %p9163_p11 = scmp.lt.s32.totalorder %s46_s8, %s46_s8 }
  0x1f   :  { %p9159_p10 = scmp.ne.s32.totalorder %s46_s8, %s9158_s1  ;;  %p9164_p12 = scmp.lt.s32.totalorder %s9158_s1, %s9158_s1 }
  0x21   :  { %p9165_p13 = por %p9164_p12, %p9163_p11 }
  0x23   :  { %p9166_p0 = pnand %p9165_p13, %p9159_p10 }
  0x25   :  { %9169 = shalt.err (!%p9166_p0)
}
  0x26   :  { %s9247_s9 = smov 320   ;;  %s9248_s10 = smov 20  }
  0x27   :  { %51 = dma.hbm_to_vmem [thread:$0]  %s12300_s2, 25600, %s46_s8, [#allocation6], %s9247_s9, %s9247_s9, %s9248_s10  }
  0x28   :  { %s9249_s13 = smov [#allocation8]  }
  0x29   :  { %s57_s14 = sshll.u32 %s9249_s13, 4  ;;  %s58_s14 = int_to_ptr.vmem [resolvable:$true] %s57_s14 }
  0x2a   :  { %s9178_s0 = scalar_lea.vmem %s58_s14, 5120  ;;  %p9183_p2 = scmp.lt.s32.totalorder %s58_s14, %s58_s14 }
  0x2b   :  { %p9179_p1 = scmp.ne.s32.totalorder %s58_s14, %s9178_s0  ;;  %p9184_p3 = scmp.lt.s32.totalorder %s9178_s0, %s9178_s0 }
  0x2d   :  { %p9185_p4 = por %p9184_p3, %p9183_p2 }
  0x2f   :  { %p9186_p5 = pnand %p9185_p4, %p9179_p1 }
  0x31   :  { %9189 = shalt.err (!%p9186_p5)
}
  0x32   :  { %63 = dma.hbm_to_vmem [thread:$0]  %s12301_s3, 5120, %s58_s14, [#allocation9], %s9247_s9, %s9247_s9, %s9248_s10  }
  0x33   :  { %9230 = dma.done.wait [#allocation3], 2048  }
  0x34   :  { %9231 = vsyncadd [#allocation3], 4294965248 }
  0x35   :  { %9232 = dma.done.wait [#allocation6], 35840  }
  0x36   :  { %9233 = vsyncadd [#allocation6], 4294931456 }
  0x37   :  { %9234 = dma.done.wait [#allocation9], 5120  }
  0x38   :  { %9235 = vsyncadd [#allocation9], 4294962176  ;;  %v12304_v0 = vmov 0   ;;  %v7982_v1 = vld [vmem:[#allocation5 + $0x234] ss:$40 sps:$4 sm:$0xff]   ;;  %v9300_v35 = vld [vmem:[#allocation2] sm:$0xff]  }
  0x39   :  { %717 = vmatprep.mubr.bf16.mxu0 %v12304_v0  ;;  %910 = vmatprep.mubr.bf16.mxu1 %v12304_v0  ;;  %v7984_v2 = vld [vmem:[#allocation5 + $0x23c] ss:$40 sps:$4 sm:$0xff]   ;;  %v7986_v3 = vld [vmem:[#allocation5 + $0x230] ss:$40 sps:$4 sm:$0xff]   ;;  %v7990_v6 = vld [vmem:[#allocation5 + $0x1ec] ss:$40 sps:$4 sm:$0xff]  }
  0x3a   :  { %685 = vmatprep.subr.bf16.mxu0 %v7982_v1  ;;  %v7987_v4 = vld [vmem:[#allocation5 + $0x238] ss:$40 sps:$4 sm:$0xff]   ;;  %878 = vmatprep.subr.bf16.mxu1 %v7984_v2  ;;  %v7988_v5 = vld [vmem:[#allocation5 + $0x1e4] ss:$40 sps:$4 sm:$0xff]   ;;  %v7993_v8 = vld [vmem:[#allocation5 + $0x1e8] ss:$40 sps:$4 sm:$0xff]  }
  0x3b   :  { %686 = vmatpush1.bf16.msra.mxu0 %v7986_v3  ;;  %879 = vmatpush1.bf16.msra.mxu1 %v7987_v4  ;;  %v7992_v7 = vld [vmem:[#allocation5 + $0x1e0] ss:$40 sps:$4 sm:$0xff]   ;;  %v7994_v9 = vld [vmem:[#allocation5 + $0x194] ss:$40 sps:$4 sm:$0xff]   ;;  %v7998_v11 = vld [vmem:[#allocation5 + $0x190] ss:$40 sps:$4 sm:$0xff]  }
  0x3c   :  { %687 = vmatprep.subr.bf16.mxu0 %v7988_v5  ;;  %880 = vmatprep.subr.bf16.mxu1 %v7990_v6  ;;  %v7996_v10 = vld [vmem:[#allocation5 + $0x19c] ss:$40 sps:$4 sm:$0xff]   ;;  %v7999_v12 = vld [vmem:[#allocation5 + $0x198] ss:$40 sps:$4 sm:$0xff]   ;;  %v8002_v14 = vld [vmem:[#allocation5 + $0x14c] ss:$40 sps:$4 sm:$0xff]  }
  0x3d   :  { %v8000_v13 = vld [vmem:[#allocation5 + $0x144] ss:$40 sps:$4 sm:$0xff]   ;;  %v8004_v15 = vld [vmem:[#allocation5 + $0x140] ss:$40 sps:$4 sm:$0xff]   ;;  %v8006_v17 = vld [vmem:[#allocation5 + $0xf4] ss:$40 sps:$4 sm:$0xff]  }
  0x3e   :  { %v8005_v16 = vld [vmem:[#allocation5 + $0x148] ss:$40 sps:$4 sm:$0xff]   ;;  %v8008_v18 = vld [vmem:[#allocation5 + $0xfc] ss:$40 sps:$4 sm:$0xff]   ;;  %v8011_v20 = vld [vmem:[#allocation5 + $0xf8] ss:$40 sps:$4 sm:$0xff]  }
  0x3f   :  { %688 = vmatpush1.bf16.msra.mxu0 %v7992_v7  ;;  %881 = vmatpush1.bf16.msra.mxu1 %v7993_v8  ;;  %v8010_v19 = vld [vmem:[#allocation5 + $0xf0] ss:$40 sps:$4 sm:$0xff]   ;;  %v8012_v21 = vld [vmem:[#allocation5 + $0xa4] ss:$40 sps:$4 sm:$0xff]   ;;  %v8016_v23 = vld [vmem:[#allocation5 + $0xa0] ss:$40 sps:$4 sm:$0xff]  }
  0x40   :  { %689 = vmatprep.subr.bf16.mxu0 %v7994_v9  ;;  %882 = vmatprep.subr.bf16.mxu1 %v7996_v10  ;;  %v8014_v22 = vld [vmem:[#allocation5 + $0xac] ss:$40 sps:$4 sm:$0xff]   ;;  %v8017_v24 = vld [vmem:[#allocation5 + $0xa8] ss:$40 sps:$4 sm:$0xff]   ;;  %v8020_v26 = vld [vmem:[#allocation5 + $0x5c] ss:$40 sps:$4 sm:$0xff]  }
  0x41   :  { %v8018_v25 = vld [vmem:[#allocation5 + $0x54] ss:$40 sps:$4 sm:$0xff]   ;;  %v8022_v27 = vld [vmem:[#allocation5 + $0x50] ss:$40 sps:$4 sm:$0xff]   ;;  %v8024_v29 = vld [vmem:[#allocation5 + $0x4] ss:$40 sps:$4 sm:$0xff]  }
  0x42   :  { %v8023_v28 = vld [vmem:[#allocation5 + $0x58] ss:$40 sps:$4 sm:$0xff]   ;;  %v8026_v30 = vld [vmem:[#allocation5 + $0xc] ss:$40 sps:$4 sm:$0xff]   ;;  %v8029_v32 = vld [vmem:[#allocation5 + $0x8] ss:$40 sps:$4 sm:$0xff]  }
  0x43   :  { %690 = vmatpush1.bf16.msra.mxu0 %v7998_v11  ;;  %883 = vmatpush1.bf16.msra.mxu1 %v7999_v12  ;;  %v8028_v31 = vld [vmem:[#allocation5] ss:$40 sps:$4 sm:$0xff]   ;;  %v8033_v33 = vld [vmem:[#allocation5 + $0x244] ss:$40 sps:$4 sm:$0xff]   ;;  %v8041_v38 = vld [vmem:[#allocation5 + $0x1f4] ss:$40 sps:$4 sm:$0xff]  }
  0x44   :  { %691 = vmatprep.subr.bf16.mxu0 %v8000_v13  ;;  %884 = vmatprep.subr.bf16.mxu1 %v8002_v14  ;;  %v8036_v34 = vld [vmem:[#allocation5 + $0x24c] ss:$40 sps:$4 sm:$0xff]   ;;  %v8031_v36 = vld [vmem:[#allocation5 + $0x240] ss:$40 sps:$4 sm:$0xff]   ;;  %v8044_v39 = vld [vmem:[#allocation5 + $0x1fc] ss:$40 sps:$4 sm:$0xff]  }
  0x45   :  { %v8034_v37 = vld [vmem:[#allocation5 + $0x248] ss:$40 sps:$4 sm:$0xff]   ;;  %v8042_v41 = vld [vmem:[#allocation5 + $0x1f8] ss:$40 sps:$4 sm:$0xff]   ;;  %v8049_v42 = vld [vmem:[#allocation5 + $0x1a4] ss:$40 sps:$4 sm:$0xff]  }
  0x46   :  { %v8039_v40 = vld [vmem:[#allocation5 + $0x1f0] ss:$40 sps:$4 sm:$0xff]   ;;  %v8052_v43 = vld [vmem:[#allocation5 + $0x1ac] ss:$40 sps:$4 sm:$0xff]   ;;  %v8047_v45 = vld [vmem:[#allocation5 + $0x1a0] ss:$40 sps:$4 sm:$0xff]  }
  0x47   :  { %692 = vmatpush1.bf16.msra.mxu0 %v8004_v15  ;;  %885 = vmatpush1.bf16.msra.mxu1 %v8005_v16  ;;  %v9306_v44 = vld [vmem:[#allocation2 + $0x8] sm:$0xff]   ;;  %v8057_v47 = vld [vmem:[#allocation5 + $0x154] ss:$40 sps:$4 sm:$0xff]   ;;  %v8055_v49 = vld [vmem:[#allocation5 + $0x150] ss:$40 sps:$4 sm:$0xff]   ;;  %s9251_s2 = smov [#allocation10]  }
  0x48   :  { %693 = vmatprep.subr.bf16.mxu0 %v8006_v17  ;;  %886 = vmatprep.subr.bf16.mxu1 %v8008_v18  ;;  %v8050_v46 = vld [vmem:[#allocation5 + $0x1a8] ss:$40 sps:$4 sm:$0xff]   ;;  %v8060_v48 = vld [vmem:[#allocation5 + $0x15c] ss:$40 sps:$4 sm:$0xff]   ;;  %v8058_v51 = vld [vmem:[#allocation5 + $0x158] ss:$40 sps:$4 sm:$0xff]  }
  0x49   :  { %v9312_v50 = vld [vmem:[#allocation2 + $0x10] sm:$0xff]   ;;  %v8065_v52 = vld [vmem:[#allocation5 + $0x104] ss:$40 sps:$4 sm:$0xff]   ;;  %v8063_v54 = vld [vmem:[#allocation5 + $0x100] ss:$40 sps:$4 sm:$0xff]   ;;  %s7235_s3 = sshll.u32 %s9251_s2, 4  ;;  %s7236_s3 = int_to_ptr.vmem [resolvable:$true] %s7235_s3 }
  0x4a   :  { %v8068_v53 = vld [vmem:[#allocation5 + $0x10c] ss:$40 sps:$4 sm:$0xff]   ;;  %v8066_v55 = vld [vmem:[#allocation5 + $0x108] ss:$40 sps:$4 sm:$0xff]   ;;  %v8076_v57 = vld [vmem:[#allocation5 + $0xbc] ss:$40 sps:$4 sm:$0xff]   ;;  %p9195_p7 = scmp.lt.s32.totalorder %s7236_s3, %s7236_s3 }
  0x4b   :  { %694 = vmatpush1.bf16.msra.mxu0 %v8010_v19  ;;  %887 = vmatpush1.bf16.msra.mxu1 %v8011_v20  ;;  %v8073_v56 = vld [vmem:[#allocation5 + $0xb4] ss:$40 sps:$4 sm:$0xff]   ;;  %v8071_v58 = vld [vmem:[#allocation5 + $0xb0] ss:$40 sps:$4 sm:$0xff]   ;;  %v8081_v60 = vld [vmem:[#allocation5 + $0x64] ss:$40 sps:$4 sm:$0xff]  }
  0x4c   :  { %695 = vmatprep.subr.bf16.mxu0 %v8012_v21  ;;  %888 = vmatprep.subr.bf16.mxu1 %v8014_v22  ;;  %v8074_v59 = vld [vmem:[#allocation5 + $0xb8] ss:$40 sps:$4 sm:$0xff]   ;;  %v8084_v61 = vld [vmem:[#allocation5 + $0x6c] ss:$40 sps:$4 sm:$0xff]   ;;  %v8082_v1 = vld [vmem:[#allocation5 + $0x68] ss:$40 sps:$4 sm:$0xff]  }
  0x4d   :  { %v9318_v62 = vld [vmem:[#allocation2 + $0x18] sm:$0xff]   ;;  %v8079_v63 = vld [vmem:[#allocation5 + $0x60] ss:$40 sps:$4 sm:$0xff]   ;;  %v9336_v9 = vld [vmem:[#allocation2 + $0x30] sm:$0xff]   ;;  %s9190_s17 = scalar_lea.vmem %s7236_s3, 20480 }
  0x4e   :  { %v8089_v2 = vld [vmem:[#allocation5 + $0x14] ss:$40 sps:$4 sm:$0xff]   ;;  %v8087_v4 = vld [vmem:[#allocation5 + $0x10] ss:$40 sps:$4 sm:$0xff]   ;;  %v9324_v6 = vld [vmem:[#allocation2 + $0x20] sm:$0xff]   ;;  %p9191_p6 = scmp.ne.s32.totalorder %s7236_s3, %s9190_s17  ;;  %p9196_p8 = scmp.lt.s32.totalorder %s9190_s17, %s9190_s17 }
  0x4f   :  { %696 = vmatpush1.bf16.msra.mxu0 %v8016_v23  ;;  %889 = vmatpush1.bf16.msra.mxu1 %v8017_v24  ;;  %v8092_v3 = vld [vmem:[#allocation5 + $0x1c] ss:$40 sps:$4 sm:$0xff]   ;;  %v8090_v5 = vld [vmem:[#allocation5 + $0x18] ss:$40 sps:$4 sm:$0xff]   ;;  %v9330_v8 = vld [vmem:[#allocation2 + $0x28] sm:$0xff]  }
  0x50   :  { %697 = vmatprep.subr.bf16.mxu0 %v8018_v25  ;;  %890 = vmatprep.subr.bf16.mxu1 %v8020_v26  ;;  %v8096_v7 = vld [vmem:[#allocation5 + $0x254] ss:$40 sps:$4 sm:$0xff]   ;;  %v9348_v11 = vld [vmem:[#allocation2 + $0x40] sm:$0xff]   ;;  %v9354_v12 = vld [vmem:[#allocation2 + $0x48] sm:$0xff]   ;;  %p9197_p9 = por %p9196_p8, %p9195_p7 }
  0x51   :  { %v9342_v10 = vld [vmem:[#allocation2 + $0x38] sm:$0xff]   ;;  %v9360_v13 = vld [vmem:[#allocation2 + $0x50] sm:$0xff]   ;;  %v9372_v15 = vld [vmem:[#allocation2 + $0x60] sm:$0xff]  }
  0x52   :  { %v9366_v14 = vld [vmem:[#allocation2 + $0x58] sm:$0xff]   ;;  %v9378_v16 = vld [vmem:[#allocation2 + $0x68] sm:$0xff]   ;;  %v9384_v18 = vld [vmem:[#allocation2 + $0x70] sm:$0xff]   ;;  %p9198_p10 = pnand %p9197_p9, %p9191_p6 }
  0x53   :  { %698 = vmatpush1.bf16.msra.mxu0 %v8022_v27  ;;  %891 = vmatpush1.bf16.msra.mxu1 %v8023_v28  ;;  %v8117_v17 = vld [vmem:[#allocation7 + $0x11c] ss:$20 sps:$4 sm:$0xff]   ;;  %v8099_v21 = vld [vmem:[#allocation5 + $0x204] ss:$40 sps:$4 sm:$0xff]   ;;  %v8120_v23 = vld [vmem:[#allocation7 + $0xf4] ss:$20 sps:$4 sm:$0xff]  }
  0x54   :  { %699 = vmatprep.subr.bf16.mxu0 %v8024_v29  ;;  %892 = vmatprep.subr.bf16.mxu1 %v8026_v30  ;;  %v9390_v19 = vld [vmem:[#allocation2 + $0x78] sm:$0xff]   ;;  %v8097_v24 = vld [vmem:[#allocation5 + $0x200] ss:$40 sps:$4 sm:$0xff]   ;;  %v8118_v26 = vld [vmem:[#allocation7 + $0xf0] ss:$20 sps:$4 sm:$0xff]  }
  0x55   :  { %v8094_v20 = vld [vmem:[#allocation5 + $0x250] ss:$40 sps:$4 sm:$0xff]   ;;  %v8102_v25 = vld [vmem:[#allocation5 + $0x1b4] ss:$40 sps:$4 sm:$0xff]   ;;  %v8126_v28 = vld [vmem:[#allocation7 + $0xcc] ss:$20 sps:$4 sm:$0xff]  }
  0x56   :  { %v8115_v22 = vld [vmem:[#allocation7 + $0x118] ss:$20 sps:$4 sm:$0xff]   ;;  %v8124_v30 = vld [vmem:[#allocation7 + $0xc8] ss:$20 sps:$4 sm:$0xff]  }
  0x57   :  { %700 = vmatpush1.bf16.msra.mxu0 %v8028_v31  ;;  %893 = vmatpush1.bf16.msra.mxu1 %v8029_v32  ;;  %v8100_v27 = vld [vmem:[#allocation5 + $0x1b0] ss:$40 sps:$4 sm:$0xff]   ;;  %v8105_v29 = vld [vmem:[#allocation5 + $0x164] ss:$40 sps:$4 sm:$0xff]   ;;  %v8103_v32 = vld [vmem:[#allocation5 + $0x160] ss:$40 sps:$4 sm:$0xff]  }
  0x58   :  { %1071 = vmatprep.subr.bf16.mxu0 %v8033_v33  ;;  %1264 = vmatprep.subr.bf16.mxu1 %v8036_v34  ;;  %v8129_v31 = vld [vmem:[#allocation7 + $0xa4] ss:$20 sps:$4 sm:$0xff]   ;;  %v8108_v33 = vld [vmem:[#allocation5 + $0x114] ss:$40 sps:$4 sm:$0xff]  }
  0x59   :  { %v8127_v34 = vld [vmem:[#allocation7 + $0xa0] ss:$20 sps:$4 sm:$0xff]  }
  0x5a   :  { %718 = vmatmul.mubr.bf16.vlgmr.msra.gmra.mxu0 %v9300_v35  ;;  %911 = vmatmul.mubr.bf16.vlgmr.msra.gmra.mxu1 %v9300_v35 }
  0x5b   :  { %1072 = vmatpush1.bf16.msra.mxu0 %v8031_v36  ;;  %1265 = vmatpush1.bf16.msra.mxu1 %v8034_v37  ;;  %v8132_v36 = vld [vmem:[#allocation7 + $0x7c] ss:$20 sps:$4 sm:$0xff]   ;;  %v8111_v37 = vld [vmem:[#allocation5 + $0xc4] ss:$40 sps:$4 sm:$0xff]  }
  0x5c   :  { %727 = vmatprep.mubr.bf16.mxu0 %v12304_v0  ;;  %920 = vmatprep.mubr.bf16.mxu1 %v12304_v0 }
  0x5d   :  { %1073 = vmatprep.subr.bf16.mxu0 %v8041_v38  ;;  %1266 = vmatprep.subr.bf16.mxu1 %v8044_v39  ;;  %v8130_v38 = vld [vmem:[#allocation7 + $0x78] ss:$20 sps:$4 sm:$0xff]   ;;  %v8135_v39 = vld [vmem:[#allocation7 + $0x54] ss:$20 sps:$4 sm:$0xff]  }
  0x5f   :  { %1074 = vmatpush1.bf16.msra.mxu0 %v8039_v40  ;;  %1267 = vmatpush1.bf16.msra.mxu1 %v8042_v41  ;;  %v8109_v40 = vld [vmem:[#allocation5 + $0xc0] ss:$40 sps:$4 sm:$0xff]   ;;  %v8114_v41 = vld [vmem:[#allocation5 + $0x74] ss:$40 sps:$4 sm:$0xff]  }
  0x60   :  { %1075 = vmatprep.subr.bf16.mxu0 %v8049_v42  ;;  %1268 = vmatprep.subr.bf16.mxu1 %v8052_v43  ;;  %v8133_v42 = vld [vmem:[#allocation7 + $0x50] ss:$20 sps:$4 sm:$0xff]  }
  0x61   :  { %v8112_v43 = vld [vmem:[#allocation5 + $0x70] ss:$40 sps:$4 sm:$0xff]  }
  0x62   :  { %728 = vmatmul.mubr.bf16.gmra.mxu0 %v9306_v44  ;;  %921 = vmatmul.mubr.bf16.gmra.mxu1 %v9306_v44 }
  0x63   :  { %737 = vmatprep.mubr.bf16.mxu0 %v12304_v0  ;;  %930 = vmatprep.mubr.bf16.mxu1 %v12304_v0 }
  0x64   :  { %1076 = vmatpush1.bf16.msra.mxu0 %v8047_v45  ;;  %1269 = vmatpush1.bf16.msra.mxu1 %v8050_v46  ;;  %v8123_v45 = vld [vmem:[#allocation5 + $0x24] ss:$40 sps:$4 sm:$0xff]   ;;  %v8136_v46 = vld [vmem:[#allocation7 + $0x28] ss:$20 sps:$4 sm:$0xff]  }
  0x65   :  { %1077 = vmatprep.subr.bf16.mxu0 %v8057_v47  ;;  %1270 = vmatprep.subr.bf16.mxu1 %v8060_v48  ;;  %v8141_v47 = vld [vmem:[#allocation7 + $0x4] ss:$20 sps:$4 sm:$0xff]   ;;  %v8121_v48 = vld [vmem:[#allocation5 + $0x20] ss:$40 sps:$4 sm:$0xff]  }
  0x68   :  { %1078 = vmatpush1.bf16.msra.mxu0 %v8055_v49  ;;  %1271 = vmatpush1.bf16.msra.mxu1 %v8058_v51  ;;  %v8139_v49 = vld [vmem:[#allocation7] ss:$20 sps:$4 sm:$0xff]   ;;  %v8144_v51 = vld [vmem:[#allocation7 + $0x25c] ss:$20 sps:$4 sm:$0xff]  }
  0x69   :  { %1079 = vmatprep.subr.bf16.mxu0 %v8065_v52  ;;  %1272 = vmatprep.subr.bf16.mxu1 %v8068_v53  ;;  %v8145_v52 = vld [vmem:[#allocation7 + $0x230] ss:$20 sps:$4 sm:$0xff]   ;;  %v8147_v53 = vld [vmem:[#allocation7 + $0x234] ss:$20 sps:$4 sm:$0xff]  }
  0x6a   :  { %738 = vmatmul.mubr.bf16.gmra.mxu0 %v9312_v50  ;;  %931 = vmatmul.mubr.bf16.gmra.mxu1 %v9312_v50 }
  0x6b   :  { %747 = vmatprep.mubr.bf16.mxu0 %v12304_v0  ;;  %940 = vmatprep.mubr.bf16.mxu1 %v12304_v0 }
  0x6c   :  { %1080 = vmatpush1.bf16.msra.mxu0 %v8063_v54  ;;  %1273 = vmatpush1.bf16.msra.mxu1 %v8066_v55  ;;  %v8148_v54 = vld [vmem:[#allocation7 + $0x208] ss:$20 sps:$4 sm:$0xff]   ;;  %v8150_v55 = vld [vmem:[#allocation7 + $0x20c] ss:$20 sps:$4 sm:$0xff]  }
  0x6d   :  { %1081 = vmatprep.subr.bf16.mxu0 %v8073_v56  ;;  %1274 = vmatprep.subr.bf16.mxu1 %v8076_v57  ;;  %v8151_v56 = vld [vmem:[#allocation7 + $0x1e0] ss:$20 sps:$4 sm:$0xff]   ;;  %v8153_v57 = vld [vmem:[#allocation7 + $0x1e4] ss:$20 sps:$4 sm:$0xff]  }
  0x70   :  { %1082 = vmatpush1.bf16.msra.mxu0 %v8071_v58  ;;  %1275 = vmatpush1.bf16.msra.mxu1 %v8074_v59 }
  0x71   :  { %1083 = vmatprep.subr.bf16.mxu0 %v8081_v60  ;;  %1276 = vmatprep.subr.bf16.mxu1 %v8084_v61 }
  0x72   :  { %748 = vmatmul.mubr.bf16.gmra.mxu0 %v9318_v62  ;;  %941 = vmatmul.mubr.bf16.gmra.mxu1 %v9318_v62 }
  0x73   :  { %757 = vmatprep.mubr.bf16.mxu0 %v12304_v0  ;;  %950 = vmatprep.mubr.bf16.mxu1 %v12304_v0 }
  0x74   :  { %1084 = vmatpush1.bf16.msra.mxu0 %v8079_v63  ;;  %1277 = vmatpush1.bf16.msra.mxu1 %v8082_v1 }
  0x75   :  { %1085 = vmatprep.subr.bf16.mxu0 %v8089_v2  ;;  %1278 = vmatprep.subr.bf16.mxu1 %v8092_v3  ;;  %v8154_v3 = vld [vmem:[#allocation7 + $0x1b8] ss:$20 sps:$4 sm:$0xff]  }
  0x78   :  { %1086 = vmatpush1.bf16.msra.mxu0 %v8087_v4  ;;  %1279 = vmatpush1.bf16.msra.mxu1 %v8090_v5  ;;  %v8156_v4 = vld [vmem:[#allocation7 + $0x1bc] ss:$20 sps:$4 sm:$0xff]  }
  0x79   :  { %1457 = vmatprep.subr.bf16.mxu0 %v8096_v7  ;;  %4130 = vmatprep.subr.bf16.mxu1 %v8117_v17 }
  0x7a   :  { %758 = vmatmul.mubr.bf16.gmra.mxu0 %v9324_v6  ;;  %951 = vmatmul.mubr.bf16.gmra.mxu1 %v9324_v6 }
  0x7b   :  { %767 = vmatprep.mubr.bf16.mxu0 %v12304_v0  ;;  %960 = vmatprep.mubr.bf16.mxu1 %v12304_v0 }
  0x82   :  { %768 = vmatmul.mubr.bf16.gmra.mxu0 %v9330_v8  ;;  %961 = vmatmul.mubr.bf16.gmra.mxu1 %v9330_v8 }
  0x83   :  { %777 = vmatprep.mubr.bf16.mxu0 %v12304_v0  ;;  %970 = vmatprep.mubr.bf16.mxu1 %v12304_v0 }
  0x8a   :  { %778 = vmatmul.mubr.bf16.gmra.mxu0 %v9336_v9  ;;  %971 = vmatmul.mubr.bf16.gmra.mxu1 %v9336_v9 }
  0x8b   :  { %787 = vmatprep.mubr.bf16.mxu0 %v12304_v0  ;;  %980 = vmatprep.mubr.bf16.mxu1 %v12304_v0 }
  0x92   :  { %788 = vmatmul.mubr.bf16.gmra.mxu0 %v9342_v10  ;;  %981 = vmatmul.mubr.bf16.gmra.mxu1 %v9342_v10 }
  0x93   :  { %797 = vmatprep.mubr.bf16.mxu0 %v12304_v0  ;;  %990 = vmatprep.mubr.bf16.mxu1 %v12304_v0 }
  0x9a   :  { %798 = vmatmul.mubr.bf16.gmra.mxu0 %v9348_v11  ;;  %991 = vmatmul.mubr.bf16.gmra.mxu1 %v9348_v11 }
  0x9b   :  { %807 = vmatprep.mubr.bf16.mxu0 %v12304_v0  ;;  %1000 = vmatprep.mubr.bf16.mxu1 %v12304_v0 }
  0xa2   :  { %808 = vmatmul.mubr.bf16.gmra.mxu0 %v9354_v12  ;;  %1001 = vmatmul.mubr.bf16.gmra.mxu1 %v9354_v12 }
  0xa3   :  { %817 = vmatprep.mubr.bf16.mxu0 %v12304_v0  ;;  %1010 = vmatprep.mubr.bf16.mxu1 %v12304_v0 }
  0xaa   :  { %818 = vmatmul.mubr.bf16.gmra.mxu0 %v9360_v13  ;;  %1011 = vmatmul.mubr.bf16.gmra.mxu1 %v9360_v13 }
  0xab   :  { %827 = vmatprep.mubr.bf16.mxu0 %v12304_v0  ;;  %1020 = vmatprep.mubr.bf16.mxu1 %v12304_v0 }
  0xb2   :  { %828 = vmatmul.mubr.bf16.gmra.mxu0 %v9366_v14  ;;  %1021 = vmatmul.mubr.bf16.gmra.mxu1 %v9366_v14 }
  0xb3   :  { %837 = vmatprep.mubr.bf16.mxu0 %v12304_v0  ;;  %1030 = vmatprep.mubr.bf16.mxu1 %v12304_v0 }
  0xba   :  { %838 = vmatmul.mubr.bf16.gmra.mxu0 %v9372_v15  ;;  %1031 = vmatmul.mubr.bf16.gmra.mxu1 %v9372_v15 }
  0xbb   :  { %847 = vmatprep.mubr.bf16.mxu0 %v12304_v0  ;;  %1040 = vmatprep.mubr.bf16.mxu1 %v12304_v0 }
  0xc2   :  { %848 = vmatmul.mubr.bf16.gmra.mxu0 %v9378_v16  ;;  %1041 = vmatmul.mubr.bf16.gmra.mxu1 %v9378_v16 }
  0xc3   :  { %857 = vmatprep.mubr.bf16.mxu0 %v12304_v0  ;;  %1050 = vmatprep.mubr.bf16.mxu1 %v12304_v0 }
  0xca   :  { %858 = vmatmul.mubr.bf16.gmra.mxu0 %v9384_v18  ;;  %1051 = vmatmul.mubr.bf16.gmra.mxu1 %v9384_v18 }
  0xcb   :  { %867 = vmatprep.mubr.bf16.mxu0 %v12304_v0  ;;  %1060 = vmatprep.mubr.bf16.mxu1 %v12304_v0 }
  0xd2   :  { %868 = vmatmul.mubr.bf16.gmra.mxu0 %v9390_v19  ;;  %1061 = vmatmul.mubr.bf16.gmra.mxu1 %v9390_v19 }
  0xd3   :  { %1103 = vmatprep.mubr.bf16.mxu0 %v12304_v0  ;;  %1296 = vmatprep.mubr.bf16.mxu1 %v12304_v0 }
  0xda   :  { %1104 = vmatmul.mubr.bf16.vlgmr.msra.gmra.mxu0 %v9300_v35  ;;  %1297 = vmatmul.mubr.bf16.vlgmr.msra.gmra.mxu1 %v9300_v35  ;;  %v8106_v35 = vld [vmem:[#allocation5 + $0x110] ss:$40 sps:$4 sm:$0xff]  }
  0xdb   :  { %1458 = vmatpush1.bf16.msra.mxu0 %v8094_v20  ;;  %1113 = vmatprep.mubr.bf16.mxu0 %v12304_v0 }
  0xdc   :  { %1306 = vmatprep.mubr.bf16.mxu1 %v12304_v0  ;;  %1459 = vmatprep.subr.bf16.mxu0 %v8099_v21 }
  0xdd   :  { %4131 = vmatpush1.bf16.msra.mxu1 %v8115_v22 }
  0xde   :  { %4132 = vmatprep.subr.bf16.mxu1 %v8120_v23 }
  0xdf   :  { %1460 = vmatpush1.bf16.msra.mxu0 %v8097_v24 }
  0xe0   :  { %1461 = vmatprep.subr.bf16.mxu0 %v8102_v25  ;;  %v8159_v25 = vld [vmem:[#allocation7 + $0x194] ss:$20 sps:$4 sm:$0xff]  }
  0xe1   :  { %4133 = vmatpush1.bf16.msra.mxu1 %v8118_v26  ;;  %v8157_v26 = vld [vmem:[#allocation7 + $0x190] ss:$20 sps:$4 sm:$0xff]  }
  0xe2   :  { %1114 = vmatmul.mubr.bf16.gmra.mxu0 %v9306_v44  ;;  %1307 = vmatmul.mubr.bf16.gmra.mxu1 %v9306_v44  ;;  %v8138_v44 = vld [vmem:[#allocation7 + $0x2c] ss:$20 sps:$4 sm:$0xff]  }
  0xe3   :  { %1123 = vmatprep.mubr.bf16.mxu0 %v12304_v0  ;;  %1316 = vmatprep.mubr.bf16.mxu1 %v12304_v0 }
  0xe4   :  { %1462 = vmatpush1.bf16.msra.mxu0 %v8100_v27  ;;  %4134 = vmatprep.subr.bf16.mxu1 %v8126_v28 }
  0xe5   :  { %1463 = vmatprep.subr.bf16.mxu0 %v8105_v29  ;;  %4135 = vmatpush1.bf16.msra.mxu1 %v8124_v30  ;;  %v8162_v30 = vld [vmem:[#allocation7 + $0x16c] ss:$20 sps:$4 sm:$0xff]  }
  0xe6   :  { %4136 = vmatprep.subr.bf16.mxu1 %v8129_v31  ;;  %v8160_v31 = vld [vmem:[#allocation7 + $0x168] ss:$20 sps:$4 sm:$0xff]  }
  0xe8   :  { %1464 = vmatpush1.bf16.msra.mxu0 %v8103_v32 }
  0xe9   :  { %1465 = vmatprep.subr.bf16.mxu0 %v8108_v33  ;;  %4137 = vmatpush1.bf16.msra.mxu1 %v8127_v34 }
  0xea   :  { %1124 = vmatmul.mubr.bf16.gmra.mxu0 %v9312_v50  ;;  %1317 = vmatmul.mubr.bf16.gmra.mxu1 %v9312_v50  ;;  %v8142_v50 = vld [vmem:[#allocation7 + $0x258] ss:$20 sps:$4 sm:$0xff]  }
  0xeb   :  { %1133 = vmatprep.mubr.bf16.mxu0 %v12304_v0  ;;  %1326 = vmatprep.mubr.bf16.mxu1 %v12304_v0 }
  0xec   :  { %1466 = vmatpush1.bf16.msra.mxu0 %v8106_v35  ;;  %4138 = vmatprep.subr.bf16.mxu1 %v8132_v36  ;;  %v8165_v36 = vld [vmem:[#allocation7 + $0x144] ss:$20 sps:$4 sm:$0xff]  }
  0xed   :  { %1467 = vmatprep.subr.bf16.mxu0 %v8111_v37  ;;  %4139 = vmatpush1.bf16.msra.mxu1 %v8130_v38  ;;  %v8163_v38 = vld [vmem:[#allocation7 + $0x140] ss:$20 sps:$4 sm:$0xff]  }
  0xee   :  { %4140 = vmatprep.subr.bf16.mxu1 %v8135_v39 }
  0xf0   :  { %1468 = vmatpush1.bf16.msra.mxu0 %v8109_v40 }
  0xf1   :  { %1469 = vmatprep.subr.bf16.mxu0 %v8114_v41  ;;  %4141 = vmatpush1.bf16.msra.mxu1 %v8133_v42 }
  0xf2   :  { %1134 = vmatmul.mubr.bf16.gmra.mxu0 %v9318_v62  ;;  %1327 = vmatmul.mubr.bf16.gmra.mxu1 %v9318_v62 }
  0xf3   :  { %1143 = vmatprep.mubr.bf16.mxu0 %v12304_v0  ;;  %1336 = vmatprep.mubr.bf16.mxu1 %v12304_v0 }
  0xf4   :  { %1470 = vmatpush1.bf16.msra.mxu0 %v8112_v43  ;;  %4142 = vmatprep.subr.bf16.mxu1 %v8138_v44 }
  0xf5   :  { %1471 = vmatprep.subr.bf16.mxu0 %v8123_v45  ;;  %4143 = vmatpush1.bf16.msra.mxu1 %v8136_v46 }
  0xf6   :  { %4144 = vmatprep.subr.bf16.mxu1 %v8141_v47 }
  0xf8   :  { %1472 = vmatpush1.bf16.msra.mxu0 %v8121_v48 }
  0xf9   :  { %4145 = vmatpush1.bf16.msra.mxu1 %v8139_v49 }
  0xfa   :  { %1144 = vmatmul.mubr.bf16.gmra.mxu0 %v9324_v6  ;;  %1337 = vmatmul.mubr.bf16.gmra.mxu1 %v9324_v6 }
  0xfb   :  { %1153 = vmatprep.mubr.bf16.mxu0 %v12304_v0  ;;  %1346 = vmatprep.mubr.bf16.mxu1 %v12304_v0 }
  0xfc   :  { %4146 = vmatprep.subr.bf16.mxu1 %v8144_v51 }
  0xfd   :  { %4147 = vmatpush2.bf16.msra.mxu1 %v8142_v50 }
  0xfe   :  { %4148 = vmatprep.subr.bf16.mxu1 %v8147_v53 }
 0x101   :  { %4149 = vmatpush2.bf16.msra.mxu1 %v8145_v52 }
 0x102   :  { %1154 = vmatmul.mubr.bf16.gmra.mxu0 %v9330_v8  ;;  %1347 = vmatmul.mubr.bf16.gmra.mxu1 %v9330_v8 }
 0x103   :  { %1163 = vmatprep.mubr.bf16.mxu0 %v12304_v0  ;;  %1356 = vmatprep.mubr.bf16.mxu1 %v12304_v0 }
 0x104   :  { %4150 = vmatprep.subr.bf16.mxu1 %v8150_v55 }
 0x105   :  { %4151 = vmatpush2.bf16.msra.mxu1 %v8148_v54 }
 0x106   :  { %4152 = vmatprep.subr.bf16.mxu1 %v8153_v57 }
 0x109   :  { %4153 = vmatpush2.bf16.msra.mxu1 %v8151_v56 }
 0x10a   :  { %1164 = vmatmul.mubr.bf16.gmra.mxu0 %v9336_v9  ;;  %1357 = vmatmul.mubr.bf16.gmra.mxu1 %v9336_v9 }
 0x10b   :  { %1173 = vmatprep.mubr.bf16.mxu0 %v12304_v0  ;;  %1366 = vmatprep.mubr.bf16.mxu1 %v12304_v0 }
 0x10c   :  { %4154 = vmatprep.subr.bf16.mxu1 %v8156_v4 }
 0x10d   :  { %4155 = vmatpush2.bf16.msra.mxu1 %v8154_v3 }
 0x10e   :  { %4156 = vmatprep.subr.bf16.mxu1 %v8159_v25 }
 0x111   :  { %4157 = vmatpush2.bf16.msra.mxu1 %v8157_v26 }
 0x112   :  { %1174 = vmatmul.mubr.bf16.gmra.mxu0 %v9342_v10  ;;  %1367 = vmatmul.mubr.bf16.gmra.mxu1 %v9342_v10 }
 0x113   :  { %1183 = vmatprep.mubr.bf16.mxu0 %v12304_v0  ;;  %1376 = vmatprep.mubr.bf16.mxu1 %v12304_v0 }
 0x114   :  { %4158 = vmatprep.subr.bf16.mxu1 %v8162_v30 }
 0x115   :  { %4159 = vmatpush2.bf16.msra.mxu1 %v8160_v31 }
 0x116   :  { %4160 = vmatprep.subr.bf16.mxu1 %v8165_v36 }
 0x119   :  { %4161 = vmatpush2.bf16.msra.mxu1 %v8163_v38  ;;  %v8171_v38 = vld [vmem:[#allocation7 + $0x61c] ss:$20 sps:$4 sm:$0xff]  }
 0x11a   :  { %v9428_v58 = vpop.f32.mrf.mxu0  ;;  %v9430_v59 = vpop.f32.mrf.mxu1  ;;  %1184 = vmatmul.mubr.bf16.gmra.mxu0 %v9348_v11  ;;  %1377 = vmatmul.mubr.bf16.gmra.mxu1 %v9348_v11 }
 0x11b   :  { %1193 = vmatprep.mubr.bf16.mxu0 %v12304_v0  ;;  %1386 = vmatprep.mubr.bf16.mxu1 %v12304_v0 }
 0x11c   :  { %v9436_v60 = vpop.f32.mrf.mxu0  ;;  %v9438_v61 = vpop.f32.mrf.mxu1  ;;  %4516 = vmatprep.subr.bf16.mxu1 %v8171_v38  ;;  %v8174_v38 = vld [vmem:[#allocation7 + $0x374] ss:$20 sps:$4 sm:$0xff]  }
 0x11e   :  { %v9440_v62 = vpop.f32.mrf.mxu0  ;;  %v9442_v63 = vpop.f32.mrf.mxu1 }
 0x120   :  { %v9444_v1 = vpop.f32.mrf.mxu0  ;;  %v9446_v2 = vpop.f32.mrf.mxu1 }
 0x122   :  { %v9448_v5 = vpop.f32.mrf.mxu0  ;;  %v9450_v6 = vpop.f32.mrf.mxu1  ;;  %1194 = vmatmul.mubr.bf16.gmra.mxu0 %v9354_v12  ;;  %1387 = vmatmul.mubr.bf16.gmra.mxu1 %v9354_v12 }
 0x123   :  { %1203 = vmatprep.mubr.bf16.mxu0 %v12304_v0  ;;  %1396 = vmatprep.mubr.bf16.mxu1 %v12304_v0 }
 0x124   :  { %v9456_v7 = vpop.f32.mrf.mxu0  ;;  %v9458_v8 = vpop.f32.mrf.mxu1 }
 0x126   :  { %v9460_v9 = vpop.f32.mrf.mxu0  ;;  %v9462_v10 = vpop.f32.mrf.mxu1 }
 0x128   :  { %v9464_v11 = vpop.f32.mrf.mxu0  ;;  %v9466_v17 = vpop.f32.mrf.mxu1 }
 0x12a   :  { %v9468_v20 = vpop.f32.mrf.mxu0  ;;  %v9470_v12 = vpop.f32.mrf.mxu1  ;;  %1204 = vmatmul.mubr.bf16.gmra.mxu0 %v9360_v13  ;;  %1397 = vmatmul.mubr.bf16.gmra.mxu1 %v9360_v13 }
 0x12b   :  { %1213 = vmatprep.mubr.bf16.mxu0 %v12304_v0  ;;  %1406 = vmatprep.mubr.bf16.mxu1 %v12304_v0 }
 0x12c   :  { %v9476_v21 = vpop.f32.mrf.mxu0  ;;  %v9478_v22 = vpop.f32.mrf.mxu1 }
 0x12e   :  { %v9480_v23 = vpop.f32.mrf.mxu0  ;;  %v9482_v24 = vpop.f32.mrf.mxu1 }
 0x130   :  { %v9484_v27 = vpop.f32.mrf.mxu0  ;;  %v9486_v28 = vpop.f32.mrf.mxu1 }
 0x132   :  { %v9488_v13 = vpop.f32.mrf.mxu0  ;;  %v9490_v29 = vpop.f32.mrf.mxu1  ;;  %1214 = vmatmul.mubr.bf16.gmra.mxu0 %v9366_v14  ;;  %1407 = vmatmul.mubr.bf16.gmra.mxu1 %v9366_v14 }
 0x133   :  { %1223 = vmatprep.mubr.bf16.mxu0 %v12304_v0  ;;  %1416 = vmatprep.mubr.bf16.mxu1 %v12304_v0 }
 0x134   :  { %v9496_v32 = vpop.f32.mrf.mxu0  ;;  %v9498_v33 = vpop.f32.mrf.mxu1 }
 0x136   :  { %v9500_v34 = vpop.f32.mrf.mxu0  ;;  %v9502_v35 = vpop.f32.mrf.mxu1 }
 0x138   :  { %v9504_v37 = vpop.f32.mrf.mxu0  ;;  %v9506_v14 = vpop.f32.mrf.mxu1 }
 0x13a   :  { %v9508_v39 = vpop.f32.mrf.mxu0  ;;  %v9510_v40 = vpop.f32.mrf.mxu1  ;;  %1224 = vmatmul.mubr.bf16.gmra.mxu0 %v9372_v15  ;;  %1417 = vmatmul.mubr.bf16.gmra.mxu1 %v9372_v15 }
 0x13b   :  { %1233 = vmatprep.mubr.bf16.mxu0 %v12304_v0  ;;  %1426 = vmatprep.mubr.bf16.mxu1 %v12304_v0 }
 0x13c   :  { %v9516_v41 = vpop.f32.mrf.mxu0  ;;  %v9518_v42 = vpop.f32.mrf.mxu1 }
 0x13e   :  { %v9520_v43 = vpop.f32.mrf.mxu0  ;;  %v9522_v44 = vpop.f32.mrf.mxu1 }
 0x140   :  { %v9524_v45 = vpop.f32.mrf.mxu0  ;;  %v9526_v46 = vpop.f32.mrf.mxu1 }
 0x142   :  { %v9528_v47 = vpop.f32.mrf.mxu0  ;;  %v9530_v15 = vpop.f32.mrf.mxu1  ;;  %1234 = vmatmul.mubr.bf16.gmra.mxu0 %v9378_v16  ;;  %1427 = vmatmul.mubr.bf16.gmra.mxu1 %v9378_v16 }
 0x143   :  { %1243 = vmatprep.mubr.bf16.mxu0 %v12304_v0  ;;  %1436 = vmatprep.mubr.bf16.mxu1 %v12304_v0 }
 0x144   :  { %v9536_v48 = vpop.f32.mrf.mxu0  ;;  %v9538_v49 = vpop.f32.mrf.mxu1 }
 0x146   :  { %v9540_v50 = vpop.f32.mrf.mxu0  ;;  %v9542_v51 = vpop.f32.mrf.mxu1 }
 0x148   :  { %v9544_v52 = vpop.f32.mrf.mxu0  ;;  %v9546_v53 = vpop.f32.mrf.mxu1 }
 0x14a   :  { %v9548_v54 = vpop.f32.mrf.mxu0  ;;  %v9550_v55 = vpop.f32.mrf.mxu1  ;;  %1244 = vmatmul.mubr.bf16.gmra.mxu0 %v9384_v18  ;;  %1437 = vmatmul.mubr.bf16.gmra.mxu1 %v9384_v18  ;;  %v8168_v18 = vld [vmem:[#allocation7 + $0x39c] ss:$20 sps:$4 sm:$0xff]  }
 0x14b   :  { %1253 = vmatprep.mubr.bf16.mxu0 %v12304_v0  ;;  %1446 = vmatprep.mubr.bf16.mxu1 %v12304_v0 }
 0x14c   :  { %v9556_v16 = vpop.f32.mrf.mxu0  ;;  %v9558_v56 = vpop.f32.mrf.mxu1  ;;  %4323 = vmatprep.subr.bf16.mxu0 %v8168_v18 }
 0x14d   :  { %12449 = vst [vmem:[#allocation18_spill] sm:$0xff] %v9558_v56  ;;  %v9098_v56 = vld [vmem:[#allocation2 + $0x20] sm:$0xff]  }
 0x14e   :  { %v9560_v57 = vpop.f32.mrf.mxu0  ;;  %v9562_v3 = vpop.f32.mrf.mxu1 }
 0x14f   :  { %12450 = vst [vmem:[#allocation19_spill] sm:$0xff] %v9560_v57  ;;  %12451 = vst [vmem:[#allocation20_spill] sm:$0xff] %v9562_v3  ;;  %v9094_v57 = vld [vmem:[#allocation2] sm:$0xff]  }
 0x150   :  { %v9564_v4 = vpop.f32.mrf.mxu0  ;;  %v9566_v25 = vpop.f32.mrf.mxu1 }
 0x151   :  { %12452 = vst [vmem:[#allocation21_spill] sm:$0xff] %v9564_v4  ;;  %12453 = vst [vmem:[#allocation22_spill] sm:$0xff] %v9566_v25 }
 0x152   :  { %v9568_v26 = vpop.f32.mrf.mxu0  ;;  %v9570_v30 = vpop.f32.mrf.mxu1  ;;  %1254 = vmatmul.mubr.bf16.gmra.mxu0 %v9390_v19  ;;  %1447 = vmatmul.mubr.bf16.gmra.mxu1 %v9390_v19 }
 0x153   :  { %12454 = vst [vmem:[#allocation23_spill] sm:$0xff] %v9568_v26  ;;  %12455 = vst [vmem:[#allocation24_spill] sm:$0xff] %v9570_v30  ;;  %1489 = vmatprep.mubr.bf16.mxu0 %v12304_v0  ;;  %v8166_v26 = vld [vmem:[#allocation7 + $0x398] ss:$20 sps:$4 sm:$0xff]  }
 0x154   :  { %v9575_v31 = vpop.f32.mrf.mxu0  ;;  %v9577_v36 = vpop.f32.mrf.mxu1 }
 0x155   :  { %12456 = vst [vmem:[#allocation25_spill] sm:$0xff] %v9575_v31  ;;  %12457 = vst [vmem:[#allocation26_spill] sm:$0xff] %v9577_v36  ;;  %v12464_v31 = vmov 0  }
 0x156   :  { %v9579_v4 = vpop.f32.mrf.mxu0  ;;  %v9581_v25 = vpop.f32.mrf.mxu1 }
 0x157   :  { %12458 = vst [vmem:[#allocation27_spill] sm:$0xff] %v9579_v4  ;;  %12459 = vst [vmem:[#allocation28_spill] sm:$0xff] %v9581_v25  ;;  %v8172_v25 = vld [vmem:[#allocation7 + $0x370] ss:$20 sps:$4 sm:$0xff]  }
 0x158   :  { %v9583_v30 = vpop.f32.mrf.mxu0  ;;  %v9585_v3 = vpop.f32.mrf.mxu1 }
 0x159   :  { %12460 = vst [vmem:[#allocation29_spill] sm:$0xff] %v9583_v30  ;;  %12461 = vst [vmem:[#allocation30_spill] sm:$0xff] %v9585_v3 }
 0x15a   :  { %v9587_v19 = vpop.f32.mrf.mxu0  ;;  %v9589_v0 = vpop.f32.mrf.mxu1  ;;  %1490 = vmatmul.mubr.bf16.vlgmr.msra.gmra.mxu0 %v9094_v57 }
 0x15b   :  { %12462 = vst [vmem:[#allocation31_spill] sm:$0xff] %v9587_v19  ;;  %12463 = vst [vmem:[#allocation32_spill] sm:$0xff] %v9589_v0  ;;  %1499 = vmatprep.mubr.bf16.mxu0 %v12464_v31  ;;  %4324 = vmatpush1.bf16.msra.mxu0 %v8166_v26  ;;  %v9095_v26 = vld [vmem:[#allocation2 + $0x8] sm:$0xff]  }
 0x15c   :  { %v9592_v18 = vpop.f32.mrf.mxu0  ;;  %v9594_v4 = vpop.f32.mrf.mxu1  ;;  %4325 = vmatprep.subr.bf16.mxu0 %v8174_v38 }
 0x15d   :  { %12465 = vst [vmem:[#allocation33_spill] sm:$0xff] %v9592_v18  ;;  %12466 = vst [vmem:[#allocation34_spill] sm:$0xff] %v9594_v4 }
 0x15e   :  { %v9596_v36 = vpop.f32.mrf.mxu0  ;;  %v9598_v30 = vpop.f32.mrf.mxu1 }
 0x15f   :  { %12467 = vst [vmem:[#allocation35_spill] sm:$0xff] %v9596_v36  ;;  %12468 = vst [vmem:[#allocation36_spill] sm:$0xff] %v9598_v30  ;;  %4326 = vmatpush1.bf16.msra.mxu0 %v8172_v25  ;;  %v8175_v25 = vld [vmem:[#allocation7 + $0x348] ss:$20 sps:$4 sm:$0xff]  }
 0x160   :  { %v9600_v19 = vpop.f32.mrf.mxu0  ;;  %v9602_v0 = vpop.f32.mrf.mxu1 }
 0x161   :  { %12469 = vst [vmem:[#allocation37_spill] sm:$0xff] %v9600_v19  ;;  %12470 = vst [vmem:[#allocation38_spill] sm:$0xff] %v9602_v0  ;;  %v8177_v19 = vld [vmem:[#allocation7 + $0x34c] ss:$20 sps:$4 sm:$0xff]  }
 0x162   :  { %v9604_v57 = vpop.f32.mrf.mxu0  ;;  %v9606_v3 = vpop.f32.mrf.mxu1  ;;  %1500 = vmatmul.mubr.bf16.gmra.mxu0 %v9095_v26  ;;  %4327 = vmatprep.subr.bf16.mxu0 %v8177_v19 }
 0x163   :  { %12471 = vst [vmem:[#allocation39_spill] sm:$0xff] %v9604_v57  ;;  %12472 = vst [vmem:[#allocation40_spill] sm:$0xff] %v9606_v3  ;;  %1509 = vmatprep.mubr.bf16.mxu0 %v12464_v31  ;;  %4328 = vmatpush1.bf16.msra.mxu0 %v8175_v25  ;;  %v9096_v57 = vld [vmem:[#allocation2 + $0x10] sm:$0xff]  }
 0x164   :  { %v9609_v4 = vpop.f32.mrf.mxu0  ;;  %v9611_v18 = vpop.f32.mrf.mxu1 }
 0x165   :  { %12473 = vst [vmem:[#allocation41_spill] sm:$0xff] %v9609_v4  ;;  %12474 = vst [vmem:[#allocation42_spill] sm:$0xff] %v9611_v18 }
 0x166   :  { %v9613_v36 = vpop.f32.mrf.mxu0  ;;  %v9615_v38 = vpop.f32.mrf.mxu1 }
 0x167   :  { %12475 = vst [vmem:[#allocation43_spill] sm:$0xff] %v9613_v36  ;;  %12476 = vst [vmem:[#allocation44_spill] sm:$0xff] %v9615_v38 }
 0x168   :  { %v9617_v30 = vpop.f32.mrf.mxu0  ;;  %v9619_v0 = vpop.f32.mrf.mxu1 }
 0x169   :  { %12477 = vst [vmem:[#allocation45_spill] sm:$0xff] %v9617_v30  ;;  %12478 = vst [vmem:[#allocation46_spill] sm:$0xff] %v9619_v0  ;;  %v8181_v30 = vld [vmem:[#allocation7 + $0x320] ss:$20 sps:$4 sm:$0xff]   ;;  %v8183_v0 = vld [vmem:[#allocation7 + $0x324] ss:$20 sps:$4 sm:$0xff]  }
 0x16a   :  { %v9621_v3 = vpop.f32.mrf.mxu0  ;;  %v9623_v26 = vpop.f32.mrf.mxu1  ;;  %1510 = vmatmul.mubr.bf16.gmra.mxu0 %v9096_v57  ;;  %4329 = vmatprep.subr.bf16.mxu0 %v8183_v0 }
 0x16b   :  { %12479 = vst [vmem:[#allocation47_spill] sm:$0xff] %v9621_v3  ;;  %12480 = vst [vmem:[#allocation48_spill] sm:$0xff] %v9623_v26  ;;  %1519 = vmatprep.mubr.bf16.mxu0 %v12464_v31  ;;  %v9097_v3 = vld [vmem:[#allocation2 + $0x18] sm:$0xff]   ;;  %4330 = vmatpush1.bf16.msra.mxu0 %v8181_v30 }
 0x16c   :  { %v9626_v18 = vpop.f32.mrf.mxu0  ;;  %v9628_v36 = vpop.f32.mrf.mxu1 }
 0x16d   :  { %12481 = vst [vmem:[#allocation49_spill] sm:$0xff] %v9626_v18  ;;  %12482 = vst [vmem:[#allocation50_spill] sm:$0xff] %v9628_v36 }
 0x16e   :  { %v9630_v38 = vpop.f32.mrf.mxu0  ;;  %v9632_v4 = vpop.f32.mrf.mxu1 }
 0x16f   :  { %12483 = vst [vmem:[#allocation51_spill] sm:$0xff] %v9630_v38  ;;  %12484 = vst [vmem:[#allocation52_spill] sm:$0xff] %v9632_v4 }
 0x170   :  { %v9634_v19 = vpop.f32.mrf.mxu0  ;;  %v9636_v25 = vpop.f32.mrf.mxu1 }
 0x171   :  { %12485 = vst [vmem:[#allocation53_spill] sm:$0xff] %v9634_v19  ;;  %12486 = vst [vmem:[#allocation54_spill] sm:$0xff] %v9636_v25  ;;  %v8186_v25 = vld [vmem:[#allocation7 + $0x2fc] ss:$20 sps:$4 sm:$0xff]  }
 0x172   :  { %v9638_v26 = vpop.f32.mrf.mxu0  ;;  %v9640_v57 = vpop.f32.mrf.mxu1  ;;  %1520 = vmatmul.mubr.bf16.gmra.mxu0 %v9097_v3  ;;  %4331 = vmatprep.subr.bf16.mxu0 %v8186_v25  ;;  %v9678_v25 = vmul.f32 %v9428_v58, %v9428_v58 }
 0x173   :  { %12487 = vst [vmem:[#allocation55_spill] sm:$0xff] %v9638_v26  ;;  %12488 = vst [vmem:[#allocation56_spill] sm:$0xff] %v9640_v57  ;;  %1529 = vmatprep.mubr.bf16.mxu0 %v12464_v31  ;;  %v8184_v26 = vld [vmem:[#allocation7 + $0x2f8] ss:$20 sps:$4 sm:$0xff]  }
 0x174   :  { %v9643_v36 = vpop.f32.mrf.mxu0  ;;  %v9645_v38 = vpop.f32.mrf.mxu1  ;;  %4332 = vmatpush1.bf16.msra.mxu0 %v8184_v26  ;;  %12500 = vst [vmem:[#allocation68_spill] sm:$0xff] %v9678_v25  ;;  %v9683_v26 = vmul.f32 %v9430_v59, %v9430_v59  ;;  %v9703_v59 = vmul.f32 %v9442_v63, %v9442_v63  ;;  %v9723_v63 = vmul.f32 %v9456_v7, %v9456_v7 }
 0x175   :  { %12489 = vst [vmem:[#allocation57_spill] sm:$0xff] %v9645_v38  ;;  %v9743_v7 = vmul.f32 %v9464_v11, %v9464_v11  ;;  %v9763_v11 = vmul.f32 %v9478_v22, %v9478_v22  ;;  %v9783_v22 = vmul.f32 %v9486_v28, %v9486_v28  ;;  %v9803_v28 = vmul.f32 %v9500_v34, %v9500_v34 }
 0x176   :  { %v9647_v4 = vpop.f32.mrf.mxu0  ;;  %v9649_v18 = vpop.f32.mrf.mxu1  ;;  %v9823_v34 = vmul.f32 %v9508_v39, %v9508_v39 }
 0x177   :  { %12490 = vst [vmem:[#allocation58_spill] sm:$0xff] %v9647_v4  ;;  %12491 = vst [vmem:[#allocation59_spill] sm:$0xff] %v9649_v18 }
 0x178   :  { %v9651_v19 = vpop.f32.mrf.mxu0  ;;  %v9653_v0 = vpop.f32.mrf.mxu1  ;;  %12505 = vst [vmem:[#allocation73_spill] sm:$0xff] %v9763_v11  ;;  %12506 = vst [vmem:[#allocation74_spill] sm:$0xff] %v9783_v22  ;;  %v9100_v11 = vld [vmem:[#allocation2 + $0x30] sm:$0xff]  }
 0x179   :  { %12492 = vst [vmem:[#allocation60_spill] sm:$0xff] %v9651_v19  ;;  %12493 = vst [vmem:[#allocation61_spill] sm:$0xff] %v9653_v0 }
 0x17a   :  { %v9655_v57 = vpop.f32.mrf.mxu0  ;;  %v9657_v3 = vpop.f32.mrf.mxu1  ;;  %1530 = vmatmul.mubr.bf16.gmra.mxu0 %v9098_v56  ;;  %v9099_v56 = vld [vmem:[#allocation2 + $0x28] sm:$0xff]  }
 0x17b   :  { %12494 = vst [vmem:[#allocation62_spill] sm:$0xff] %v9655_v57  ;;  %12495 = vst [vmem:[#allocation63_spill] sm:$0xff] %v9657_v3  ;;  %1539 = vmatprep.mubr.bf16.mxu0 %v12464_v31 }
 0x17c   :  { %v9660_v30 = vpop.f32.mrf.mxu0  ;;  %v9662_v4 = vpop.f32.mrf.mxu1 }
 0x17e   :  { %v9664_v18 = vpop.f32.mrf.mxu0  ;;  %v9666_v19 = vpop.f32.mrf.mxu1 }
 0x180   :  { %v9668_v0 = vpop.f32.mrf.mxu0  ;;  %v9670_v38 = vpop.f32.mrf.mxu1 }
 0x181   :  { %12496 = vst [vmem:[#allocation64_spill] sm:$0xff] %v9668_v0  ;;  %12497 = vst [vmem:[#allocation65_spill] sm:$0xff] %v9670_v38  ;;  %v9687_v0 = vmul.f32 %v9436_v60, %v9436_v60  ;;  %v8192_v38 = vld [vmem:[#allocation7 + $0x2d4] ss:$20 sps:$4 sm:$0xff]   ;;  %v9707_v60 = vmul.f32 %v9444_v1, %v9444_v1  ;;  %v9727_v1 = vmul.f32 %v9458_v8, %v9458_v8 }
 0x182   :  { %v9672_v57 = vpop.f32.mrf.mxu0  ;;  %v9674_v3 = vpop.f32.mrf.mxu1  ;;  %1540 = vmatmul.mubr.bf16.gmra.mxu0 %v9099_v56  ;;  %v9695_v56 = vmul.f32 %v9440_v62, %v9440_v62  ;;  %v9715_v62 = vmul.f32 %v9448_v5, %v9448_v5  ;;  %4333 = vmatprep.subr.bf16.mxu0 %v8192_v38  ;;  %v9747_v8 = vmul.f32 %v9466_v17, %v9466_v17 }
 0x183   :  { %12498 = vst [vmem:[#allocation66_spill] sm:$0xff] %v9672_v57  ;;  %12499 = vst [vmem:[#allocation67_spill] sm:$0xff] %v9674_v3  ;;  %1549 = vmatprep.mubr.bf16.mxu0 %v12464_v31  ;;  %v9691_v57 = vmul.f32 %v9438_v61, %v9438_v61  ;;  %v8190_v3 = vld [vmem:[#allocation7 + $0x2d0] ss:$20 sps:$4 sm:$0xff]   ;;  %v9711_v61 = vmul.f32 %v9446_v2, %v9446_v2  ;;  %v9731_v2 = vmul.f32 %v9460_v9, %v9460_v9 }
 0x184   :  { %v9697_v58 = vpop.f32.mrf.mxu0  ;;  %v9699_v25 = vpop.f32.mrf.mxu1  ;;  %12503 = vst [vmem:[#allocation71_spill] sm:$0xff] %v9727_v1  ;;  %12504 = vst [vmem:[#allocation72_spill] sm:$0xff] %v9747_v8  ;;  %v9751_v9 = vmul.f32 %v9468_v20, %v9468_v20  ;;  %4334 = vmatpush1.bf16.msra.mxu0 %v8190_v3  ;;  %v9755_v38 = vmul.f32 %v9470_v12, %v9470_v12  ;;  %v9767_v17 = vmul.f32 %v9480_v23, %v9480_v23  ;;  %v8195_v1 = vld [vmem:[#allocation7 + $0x2ac] ss:$20 sps:$4 sm:$0xff]  }
 0x185   :  { %12501 = vst [vmem:[#allocation69_spill] sm:$0xff] %v9691_v57  ;;  %12502 = vst [vmem:[#allocation70_spill] sm:$0xff] %v9711_v61  ;;  %v9719_v57 = vmul.f32 %v9450_v6, %v9450_v6  ;;  %v9739_v6 = vmul.f32 %v9462_v10, %v9462_v10  ;;  %v9759_v10 = vmul.f32 %v9476_v21, %v9476_v21  ;;  %4335 = vmatprep.subr.bf16.mxu0 %v8195_v1 }
 0x186   :  { %v9733_v61 = vpop.f32.mrf.mxu0  ;;  %v9735_v5 = vpop.f32.mrf.mxu1  ;;  %v9775_v12 = vmul.f32 %v9482_v24, %v9482_v24  ;;  %v9779_v21 = vmul.f32 %v9484_v27, %v9484_v27  ;;  %v9787_v23 = vmul.f32 %v9488_v13, %v9488_v13  ;;  %v9791_v3 = vmul.f32 %v9490_v29, %v9490_v29 }
 0x187   :  { %v9795_v24 = vmul.f32 %v9496_v32, %v9496_v32  ;;  %v9799_v27 = vmul.f32 %v9498_v33, %v9498_v33  ;;  %v9811_v29 = vmul.f32 %v9502_v35, %v9502_v35  ;;  %v9815_v32 = vmul.f32 %v9504_v37, %v9504_v37 }
 0x188   :  { %v9769_v8 = vpop.f32.mrf.mxu0  ;;  %v9771_v20 = vpop.f32.mrf.mxu1  ;;  %v9819_v33 = vmul.f32 %v9506_v14, %v9506_v14  ;;  %v9832_v35 = vmul.f32 %v9516_v41, %v9516_v41  ;;  %v9836_v37 = vmul.f32 %v9518_v42, %v9518_v42  ;;  %v9840_v14 = vmul.f32 %v9520_v43, %v9520_v43 }
 0x189   :  { %12507 = vst [vmem:[#allocation75_spill] sm:$0xff] %v9799_v27  ;;  %v9852_v41 = vmul.f32 %v9524_v45, %v9524_v45  ;;  %v9856_v42 = vmul.f32 %v9526_v46, %v9526_v46  ;;  %v9860_v43 = vmul.f32 %v9528_v47, %v9528_v47  ;;  %v9872_v45 = vmul.f32 %v9538_v49, %v9538_v49  ;;  %v8193_v27 = vld [vmem:[#allocation7 + $0x2a8] ss:$20 sps:$4 sm:$0xff]  }
 0x18a   :  { %v9805_v22 = vpop.f32.mrf.mxu0  ;;  %v9807_v13 = vpop.f32.mrf.mxu1  ;;  %1550 = vmatmul.mubr.bf16.gmra.mxu0 %v9100_v11  ;;  %12508 = vst [vmem:[#allocation76_spill] sm:$0xff] %v9819_v33  ;;  %v9828_v11 = vmul.f32 %v9510_v40, %v9510_v40  ;;  %12510 = vst [vmem:[#allocation78_spill] sm:$0xff] %v9832_v35  ;;  %v9848_v40 = vmul.f32 %v9522_v44, %v9522_v44  ;;  %v9868_v44 = vmul.f32 %v9536_v48, %v9536_v48 }
 0x18b   :  { %1559 = vmatprep.mubr.bf16.mxu0 %v12464_v31  ;;  %12511 = vst [vmem:[#allocation79_spill] sm:$0xff] %v9836_v37  ;;  %12512 = vst [vmem:[#allocation80_spill] sm:$0xff] %v9840_v14  ;;  %v9864_v37 = vmul.f32 %v9530_v15, %v9530_v15  ;;  %v9876_v46 = vmul.f32 %v9540_v50, %v9540_v50  ;;  %v9884_v15 = vmul.f32 %v9542_v51, %v9542_v51  ;;  %v8201_v14 = vld [vmem:[#allocation7 + $0x284] ss:$20 sps:$4 sm:$0xff]  }
 0x18c   :  { %12509 = vst [vmem:[#allocation77_spill] sm:$0xff] %v9828_v11  ;;  %v9842_v39 = vpop.f32.mrf.mxu0  ;;  %v9844_v33 = vpop.f32.mrf.mxu1  ;;  %12513 = vst [vmem:[#allocation81_spill] sm:$0xff] %v9848_v40  ;;  %v9888_v48 = vmul.f32 %v9544_v52, %v9544_v52  ;;  %v9892_v49 = vmul.f32 %v9546_v53, %v9546_v53  ;;  %v9896_v50 = vmul.f32 %v9548_v54, %v9548_v54  ;;  %4336 = vmatpush1.bf16.msra.mxu0 %v8193_v27  ;;  %v9101_v27 = vld [vmem:[#allocation2 + $0x38] sm:$0xff]   ;;  %v12603_v11 = vld [vmem:[#allocation56_spill] sm:$0xff] }
 0x18d   :  { %12514 = vst [vmem:[#allocation82_spill] sm:$0xff] %v9852_v41  ;;  %12515 = vst [vmem:[#allocation83_spill] sm:$0xff] %v9856_v42  ;;  %v9904_v51 = vmul.f32 %v9556_v16, %v9556_v16  ;;  %v12589_v41 = vld [vmem:[#allocation49_spill] sm:$0xff]  ;;  %v10081_v35 = vmul.f32 %v12603_v11, %v12603_v11  ;;  %4337 = vmatprep.subr.bf16.mxu0 %v8201_v14  ;;  %v12610_v11 = vld [vmem:[#allocation59_spill] sm:$0xff] }
 0x18e   :  { %12516 = vst [vmem:[#allocation84_spill] sm:$0xff] %v9860_v43  ;;  %12517 = vst [vmem:[#allocation85_spill] sm:$0xff] %v9864_v37  ;;  %v9878_v42 = vpop.f32.mrf.mxu0  ;;  %v9880_v47 = vpop.f32.mrf.mxu1  ;;  %v12563_v37 = vld [vmem:[#allocation36_spill] sm:$0xff]  ;;  %v12616_v14 = vld [vmem:[#allocation62_spill] sm:$0xff] }
 0x18f   :  { %12518 = vst [vmem:[#allocation86_spill] sm:$0xff] %v9868_v44  ;;  %12519 = vst [vmem:[#allocation87_spill] sm:$0xff] %v9872_v45  ;;  %v9900_v45 = vmul.f32 %v9550_v55, %v9550_v55  ;;  %v12573_v44 = vld [vmem:[#allocation41_spill] sm:$0xff] }
 0x190   :  { %12520 = vst [vmem:[#allocation88_spill] sm:$0xff] %v9876_v46  ;;  %12521 = vst [vmem:[#allocation89_spill] sm:$0xff] %v9884_v15  ;;  %v12527_v15 = vld [vmem:[#allocation18_spill] sm:$0xff]  ;;  %v9916_v54 = vpop.f32.mrf.mxu1  ;;  %v12541_v46 = vld [vmem:[#allocation25_spill] sm:$0xff] }
 0x191   :  { %12522 = vst [vmem:[#allocation90_spill] sm:$0xff] %v9888_v48  ;;  %12523 = vst [vmem:[#allocation91_spill] sm:$0xff] %v9892_v49  ;;  %v9908_v52 = vmul.f32 %v12527_v15, %v12527_v15  ;;  %v12529_v48 = vld [vmem:[#allocation19_spill] sm:$0xff]  ;;  %v9914_v49 = vpop.f32.mrf.mxu0 }
 0x192   :  { %12524 = vst [vmem:[#allocation92_spill] sm:$0xff] %v9896_v50  ;;  %12525 = vst [vmem:[#allocation93_spill] sm:$0xff] %v9900_v45  ;;  %v9912_v53 = vmul.f32 %v12529_v48, %v12529_v48  ;;  %v12531_v50 = vld [vmem:[#allocation20_spill] sm:$0xff]  ;;  %v12533_v45 = vld [vmem:[#allocation21_spill] sm:$0xff]  ;;  %1560 = vmatmul.mubr.bf16.gmra.mxu0 %v9101_v27 }
 0x193   :  { %12526 = vst [vmem:[#allocation94_spill] sm:$0xff] %v9904_v51  ;;  %12528 = vst [vmem:[#allocation18_spill] sm:$0xff] %v9908_v52  ;;  %v9920_v55 = vmul.f32 %v12531_v50, %v12531_v50  ;;  %v9924_v16 = vmul.f32 %v12533_v45, %v12533_v45  ;;  %v12535_v51 = vld [vmem:[#allocation22_spill] sm:$0xff]  ;;  %v12537_v52 = vld [vmem:[#allocation23_spill] sm:$0xff]  ;;  %v9940_v50 = vmul.f32 %v12541_v46, %v12541_v46  ;;  %1569 = vmatprep.mubr.bf16.mxu0 %v12464_v31 }
 0x194   :  { %12530 = vst [vmem:[#allocation19_spill] sm:$0xff] %v9912_v53  ;;  %v9928_v15 = vmul.f32 %v12535_v51, %v12535_v51  ;;  %v9932_v48 = vmul.f32 %v12537_v52, %v12537_v52  ;;  %v12539_v53 = vld [vmem:[#allocation24_spill] sm:$0xff]  ;;  %v9952_v52 = vpop.f32.mrf.mxu1  ;;  %v12549_v46 = vld [vmem:[#allocation29_spill] sm:$0xff]  ;;  %12604 = vst [vmem:[#allocation56_spill] sm:$0xff] %v10081_v35  ;;  %v10099_v35 = vmul.f32 %v12610_v11, %v12610_v11 }
 0x195   :  { %12532 = vst [vmem:[#allocation20_spill] sm:$0xff] %v9920_v55  ;;  %12534 = vst [vmem:[#allocation21_spill] sm:$0xff] %v9924_v16  ;;  %v9936_v1 = vmul.f32 %v12539_v53, %v12539_v53  ;;  %v12543_v55 = vld [vmem:[#allocation26_spill] sm:$0xff]  ;;  %v12545_v16 = vld [vmem:[#allocation27_spill] sm:$0xff]  ;;  %v10120_v11 = vmul.f32 %v9660_v30, %v9660_v30 }
 0x196   :  { %12536 = vst [vmem:[#allocation22_spill] sm:$0xff] %v9928_v15  ;;  %12538 = vst [vmem:[#allocation23_spill] sm:$0xff] %v9932_v48  ;;  %v9944_v45 = vmul.f32 %v12543_v55, %v12543_v55  ;;  %v9948_v51 = vmul.f32 %v12545_v16, %v12545_v16  ;;  %v9950_v15 = vpop.f32.mrf.mxu0  ;;  %v12547_v53 = vld [vmem:[#allocation28_spill] sm:$0xff]  ;;  %v12551_v55 = vld [vmem:[#allocation30_spill] sm:$0xff] }
 0x197   :  { %12540 = vst [vmem:[#allocation24_spill] sm:$0xff] %v9936_v1  ;;  %12542 = vst [vmem:[#allocation25_spill] sm:$0xff] %v9940_v50  ;;  %v9956_v1 = vmul.f32 %v12547_v53, %v12547_v53  ;;  %v9960_v50 = vmul.f32 %v12549_v46, %v12549_v46  ;;  %v12553_v16 = vld [vmem:[#allocation31_spill] sm:$0xff]  ;;  %v12555_v48 = vld [vmem:[#allocation32_spill] sm:$0xff] }
 0x198   :  { %12544 = vst [vmem:[#allocation26_spill] sm:$0xff] %v9944_v45  ;;  %12546 = vst [vmem:[#allocation27_spill] sm:$0xff] %v9948_v51  ;;  %v9964_v45 = vmul.f32 %v12551_v55, %v12551_v55  ;;  %v9968_v51 = vmul.f32 %v12553_v16, %v12553_v16  ;;  %v9973_v27 = vmul.f32 %v12555_v48, %v12555_v48  ;;  %v12557_v53 = vld [vmem:[#allocation33_spill] sm:$0xff]  ;;  %v12559_v46 = vld [vmem:[#allocation34_spill] sm:$0xff]  ;;  %v9987_v16 = vpop.f32.mrf.mxu0 }
 0x199   :  { %12548 = vst [vmem:[#allocation28_spill] sm:$0xff] %v9956_v1  ;;  %12550 = vst [vmem:[#allocation29_spill] sm:$0xff] %v9960_v50  ;;  %v9977_v1 = vmul.f32 %v12557_v53, %v12557_v53  ;;  %v9981_v50 = vmul.f32 %v12559_v46, %v12559_v46  ;;  %v12561_v55 = vld [vmem:[#allocation35_spill] sm:$0xff]  ;;  %v9993_v48 = vmul.f32 %v12563_v37, %v12563_v37 }
 0x19a   :  { %12552 = vst [vmem:[#allocation30_spill] sm:$0xff] %v9964_v45  ;;  %12554 = vst [vmem:[#allocation31_spill] sm:$0xff] %v9968_v51  ;;  %v9985_v45 = vmul.f32 %v12561_v55, %v12561_v55  ;;  %v9989_v51 = vpop.f32.mrf.mxu1  ;;  %v10013_v37 = vmul.f32 %v12573_v44, %v12573_v44 }
 0x19b   :  { %12556 = vst [vmem:[#allocation32_spill] sm:$0xff] %v9973_v27  ;;  %12558 = vst [vmem:[#allocation33_spill] sm:$0xff] %v9977_v1  ;;  %v12565_v27 = vld [vmem:[#allocation37_spill] sm:$0xff]  ;;  %v12567_v1 = vld [vmem:[#allocation38_spill] sm:$0xff] }
 0x19c   :  { %12560 = vst [vmem:[#allocation34_spill] sm:$0xff] %v9981_v50  ;;  %12562 = vst [vmem:[#allocation35_spill] sm:$0xff] %v9985_v45  ;;  %v9997_v53 = vmul.f32 %v12565_v27, %v12565_v27  ;;  %v10001_v46 = vmul.f32 %v12567_v1, %v12567_v1  ;;  %v12569_v50 = vld [vmem:[#allocation39_spill] sm:$0xff]  ;;  %v12571_v45 = vld [vmem:[#allocation40_spill] sm:$0xff] }
 0x19d   :  { %12564 = vst [vmem:[#allocation36_spill] sm:$0xff] %v9993_v48  ;;  %v10005_v55 = vmul.f32 %v12569_v50, %v12569_v50  ;;  %v10009_v43 = vmul.f32 %v12571_v45, %v12571_v45  ;;  %12574 = vst [vmem:[#allocation41_spill] sm:$0xff] %v10013_v37  ;;  %v12575_v48 = vld [vmem:[#allocation42_spill] sm:$0xff]  ;;  %v10025_v50 = vpop.f32.mrf.mxu1 }
 0x19e   :  { %12566 = vst [vmem:[#allocation37_spill] sm:$0xff] %v9997_v53  ;;  %12568 = vst [vmem:[#allocation38_spill] sm:$0xff] %v10001_v46  ;;  %v10017_v27 = vmul.f32 %v12575_v48, %v12575_v48  ;;  %v12577_v53 = vld [vmem:[#allocation43_spill] sm:$0xff]  ;;  %v10023_v46 = vpop.f32.mrf.mxu0  ;;  %v12583_v37 = vld [vmem:[#allocation46_spill] sm:$0xff] }
 0x19f   :  { %12570 = vst [vmem:[#allocation39_spill] sm:$0xff] %v10005_v55  ;;  %12572 = vst [vmem:[#allocation40_spill] sm:$0xff] %v10009_v43  ;;  %v10021_v1 = vmul.f32 %v12577_v53, %v12577_v53  ;;  %v12579_v55 = vld [vmem:[#allocation44_spill] sm:$0xff]  ;;  %v12581_v43 = vld [vmem:[#allocation45_spill] sm:$0xff]  ;;  %v10037_v48 = vmul.f32 %v12583_v37, %v12583_v37 }
 0x1a0   :  { %12576 = vst [vmem:[#allocation42_spill] sm:$0xff] %v10017_v27  ;;  %v10029_v45 = vmul.f32 %v12579_v55, %v12579_v55  ;;  %v10033_v44 = vmul.f32 %v12581_v43, %v12581_v43  ;;  %v12585_v27 = vld [vmem:[#allocation47_spill] sm:$0xff]  ;;  %v10049_v55 = vmul.f32 %v12589_v41, %v12589_v41  ;;  %v12597_v41 = vld [vmem:[#allocation53_spill] sm:$0xff]  ;;  %12611 = vst [vmem:[#allocation59_spill] sm:$0xff] %v10099_v35 }
 0x1a1   :  { %12578 = vst [vmem:[#allocation43_spill] sm:$0xff] %v10021_v1  ;;  %12584 = vst [vmem:[#allocation46_spill] sm:$0xff] %v10037_v48  ;;  %v10041_v53 = vmul.f32 %v12585_v27, %v12585_v27  ;;  %v12587_v1 = vld [vmem:[#allocation48_spill] sm:$0xff]  ;;  %v10059_v48 = vpop.f32.mrf.mxu0  ;;  %v10061_v27 = vpop.f32.mrf.mxu1 }
 0x1a2   :  { %12580 = vst [vmem:[#allocation44_spill] sm:$0xff] %v10029_v45  ;;  %12582 = vst [vmem:[#allocation45_spill] sm:$0xff] %v10033_v44  ;;  %v10045_v40 = vmul.f32 %v12587_v1, %v12587_v1  ;;  %v12591_v45 = vld [vmem:[#allocation50_spill] sm:$0xff]  ;;  %v12593_v44 = vld [vmem:[#allocation51_spill] sm:$0xff] }
 0x1a3   :  { %12586 = vst [vmem:[#allocation47_spill] sm:$0xff] %v10041_v53  ;;  %12590 = vst [vmem:[#allocation49_spill] sm:$0xff] %v10049_v55  ;;  %v10053_v43 = vmul.f32 %v12591_v45, %v12591_v45  ;;  %v10057_v37 = vmul.f32 %v12593_v44, %v12593_v44  ;;  %v8199_v53 = vld [vmem:[#allocation7 + $0x280] ss:$20 sps:$4 sm:$0xff]   ;;  %v10069_v55 = vmul.f32 %v12597_v41, %v12597_v41  ;;  %v12601_v44 = vld [vmem:[#allocation55_spill] sm:$0xff] }
 0x1a4   :  { %12588 = vst [vmem:[#allocation48_spill] sm:$0xff] %v10045_v40  ;;  %v12595_v1 = vld [vmem:[#allocation52_spill] sm:$0xff]  ;;  %v12599_v45 = vld [vmem:[#allocation54_spill] sm:$0xff]  ;;  %4338 = vmatpush1.bf16.msra.mxu0 %v8199_v53  ;;  %12620 = vst [vmem:[#allocation96_spill] sm:$0xff] %v10120_v11  ;;  %v10124_v53 = vmul.f32 %v9662_v4, %v9662_v4 }
 0x1a5   :  { %12592 = vst [vmem:[#allocation50_spill] sm:$0xff] %v10053_v43  ;;  %12594 = vst [vmem:[#allocation51_spill] sm:$0xff] %v10057_v37  ;;  %v10065_v40 = vmul.f32 %v12595_v1, %v12595_v1  ;;  %v10073_v43 = vmul.f32 %v12599_v45, %v12599_v45  ;;  %v10077_v37 = vmul.f32 %v12601_v44, %v12601_v44  ;;  %v1298_v45 = vpop.f32.mrf.mxu1  ;;  %v12608_v44 = vld [vmem:[#allocation58_spill] sm:$0xff]  ;;  %v12625_v11 = vld [vmem:[#allocation65_spill] sm:$0xff] }
 0x1a6   :  { %12598 = vst [vmem:[#allocation53_spill] sm:$0xff] %v10069_v55  ;;  %v10085_v1 = vmul.f32 %v9643_v36, %v9643_v36  ;;  %v10091_v55 = vpop.f32.mrf.mxu0  ;;  %v12612_v36 = vld [vmem:[#allocation60_spill] sm:$0xff]  ;;  %12621 = vst [vmem:[#allocation97_spill] sm:$0xff] %v10124_v53  ;;  %v1811_v4 = vmul.f32 %v1298_v45, %v1298_v45  ;;  %v10160_v45 = vmul.f32 %v9699_v25, %v9699_v25 }
 0x1a7   :  { %12596 = vst [vmem:[#allocation52_spill] sm:$0xff] %v10065_v40  ;;  %12600 = vst [vmem:[#allocation54_spill] sm:$0xff] %v10073_v43  ;;  %v12606_v40 = vld [vmem:[#allocation57_spill] sm:$0xff]  ;;  %v9102_v43 = vld [vmem:[#allocation2 + $0x40] sm:$0xff]   ;;  %v10176_v25 = vmul.f32 %v9771_v20, %v9771_v20 }
 0x1a8   :  { %12602 = vst [vmem:[#allocation55_spill] sm:$0xff] %v10077_v37  ;;  %12605 = vst [vmem:[#allocation95_spill] sm:$0xff] %v10085_v1  ;;  %v10089_v41 = vmul.f32 %v12606_v40, %v12606_v40  ;;  %1570 = vmatmul.mubr.bf16.gmra.mxu0 %v9102_v43  ;;  %v10095_v37 = vmul.f32 %v12608_v44, %v12608_v44  ;;  %v10103_v1 = vmul.f32 %v12612_v36, %v12612_v36  ;;  %v12614_v40 = vld [vmem:[#allocation61_spill] sm:$0xff]  ;;  %v12618_v44 = vld [vmem:[#allocation63_spill] sm:$0xff]  ;;  %v1107_v36 = vpop.f32.mrf.mxu0 }
 0x1a9   :  { %1579 = vmatprep.mubr.bf16.mxu0 %v12464_v31  ;;  %v10112_v43 = vmul.f32 %v12616_v14, %v12616_v14  ;;  %v1810_v14 = vmul.f32 %v1107_v36, %v1107_v36  ;;  %12634 = vst [vmem:[#allocation100_spill] sm:$0xff] %v10176_v25  ;;  %v8187_v25 = vld [vmem:[#allocation7 + $0x5c8] ss:$20 sps:$4 sm:$0xff]  }
 0x1aa   :  { %12607 = vst [vmem:[#allocation57_spill] sm:$0xff] %v10089_v41  ;;  %12609 = vst [vmem:[#allocation58_spill] sm:$0xff] %v10095_v37  ;;  %v10108_v41 = vmul.f32 %v12614_v40, %v12614_v40  ;;  %v10116_v37 = vmul.f32 %v12618_v44, %v12618_v44  ;;  %v10128_v40 = vmul.f32 %v9664_v18, %v9664_v18  ;;  %v10142_v53 = vpop.f32.mrf.mxu0  ;;  %v12627_v18 = vld [vmem:[#allocation66_spill] sm:$0xff] }
 0x1ab   :  { %12613 = vst [vmem:[#allocation60_spill] sm:$0xff] %v10103_v1  ;;  %12617 = vst [vmem:[#allocation62_spill] sm:$0xff] %v10112_v43  ;;  %v1300_v1 = vpop.f32.mrf.mxu1  ;;  %v10132_v44 = vmul.f32 %v9666_v19, %v9666_v19  ;;  %v10140_v43 = vmul.f32 %v12625_v11, %v12625_v11  ;;  %v10146_v36 = vmul.f32 %v12627_v18, %v12627_v18 }
 0x1ac   :  { %12615 = vst [vmem:[#allocation61_spill] sm:$0xff] %v10108_v41  ;;  %12619 = vst [vmem:[#allocation63_spill] sm:$0xff] %v10116_v37  ;;  %v1812_v41 = vmul.f32 %v1300_v1, %v1300_v1  ;;  %v12624_v37 = vld [vmem:[#allocation64_spill] sm:$0xff]  ;;  %v12629_v1 = vld [vmem:[#allocation67_spill] sm:$0xff]  ;;  %v10156_v11 = vmul.f32 %v9697_v58, %v9697_v58  ;;  %v10164_v18 = vmul.f32 %v9733_v61, %v9733_v61 }
 0x1ad   :  { %12622 = vst [vmem:[#allocation98_spill] sm:$0xff] %v10128_v40  ;;  %12623 = vst [vmem:[#allocation99_spill] sm:$0xff] %v10132_v44  ;;  %v10136_v30 = vmul.f32 %v12624_v37, %v12624_v37  ;;  %v1302_v35 = vpop.f32.mrf.mxu1  ;;  %v10150_v19 = vmul.f32 %v12629_v1, %v12629_v1  ;;  %v12630_v44 = vld [vmem:[#allocation68_spill] sm:$0xff]  ;;  %v8202_v58 = vld [vmem:[#allocation7 + $0x4d8] ss:$20 sps:$4 sm:$0xff]   ;;  %v1971_v61 = vadd.f32 %v1811_v4, %v9687_v0 }
 0x1ae   :  { %12626 = vst [vmem:[#allocation64_spill] sm:$0xff] %v10140_v43  ;;  %12628 = vst [vmem:[#allocation65_spill] sm:$0xff] %v10146_v36  ;;  %v1970_v40 = vadd.f32 %v1810_v14, %v12630_v44  ;;  %v1972_v37 = vadd.f32 %v1812_v41, %v9683_v26  ;;  %v1816_v43 = vmul.f32 %v1302_v35, %v1302_v35  ;;  %v1111_v36 = vpop.f32.mrf.mxu0 }
 0x1af   :  { %12631 = vst [vmem:[#allocation66_spill] sm:$0xff] %v10156_v11  ;;  %12632 = vst [vmem:[#allocation67_spill] sm:$0xff] %v10160_v45  ;;  %v1304_v1 = vpop.f32.mrf.mxu1  ;;  %v10168_v14 = vmul.f32 %v9735_v5, %v9735_v5  ;;  %v1815_v44 = vmul.f32 %v1111_v36, %v1111_v36  ;;  %v10172_v11 = vmul.f32 %v9769_v8, %v9769_v8  ;;  %v9103_v5 = vld [vmem:[#allocation2 + $0x48] sm:$0xff]  }
 0x1b0   :  { %12633 = vst [vmem:[#allocation68_spill] sm:$0xff] %v10164_v18  ;;  %v2130_v26 = vadd.f32 1e-30, %v1970_v40  ;;  %v2132_v41 = vadd.f32 1e-30, %v1972_v37  ;;  %v1817_v35 = vmul.f32 %v1304_v1, %v1304_v1  ;;  %v10179_v45 = vpop.f32.mrf.mxu0  ;;  %1580 = vmatmul.mubr.bf16.gmra.mxu0 %v9103_v5  ;;  %v10183_v36 = vmul.f32 %v9805_v22, %v9805_v22 }
 0x1b1   :  { %v1308_v18 = vpop.f32.mrf.mxu1  ;;  %v8204_v40 = vld [vmem:[#allocation7 + $0x4dc] ss:$20 sps:$4 sm:$0xff]   ;;  %v1975_v8 = vadd.f32 %v1815_v44, %v9695_v56  ;;  %1589 = vmatprep.mubr.bf16.mxu0 %v12464_v31  ;;  %v10189_v0 = vmul.f32 %v9807_v13, %v9807_v13  ;;  %v1976_v20 = vadd.f32 %v1816_v43, %v9707_v60  ;;  %v10195_v22 = vmul.f32 %v9842_v39, %v9842_v39 }
 0x1b2   :  { %8454 = vlog2.f32 %v2130_v26  ;;  %v1821_v37 = vmul.f32 %v1308_v18, %v1308_v18  ;;  %v1977_v4 = vadd.f32 %v1817_v35, %v9703_v59  ;;  %v1117_v1 = vpop.f32.mrf.mxu0  ;;  %4339 = vmatprep.subr.bf16.mxu0 %v8204_v40  ;;  %v10199_v13 = vmul.f32 %v9844_v33, %v9844_v33 }
 0x1b3   :  { %8456 = vlog2.f32 %v2132_v41  ;;  %v1310_v5 = vpop.f32.mrf.mxu1  ;;  %v2135_v56 = vadd.f32 1e-30, %v1975_v8  ;;  %v1820_v18 = vmul.f32 %v1117_v1, %v1117_v1  ;;  %4340 = vmatpush2.bf16.msra.mxu0 %v8202_v58  ;;  %v2131_v41 = vadd.f32 1e-30, %v1971_v61 }
 0x1b4   :  { %v1822_v26 = vmul.f32 %v1310_v5, %v1310_v5  ;;  %12635 = vst [vmem:[#allocation101_spill] sm:$0xff] %v10199_v13  ;;  %v2137_v44 = vadd.f32 1e-30, %v1977_v4  ;;  %v1981_v60 = vadd.f32 %v1821_v37, %v9723_v63  ;;  %v10202_v59 = vpop.f32.mrf.mxu0  ;;  %v10206_v35 = vmul.f32 %v9878_v42, %v9878_v42 }
 0x1b5   :  { %v1312_v43 = vpop.f32.mrf.mxu1  ;;  %8458 = vlog2.f32 %v2135_v56  ;;  %v1980_v39 = vadd.f32 %v1820_v18, %v9715_v62  ;;  %v10212_v33 = vmul.f32 %v9880_v47, %v9880_v47  ;;  %v2136_v61 = vadd.f32 1e-30, %v1976_v20  ;;  %v9104_v56 = vld [vmem:[#allocation2 + $0x50] sm:$0xff]  }
 0x1b6   :  { %v1982_v58 = vadd.f32 %v1822_v26, %v9719_v57  ;;  %8460 = vlog2.f32 %v2137_v44  ;;  %v1826_v40 = vmul.f32 %v1312_v43, %v1312_v43  ;;  %v1121_v63 = vpop.f32.mrf.mxu0  ;;  %v10216_v37 = vmul.f32 %v9914_v49, %v9914_v49 }
 0x1b7   :  { %v1314_v8 = vpop.f32.mrf.mxu1  ;;  %v10220_v42 = vmul.f32 %v9916_v54, %v9916_v54  ;;  %v2140_v62 = vadd.f32 1e-30, %v1980_v39  ;;  %v1825_v4 = vmul.f32 %v1121_v63, %v1121_v63  ;;  %8462 = vlog2.f32 %v2131_v41  ;;  %v8210_v41 = vld [vmem:[#allocation7 + $0x4b4] ss:$20 sps:$4 sm:$0xff]  }
 0x1b8   :  { %v2141_v57 = vadd.f32 1e-30, %v1981_v60  ;;  %v1986_v47 = vadd.f32 %v1826_v40, %v9743_v7  ;;  %v1827_v1 = vmul.f32 %v1314_v8, %v1314_v8  ;;  %v10223_v20 = vpop.f32.mrf.mxu0  ;;  %1590 = vmatmul.mubr.bf16.gmra.mxu0 %v9104_v56  ;;  %v10227_v49 = vmul.f32 %v9950_v15, %v9950_v15  ;;  %v8208_v7 = vld [vmem:[#allocation7 + $0x4b0] ss:$20 sps:$4 sm:$0xff]   ;;  %4341 = vmatprep.subr.bf16.mxu0 %v8210_v41 }
 0x1b9   :  { %12636 = vst [vmem:[#allocation102_spill] sm:$0xff] %v10220_v42  ;;  %v1318_v5 = vpop.f32.mrf.mxu1  ;;  %v10231_v54 = vmul.f32 %v9952_v52, %v9952_v52  ;;  %v2142_v18 = vadd.f32 1e-30, %v1982_v58  ;;  %v1985_v26 = vadd.f32 %v1825_v4, %v9731_v2  ;;  %1599 = vmatprep.mubr.bf16.mxu0 %v12464_v31  ;;  %8464 = vlog2.f32 %v2136_v61  ;;  %4342 = vmatpush2.bf16.msra.mxu0 %v8208_v7  ;;  %v8189_v42 = vld [vmem:[#allocation7 + $0x5cc] ss:$20 sps:$4 sm:$0xff]  }
 0x1ba   :  { %v2146_v44 = vadd.f32 1e-30, %v1986_v47  ;;  %v1987_v60 = vadd.f32 %v1827_v1, %v9739_v6  ;;  %v1831_v43 = vmul.f32 %v1318_v5, %v1318_v5  ;;  %v1127_v39 = vpop.f32.mrf.mxu0  ;;  %8466 = vlog2.f32 %v2140_v62 }
 0x1bb   :  { %v1320_v40 = vpop.f32.mrf.mxu1  ;;  %v2145_v15 = vadd.f32 1e-30, %v1985_v26  ;;  %v1830_v63 = vmul.f32 %v1127_v39, %v1127_v39  ;;  %v10238_v52 = vmul.f32 %v9987_v16, %v9987_v16  ;;  %v10242_v2 = vmul.f32 %v9989_v51, %v9989_v51 }
 0x1bc   :  { %v1832_v8 = vmul.f32 %v1320_v40, %v1320_v40  ;;  %v10246_v58 = vmul.f32 %v10023_v46, %v10023_v46  ;;  %8468 = vlog2.f32 %v2141_v57  ;;  %v10248_v6 = vpop.f32.mrf.mxu0  ;;  %v2147_v62 = vadd.f32 1e-30, %v1987_v60 }
 0x1bd   :  { %12637 = vst [vmem:[#allocation103_spill] sm:$0xff] %v10242_v2  ;;  %v1322_v61 = vpop.f32.mrf.mxu1  ;;  %8470 = vlog2.f32 %v2142_v18  ;;  %v1990_v4 = vadd.f32 %v1830_v63, %v9751_v9  ;;  %v10254_v51 = vmul.f32 %v10025_v50, %v10025_v50  ;;  %v10258_v46 = vmul.f32 %v10059_v48, %v10059_v48 }
 0x1be   :  { %12638 = vst [vmem:[#allocation104_spill] sm:$0xff] %v10246_v58  ;;  %v1992_v16 = vadd.f32 %v1832_v8, %v9755_v38  ;;  %8472 = vlog2.f32 %v2146_v44  ;;  %v1991_v57 = vadd.f32 %v1831_v43, %v9759_v10  ;;  %v1131_v1 = vpop.f32.mrf.mxu0  ;;  %v10263_v9 = vmul.f32 %v10061_v27, %v10061_v27  ;;  %v9105_v44 = vld [vmem:[#allocation2 + $0x58] sm:$0xff]  }
 0x1bf   :  { %v8455_v47 = vpop.eup %8454  ;;  %12639 = vst [vmem:[#allocation105_spill] sm:$0xff] %v10254_v51  ;;  %v1324_v5 = vpop.f32.mrf.mxu1  ;;  %v10267_v38 = vmul.f32 %v10091_v55, %v10091_v55  ;;  %8474 = vlog2.f32 %v2145_v15  ;;  %v1836_v50 = vmul.f32 %v1322_v61, %v1322_v61  ;;  %v2150_v26 = vadd.f32 1e-30, %v1990_v4 }
 0x1c0   :  { %v8457_v56 = vpop.eup %8456  ;;  %12640 = vst [vmem:[#allocation106_spill] sm:$0xff] %v10263_v9  ;;  %v2291_v18 = vmul.f32 0.6931472, %v8455_v47  ;;  %v1835_v48 = vmul.f32 %v1131_v1, %v1131_v1  ;;  %v1837_v7 = vmul.f32 %v1324_v5, %v1324_v5  ;;  %v10269_v41 = vpop.f32.mrf.mxu0  ;;  %1600 = vmatmul.mubr.bf16.gmra.mxu0 %v9105_v44  ;;  %v10273_v27 = vmul.f32 %v10142_v53, %v10142_v53  ;;  %v8211_v9 = vld [vmem:[#allocation7 + $0x488] ss:$20 sps:$4 sm:$0xff]  }
 0x1c1   :  { %12641 = vst [vmem:[#allocation107_spill] sm:$0xff] %v10267_v38  ;;  %v1328_v10 = vpop.f32.mrf.mxu1  ;;  %v2295_v60 = vmul.f32 0.6931472, %v8457_v56  ;;  %v10277_v55 = vmul.f32 %v10179_v45, %v10179_v45  ;;  %8476 = vlog2.f32 %v2147_v62  ;;  %1609 = vmatprep.mubr.bf16.mxu0 %v12464_v31  ;;  %v2151_v39 = vadd.f32 1e-30, %v1991_v57 }
 0x1c2   :  { %12642 = vst [vmem:[#allocation108_spill] sm:$0xff] %v10273_v27  ;;  %v8459_v43 = vpop.eup %8458  ;;  %v2152_v40 = vadd.f32 1e-30, %v1992_v16  ;;  %v1995_v15 = vadd.f32 %v1835_v48, %v9767_v17  ;;  %v1841_v63 = vmul.f32 %v1328_v10, %v1328_v10  ;;  %v1137_v8 = vpop.f32.mrf.mxu0  ;;  %v1996_v53 = vadd.f32 %v1836_v50, %v9779_v21 }
 0x1c3   :  { %12643 = vst [vmem:[#allocation109_spill] sm:$0xff] %v10277_v55  ;;  %v1330_v61 = vpop.f32.mrf.mxu1  ;;  %v8461_v4 = vpop.eup %8460  ;;  %v2301_v47 = vmul.f32 0.6931472, %v8459_v43  ;;  %v1997_v1 = vadd.f32 %v1837_v7, %v9775_v12  ;;  %v1840_v5 = vmul.f32 %v1137_v8, %v1137_v8  ;;  %v2610_v45 = vmul.f32 0.5, %v2291_v18 }
 0x1c4   :  { %v2305_v56 = vmul.f32 0.6931472, %v8461_v4  ;;  %8478 = vlog2.f32 %v2150_v26  ;;  %v1842_v62 = vmul.f32 %v1330_v61, %v1330_v61  ;;  %v10283_v44 = vpop.f32.mrf.mxu0  ;;  %v8463_v16 = vpop.eup %8462  ;;  %v2612_v2 = vmul.f32 0.5, %v2295_v60  ;;  %v8213_v26 = vld [vmem:[#allocation7 + $0x48c] ss:$20 sps:$4 sm:$0xff]  }
 0x1c5   :  { %v1332_v57 = vpop.f32.mrf.mxu1  ;;  %v2615_v17 = vmul.f32 0.5, %v2301_v47  ;;  %v2155_v48 = vadd.f32 1e-30, %v1995_v15  ;;  %v2000_v10 = vadd.f32 %v1840_v5, %v9787_v23  ;;  %v2157_v13 = vadd.f32 1e-30, %v1997_v1  ;;  %v9106_v47 = vld [vmem:[#allocation2 + $0x60] sm:$0xff]   ;;  %4343 = vmatprep.subr.bf16.mxu0 %v8213_v26 }
 0x1c6   :  { %v2617_v43 = vmul.f32 0.5, %v2305_v56  ;;  %v2001_v21 = vadd.f32 %v1841_v63, %v9795_v24  ;;  %v2002_v12 = vadd.f32 %v1842_v62, %v9791_v3  ;;  %v1141_v50 = vpop.f32.mrf.mxu0  ;;  %v8465_v7 = vpop.eup %8464  ;;  %v10292_v60 = vmul.f32 %v10202_v59, %v10202_v59  ;;  %4344 = vmatpush2.bf16.msra.mxu0 %v8211_v9 }
 0x1c7   :  { %v1334_v18 = vpop.f32.mrf.mxu1  ;;  %v10288_v8 = vpack.c.bf16 %v2615_v17, %v2610_v45  ;;  %v10296_v23 = vmul.f32 %v10223_v20, %v10223_v20  ;;  %8480 = vlog2.f32 %v2151_v39  ;;  %v8467_v15 = vpop.eup %8466  ;;  %v2160_v3 = vadd.f32 1e-30, %v2000_v10 }
 0x1c8   :  { %12645 = vst [vmem:[#allocation111_spill] sm:$0xff] %v10292_v60  ;;  %v10298_v61 = vpack.c.bf16 %v2617_v43, %v2612_v2  ;;  %8482 = vlog2.f32 %v2152_v40  ;;  %v2293_v24 = vmul.f32 0.6931472, %v8463_v16  ;;  %v10300_v63 = vpop.f32.mrf.mxu0  ;;  %1610 = vmatmul.mubr.bf16.gmra.mxu0 %v9106_v47  ;;  %v10306_v59 = vmul.f32 %v10248_v6, %v10248_v6 }
 0x1c9   :  { %12644 = vst [vmem:[#allocation110_spill] sm:$0xff] %v10288_v8  ;;  %12646 = vst [vmem:[#allocation112_spill] sm:$0xff] %v10296_v23  ;;  %v1338_v4 = vpop.f32.mrf.mxu1  ;;  %v10302_v1 = vpop.eup %8468  ;;  %v2156_v20 = vadd.f32 1e-30, %v1996_v53  ;;  %8484 = vlog2.f32 %v2155_v48  ;;  %v1845_v39 = vmul.f32 %v1141_v50, %v1141_v50  ;;  %1619 = vmatprep.mubr.bf16.mxu0 %v12464_v31  ;;  %v2161_v40 = vadd.f32 1e-30, %v2001_v21 }
 0x1ca   :  { %12647 = vst [vmem:[#allocation113_spill] sm:$0xff] %v10298_v61  ;;  %12648 = vst [vmem:[#allocation114_spill] sm:$0xff] %v10306_v59  ;;  %v8471_v2 = vpop.eup %8470  ;;  %8486 = vlog2.f32 %v2157_v13  ;;  %v1847_v5 = vmul.f32 %v1334_v18, %v1334_v18  ;;  %v2303_v45 = vmul.f32 0.6931472, %v8465_v7  ;;  %v1147_v56 = vpop.f32.mrf.mxu0  ;;  %v2311_v17 = vmul.f32 0.6931472, %v8467_v15 }
 0x1cb   :  { %v1340_v62 = vpop.f32.mrf.mxu1  ;;  %v10309_v16 = vpop.eup %8472  ;;  %v2162_v10 = vadd.f32 1e-30, %v2002_v12  ;;  %v1846_v43 = vmul.f32 %v1332_v57, %v1332_v57  ;;  %v2005_v6 = vadd.f32 %v1845_v39, %v9803_v28  ;;  %8488 = vlog2.f32 %v2160_v3  ;;  %v8169_v15 = vld [vmem:[#allocation7 + $0x618] ss:$20 sps:$4 sm:$0xff]   ;;  %v8180_v39 = vld [vmem:[#allocation7 + $0x5f4] ss:$20 sps:$4 sm:$0xff]  }
 0x1cc   :  { %v8475_v53 = vpop.eup %8474  ;;  %v2007_v48 = vadd.f32 %v1847_v5, %v9811_v29  ;;  %v2611_v50 = vmul.f32 0.5, %v2293_v24  ;;  %v2616_v9 = vmul.f32 0.5, %v2303_v45  ;;  %v10313_v26 = vpop.f32.mrf.mxu0  ;;  %8490 = vlog2.f32 %v2156_v20  ;;  %v8217_v5 = vld [vmem:[#allocation7 + $0x460] ss:$20 sps:$4 sm:$0xff]  }
 0x1cd   :  { %v1342_v13 = vpop.f32.mrf.mxu1  ;;  %v10317_v21 = vmul.f32 %v10269_v41, %v10269_v41  ;;  %v2165_v18 = vadd.f32 1e-30, %v2005_v6  ;;  %v1851_v7 = vmul.f32 %v1338_v4, %v1338_v4  ;;  %8492 = vlog2.f32 %v2161_v40  ;;  %v8219_v4 = vld [vmem:[#allocation7 + $0x464] ss:$20 sps:$4 sm:$0xff]   ;;  %v8216_v59 = vld [vmem:[#allocation7 + $0x554] ss:$20 sps:$4 sm:$0xff]  }
 0x1ce   :  { %v8477_v12 = vpop.eup %8476  ;;  %v2167_v57 = vadd.f32 1e-30, %v2007_v48  ;;  %v10319_v28 = vpack.c.bf16 %v2616_v9, %v2611_v50  ;;  %v1850_v3 = vmul.f32 %v1147_v56, %v1147_v56  ;;  %v1151_v29 = vpop.f32.mrf.mxu0  ;;  %8494 = vlog2.f32 %v2162_v10  ;;  %v9107_v48 = vld [vmem:[#allocation2 + $0x68] sm:$0xff]   ;;  %4345 = vmatprep.subr.bf16.mxu0 %v8219_v4 }
 0x1cf   :  { %12649 = vst [vmem:[#allocation115_spill] sm:$0xff] %v10317_v21  ;;  %v1344_v24 = vpop.f32.mrf.mxu1  ;;  %v10323_v47 = vmul.f32 %v10283_v44, %v10283_v44  ;;  %v2006_v20 = vadd.f32 %v1846_v43, %v9815_v32  ;;  %v1852_v41 = vmul.f32 %v1340_v62, %v1340_v62  ;;  %v10326_v45 = vmul.f32 0.5, %v2311_v17  ;;  %v12652_v62 = vld [vmem:[#allocation78_spill] sm:$0xff]  ;;  %v12653_v17 = vld [vmem:[#allocation77_spill] sm:$0xff]  ;;  %4346 = vmatpush2.bf16.msra.mxu0 %v8217_v5 }
 0x1d0   :  { %12650 = vst [vmem:[#allocation116_spill] sm:$0xff] %v10319_v28  ;;  %v2315_v40 = vmul.f32 0.6931472, %v8471_v2  ;;  %8496 = vlog2.f32 %v2165_v18  ;;  %4162 = vmatprep.mubr.bf16.mxu1 %v10319_v28  ;;  %v2010_v56 = vadd.f32 %v1850_v3, %v9823_v34  ;;  %v10330_v6 = vpop.f32.mrf.mxu0  ;;  %1620 = vmatmul.mubr.bf16.gmra.mxu0 %v9107_v48  ;;  %v2321_v50 = vmul.f32 0.6931472, %v8475_v53 }
 0x1d1   :  { %12651 = vst [vmem:[#allocation117_spill] sm:$0xff] %v10323_v47  ;;  %v1348_v10 = vpop.f32.mrf.mxu1  ;;  %v8479_v44 = vpop.eup %8478  ;;  %v2325_v32 = vmul.f32 0.6931472, %v8477_v12  ;;  %v2011_v43 = vadd.f32 %v1851_v7, %v12652_v62  ;;  %4163 = vmatmul.mubr.bf16.vlgmr.msra.gmra.mxu1 %v10288_v8  ;;  %v2012_v9 = vadd.f32 %v1852_v41, %v12653_v17  ;;  %1629 = vmatprep.mubr.bf16.mxu0 %v12464_v31  ;;  %8498 = vlog2.f32 %v2167_v57  ;;  %v8178_v48 = vld [vmem:[#allocation7 + $0x5f0] ss:$20 sps:$4 sm:$0xff]  }
 0x1d2   :  { %v2170_v2 = vadd.f32 1e-30, %v2010_v56  ;;  %4517 = vmatpush1.bf16.msra.mxu1 %v8169_v15  ;;  %v1856_v34 = vmul.f32 %v1342_v13, %v1342_v13  ;;  %v1855_v18 = vmul.f32 %v1151_v29, %v1151_v29  ;;  %v1157_v3 = vpop.f32.mrf.mxu0  ;;  %v2166_v53 = vadd.f32 1e-30, %v2006_v20  ;;  %v12655_v13 = vld [vmem:[#allocation80_spill] sm:$0xff] }
 0x1d3   :  { %v10336_v28 = vpop.f32.mrf.mxu1  ;;  %v2172_v12 = vadd.f32 1e-30, %v2012_v9  ;;  %v1857_v7 = vmul.f32 %v1344_v24, %v1344_v24  ;;  %v2313_v62 = vmul.f32 0.6931472, %v10302_v1  ;;  %4518 = vmatprep.subr.bf16.mxu1 %v8180_v39  ;;  %v10341_v57 = vmul.f32 0.5, %v2315_v40  ;;  %v12658_v40 = vld [vmem:[#allocation82_spill] sm:$0xff] }
 0x1d4   :  { %v10339_v41 = vpop.eup %8480  ;;  %v2331_v15 = vmul.f32 0.6931472, %v8479_v44  ;;  %8500 = vlog2.f32 %v2170_v2  ;;  %v2015_v29 = vadd.f32 %v1855_v18, %v12655_v13  ;;  %v10344_v56 = vpop.f32.mrf.mxu0  ;;  %v2625_v4 = vmul.f32 0.5, %v2321_v50  ;;  %v12659_v9 = vld [vmem:[#allocation81_spill] sm:$0xff]  ;;  %v12666_v47 = vld [vmem:[#allocation88_spill] sm:$0xff] }
 0x1d5   :  { %12654 = vst [vmem:[#allocation78_spill] sm:$0xff] %v10341_v57  ;;  %v1352_v17 = vpop.f32.mrf.mxu1  ;;  %v8483_v8 = vpop.eup %8482  ;;  %v2171_v20 = vadd.f32 1e-30, %v2011_v43  ;;  %8502 = vlog2.f32 %v2172_v12  ;;  %v2323_v24 = vmul.f32 0.6931472, %v10309_v16  ;;  %v10347_v39 = vmul.f32 0.5, %v2325_v32 }
 0x1d6   :  { %v8485_v1 = vpop.eup %8484  ;;  %v10351_v5 = vmul.f32 %v10300_v63, %v10300_v63  ;;  %v2016_v44 = vadd.f32 %v1856_v34, %v12658_v40  ;;  %v2017_v2 = vadd.f32 %v1857_v7, %v12659_v9  ;;  %v1161_v18 = vpop.f32.mrf.mxu0  ;;  %4519 = vmatpush1.bf16.msra.mxu1 %v8178_v48  ;;  %8504 = vlog2.f32 %v2166_v53  ;;  %v8198_v32 = vld [vmem:[#allocation7 + $0x5a4] ss:$20 sps:$4 sm:$0xff]   ;;  %v9108_v48 = vld [vmem:[#allocation2 + $0x70] sm:$0xff]  }
 0x1d7   :  { %12656 = vst [vmem:[#allocation77_spill] sm:$0xff] %v10347_v39  ;;  %v1354_v13 = vpop.f32.mrf.mxu1  ;;  %v8487_v50 = vpop.eup %8486  ;;  %v2175_v43 = vadd.f32 1e-30, %v2015_v29  ;;  %v2621_v12 = vmul.f32 0.5, %v2313_v62  ;;  %v2626_v16 = vmul.f32 0.5, %v2323_v24  ;;  %4520 = vmatprep.subr.bf16.mxu1 %v8189_v42  ;;  %v10355_v39 = vmul.f32 0.5, %v2331_v15 }
 0x1d8   :  { %12657 = vst [vmem:[#allocation80_spill] sm:$0xff] %v10351_v5  ;;  %v2335_v57 = vmul.f32 0.6931472, %v8483_v8  ;;  %v10359_v63 = vmul.f32 %v10313_v26, %v10313_v26  ;;  %v1861_v34 = vmul.f32 %v1348_v10, %v1348_v10  ;;  %v10361_v7 = vpop.f32.mrf.mxu0  ;;  %1630 = vmatmul.mubr.bf16.gmra.mxu0 %v9108_v48  ;;  %v8222_v53 = vld [vmem:[#allocation7 + $0x43c] ss:$20 sps:$4 sm:$0xff]   ;;  %v8489_v29 = vpop.eup %8488  ;;  %8506 = vlog2.f32 %v2171_v20 }
 0x1d9   :  { %v10363_v40 = vpop.f32.mrf.mxu1  ;;  %v2341_v62 = vmul.f32 0.6931472, %v8485_v1  ;;  %v10365_v42 = vpack.c.bf16 %v2626_v16, %v2621_v12  ;;  %v10368_v15 = vpack.c.bf16 %v2625_v4, %v10326_v45  ;;  %1639 = vmatprep.mubr.bf16.mxu0 %v12464_v31  ;;  %v8196_v8 = vld [vmem:[#allocation7 + $0x5a0] ss:$20 sps:$4 sm:$0xff]   ;;  %v8220_v26 = vld [vmem:[#allocation7 + $0x438] ss:$20 sps:$4 sm:$0xff]   ;;  %v8491_v10 = vpop.eup %8490  ;;  %4347 = vmatprep.subr.bf16.mxu0 %v8222_v53  ;;  %8508 = vlog2.f32 %v2175_v43 }
 0x1da   :  { %12660 = vst [vmem:[#allocation82_spill] sm:$0xff] %v10359_v63  ;;  %v2345_v24 = vmul.f32 0.6931472, %v8487_v50  ;;  %v2176_v9 = vadd.f32 1e-30, %v2016_v44  ;;  %v1860_v63 = vmul.f32 %v1157_v3, %v1157_v3  ;;  %v10371_v5 = vpop.f32.mrf.mxu0  ;;  %4521 = vmatpush1.bf16.msra.mxu1 %v8187_v25  ;;  %v10375_v20 = vpop.eup %8492  ;;  %v12663_v45 = vld [vmem:[#allocation86_spill] sm:$0xff]  ;;  %v1862_v1 = vmul.f32 %v10336_v28, %v10336_v28  ;;  %4348 = vmatpush2.bf16.msra.mxu0 %v8220_v26 }
 0x1db   :  { %12661 = vst [vmem:[#allocation81_spill] sm:$0xff] %v10365_v42  ;;  %12662 = vst [vmem:[#allocation118_spill] sm:$0xff] %v10368_v15  ;;  %v2177_v61 = vadd.f32 1e-30, %v2017_v2  ;;  %v10373_v48 = vpop.f32.mrf.mxu1  ;;  %4172 = vmatprep.mubr.bf16.mxu1 %v10365_v42  ;;  %v2021_v4 = vadd.f32 %v1861_v34, %v12663_v45  ;;  %v1865_v50 = vmul.f32 %v1161_v18, %v1161_v18  ;;  %v8207_v44 = vld [vmem:[#allocation7 + $0x57c] ss:$20 sps:$4 sm:$0xff]   ;;  %v8495_v2 = vpop.eup %8494  ;;  %4522 = vmatprep.subr.bf16.mxu1 %v8198_v32 }
 0x1dc   :  { %v2351_v3 = vmul.f32 0.6931472, %v8489_v29  ;;  %4173 = vmatmul.mubr.bf16.gmra.mxu1 %v10368_v15  ;;  %v12664_v12 = vld [vmem:[#allocation84_spill] sm:$0xff]  ;;  %v1866_v25 = vmul.f32 %v1352_v17, %v1352_v17  ;;  %v1867_v53 = vmul.f32 %v1354_v13, %v1354_v13  ;;  %v10383_v31 = vpop.f32.mrf.mxu0  ;;  %v12665_v34 = vld [vmem:[#allocation85_spill] sm:$0xff]  ;;  %v2333_v18 = vmul.f32 0.6931472, %v10339_v41 }
 0x1dd   :  { %v2020_v16 = vadd.f32 %v1860_v63, %v12664_v12  ;;  %v10385_v43 = vpop.f32.mrf.mxu1  ;;  %v8497_v42 = vpop.eup %8496  ;;  %v2022_v45 = vadd.f32 %v1862_v1, %v12665_v34  ;;  %v2025_v28 = vadd.f32 %v1865_v50, %v12666_v47  ;;  %v2343_v21 = vmul.f32 0.6931472, %v8491_v10  ;;  %v8205_v29 = vld [vmem:[#allocation7 + $0x578] ss:$20 sps:$4 sm:$0xff]  }
 0x1de   :  { %v10390_v15 = vmul.f32 0.5, %v2335_v57  ;;  %v2635_v63 = vmul.f32 0.5, %v2341_v62  ;;  %8510 = vlog2.f32 %v2177_v61  ;;  %v1171_v13 = vpop.f32.mrf.mxu0  ;;  %4523 = vmatpush1.bf16.msra.mxu1 %v8196_v8  ;;  %v8499_v32 = vpop.eup %8498  ;;  %v10392_v23 = vmul.f32 0.5, %v2345_v24  ;;  %v12669_v47 = vld [vmem:[#allocation89_spill] sm:$0xff] }
 0x1df   :  { %v2180_v17 = vadd.f32 1e-30, %v2020_v16  ;;  %v1364_v12 = vpop.f32.mrf.mxu1  ;;  %v2355_v1 = vmul.f32 0.6931472, %v8495_v2  ;;  %v2182_v34 = vadd.f32 1e-30, %v2022_v45  ;;  %v2027_v50 = vadd.f32 %v1867_v53, %v12669_v47  ;;  %4524 = vmatprep.subr.bf16.mxu1 %v8207_v44 }
 0x1e0   :  { %12667 = vst [vmem:[#allocation86_spill] sm:$0xff] %v10390_v15  ;;  %12668 = vst [vmem:[#allocation84_spill] sm:$0xff] %v10392_v23  ;;  %v10395_v41 = vmul.f32 0.5, %v2351_v3  ;;  %v2361_v26 = vmul.f32 0.6931472, %v8497_v42  ;;  %8512 = vlog2.f32 %v2176_v9  ;;  %v10397_v62 = vpop.f32.mrf.mxu0  ;;  %v9109_v10 = vld [vmem:[#allocation2 + $0x78] sm:$0xff]   ;;  %v1871_v42 = vmul.f32 %v10363_v40, %v10363_v40 }
 0x1e1   :  { %v2181_v57 = vadd.f32 1e-30, %v2021_v4  ;;  %v10399_v61 = vpop.f32.mrf.mxu1  ;;  %1640 = vmatmul.mubr.bf16.gmra.mxu0 %v9109_v10  ;;  %v8501_v8 = vpop.eup %8500  ;;  %v12670_v16 = vld [vmem:[#allocation90_spill] sm:$0xff]  ;;  %v2185_v23 = vadd.f32 1e-30, %v2025_v28  ;;  %v2631_v2 = vmul.f32 0.5, %v2333_v18  ;;  %8514 = vlog2.f32 %v2180_v17 }
 0x1e2   :  { %v2026_v24 = vadd.f32 %v1866_v25, %v12670_v16  ;;  %v2636_v45 = vmul.f32 0.5, %v2343_v21  ;;  %v8226_v15 = vld [vmem:[#allocation7 + $0x410] ss:$20 sps:$4 sm:$0xff]   ;;  %v8503_v53 = vpop.eup %8502  ;;  %v2365_v44 = vmul.f32 0.6931472, %v8499_v32  ;;  %v10405_v9 = vpack.c.bf16 %v2635_v63, %v10355_v39  ;;  %v10407_v4 = vpop.f32.mrf.mxu0  ;;  %4525 = vmatpush1.bf16.msra.mxu1 %v8205_v29 }
 0x1e3   :  { %v10409_v3 = vpop.f32.mrf.mxu1  ;;  %v8228_v47 = vld [vmem:[#allocation7 + $0x414] ss:$20 sps:$4 sm:$0xff]   ;;  %8516 = vlog2.f32 %v2182_v34  ;;  %v2187_v25 = vadd.f32 1e-30, %v2027_v50  ;;  %v1870_v21 = vmul.f32 %v10371_v5, %v10371_v5  ;;  %v8214_v18 = vld [vmem:[#allocation7 + $0x550] ss:$20 sps:$4 sm:$0xff]   ;;  %4526 = vmatprep.subr.bf16.mxu1 %v8216_v59  ;;  %v8505_v40 = vpop.eup %8504  ;;  %v10417_v63 = vmul.f32 %v10330_v6, %v10330_v6 }
 0x1e4   :  { %12671 = vst [vmem:[#allocation85_spill] sm:$0xff] %v10405_v9  ;;  %v10411_v28 = vpack.c.bf16 %v2636_v45, %v2631_v2  ;;  %v8225_v17 = vld [vmem:[#allocation7 + $0x52c] ss:$20 sps:$4 sm:$0xff]   ;;  %v2371_v32 = vmul.f32 0.6931472, %v8501_v8  ;;  %v1872_v29 = vmul.f32 %v10373_v48, %v10373_v48  ;;  %v10421_v34 = vpop.f32.mrf.mxu0  ;;  %4349 = vmatprep.subr.bf16.mxu0 %v8228_v47  ;;  %8518 = vlog2.f32 %v2185_v23  ;;  %v12675_v8 = vld [vmem:[#allocation92_spill] sm:$0xff] }
 0x1e5   :  { %v2375_v39 = vmul.f32 0.6931472, %v8503_v53  ;;  %12673 = vst [vmem:[#allocation89_spill] sm:$0xff] %v10417_v63  ;;  %v10423_v50 = vpop.f32.mrf.mxu1  ;;  %v8231_v10 = vld [vmem:[#allocation7 + $0x3ec] ss:$20 sps:$4 sm:$0xff]   ;;  %v2030_v16 = vadd.f32 %v1870_v21, %v12675_v8  ;;  %v1876_v6 = vmul.f32 %v10385_v43, %v10385_v43  ;;  %4350 = vmatpush2.bf16.msra.mxu0 %v8226_v15  ;;  %v10430_v45 = vpop.eup %8506  ;;  %v10432_v48 = vmul.f32 0.5, %v2355_v1 }
 0x1e6   :  { %12672 = vst [vmem:[#allocation88_spill] sm:$0xff] %v10411_v28  ;;  %4182 = vmatprep.mubr.bf16.mxu1 %v10411_v28  ;;  %v12674_v59 = vld [vmem:[#allocation94_spill] sm:$0xff]  ;;  %v8229_v2 = vld [vmem:[#allocation7 + $0x3e8] ss:$20 sps:$4 sm:$0xff]   ;;  %v1875_v23 = vmul.f32 %v1171_v13, %v1171_v13  ;;  %v1877_v63 = vmul.f32 %v1364_v12, %v1364_v12  ;;  %v1181_v28 = vpop.f32.mrf.mxu0  ;;  %4351 = vmatprep.subr.bf16.mxu0 %v8231_v10  ;;  %v2645_v21 = vmul.f32 0.5, %v2361_v26  ;;  %8520 = vlog2.f32 %v2187_v25  ;;  %v12682_v25 = vld [vmem:[#allocation20_spill] sm:$0xff] }
 0x1e7   :  { %v2031_v5 = vadd.f32 %v1871_v42, %v12674_v59  ;;  %12676 = vst [vmem:[#allocation90_spill] sm:$0xff] %v10432_v48  ;;  %4183 = vmatmul.mubr.bf16.gmra.mxu1 %v10405_v9  ;;  %v12677_v53 = vld [vmem:[#allocation93_spill] sm:$0xff]  ;;  %v10436_v51 = vpop.f32.mrf.mxu1  ;;  %v10440_v15 = vmul.f32 %v10344_v56, %v10344_v56  ;;  %v2186_v43 = vadd.f32 1e-30, %v2026_v24  ;;  %v8509_v59 = vpop.eup %8508  ;;  %8522 = vlog2.f32 %v2181_v57  ;;  %v8235_v57 = vld [vmem:[#allocation7 + $0x3c0] ss:$20 sps:$4 sm:$0xff]  }
 0x1e8   :  { %v2032_v47 = vadd.f32 %v1872_v29, %v12677_v53  ;;  %v8223_v42 = vld [vmem:[#allocation7 + $0x528] ss:$20 sps:$4 sm:$0xff]   ;;  %4527 = vmatpush1.bf16.msra.mxu1 %v8214_v18  ;;  %v8234_v1 = vld [vmem:[#allocation7 + $0x504] ss:$20 sps:$4 sm:$0xff]   ;;  %v2190_v8 = vadd.f32 1e-30, %v2030_v16  ;;  %v10444_v53 = vpop.f32.mrf.mxu0  ;;  %v2037_v18 = vadd.f32 %v1877_v63, %v12682_v25 }
 0x1e9   :  { %12678 = vst [vmem:[#allocation94_spill] sm:$0xff] %v10440_v15  ;;  %v12679_v29 = vld [vmem:[#allocation19_spill] sm:$0xff]  ;;  %v2353_v12 = vmul.f32 0.6931472, %v10375_v20  ;;  %v10446_v9 = vpop.f32.mrf.mxu1  ;;  %4528 = vmatprep.subr.bf16.mxu1 %v8225_v17  ;;  %v8237_v26 = vld [vmem:[#allocation7 + $0x3c4] ss:$20 sps:$4 sm:$0xff]   ;;  %4352 = vmatpush2.bf16.msra.mxu0 %v8229_v2  ;;  %8524 = vlog2.f32 %v2186_v43 }
 0x1ea   :  { %v2035_v13 = vadd.f32 %v1875_v23, %v12679_v29  ;;  %v10448_v10 = vmul.f32 0.5, %v2365_v44  ;;  %v10450_v56 = vmul.f32 0.5, %v2371_v32  ;;  %v10452_v24 = vmul.f32 0.5, %v2375_v39  ;;  %v12683_v29 = vld [vmem:[#allocation21_spill] sm:$0xff]  ;;  %v10456_v15 = vpop.f32.mrf.mxu0  ;;  %4353 = vmatprep.subr.bf16.mxu0 %v8237_v26  ;;  %v8232_v63 = vld [vmem:[#allocation7 + $0x500] ss:$20 sps:$4 sm:$0xff]  }
 0x1eb   :  { %v2191_v16 = vadd.f32 1e-30, %v2031_v5  ;;  %v2192_v23 = vadd.f32 1e-30, %v2032_v47  ;;  %v2036_v20 = vadd.f32 %v1876_v6, %v12683_v29  ;;  %v2363_v48 = vmul.f32 0.6931472, %v8505_v40  ;;  %v10458_v60 = vpop.f32.mrf.mxu1  ;;  %v8511_v44 = vpop.eup %8510 }
 0x1ec   :  { %12680 = vst [vmem:[#allocation92_spill] sm:$0xff] %v10448_v10  ;;  %12681 = vst [vmem:[#allocation93_spill] sm:$0xff] %v10452_v24  ;;  %v2381_v17 = vmul.f32 0.6931472, %v8509_v59  ;;  %v10462_v32 = vmul.f32 %v10361_v7, %v10361_v7  ;;  %v2195_v39 = vadd.f32 1e-30, %v2035_v13  ;;  %4529 = vmatpush1.bf16.msra.mxu1 %v8223_v42  ;;  %8526 = vlog2.f32 %v2190_v8  ;;  %v10467_v6 = vpop.f32.mrf.mxu0 }
 0x1ed   :  { %v2641_v5 = vmul.f32 0.5, %v2353_v12  ;;  %v2646_v2 = vmul.f32 0.5, %v2363_v48  ;;  %v10465_v40 = vpack.c.bf16 %v2645_v21, %v10395_v41  ;;  %v10469_v47 = vpop.f32.mrf.mxu1  ;;  %4530 = vmatprep.subr.bf16.mxu1 %v8234_v1  ;;  %v8513_v59 = vpop.eup %8512  ;;  %v2197_v43 = vadd.f32 1e-30, %v2037_v18  ;;  %4354 = vmatpush2.bf16.msra.mxu0 %v8235_v57  ;;  %v12687_v26 = vld [vmem:[#allocation23_spill] sm:$0xff]  ;;  %v12688_v25 = vld [vmem:[#allocation24_spill] sm:$0xff] }
 0x1ee   :  { %12684 = vst [vmem:[#allocation19_spill] sm:$0xff] %v10462_v32  ;;  %v1881_v7 = vmul.f32 %v10399_v61, %v10399_v61  ;;  %v1880_v42 = vmul.f32 %v10407_v4, %v10407_v4  ;;  %v1882_v8 = vmul.f32 %v10409_v3, %v10409_v3  ;;  %v2385_v48 = vmul.f32 0.6931472, %v8511_v44  ;;  %v10479_v13 = vpop.f32.mrf.mxu0  ;;  %v8515_v12 = vpop.eup %8514  ;;  %v12700_v24 = vld [vmem:[#allocation31_spill] sm:$0xff] }
 0x1ef   :  { %12685 = vst [vmem:[#allocation20_spill] sm:$0xff] %v10465_v40  ;;  %8528 = vlog2.f32 %v2192_v23  ;;  %v2196_v41 = vadd.f32 1e-30, %v2036_v20  ;;  %v10477_v21 = vpack.c.bf16 %v2646_v2, %v2641_v5  ;;  %v10481_v1 = vpop.f32.mrf.mxu1  ;;  %v1885_v4 = vmul.f32 %v1181_v28, %v1181_v28  ;;  %v12690_v28 = vld [vmem:[#allocation25_spill] sm:$0xff] }
 0x1f0   :  { %8530 = vlog2.f32 %v2195_v39  ;;  %v2040_v61 = vadd.f32 %v1880_v42, %v12687_v26  ;;  %v2042_v18 = vadd.f32 %v1882_v8, %v12688_v25  ;;  %4531 = vmatpush1.bf16.msra.mxu1 %v8232_v63  ;;  %v8517_v29 = vpop.eup %8516  ;;  %v10487_v3 = vmul.f32 %v10383_v31, %v10383_v31  ;;  %v10494_v20 = vpop.f32.mrf.mxu0  ;;  %v12691_v31 = vld [vmem:[#allocation27_spill] sm:$0xff] }
 0x1f1   :  { %12686 = vst [vmem:[#allocation21_spill] sm:$0xff] %v10477_v21  ;;  %8532 = vlog2.f32 %v2191_v16  ;;  %4192 = vmatprep.mubr.bf16.mxu1 %v10477_v21  ;;  %v1886_v57 = vmul.f32 %v10423_v50, %v10423_v50  ;;  %v1887_v23 = vmul.f32 %v10436_v51, %v10436_v51  ;;  %v10496_v44 = vpop.f32.mrf.mxu1  ;;  %v2041_v39 = vadd.f32 %v1881_v7, %v12690_v28  ;;  %v8519_v5 = vpop.eup %8518  ;;  %v12694_v7 = vld [vmem:[#allocation28_spill] sm:$0xff] }
 0x1f2   :  { %12689 = vst [vmem:[#allocation23_spill] sm:$0xff] %v10487_v3  ;;  %8534 = vlog2.f32 %v2197_v43  ;;  %4193 = vmatmul.mubr.bf16.gmra.mxu1 %v10465_v40  ;;  %v2200_v16 = vadd.f32 1e-30, %v2040_v61  ;;  %v2045_v63 = vadd.f32 %v1885_v4, %v12691_v31  ;;  %v2655_v2 = vmul.f32 0.5, %v2381_v17  ;;  %v10503_v8 = vpop.f32.mrf.mxu0  ;;  %v12695_v4 = vld [vmem:[#allocation29_spill] sm:$0xff] }
 0x1f3   :  { %v10501_v42 = vmul.f32 0.5, %v2385_v48  ;;  %8536 = vlog2.f32 %v2196_v41  ;;  %v2202_v50 = vadd.f32 1e-30, %v2042_v18  ;;  %v10505_v51 = vpop.f32.mrf.mxu1  ;;  %v2391_v26 = vmul.f32 0.6931472, %v8515_v12  ;;  %v8521_v28 = vpop.eup %8520 }
 0x1f4   :  { %v2395_v25 = vmul.f32 0.6931472, %v8517_v29  ;;  %v10509_v43 = vmul.f32 %v10397_v62, %v10397_v62  ;;  %v2047_v61 = vadd.f32 %v1887_v23, %v12694_v7  ;;  %v2046_v31 = vadd.f32 %v1886_v57, %v12695_v4  ;;  %v10514_v18 = vpop.f32.mrf.mxu0  ;;  %v8523_v21 = vpop.eup %8522  ;;  %v8240_v23 = vld [vmem:[#allocation7 + $0x124] ss:$20 sps:$4 sm:$0xff]  }
 0x1f5   :  { %12692 = vst [vmem:[#allocation24_spill] sm:$0xff] %v10501_v42  ;;  %v2205_v17 = vadd.f32 1e-30, %v2045_v63  ;;  %v2373_v48 = vmul.f32 0.6931472, %v10430_v45  ;;  %v10516_v40 = vpop.f32.mrf.mxu1  ;;  %8538 = vlog2.f32 %v2200_v16  ;;  %v10520_v62 = vmul.f32 %v10421_v34, %v10421_v34  ;;  %4709 = vmatprep.subr.bf16.mxu0 %v8240_v23  ;;  %v12701_v23 = vld [vmem:[#allocation32_spill] sm:$0xff] }
 0x1f6   :  { %12693 = vst [vmem:[#allocation25_spill] sm:$0xff] %v10509_v43  ;;  %v2383_v41 = vmul.f32 0.6931472, %v8513_v59  ;;  %v2401_v12 = vmul.f32 0.6931472, %v8519_v5  ;;  %8540 = vlog2.f32 %v2202_v50  ;;  %v10523_v63 = vpack.c.bf16 %v2655_v2, %v10450_v56  ;;  %v10525_v45 = vpop.f32.mrf.mxu0  ;;  %v8525_v16 = vpop.eup %8524 }
 0x1f7   :  { %v2201_v29 = vadd.f32 1e-30, %v2041_v39  ;;  %12696 = vst [vmem:[#allocation27_spill] sm:$0xff] %v10520_v62  ;;  %v2651_v7 = vmul.f32 0.5, %v2373_v48  ;;  %v10527_v59 = vpop.f32.mrf.mxu1  ;;  %v8243_v4 = vld [vmem:[#allocation7 + $0x3a4] ss:$20 sps:$4 sm:$0xff]   ;;  %v1891_v39 = vmul.f32 %v10446_v9, %v10446_v9  ;;  %v1890_v34 = vmul.f32 %v10456_v15, %v10456_v15 }
 0x1f8   :  { %v2656_v57 = vmul.f32 0.5, %v2383_v41  ;;  %12697 = vst [vmem:[#allocation28_spill] sm:$0xff] %v10523_v63  ;;  %v2405_v42 = vmul.f32 0.6931472, %v8521_v28  ;;  %v2207_v5 = vadd.f32 1e-30, %v2047_v61  ;;  %8542 = vlog2.f32 %v2205_v17  ;;  %v10537_v2 = vpop.f32.mrf.mxu0  ;;  %4902 = vmatprep.subr.bf16.mxu1 %v8243_v4 }
 0x1f9   :  { %v2206_v50 = vadd.f32 1e-30, %v2046_v31  ;;  %v1892_v56 = vmul.f32 %v10458_v60, %v10458_v60  ;;  %v10539_v41 = vpop.f32.mrf.mxu1  ;;  %v8527_v61 = vpop.eup %8526  ;;  %v2660_v28 = vmul.f32 0.5, %v2391_v26  ;;  %v10541_v9 = vmul.f32 0.5, %v2395_v25  ;;  %v12702_v25 = vld [vmem:[#allocation33_spill] sm:$0xff] }
 0x1fa   :  { %v10533_v48 = vpack.c.bf16 %v2656_v57, %v2651_v7  ;;  %v2050_v15 = vadd.f32 %v1890_v34, %v12700_v24  ;;  %v1896_v31 = vmul.f32 %v10469_v47, %v10469_v47  ;;  %v2665_v17 = vmul.f32 0.5, %v2401_v12  ;;  %v10550_v57 = vpop.f32.mrf.mxu0  ;;  %v12703_v12 = vld [vmem:[#allocation37_spill] sm:$0xff] }
 0x1fb   :  { %12699 = vst [vmem:[#allocation119_spill] sm:$0xff] %v10541_v9  ;;  %8544 = vlog2.f32 %v2201_v29  ;;  %v2052_v60 = vadd.f32 %v1892_v56, %v12701_v23  ;;  %v1895_v7 = vmul.f32 %v10479_v13, %v10479_v13  ;;  %v10552_v4 = vpop.f32.mrf.mxu1  ;;  %v2051_v24 = vadd.f32 %v1891_v39, %v12702_v25 }
 0x1fc   :  { %12698 = vst [vmem:[#allocation29_spill] sm:$0xff] %v10533_v48  ;;  %4202 = vmatprep.mubr.bf16.mxu1 %v10533_v48  ;;  %v8529_v26 = vpop.eup %8528  ;;  %8546 = vlog2.f32 %v2207_v5  ;;  %v2210_v47 = vadd.f32 1e-30, %v2050_v15  ;;  %v2056_v29 = vadd.f32 %v1896_v31, %v12703_v12  ;;  %v10557_v48 = vmul.f32 0.5, %v2405_v42  ;;  %v10561_v23 = vpop.f32.mrf.mxu0  ;;  %v12706_v15 = vld [vmem:[#allocation35_spill] sm:$0xff] }
 0x1fd   :  { %4203 = vmatmul.mubr.bf16.gmra.mxu1 %v10523_v63  ;;  %v8531_v34 = vpop.eup %8530  ;;  %8548 = vlog2.f32 %v2206_v50  ;;  %v2212_v56 = vadd.f32 1e-30, %v2052_v60  ;;  %v1897_v13 = vmul.f32 %v10481_v1, %v10481_v1  ;;  %v10563_v9 = vpop.f32.mrf.mxu1  ;;  %v2411_v62 = vmul.f32 0.6931472, %v8527_v61  ;;  %v12707_v50 = vld [vmem:[#allocation36_spill] sm:$0xff] }
 0x1fe   :  { %12704 = vst [vmem:[#allocation31_spill] sm:$0xff] %v10557_v48  ;;  %v8533_v5 = vpop.eup %8532  ;;  %v10567_v39 = vmul.f32 %v10444_v53, %v10444_v53  ;;  %v2055_v31 = vadd.f32 %v1895_v7, %v12706_v15  ;;  %v2393_v25 = vmul.f32 0.6931472, %v8523_v21  ;;  %v2415_v12 = vmul.f32 0.6931472, %v8529_v26  ;;  %v10571_v1 = vpop.f32.mrf.mxu0 }
 0x1ff   :  { %v8535_v42 = vpop.eup %8534  ;;  %8550 = vlog2.f32 %v2210_v47  ;;  %v2057_v60 = vadd.f32 %v1897_v13, %v12707_v50  ;;  %v2403_v63 = vmul.f32 0.6931472, %v8525_v16  ;;  %v10573_v48 = vpop.f32.mrf.mxu1  ;;  %v2421_v10 = vmul.f32 0.6931472, %v8531_v34 }
 0x200   :  { %12705 = vst [vmem:[#allocation32_spill] sm:$0xff] %v10567_v39  ;;  %v8537_v43 = vpop.eup %8536  ;;  %v2211_v61 = vadd.f32 1e-30, %v2051_v24  ;;  %8552 = vlog2.f32 %v2212_v56  ;;  %v2216_v3 = vadd.f32 1e-30, %v2056_v29  ;;  %v2661_v53 = vmul.f32 0.5, %v2393_v25  ;;  %v10579_v26 = vpop.f32.mrf.mxu0 }
 0x201   :  { %v2666_v39 = vmul.f32 0.5, %v2403_v63  ;;  %v1901_v21 = vmul.f32 %v10496_v44, %v10496_v44  ;;  %v10577_v7 = vpack.c.bf16 %v2665_v17, %v2660_v28  ;;  %v10581_v47 = vpop.f32.mrf.mxu1  ;;  %v2425_v16 = vmul.f32 0.6931472, %v8535_v42 }
 0x202   :  { %v2215_v13 = vadd.f32 1e-30, %v2055_v31  ;;  %v1900_v15 = vmul.f32 %v10503_v8, %v10503_v8  ;;  %v1902_v24 = vmul.f32 %v10505_v51, %v10505_v51  ;;  %v8539_v29 = vpop.eup %8538  ;;  %v2670_v34 = vmul.f32 0.5, %v2411_v62  ;;  %v10593_v17 = vpop.f32.mrf.mxu0  ;;  %v12712_v8 = vld [vmem:[#allocation39_spill] sm:$0xff]  ;;  %v12713_v51 = vld [vmem:[#allocation40_spill] sm:$0xff] }
 0x203   :  { %12708 = vst [vmem:[#allocation33_spill] sm:$0xff] %v10577_v7  ;;  %v10589_v63 = vmul.f32 %v10467_v6, %v10467_v6  ;;  %v2217_v44 = vadd.f32 1e-30, %v2057_v60  ;;  %v10591_v28 = vpack.c.bf16 %v2666_v39, %v2661_v53  ;;  %v10595_v56 = vpop.f32.mrf.mxu1  ;;  %v8541_v31 = vpop.eup %8540  ;;  %v10597_v25 = vmul.f32 0.5, %v2415_v12  ;;  %v12714_v6 = vld [vmem:[#allocation41_spill] sm:$0xff] }
 0x204   :  { %8554 = vlog2.f32 %v2211_v61  ;;  %v2060_v42 = vadd.f32 %v1900_v15, %v12712_v8  ;;  %v2062_v50 = vadd.f32 %v1902_v24, %v12713_v51  ;;  %v2675_v62 = vmul.f32 0.5, %v2421_v10  ;;  %v10605_v53 = vpop.f32.mrf.mxu0 }
 0x205   :  { %12709 = vst [vmem:[#allocation37_spill] sm:$0xff] %v10589_v63  ;;  %12710 = vst [vmem:[#allocation35_spill] sm:$0xff] %v10591_v28  ;;  %8556 = vlog2.f32 %v2216_v3  ;;  %4212 = vmatprep.mubr.bf16.mxu1 %v10591_v28  ;;  %v2061_v60 = vadd.f32 %v1901_v21, %v12714_v6  ;;  %v1905_v39 = vmul.f32 %v10525_v45, %v10525_v45  ;;  %v10607_v63 = vpop.f32.mrf.mxu1  ;;  %v8543_v12 = vpop.eup %8542  ;;  %v2431_v61 = vmul.f32 0.6931472, %v8539_v29  ;;  %v12716_v21 = vld [vmem:[#allocation43_spill] sm:$0xff] }
 0x206   :  { %12711 = vst [vmem:[#allocation36_spill] sm:$0xff] %v10597_v25  ;;  %v10609_v25 = vmul.f32 0.5, %v2425_v16  ;;  %8558 = vlog2.f32 %v2215_v13  ;;  %4213 = vmatmul.mubr.bf16.gmra.mxu1 %v10577_v7  ;;  %v1906_v10 = vmul.f32 %v10516_v40, %v10516_v40  ;;  %v2435_v3 = vmul.f32 0.6931472, %v8541_v31  ;;  %v10617_v24 = vpop.f32.mrf.mxu0 }
 0x207   :  { %8560 = vlog2.f32 %v2217_v44  ;;  %v2065_v15 = vadd.f32 %v1905_v39, %v12716_v21  ;;  %v1907_v45 = vmul.f32 %v10527_v59, %v10527_v59  ;;  %v10619_v8 = vpop.f32.mrf.mxu1  ;;  %v10623_v13 = vmul.f32 %v10494_v20, %v10494_v20  ;;  %v12719_v59 = vld [vmem:[#allocation44_spill] sm:$0xff]  ;;  %v12720_v20 = vld [vmem:[#allocation45_spill] sm:$0xff] }
 0x208   :  { %12715 = vst [vmem:[#allocation39_spill] sm:$0xff] %v10609_v25  ;;  %v8545_v16 = vpop.eup %8544  ;;  %v2220_v29 = vadd.f32 1e-30, %v2060_v42  ;;  %v2413_v51 = vmul.f32 0.6931472, %v8533_v5  ;;  %v10627_v39 = vmul.f32 %v10514_v18, %v10514_v18  ;;  %v10630_v7 = vpop.f32.mrf.mxu0  ;;  %v1910_v18 = vmul.f32 %v10550_v57, %v10550_v57 }
 0x209   :  { %12717 = vst [vmem:[#allocation40_spill] sm:$0xff] %v10623_v13  ;;  %v2423_v6 = vmul.f32 0.6931472, %v8537_v43  ;;  %v8547_v40 = vpop.eup %8546  ;;  %v2441_v31 = vmul.f32 0.6931472, %v8543_v12  ;;  %v2067_v21 = vadd.f32 %v1907_v45, %v12719_v59  ;;  %v10632_v28 = vpop.f32.mrf.mxu1  ;;  %v2066_v13 = vadd.f32 %v1906_v10, %v12720_v20 }
 0x20a   :  { %v2221_v44 = vadd.f32 1e-30, %v2061_v60  ;;  %12718 = vst [vmem:[#allocation41_spill] sm:$0xff] %v10627_v39  ;;  %v8549_v25 = vpop.eup %8548  ;;  %v2222_v32 = vadd.f32 1e-30, %v2062_v50  ;;  %v2671_v42 = vmul.f32 0.5, %v2413_v51  ;;  %v1911_v60 = vmul.f32 %v10539_v41, %v10539_v41  ;;  %v10641_v45 = vpop.f32.mrf.mxu0 }
 0x20b   :  { %v2676_v5 = vmul.f32 0.5, %v2423_v6  ;;  %v2225_v43 = vadd.f32 1e-30, %v2065_v15  ;;  %v10637_v12 = vpack.c.bf16 %v2675_v62, %v2670_v34  ;;  %v10643_v59 = vpop.f32.mrf.mxu1  ;;  %v2680_v55 = vmul.f32 0.5, %v2431_v61  ;;  %v12723_v6 = vld [vmem:[#allocation47_spill] sm:$0xff] }
 0x20c   :  { %v8551_v39 = vpop.eup %8550  ;;  %v2445_v50 = vmul.f32 0.6931472, %v8547_v40  ;;  %8562 = vlog2.f32 %v2220_v29  ;;  %v2227_v15 = vadd.f32 1e-30, %v2067_v21  ;;  %v2070_v41 = vadd.f32 %v1910_v18, %v12723_v6  ;;  %v10650_v62 = vpop.f32.mrf.mxu0  ;;  %v12725_v40 = vld [vmem:[#allocation49_spill] sm:$0xff]  ;;  %v12726_v21 = vld [vmem:[#allocation48_spill] sm:$0xff] }
 0x20d   :  { %12721 = vst [vmem:[#allocation43_spill] sm:$0xff] %v10637_v12  ;;  %v10645_v10 = vpack.c.bf16 %v2676_v5, %v2671_v42  ;;  %v8553_v51 = vpop.eup %8552  ;;  %8564 = vlog2.f32 %v2221_v44  ;;  %v1912_v34 = vmul.f32 %v10552_v4, %v10552_v4  ;;  %v10652_v57 = vpop.f32.mrf.mxu1  ;;  %v10654_v20 = vmul.f32 0.5, %v2435_v3 }
 0x20e   :  { %v2685_v27 = vmul.f32 0.5, %v2441_v31  ;;  %8566 = vlog2.f32 %v2222_v32  ;;  %v2226_v61 = vadd.f32 1e-30, %v2066_v13  ;;  %v2451_v29 = vmul.f32 0.6931472, %v8551_v39  ;;  %v10660_v4 = vpop.f32.mrf.mxu0 }
 0x20f   :  { %12722 = vst [vmem:[#allocation44_spill] sm:$0xff] %v10645_v10  ;;  %12724 = vst [vmem:[#allocation45_spill] sm:$0xff] %v10654_v20  ;;  %4222 = vmatprep.mubr.bf16.mxu1 %v10645_v10  ;;  %8568 = vlog2.f32 %v2225_v43  ;;  %v2071_v44 = vadd.f32 %v1911_v60, %v12725_v40  ;;  %v2072_v42 = vadd.f32 %v1912_v34, %v12726_v21  ;;  %v2230_v5 = vadd.f32 1e-30, %v2070_v41  ;;  %v10676_v18 = vpop.f32.mrf.mxu1  ;;  %v12729_v41 = vld [vmem:[#allocation51_spill] sm:$0xff] }
 0x210   :  { %4223 = vmatmul.mubr.bf16.gmra.mxu1 %v10637_v12  ;;  %v1916_v3 = vmul.f32 %v10563_v9, %v10563_v9  ;;  %v1915_v32 = vmul.f32 %v10571_v1, %v10571_v1  ;;  %v1917_v13 = vmul.f32 %v10573_v48, %v10573_v48  ;;  %v10670_v39 = vmul.f32 0.5, %v2445_v50  ;;  %v10678_v6 = vpop.f32.mrf.mxu0  ;;  %v12730_v48 = vld [vmem:[#allocation52_spill] sm:$0xff] }
 0x211   :  { %v10668_v31 = vpop.eup %8554  ;;  %v2455_v43 = vmul.f32 0.6931472, %v8553_v51  ;;  %8570 = vlog2.f32 %v2227_v15  ;;  %v10674_v60 = vmul.f32 %v10537_v2, %v10537_v2  ;;  %v2232_v1 = vadd.f32 1e-30, %v2072_v42 }
 0x212   :  { %12727 = vst [vmem:[#allocation47_spill] sm:$0xff] %v10670_v39  ;;  %v10680_v9 = vpop.eup %8556  ;;  %v2075_v34 = vadd.f32 %v1915_v32, %v12729_v41  ;;  %v2077_v40 = vadd.f32 %v1917_v13, %v12730_v48  ;;  %v2433_v21 = vmul.f32 0.6931472, %v8545_v16  ;;  %v10684_v12 = vmul.f32 0.5, %v2451_v29  ;;  %v10686_v2 = vpop.f32.mrf.mxu0  ;;  %v12731_v39 = vld [vmem:[#allocation53_spill] sm:$0xff]  ;;  %v12735_v41 = vld [vmem:[#allocation56_spill] sm:$0xff] }
 0x213   :  { %12728 = vst [vmem:[#allocation49_spill] sm:$0xff] %v10674_v60  ;;  %v8559_v50 = vpop.eup %8558  ;;  %8572 = vlog2.f32 %v2226_v61  ;;  %v2231_v51 = vadd.f32 1e-30, %v2071_v44  ;;  %v2443_v15 = vmul.f32 0.6931472, %v8549_v25  ;;  %v2076_v20 = vadd.f32 %v1916_v3, %v12731_v39  ;;  %v10693_v29 = vpop.f32.mrf.mxu1  ;;  %v12734_v39 = vld [vmem:[#allocation55_spill] sm:$0xff] }
 0x214   :  { %v8561_v10 = vpop.eup %8560  ;;  %8574 = vlog2.f32 %v2230_v5  ;;  %v2235_v60 = vadd.f32 1e-30, %v2075_v34  ;;  %v2237_v38 = vadd.f32 1e-30, %v2077_v40  ;;  %v2681_v42 = vmul.f32 0.5, %v2433_v21  ;;  %v10695_v61 = vpop.f32.mrf.mxu0 }
 0x215   :  { %v2686_v58 = vmul.f32 0.5, %v2443_v15  ;;  %v10689_v32 = vpack.c.bf16 %v2685_v27, %v2680_v55  ;;  %v1920_v16 = vmul.f32 %v10593_v17, %v10593_v17  ;;  %v2461_v25 = vmul.f32 0.6931472, %v8559_v50  ;;  %v12738_v15 = vld [vmem:[#allocation58_spill] sm:$0xff] }
 0x216   :  { %8576 = vlog2.f32 %v2232_v1  ;;  %v1921_v44 = vmul.f32 %v10581_v47, %v10581_v47  ;;  %v1922_v5 = vmul.f32 %v10595_v56, %v10595_v56  ;;  %v2465_v3 = vmul.f32 0.6931472, %v8561_v10  ;;  %v10707_v17 = vpop.f32.mrf.mxu0  ;;  %v10720_v10 = vpop.f32.mrf.mxu1 }
 0x217   :  { %12732 = vst [vmem:[#allocation48_spill] sm:$0xff] %v10689_v32  ;;  %v10703_v27 = vmul.f32 %v10561_v23, %v10561_v23  ;;  %8578 = vlog2.f32 %v2235_v60  ;;  %v10705_v55 = vpack.c.bf16 %v2686_v58, %v2681_v42  ;;  %v2236_v13 = vadd.f32 1e-30, %v2076_v20 }
 0x218   :  { %8580 = vlog2.f32 %v2237_v38  ;;  %v2080_v1 = vadd.f32 %v1920_v16, %v12734_v39  ;;  %v2082_v34 = vadd.f32 %v1922_v5, %v12735_v41  ;;  %v10711_v48 = vmul.f32 0.5, %v2455_v43  ;;  %v10722_v38 = vpop.f32.mrf.mxu0  ;;  %v12736_v43 = vld [vmem:[#allocation95_spill] sm:$0xff] }
 0x219   :  { %12733 = vst [vmem:[#allocation51_spill] sm:$0xff] %v10705_v55  ;;  %v8563_v47 = vpop.eup %8562  ;;  %4232 = vmatprep.mubr.bf16.mxu1 %v10705_v55  ;;  %v1926_v23 = vmul.f32 %v10607_v63, %v10607_v63  ;;  %v1925_v58 = vmul.f32 %v10617_v24, %v10617_v24  ;;  %v1927_v56 = vmul.f32 %v10619_v8, %v10619_v8  ;;  %v2695_v60 = vmul.f32 0.5, %v2461_v25  ;;  %v12739_v8 = vld [vmem:[#allocation59_spill] sm:$0xff] }
 0x21a   :  { %v10724_v20 = vpop.eup %8564  ;;  %8582 = vlog2.f32 %v2231_v51  ;;  %v2081_v40 = vadd.f32 %v1921_v44, %v12736_v43  ;;  %4233 = vmatmul.mubr.bf16.gmra.mxu1 %v10689_v32  ;;  %v2240_v21 = vadd.f32 1e-30, %v2080_v1  ;;  %v10728_v50 = vmul.f32 0.5, %v2465_v3  ;;  %v10732_v5 = vpop.f32.mrf.mxu0  ;;  %v12740_v3 = vld [vmem:[#allocation60_spill] sm:$0xff] }
 0x21b   :  { %v8567_v63 = vpop.eup %8566  ;;  %v2242_v24 = vadd.f32 1e-30, %v2082_v34  ;;  %v2085_v42 = vadd.f32 %v1925_v58, %v12738_v15  ;;  %v2087_v16 = vadd.f32 %v1927_v56, %v12739_v8  ;;  %v2471_v41 = vmul.f32 0.6931472, %v8563_v47  ;;  %v10744_v56 = vpop.f32.mrf.mxu1 }
 0x21c   :  { %12737 = vst [vmem:[#allocation52_spill] sm:$0xff] %v10728_v50  ;;  %v8569_v39 = vpop.eup %8568  ;;  %8584 = vlog2.f32 %v2236_v13  ;;  %v10736_v51 = vmul.f32 %v10579_v26, %v10579_v26  ;;  %v2453_v25 = vmul.f32 0.6931472, %v10668_v31  ;;  %v10741_v44 = vmul.f32 %v10605_v53, %v10605_v53  ;;  %v10746_v43 = vpop.f32.mrf.mxu0  ;;  %v12745_v50 = vld [vmem:[#allocation96_spill] sm:$0xff] }
 0x21d   :  { %v2086_v1 = vadd.f32 %v1926_v23, %v12740_v3  ;;  %v2245_v34 = vadd.f32 1e-30, %v2085_v42  ;;  %v2247_v58 = vadd.f32 1e-30, %v2087_v16  ;;  %v2475_v13 = vmul.f32 0.6931472, %v8567_v63 }
 0x21e   :  { %v8571_v47 = vpop.eup %8570  ;;  %v2241_v15 = vadd.f32 1e-30, %v2081_v40  ;;  %8586 = vlog2.f32 %v2240_v21  ;;  %v2463_v26 = vmul.f32 0.6931472, %v10680_v9  ;;  %v2691_v31 = vmul.f32 0.5, %v2453_v25  ;;  %v10754_v23 = vpop.f32.mrf.mxu0  ;;  %v12743_v3 = vld [vmem:[#allocation62_spill] sm:$0xff] }
 0x21f   :  { %8588 = vlog2.f32 %v2242_v24  ;;  %v1931_v53 = vmul.f32 %v10632_v28, %v10632_v28  ;;  %v10752_v8 = vpack.c.bf16 %v2695_v60, %v10684_v12  ;;  %v1930_v63 = vmul.f32 %v10641_v45, %v10641_v45  ;;  %v10760_v28 = vpop.f32.mrf.mxu1 }
 0x220   :  { %v8573_v42 = vpop.eup %8572  ;;  %8590 = vlog2.f32 %v2245_v34  ;;  %v2696_v16 = vmul.f32 0.5, %v2463_v26  ;;  %v1932_v40 = vmul.f32 %v10643_v59, %v10643_v59  ;;  %v2481_v21 = vmul.f32 0.6931472, %v8569_v39  ;;  %v10762_v12 = vpop.f32.mrf.mxu0  ;;  %v12744_v26 = vld [vmem:[#allocation63_spill] sm:$0xff] }
 0x221   :  { %12741 = vst [vmem:[#allocation53_spill] sm:$0xff] %v10752_v8  ;;  %v8575_v9 = vpop.eup %8574  ;;  %v2485_v24 = vmul.f32 0.6931472, %v8571_v47  ;;  %v2246_v25 = vadd.f32 1e-30, %v2086_v1  ;;  %8592 = vlog2.f32 %v2247_v58  ;;  %v2090_v34 = vadd.f32 %v1930_v63, %v12743_v3  ;;  %v10785_v3 = vpop.f32.mrf.mxu1 }
 0x222   :  { %v10764_v60 = vpack.c.bf16 %v2696_v16, %v2691_v31  ;;  %v2092_v32 = vadd.f32 %v1932_v40, %v12744_v26  ;;  %v1936_v45 = vmul.f32 %v10652_v57, %v10652_v57  ;;  %v2700_v59 = vmul.f32 0.5, %v2471_v41  ;;  %v10775_v47 = vpop.f32.mrf.mxu0 }
 0x223   :  { %v8577_v55 = vpop.eup %8576  ;;  %v2091_v39 = vadd.f32 %v1931_v53, %v12745_v50  ;;  %v1935_v1 = vmul.f32 %v10660_v4, %v10660_v4  ;;  %v1937_v58 = vmul.f32 %v10676_v18, %v10676_v18  ;;  %v10777_v16 = vmul.f32 0.5, %v2475_v13  ;;  %v12747_v53 = vld [vmem:[#allocation98_spill] sm:$0xff] }
 0x224   :  { %12742 = vst [vmem:[#allocation55_spill] sm:$0xff] %v10764_v60  ;;  %v8579_v31 = vpop.eup %8578  ;;  %8594 = vlog2.f32 %v2241_v15  ;;  %4242 = vmatprep.mubr.bf16.mxu1 %v10764_v60  ;;  %v2250_v63 = vadd.f32 1e-30, %v2090_v34  ;;  %v2096_v57 = vadd.f32 %v1936_v45, %v10136_v30  ;;  %v2705_v40 = vmul.f32 0.5, %v2481_v21  ;;  %v10787_v26 = vpop.f32.mrf.mxu0 }
 0x225   :  { %v8581_v41 = vpop.eup %8580  ;;  %v10781_v50 = vmul.f32 0.5, %v2485_v24  ;;  %4243 = vmatmul.mubr.bf16.gmra.mxu1 %v10752_v8  ;;  %v2252_v4 = vadd.f32 1e-30, %v2092_v32  ;;  %v2095_v18 = vadd.f32 %v1935_v1, %v12747_v53  ;;  %12748 = vst [vmem:[#allocation95_spill] sm:$0xff] %v10787_v26  ;;  %v2491_v13 = vmul.f32 0.6931472, %v8575_v9 }
 0x226   :  { %8596 = vlog2.f32 %v2246_v25  ;;  %v10791_v15 = vmul.f32 %v10630_v7, %v10630_v7  ;;  %v2473_v30 = vmul.f32 0.6931472, %v10724_v20  ;;  %v2495_v24 = vmul.f32 0.6931472, %v8577_v55  ;;  %v12749_v8 = vld [vmem:[#allocation99_spill] sm:$0xff]  ;;  %v10795_v60 = vpop.f32.mrf.mxu0  ;;  %v1440_v20 = vpop.f32.mrf.mxu1 }
 0x227   :  { %12746 = vst [vmem:[#allocation56_spill] sm:$0xff] %v10781_v50  ;;  %v8583_v21 = vpop.eup %8582  ;;  %v2501_v34 = vmul.f32 0.6931472, %v8579_v31  ;;  %v2251_v45 = vadd.f32 1e-30, %v2091_v39  ;;  %v2097_v32 = vadd.f32 %v1937_v58, %v12749_v8  ;;  %8598 = vlog2.f32 %v2250_v63 }
 0x228   :  { %v2505_v1 = vmul.f32 0.6931472, %v8581_v41  ;;  %v2256_v53 = vadd.f32 1e-30, %v2096_v57  ;;  %v2483_v26 = vmul.f32 0.6931472, %v8573_v42  ;;  %8600 = vlog2.f32 %v2252_v4  ;;  %v10801_v55 = vpop.f32.mrf.mxu0 }
 0x229   :  { %v8585_v9 = vpop.eup %8584  ;;  %v2255_v25 = vadd.f32 1e-30, %v2095_v18  ;;  %v10797_v50 = vpack.c.bf16 %v2705_v40, %v2700_v59  ;;  %v1940_v7 = vmul.f32 %v10686_v2, %v10686_v2  ;;  %v2701_v39 = vmul.f32 0.5, %v2473_v30  ;;  %v12751_v41 = vld [vmem:[#allocation65_spill] sm:$0xff] }
 0x22a   :  { %v2706_v31 = vmul.f32 0.5, %v2483_v26  ;;  %v1941_v8 = vmul.f32 %v10693_v29, %v10693_v29  ;;  %v1942_v58 = vmul.f32 %v10720_v10, %v10720_v10  ;;  %v2710_v63 = vmul.f32 0.5, %v2491_v13  ;;  %v10812_v40 = vpop.f32.mrf.mxu0 }
 0x22b   :  { %12750 = vst [vmem:[#allocation58_spill] sm:$0xff] %v10797_v50  ;;  %v8587_v42 = vpop.eup %8586  ;;  %v10809_v59 = vmul.f32 %v10650_v62, %v10650_v62  ;;  %v2257_v57 = vadd.f32 1e-30, %v2097_v32  ;;  %v2100_v2 = vadd.f32 %v1940_v7, %v12751_v41  ;;  %8602 = vlog2.f32 %v2251_v45  ;;  %v1442_v32 = vpop.f32.mrf.mxu1 }
 0x22c   :  { %v8589_v4 = vpop.eup %8588  ;;  %v10814_v18 = vpack.c.bf16 %v2706_v31, %v2701_v39  ;;  %v2102_v29 = vadd.f32 %v1942_v58, %v10150_v19  ;;  %v1946_v10 = vmul.f32 %v10744_v56, %v10744_v56  ;;  %v10819_v13 = vmul.f32 0.5, %v2495_v24  ;;  %v10823_v7 = vpop.f32.mrf.mxu0  ;;  %v12755_v19 = vld [vmem:[#allocation66_spill] sm:$0xff]  ;;  %v12756_v24 = vld [vmem:[#allocation68_spill] sm:$0xff] }
 0x22d   :  { %v8591_v26 = vpop.eup %8590  ;;  %v2715_v30 = vmul.f32 0.5, %v2501_v34  ;;  %8604 = vlog2.f32 %v2256_v53  ;;  %v1945_v62 = vmul.f32 %v10707_v17, %v10707_v17  ;;  %v10825_v45 = vmul.f32 0.5, %v2505_v1 }
 0x22e   :  { %12752 = vst [vmem:[#allocation59_spill] sm:$0xff] %v10814_v18  ;;  %12753 = vst [vmem:[#allocation60_spill] sm:$0xff] %v10819_v13  ;;  %v8593_v41 = vpop.eup %8592  ;;  %8606 = vlog2.f32 %v2255_v25  ;;  %4252 = vmatprep.mubr.bf16.mxu1 %v10814_v18  ;;  %v2101_v39 = vadd.f32 %v1941_v8, %v12755_v19  ;;  %v2260_v56 = vadd.f32 1e-30, %v2100_v2  ;;  %v2511_v31 = vmul.f32 0.6931472, %v8587_v42  ;;  %v10833_v53 = vpop.f32.mrf.mxu0 }
 0x22f   :  { %12754 = vst [vmem:[#allocation62_spill] sm:$0xff] %v10825_v45  ;;  %8608 = vlog2.f32 %v2257_v57  ;;  %4253 = vmatmul.mubr.bf16.gmra.mxu1 %v10797_v50  ;;  %v2105_v34 = vadd.f32 %v1945_v62, %v12756_v24  ;;  %v1947_v17 = vmul.f32 %v10760_v28, %v10760_v28  ;;  %v2515_v58 = vmul.f32 0.6931472, %v8589_v4  ;;  %v1444_v2 = vpop.f32.mrf.mxu1 }
 0x230   :  { %v2262_v1 = vadd.f32 1e-30, %v2102_v29  ;;  %v2106_v25 = vadd.f32 %v1946_v10, %v10172_v11  ;;  %v2493_v45 = vmul.f32 0.6931472, %v8583_v21  ;;  %v2521_v13 = vmul.f32 0.6931472, %v8591_v26  ;;  %v10840_v62 = vpop.f32.mrf.mxu0 }
 0x231   :  { %v8595_v18 = vpop.eup %8594  ;;  %v10838_v8 = vmul.f32 %v10678_v6, %v10678_v6  ;;  %v2265_v42 = vadd.f32 1e-30, %v2105_v34  ;;  %v2503_v57 = vmul.f32 0.6931472, %v8585_v9  ;;  %v2525_v19 = vmul.f32 0.6931472, %v8593_v41 }
 0x232   :  { %v2261_v28 = vadd.f32 1e-30, %v2101_v39  ;;  %8610 = vlog2.f32 %v2260_v56  ;;  %v2107_v4 = vadd.f32 %v1947_v17, %v10168_v14  ;;  %v2711_v24 = vmul.f32 0.5, %v2493_v45  ;;  %v10847_v6 = vpop.f32.mrf.mxu0 }
 0x233   :  { %v8597_v29 = vpop.eup %8596  ;;  %v2716_v11 = vmul.f32 0.5, %v2503_v57  ;;  %v1951_v21 = vmul.f32 %v10785_v3, %v10785_v3  ;;  %v10845_v10 = vpack.c.bf16 %v2715_v30, %v2710_v63  ;;  %8612 = vlog2.f32 %v2262_v1  ;;  %v1448_v3 = vpop.f32.mrf.mxu1 }
 0x234   :  { %v2266_v9 = vadd.f32 1e-30, %v2106_v25  ;;  %v1950_v26 = vmul.f32 %v10732_v5, %v10732_v5  ;;  %v1952_v41 = vmul.f32 %v1440_v20, %v1440_v20  ;;  %v8599_v39 = vpop.eup %8598  ;;  %v2720_v56 = vmul.f32 0.5, %v2511_v31  ;;  %v10857_v63 = vpop.f32.mrf.mxu0 }
 0x235   :  { %12757 = vst [vmem:[#allocation63_spill] sm:$0xff] %v10845_v10  ;;  %v10853_v14 = vmul.f32 %v10695_v61, %v10695_v61  ;;  %8614 = vlog2.f32 %v2265_v42  ;;  %v10855_v45 = vpack.c.bf16 %v2716_v11, %v2711_v24  ;;  %v8601_v30 = vpop.eup %8600  ;;  %v10859_v34 = vmul.f32 0.5, %v2515_v58 }
 0x236   :  { %8616 = vlog2.f32 %v2261_v28  ;;  %v2110_v17 = vadd.f32 %v1950_v26, %v10183_v36  ;;  %v2112_v5 = vadd.f32 %v1952_v41, %v10189_v0  ;;  %v2267_v20 = vadd.f32 1e-30, %v2107_v4  ;;  %v10867_v25 = vpop.f32.mrf.mxu0  ;;  %v1450_v4 = vpop.f32.mrf.mxu1 }
 0x237   :  { %12758 = vst [vmem:[#allocation96_spill] sm:$0xff] %v10855_v45  ;;  %4262 = vmatprep.mubr.bf16.mxu1 %v10855_v45  ;;  %v2111_v61 = vadd.f32 %v1951_v21, %v10195_v22  ;;  %v1956_v31 = vmul.f32 %v1442_v32, %v1442_v32  ;;  %v1955_v1 = vmul.f32 %v10754_v23, %v10754_v23  ;;  %v2725_v42 = vmul.f32 0.5, %v2521_v13 }
 0x238   :  { %v10869_v57 = vmul.f32 0.5, %v2525_v19  ;;  %v2531_v58 = vmul.f32 0.6931472, %v8599_v39  ;;  %8618 = vlog2.f32 %v2266_v9  ;;  %4263 = vmatmul.mubr.bf16.gmra.mxu1 %v10845_v10  ;;  %v10872_v36 = vpop.eup %8602  ;;  %v2270_v0 = vadd.f32 1e-30, %v2110_v17  ;;  %v10876_v24 = vpop.f32.mrf.mxu0 }
 0x239   :  { %v2116_v28 = vadd.f32 %v1956_v31, %v10216_v37  ;;  %v2115_v22 = vadd.f32 %v1955_v1, %v10206_v35  ;;  %v1957_v32 = vmul.f32 %v1444_v2, %v1444_v2  ;;  %v2535_v11 = vmul.f32 0.6931472, %v8601_v30 }
 0x23a   :  { %v8605_v23 = vpop.eup %8604  ;;  %v10880_v13 = vmul.f32 %v10722_v38, %v10722_v38  ;;  %v2513_v19 = vmul.f32 0.6931472, %v8595_v18  ;;  %v2523_v21 = vmul.f32 0.6931472, %v8597_v29  ;;  %8620 = vlog2.f32 %v2267_v20  ;;  %v10886_v2 = vpop.f32.mrf.mxu0 }
 0x23b   :  { %v8607_v9 = vpop.eup %8606  ;;  %v2271_v26 = vadd.f32 1e-30, %v2111_v61  ;;  %v10884_v37 = vmul.f32 %v10746_v43, %v10746_v43  ;;  %v2275_v35 = vadd.f32 1e-30, %v2115_v22  ;;  %v2117_v39 = vadd.f32 %v1957_v32, %v10212_v33  ;;  %v1452_v20 = vpop.f32.mrf.mxu1 }
 0x23c   :  { %v8609_v41 = vpop.eup %8608  ;;  %v2721_v30 = vmul.f32 0.5, %v2513_v19  ;;  %v2726_v17 = vmul.f32 0.5, %v2523_v21  ;;  %v1961_v31 = vmul.f32 %v1448_v3, %v1448_v3  ;;  %8622 = vlog2.f32 %v2270_v0  ;;  %v10893_v61 = vpop.f32.mrf.mxu0 }
 0x23d   :  { %v2276_v38 = vadd.f32 1e-30, %v2116_v28  ;;  %v10889_v18 = vpack.c.bf16 %v2725_v42, %v2720_v56  ;;  %v1960_v29 = vmul.f32 %v10775_v47, %v10775_v47  ;;  %v2272_v43 = vadd.f32 1e-30, %v2112_v5 }
 0x23e   :  { %8624 = vlog2.f32 %v2275_v35  ;;  %v10895_v1 = vpack.c.bf16 %v2726_v17, %v2721_v30  ;;  %v2121_v22 = vadd.f32 %v1961_v31, %v10238_v52  ;;  %v2541_v32 = vmul.f32 0.6931472, %v8607_v9  ;;  %v10899_v56 = vpop.f32.mrf.mxu0 }
 0x23f   :  { %12759 = vst [vmem:[#allocation98_spill] sm:$0xff] %v10889_v18  ;;  %v8611_v33 = vpop.eup %8610  ;;  %v2545_v19 = vmul.f32 0.6931472, %v8609_v41  ;;  %v2120_v3 = vadd.f32 %v1960_v29, %v10227_v49  ;;  %v1962_v0 = vmul.f32 %v1450_v4, %v1450_v4  ;;  %v2730_v42 = vmul.f32 0.5, %v2531_v58 }
 0x240   :  { %12760 = vst [vmem:[#allocation99_spill] sm:$0xff] %v10895_v1  ;;  %8626 = vlog2.f32 %v2271_v26  ;;  %v2277_v47 = vadd.f32 1e-30, %v2117_v39  ;;  %4272 = vmatprep.mubr.bf16.mxu1 %v10895_v1  ;;  %v1966_v28 = vmul.f32 %v1452_v20, %v1452_v20  ;;  %v8613_v5 = vpop.eup %8612  ;;  %v10902_v21 = vmul.f32 0.5, %v2535_v11  ;;  %v10906_v35 = vpop.f32.mrf.mxu0 }
 0x241   :  { %8628 = vlog2.f32 %v2276_v38  ;;  %4273 = vmatmul.mubr.bf16.gmra.mxu1 %v10889_v18  ;;  %v2280_v52 = vadd.f32 1e-30, %v2120_v3  ;;  %v2122_v9 = vadd.f32 %v1962_v0, %v10231_v54  ;;  %v2281_v4 = vadd.f32 1e-30, %v2121_v22  ;;  %v12761_v54 = vld [vmem:[#allocation104_spill] sm:$0xff] }
 0x242   :  { %v8615_v49 = vpop.eup %8614  ;;  %8630 = vlog2.f32 %v2272_v43  ;;  %v2126_v58 = vadd.f32 %v1966_v28, %v10258_v46  ;;  %v1965_v26 = vmul.f32 %v10795_v60, %v10795_v60  ;;  %v2735_v39 = vmul.f32 0.5, %v2541_v32  ;;  %v10913_v17 = vpop.f32.mrf.mxu0  ;;  %v12762_v28 = vld [vmem:[#allocation69_spill] sm:$0xff] }
 0x243   :  { %v8617_v41 = vpop.eup %8616  ;;  %v10911_v11 = vmul.f32 0.5, %v2545_v19  ;;  %v2551_v30 = vmul.f32 0.6931472, %v8611_v33  ;;  %8632 = vlog2.f32 %v2280_v52  ;;  %v2555_v31 = vmul.f32 0.6931472, %v8613_v5 }
 0x244   :  { %8634 = vlog2.f32 %v2277_v47  ;;  %v2125_v38 = vadd.f32 %v1965_v26, %v12761_v54  ;;  %v2533_v29 = vmul.f32 0.6931472, %v10872_v36  ;;  %v2561_v43 = vmul.f32 0.6931472, %v8615_v49  ;;  %v10919_v32 = vpop.f32.mrf.mxu0  ;;  %v12765_v54 = vld [vmem:[#allocation107_spill] sm:$0xff] }
 0x245   :  { %v8619_v20 = vpop.eup %8618  ;;  %v2286_v46 = vadd.f32 1e-30, %v2126_v58  ;;  %v2543_v22 = vmul.f32 0.6931472, %v8605_v23  ;;  %v1813_v60 = vmul.f32 %v10801_v55, %v10801_v55  ;;  %8636 = vlog2.f32 %v2281_v4 }
 0x246   :  { %v2282_v33 = vadd.f32 1e-30, %v2122_v9  ;;  %v2285_v19 = vadd.f32 1e-30, %v2125_v38  ;;  %v2731_v3 = vmul.f32 0.5, %v2533_v29  ;;  %v10922_v5 = vpack.c.bf16 %v2735_v39, %v2730_v42  ;;  %v10926_v52 = vpop.f32.mrf.mxu0 }
 0x247   :  { %v2736_v0 = vmul.f32 0.5, %v2543_v22  ;;  %v1973_v47 = vadd.f32 %v1813_v60, %v12762_v28  ;;  %v1814_v36 = vmul.f32 %v10812_v40, %v10812_v40  ;;  %v10928_v23 = vpop.eup %8620  ;;  %v10932_v55 = vmul.f32 %v10762_v12, %v10762_v12  ;;  %v12766_v12 = vld [vmem:[#allocation70_spill] sm:$0xff]  ;;  %v12767_v22 = vld [vmem:[#allocation108_spill] sm:$0xff] }
 0x248   :  { %12763 = vst [vmem:[#allocation65_spill] sm:$0xff] %v10922_v5  ;;  %8638 = vlog2.f32 %v2285_v19  ;;  %v1818_v9 = vmul.f32 %v10823_v7, %v10823_v7  ;;  %v1819_v49 = vmul.f32 %v10833_v53, %v10833_v53  ;;  %v2740_v42 = vmul.f32 0.5, %v2551_v30  ;;  %v10940_v58 = vpop.f32.mrf.mxu0 }
 0x249   :  { %8640 = vlog2.f32 %v2286_v46  ;;  %v10938_v4 = vpack.c.bf16 %v2736_v0, %v2731_v3  ;;  %v2133_v40 = vadd.f32 1e-30, %v1973_v47  ;;  %v8623_v26 = vpop.eup %8622  ;;  %v2745_v39 = vmul.f32 0.5, %v2561_v43  ;;  %v1454_v3 = vpop.f32.mrf.mxu1 }
 0x24a   :  { %v1974_v38 = vadd.f32 %v1814_v36, %v12765_v54  ;;  %v1978_v29 = vadd.f32 %v1818_v9, %v12766_v12  ;;  %v1979_v60 = vadd.f32 %v1819_v49, %v12767_v22  ;;  %v10945_v7 = vmul.f32 0.5, %v2555_v31  ;;  %v10948_v46 = vpop.f32.mrf.mxu0  ;;  %v12768_v54 = vld [vmem:[#allocation71_spill] sm:$0xff] }
 0x24b   :  { %12764 = vst [vmem:[#allocation66_spill] sm:$0xff] %v10938_v4  ;;  %v8625_v19 = vpop.eup %8624  ;;  %8642 = vlog2.f32 %v2282_v33  ;;  %4282 = vmatprep.mubr.bf16.mxu1 %v10938_v4  ;;  %v2553_v53 = vmul.f32 0.6931472, %v8617_v41  ;;  %v2563_v30 = vmul.f32 0.6931472, %v8619_v20  ;;  %v1823_v28 = vmul.f32 %v10840_v62, %v10840_v62 }
 0x24c   :  { %8644 = vlog2.f32 %v2133_v40  ;;  %4283 = vmatmul.mubr.bf16.gmra.mxu1 %v10922_v5  ;;  %v2134_v43 = vadd.f32 1e-30, %v1974_v38  ;;  %v2138_v0 = vadd.f32 1e-30, %v1978_v29  ;;  %v2581_v36 = vmul.f32 0.6931472, %v8625_v19  ;;  %v10953_v49 = vpop.f32.mrf.mxu0 }
 0x24d   :  { %v8627_v47 = vpop.eup %8626  ;;  %v2139_v31 = vadd.f32 1e-30, %v1979_v60  ;;  %v2741_v9 = vmul.f32 0.5, %v2553_v53  ;;  %v2746_v33 = vmul.f32 0.5, %v2563_v30  ;;  %v2571_v20 = vmul.f32 0.6931472, %v8623_v26 }
 0x24e   :  { %v8629_v41 = vpop.eup %8628  ;;  %8646 = vlog2.f32 %v2134_v43  ;;  %v1983_v12 = vadd.f32 %v1823_v28, %v12768_v54  ;;  %v10956_v40 = vpack.c.bf16 %v2745_v39, %v2740_v42  ;;  %v1967_v38 = vmul.f32 %v1454_v3, %v1454_v3  ;;  %v10964_v60 = vpop.f32.mrf.mxu0  ;;  %v12771_v3 = vld [vmem:[#allocation109_spill] sm:$0xff]  ;;  %v12773_v54 = vld [vmem:[#allocation111_spill] sm:$0xff] }
 0x24f   :  { %v10958_v22 = vpop.eup %8630  ;;  %8648 = vlog2.f32 %v2138_v0  ;;  %v10960_v29 = vpack.c.bf16 %v2746_v33, %v2741_v9  ;;  %v1824_v62 = vmul.f32 %v10847_v6, %v10847_v6  ;;  %v1828_v26 = vmul.f32 %v10857_v63, %v10857_v63 }
 0x250   :  { %12769 = vst [vmem:[#allocation68_spill] sm:$0xff] %v10956_v40  ;;  %v8633_v19 = vpop.eup %8632  ;;  %8650 = vlog2.f32 %v2139_v31  ;;  %v2143_v53 = vadd.f32 1e-30, %v1983_v12  ;;  %v1829_v42 = vmul.f32 %v10867_v25, %v10867_v25  ;;  %v2755_v30 = vmul.f32 0.5, %v2581_v36  ;;  %v10974_v28 = vpop.f32.mrf.mxu0  ;;  %v12772_v31 = vld [vmem:[#allocation72_spill] sm:$0xff] }
 0x251   :  { %12770 = vst [vmem:[#allocation104_spill] sm:$0xff] %v10960_v29  ;;  %v10970_v39 = vpop.eup %8634  ;;  %4292 = vmatprep.mubr.bf16.mxu1 %v10960_v29  ;;  %v1984_v43 = vadd.f32 %v1824_v62, %v12771_v3  ;;  %v2573_v0 = vmul.f32 0.6931472, %v8627_v47  ;;  %v2583_v6 = vmul.f32 0.6931472, %v8629_v41  ;;  %v2750_v9 = vmul.f32 0.5, %v2571_v20 }
 0x252   :  { %v1988_v33 = vadd.f32 %v1828_v26, %v12772_v31  ;;  %v1989_v12 = vadd.f32 %v1829_v42, %v12773_v54  ;;  %v1833_v63 = vmul.f32 %v10876_v24, %v10876_v24  ;;  %v8637_v25 = vpop.eup %8636  ;;  %v2591_v5 = vmul.f32 0.6931472, %v8633_v19  ;;  %v10980_v29 = vpop.f32.mrf.mxu0  ;;  %v12774_v20 = vld [vmem:[#allocation73_spill] sm:$0xff] }
 0x253   :  { %8652 = vlog2.f32 %v2143_v53  ;;  %v2144_v36 = vadd.f32 1e-30, %v1984_v43  ;;  %v2751_v4 = vmul.f32 0.5, %v2573_v0  ;;  %v2756_v62 = vmul.f32 0.5, %v2583_v6 }
 0x254   :  { %4293 = vmatmul.mubr.bf16.gmra.mxu1 %v10956_v40  ;;  %v2148_v47 = vadd.f32 1e-30, %v1988_v33  ;;  %v2149_v41 = vadd.f32 1e-30, %v1989_v12  ;;  %v1993_v3 = vadd.f32 %v1833_v63, %v12774_v20  ;;  %v10985_v42 = vmul.f32 0.6931472, %v10928_v23  ;;  %v10991_v53 = vpop.f32.mrf.mxu0 }
 0x255   :  { %v8639_v26 = vpop.eup %8638  ;;  %8654 = vlog2.f32 %v2144_v36  ;;  %v10987_v24 = vpack.c.bf16 %v2755_v30, %v2750_v9  ;;  %v1834_v19 = vmul.f32 %v10886_v2, %v10886_v2  ;;  %v10993_v31 = vpack.c.bf16 %v2756_v62, %v2751_v4  ;;  %v12777_v33 = vld [vmem:[#allocation105_spill] sm:$0xff]  ;;  %v12778_v23 = vld [vmem:[#allocation112_spill] sm:$0xff]  ;;  %v12779_v62 = vld [vmem:[#allocation74_spill] sm:$0xff] }
 0x256   :  { %v8641_v43 = vpop.eup %8640  ;;  %v2601_v0 = vmul.f32 0.6931472, %v8639_v26  ;;  %8656 = vlog2.f32 %v2148_v47  ;;  %v2153_v6 = vadd.f32 1e-30, %v1993_v3  ;;  %v10996_v54 = vadd.f32 %v1967_v38, %v12777_v33  ;;  %v11001_v9 = vpop.f32.mrf.mxu0 }
 0x257   :  { %12775 = vst [vmem:[#allocation69_spill] sm:$0xff] %v10987_v24  ;;  %12776 = vst [vmem:[#allocation107_spill] sm:$0xff] %v10993_v31  ;;  %8658 = vlog2.f32 %v2149_v41  ;;  %v1994_v12 = vadd.f32 %v1834_v19, %v12778_v23  ;;  %v1838_v30 = vmul.f32 %v10893_v61, %v10893_v61  ;;  %v2760_v63 = vmul.f32 0.5, %v2591_v5  ;;  %4302 = vmatprep.mubr.bf16.mxu1 %v10993_v31  ;;  %v12780_v61 = vld [vmem:[#allocation114_spill] sm:$0xff]  ;;  %v8246_v31 = vld [vmem:[#allocation7 + $0xfc] ss:$20 sps:$4 sm:$0xff]  }
 0x258   :  { %v11003_v2 = vpop.eup %8642  ;;  %v2765_v36 = vmul.f32 0.5, %v2601_v0  ;;  %v1839_v4 = vmul.f32 %v10899_v56, %v10899_v56  ;;  %v2593_v47 = vmul.f32 0.6931472, %v8637_v25  ;;  %8660 = vlog2.f32 %v2153_v6  ;;  %v11009_v26 = vpop.f32.mrf.mxu0 }
 0x259   :  { %v8645_v38 = vpop.eup %8644  ;;  %v2154_v41 = vadd.f32 1e-30, %v1994_v12  ;;  %v1998_v20 = vadd.f32 %v1838_v30, %v12779_v62  ;;  %v2603_v3 = vmul.f32 0.6931472, %v8641_v43  ;;  %v1843_v5 = vmul.f32 %v10906_v35, %v10906_v35 }
 0x25a   :  { %v1999_v19 = vadd.f32 %v1839_v4, %v12780_v61  ;;  %v2761_v33 = vmul.f32 0.5, %v2593_v47  ;;  %v11014_v0 = vpack.c.bf16 %v2765_v36, %v2760_v63  ;;  %v1844_v6 = vmul.f32 %v10913_v17, %v10913_v17  ;;  %v11018_v12 = vpop.f32.mrf.mxu0  ;;  %v12782_v47 = vld [vmem:[#allocation75_spill] sm:$0xff] }
 0x25b   :  { %v8647_v23 = vpop.eup %8646  ;;  %8662 = vlog2.f32 %v2154_v41  ;;  %v2158_v56 = vadd.f32 1e-30, %v1998_v20  ;;  %v2766_v25 = vmul.f32 0.5, %v2603_v3  ;;  %v2003_v62 = vadd.f32 %v1843_v5, %v12782_v47  ;;  %v12784_v41 = vld [vmem:[#allocation115_spill] sm:$0xff]  ;;  %v12785_v47 = vld [vmem:[#allocation76_spill] sm:$0xff] }
 0x25c   :  { %12781 = vst [vmem:[#allocation70_spill] sm:$0xff] %v11014_v0  ;;  %v8649_v43 = vpop.eup %8648  ;;  %v2299_v30 = vmul.f32 0.6931472, %v8647_v23  ;;  %4303 = vmatmul.mubr.bf16.gmra.mxu1 %v10987_v24  ;;  %v2159_v4 = vadd.f32 1e-30, %v1999_v19  ;;  %v1848_v35 = vmul.f32 %v10919_v32, %v10919_v32  ;;  %v2004_v20 = vadd.f32 %v1844_v6, %v12784_v41  ;;  %v11029_v3 = vpop.f32.mrf.mxu0  ;;  %v12786_v24 = vld [vmem:[#allocation117_spill] sm:$0xff] }
 0x25d   :  { %v8651_v63 = vpop.eup %8650  ;;  %8664 = vlog2.f32 %v2158_v56  ;;  %v11024_v36 = vpack.c.bf16 %v2766_v25, %v2761_v33  ;;  %v1849_v17 = vmul.f32 %v10926_v52, %v10926_v52  ;;  %v2163_v19 = vadd.f32 1e-30, %v2003_v62 }
 0x25e   :  { %v2614_v61 = vmul.f32 0.5, %v2299_v30  ;;  %v2309_v23 = vmul.f32 0.6931472, %v8651_v63  ;;  %8666 = vlog2.f32 %v2159_v4  ;;  %v2164_v5 = vadd.f32 1e-30, %v2004_v20  ;;  %v11034_v25 = vpop.f32.mrf.mxu0 }
 0x25f   :  { %12783 = vst [vmem:[#allocation108_spill] sm:$0xff] %v11024_v36  ;;  %4312 = vmatprep.mubr.bf16.mxu1 %v11024_v36  ;;  %v2008_v32 = vadd.f32 %v1848_v35, %v12785_v47  ;;  %v2009_v56 = vadd.f32 %v1849_v17, %v12786_v24  ;;  %v2297_v33 = vmul.f32 0.6931472, %v8645_v38  ;;  %8668 = vlog2.f32 %v2163_v19  ;;  %v12788_v38 = vld [vmem:[#allocation79_spill] sm:$0xff] }
 0x260   :  { %v8653_v6 = vpop.eup %8652  ;;  %v2619_v41 = vmul.f32 0.5, %v2309_v23  ;;  %v2307_v52 = vmul.f32 0.6931472, %v8649_v43  ;;  %v1853_v30 = vmul.f32 %v10940_v58, %v10940_v58  ;;  %8670 = vlog2.f32 %v2164_v5  ;;  %v11038_v36 = vpop.f32.mrf.mxu0 }
 0x261   :  { %v2168_v4 = vadd.f32 1e-30, %v2008_v32  ;;  %v2169_v62 = vadd.f32 1e-30, %v2009_v56  ;;  %v2613_v63 = vmul.f32 0.5, %v2297_v33  ;;  %v1854_v23 = vmul.f32 %v10948_v46, %v10948_v46  ;;  %v12790_v46 = vld [vmem:[#allocation80_spill] sm:$0xff] }
 0x262   :  { %v8655_v20 = vpop.eup %8654  ;;  %v11040_v35 = vpack.c.bf16 %v2619_v41, %v2614_v61  ;;  %v2618_v24 = vmul.f32 0.5, %v2307_v52  ;;  %v2013_v17 = vadd.f32 %v1853_v30, %v12788_v38  ;;  %v1858_v58 = vmul.f32 %v10953_v49, %v10953_v49  ;;  %v11049_v47 = vpop.f32.mrf.mxu0  ;;  %v8238_v33 = vld [vmem:[#allocation7 + $0x120] ss:$20 sps:$4 sm:$0xff]   ;;  %v12792_v49 = vld [vmem:[#allocation83_spill] sm:$0xff] }
 0x263   :  { %v8657_v19 = vpop.eup %8656  ;;  %v2319_v43 = vmul.f32 0.6931472, %v8655_v20  ;;  %8672 = vlog2.f32 %v2168_v4  ;;  %v1859_v5 = vmul.f32 %v10964_v60, %v10964_v60  ;;  %v2014_v41 = vadd.f32 %v1854_v23, %v12790_v46  ;;  %v12793_v38 = vld [vmem:[#allocation82_spill] sm:$0xff]  ;;  %v12794_v23 = vld [vmem:[#allocation113_spill] sm:$0xff] }
 0x264   :  { %12787 = vst [vmem:[#allocation71_spill] sm:$0xff] %v11040_v35  ;;  %v8659_v32 = vpop.eup %8658  ;;  %4313 = vmatmul.mubr.bf16.gmra.mxu1 %v11014_v0  ;;  %8674 = vlog2.f32 %v2169_v62  ;;  %v11052_v61 = vpack.c.bf16 %v2618_v24, %v2613_v63  ;;  %v2173_v56 = vadd.f32 1e-30, %v2013_v17  ;;  %v12791_v4 = vmov 0   ;;  %v11058_v40 = vpop.f32.mrf.mxu0  ;;  %v12795_v0 = vld [vmem:[#allocation78_spill] sm:$0xff] }
 0x265   :  { %v2624_v52 = vmul.f32 0.5, %v2319_v43  ;;  %v2329_v30 = vmul.f32 0.6931472, %v8659_v32  ;;  %4548 = vmatprep.mubr.bf16.mxu1 %v12791_v4  ;;  %v2018_v20 = vadd.f32 %v1858_v58, %v12792_v49  ;;  %v2019_v60 = vadd.f32 %v1859_v5, %v12793_v38  ;;  %v8661_v18 = vpop.eup %8660 }
 0x266   :  { %12789 = vst [vmem:[#allocation109_spill] sm:$0xff] %v11052_v61  ;;  %4355 = vmatprep.mubr.bf16.mxu0 %v11052_v61  ;;  %8676 = vlog2.f32 %v2173_v56  ;;  %v2174_v62 = vadd.f32 1e-30, %v2014_v41  ;;  %v2317_v63 = vmul.f32 0.6931472, %v8653_v6  ;;  %v1863_v58 = vmul.f32 %v10974_v28, %v10974_v28  ;;  %v11064_v46 = vpop.f32.mrf.mxu0  ;;  %v12796_v56 = vld [vmem:[#allocation77_spill] sm:$0xff] }
 0x267   :  { %v2327_v24 = vmul.f32 0.6931472, %v8657_v19  ;;  %v2629_v17 = vmul.f32 0.5, %v2329_v30  ;;  %4356 = vmatmul.mubr.bf16.vlgmr.msra.gmra.mxu0 %v12794_v23  ;;  %v2178_v43 = vadd.f32 1e-30, %v2018_v20  ;;  %v11068_v41 = vpack.c.bf16 %v12796_v56, %v12795_v0  ;;  %v12798_v30 = vld [vmem:[#allocation87_spill] sm:$0xff] }
 0x268   :  { %v2179_v32 = vadd.f32 1e-30, %v2019_v60  ;;  %v8663_v5 = vpop.eup %8662  ;;  %8678 = vlog2.f32 %v2174_v62  ;;  %4710 = vmatpush1.bf16.msra.mxu0 %v8238_v33  ;;  %v2623_v49 = vmul.f32 0.5, %v2317_v63  ;;  %v8241_v19 = vld [vmem:[#allocation7 + $0x3a0] ss:$20 sps:$4 sm:$0xff]   ;;  %v2023_v20 = vadd.f32 %v1863_v58, %v12798_v30  ;;  %v11073_v28 = vpop.f32.mrf.mxu0 }
 0x269   :  { %v2628_v38 = vmul.f32 0.5, %v2327_v24  ;;  %12797 = vst [vmem:[#allocation72_spill] sm:$0xff] %v11068_v41  ;;  %v2339_v6 = vmul.f32 0.6931472, %v8663_v5  ;;  %8680 = vlog2.f32 %v2178_v43  ;;  %v11071_v60 = vpack.c.bf16 %v2629_v17, %v2624_v52  ;;  %4711 = vmatprep.subr.bf16.mxu0 %v8246_v31  ;;  %v8244_v33 = vld [vmem:[#allocation7 + $0xf8] ss:$20 sps:$4 sm:$0xff]  }
 0x26a   :  { %v8665_v1 = vpop.eup %8664  ;;  %8682 = vlog2.f32 %v2179_v32  ;;  %v8249_v63 = vld [vmem:[#allocation7 + $0x37c] ss:$20 sps:$4 sm:$0xff]   ;;  %v1864_v0 = vmul.f32 %v10980_v29, %v10980_v29  ;;  %v1868_v24 = vmul.f32 %v10991_v53, %v10991_v53  ;;  %v8252_v43 = vld [vmem:[#allocation7 + $0xd4] ss:$20 sps:$4 sm:$0xff]   ;;  %v2183_v52 = vadd.f32 1e-30, %v2023_v20  ;;  %v11083_v56 = vpop.f32.mrf.mxu0 }
 0x26b   :  { %12799 = vst [vmem:[#allocation111_spill] sm:$0xff] %v11071_v60  ;;  %v11075_v62 = vpack.c.bf16 %v2628_v38, %v2623_v49  ;;  %v8667_v5 = vpop.eup %8666  ;;  %v2634_v58 = vmul.f32 0.5, %v2339_v6  ;;  %v1869_v31 = vmul.f32 %v11001_v9, %v11001_v9  ;;  %v2337_v17 = vmul.f32 0.6931472, %v8661_v18  ;;  %v12801_v49 = vld [vmem:[#allocation89_spill] sm:$0xff]  ;;  %v12802_v38 = vld [vmem:[#allocation91_spill] sm:$0xff] }
 0x26c   :  { %v2349_v32 = vmul.f32 0.6931472, %v8667_v5  ;;  %4549 = vmatmul.mubr.bf16.vlgmr.msra.gmra.mxu1 %v11040_v35  ;;  %v2024_v29 = vadd.f32 %v1864_v0, %v12801_v49  ;;  %v2028_v30 = vadd.f32 %v1868_v24, %v12802_v38  ;;  %v2347_v53 = vmul.f32 0.6931472, %v8665_v1  ;;  %v8669_v10 = vpop.eup %8668  ;;  %v8247_v6 = vld [vmem:[#allocation7 + $0x378] ss:$20 sps:$4 sm:$0xff]   ;;  %v11093_v45 = vpop.f32.mrf.mxu0  ;;  %4712 = vmatpush1.bf16.msra.mxu0 %v8244_v33 }
 0x26d   :  { %12800 = vst [vmem:[#allocation73_spill] sm:$0xff] %v11075_v62  ;;  %4365 = vmatprep.mubr.bf16.mxu0 %v11075_v62  ;;  %4903 = vmatpush1.bf16.msra.mxu1 %v8241_v19  ;;  %8684 = vlog2.f32 %v2183_v52  ;;  %v12803_v9 = vld [vmem:[#allocation94_spill] sm:$0xff]  ;;  %v2633_v20 = vmul.f32 0.5, %v2337_v17  ;;  %v1873_v5 = vmul.f32 %v11009_v26, %v11009_v26  ;;  %v8255_v35 = vld [vmem:[#allocation7 + $0x354] ss:$20 sps:$4 sm:$0xff]   ;;  %v8671_v50 = vpop.eup %8670 }
 0x26e   :  { %4558 = vmatprep.mubr.bf16.mxu1 %v12791_v4  ;;  %v2029_v18 = vadd.f32 %v1869_v31, %v12803_v9  ;;  %v2639_v0 = vmul.f32 0.5, %v2349_v32  ;;  %4904 = vmatprep.subr.bf16.mxu1 %v8249_v63  ;;  %v2184_v24 = vadd.f32 1e-30, %v2024_v29  ;;  %v2188_v1 = vadd.f32 1e-30, %v2028_v30  ;;  %v12804_v38 = vld [vmem:[#allocation18_spill] sm:$0xff]  ;;  %v11101_v23 = vpop.f32.mrf.mxu0 }
 0x26f   :  { %v2638_v19 = vmul.f32 0.5, %v2347_v53  ;;  %v2359_v52 = vmul.f32 0.6931472, %v8671_v50  ;;  %4366 = vmatmul.mubr.bf16.gmra.mxu0 %v11068_v41  ;;  %v2033_v31 = vadd.f32 %v1873_v5, %v12804_v38  ;;  %v12805_v17 = vld [vmem:[#allocation86_spill] sm:$0xff]  ;;  %v12806_v9 = vld [vmem:[#allocation84_spill] sm:$0xff]  ;;  %4713 = vmatprep.subr.bf16.mxu0 %v8252_v43  ;;  %v1874_v50 = vmul.f32 %v11018_v12, %v11018_v12 }
 0x270   :  { %v2189_v49 = vadd.f32 1e-30, %v2029_v18  ;;  %v11099_v62 = vpack.c.bf16 %v12806_v9, %v12805_v17  ;;  %v8250_v26 = vld [vmem:[#allocation7 + $0xd0] ss:$20 sps:$4 sm:$0xff]   ;;  %v8673_v32 = vpop.eup %8672  ;;  %8686 = vlog2.f32 %v2184_v24  ;;  %v11105_v33 = vpack.c.bf16 %v2639_v0, %v2634_v58  ;;  %v8258_v29 = vld [vmem:[#allocation7 + $0xac] ss:$20 sps:$4 sm:$0xff]   ;;  %v11111_v38 = vpop.f32.mrf.mxu0 }
 0x271   :  { %v11103_v63 = vpack.c.bf16 %v2638_v19, %v2633_v20  ;;  %v8675_v30 = vpop.eup %8674  ;;  %v2644_v53 = vmul.f32 0.5, %v2359_v52  ;;  %4905 = vmatpush1.bf16.msra.mxu1 %v8247_v6  ;;  %8688 = vlog2.f32 %v2188_v1  ;;  %v2193_v18 = vadd.f32 1e-30, %v2033_v31  ;;  %v8253_v5 = vld [vmem:[#allocation7 + $0x350] ss:$20 sps:$4 sm:$0xff]   ;;  %v12810_v58 = vld [vmem:[#allocation19_spill] sm:$0xff]  ;;  %4714 = vmatpush1.bf16.msra.mxu0 %v8250_v26 }
 0x272   :  { %12807 = vst [vmem:[#allocation105_spill] sm:$0xff] %v11099_v62  ;;  %12809 = vst [vmem:[#allocation74_spill] sm:$0xff] %v11105_v33  ;;  %v1878_v43 = vmul.f32 %v11029_v3, %v11029_v3  ;;  %v2369_v24 = vmul.f32 0.6931472, %v8675_v30  ;;  %8690 = vlog2.f32 %v2189_v49  ;;  %4906 = vmatprep.subr.bf16.mxu1 %v8255_v35  ;;  %v2034_v20 = vadd.f32 %v1874_v50, %v12810_v58  ;;  %v8261_v0 = vld [vmem:[#allocation7 + $0x32c] ss:$20 sps:$4 sm:$0xff]   ;;  %v11118_v17 = vpop.f32.mrf.mxu0 }
 0x273   :  { %12808 = vst [vmem:[#allocation112_spill] sm:$0xff] %v11103_v63  ;;  %4375 = vmatprep.mubr.bf16.mxu0 %v11103_v63  ;;  %v1879_v12 = vmul.f32 %v11034_v25, %v11034_v25  ;;  %v8677_v6 = vpop.eup %8676  ;;  %8692 = vlog2.f32 %v2193_v18  ;;  %v12811_v1 = vld [vmem:[#allocation22_spill] sm:$0xff]  ;;  %v2357_v52 = vmul.f32 0.6931472, %v8669_v10  ;;  %v2367_v3 = vmul.f32 0.6931472, %v8673_v32  ;;  %4715 = vmatprep.subr.bf16.mxu0 %v8258_v29 }
 0x274   :  { %v2038_v19 = vadd.f32 %v1878_v43, %v12811_v1  ;;  %v8256_v31 = vld [vmem:[#allocation7 + $0xa8] ss:$20 sps:$4 sm:$0xff]   ;;  %v2649_v49 = vmul.f32 0.5, %v2369_v24  ;;  %4559 = vmatmul.mubr.bf16.gmra.mxu1 %v11071_v60  ;;  %v2194_v35 = vadd.f32 1e-30, %v2034_v20  ;;  %v1883_v25 = vmul.f32 %v11038_v36, %v11038_v36  ;;  %v12813_v43 = vld [vmem:[#allocation90_spill] sm:$0xff]  ;;  %v11129_v20 = vpop.f32.mrf.mxu0 }
 0x275   :  { %v12812_v9 = vld [vmem:[#allocation23_spill] sm:$0xff]  ;;  %v8679_v18 = vpop.eup %8678  ;;  %4568 = vmatprep.mubr.bf16.mxu1 %v12791_v4  ;;  %4907 = vmatpush1.bf16.msra.mxu1 %v8253_v5  ;;  %v2643_v26 = vmul.f32 0.5, %v2357_v52  ;;  %v2648_v32 = vmul.f32 0.5, %v2367_v3  ;;  %v12814_v58 = vld [vmem:[#allocation92_spill] sm:$0xff]  ;;  %v8264_v1 = vld [vmem:[#allocation7 + $0x84] ss:$20 sps:$4 sm:$0xff]   ;;  %v1884_v52 = vmul.f32 %v11049_v47, %v11049_v47 }
 0x276   :  { %v2039_v50 = vadd.f32 %v1879_v12, %v12812_v9  ;;  %v8259_v30 = vld [vmem:[#allocation7 + $0x328] ss:$20 sps:$4 sm:$0xff]   ;;  %v2198_v10 = vadd.f32 1e-30, %v2038_v19  ;;  %v11127_v24 = vpack.c.bf16 %v12814_v58, %v12813_v43  ;;  %v8681_v12 = vpop.eup %8680  ;;  %v2379_v9 = vmul.f32 0.6931472, %v8679_v18  ;;  %4908 = vmatprep.subr.bf16.mxu1 %v8261_v0  ;;  %v11139_v43 = vpop.f32.mrf.mxu0  ;;  %4716 = vmatpush1.bf16.msra.mxu0 %v8256_v31 }
 0x277   :  { %8694 = vlog2.f32 %v2194_v35  ;;  %v12816_v29 = vld [vmem:[#allocation26_spill] sm:$0xff]  ;;  %v8683_v41 = vpop.eup %8682  ;;  %4376 = vmatmul.mubr.bf16.gmra.mxu0 %v11099_v62  ;;  %v11133_v5 = vpack.c.bf16 %v2648_v32, %v2643_v26  ;;  %v11135_v19 = vpack.c.bf16 %v2649_v49, %v2644_v53  ;;  %v12819_v0 = vld [vmem:[#allocation25_spill] sm:$0xff]  ;;  %v1888_v53 = vmul.f32 %v11058_v40, %v11058_v40  ;;  %4717 = vmatprep.subr.bf16.mxu0 %v8264_v1 }
 0x278   :  { %12815 = vst [vmem:[#allocation114_spill] sm:$0xff] %v11127_v24  ;;  %v2199_v36 = vadd.f32 1e-30, %v2039_v50  ;;  %v2043_v60 = vadd.f32 %v1883_v25, %v12816_v29  ;;  %v8267_v63 = vld [vmem:[#allocation7 + $0x304] ss:$20 sps:$4 sm:$0xff]   ;;  %8696 = vlog2.f32 %v2198_v10  ;;  %v2654_v35 = vmul.f32 0.5, %v2379_v9  ;;  %v11147_v32 = vpop.f32.mrf.mxu0 }
 0x279   :  { %12817 = vst [vmem:[#allocation75_spill] sm:$0xff] %v11133_v5  ;;  %12818 = vst [vmem:[#allocation115_spill] sm:$0xff] %v11135_v19  ;;  %v8262_v3 = vld [vmem:[#allocation7 + $0x80] ss:$20 sps:$4 sm:$0xff]   ;;  %v2389_v50 = vmul.f32 0.6931472, %v8683_v41  ;;  %4385 = vmatprep.mubr.bf16.mxu0 %v11133_v5  ;;  %v2044_v18 = vadd.f32 %v1884_v52, %v12819_v0  ;;  %4909 = vmatpush1.bf16.msra.mxu1 %v8259_v30  ;;  %v1889_v49 = vmul.f32 %v11064_v46, %v11064_v46 }
 0x27a   :  { %8698 = vlog2.f32 %v2199_v36  ;;  %v2203_v25 = vadd.f32 1e-30, %v2043_v60  ;;  %v2377_v47 = vmul.f32 0.6931472, %v8677_v6  ;;  %v8265_v10 = vld [vmem:[#allocation7 + $0x300] ss:$20 sps:$4 sm:$0xff]   ;;  %v8685_v41 = vpop.eup %8684  ;;  %v1893_v31 = vmul.f32 %v11073_v28, %v11073_v28  ;;  %4910 = vmatprep.subr.bf16.mxu1 %v8267_v63  ;;  %v11153_v52 = vpop.f32.mrf.mxu0  ;;  %4718 = vmatpush1.bf16.msra.mxu0 %v8262_v3 }
 0x27b   :  { %v8270_v26 = vld [vmem:[#allocation7 + $0x5c] ss:$20 sps:$4 sm:$0xff]   ;;  %v2659_v58 = vmul.f32 0.5, %v2389_v50  ;;  %v2387_v60 = vmul.f32 0.6931472, %v8681_v12  ;;  %v12820_v40 = vld [vmem:[#allocation30_spill] sm:$0xff] }
 0x27c   :  { %8700 = vlog2.f32 %v2203_v25  ;;  %v8273_v30 = vld [vmem:[#allocation7 + $0x2dc] ss:$20 sps:$4 sm:$0xff]   ;;  %v2204_v9 = vadd.f32 1e-30, %v2044_v18  ;;  %v2048_v36 = vadd.f32 %v1888_v53, %v12820_v40  ;;  %v12821_v29 = vld [vmem:[#allocation27_spill] sm:$0xff]  ;;  %v2653_v6 = vmul.f32 0.5, %v2377_v47  ;;  %4569 = vmatmul.mubr.bf16.gmra.mxu1 %v11105_v33  ;;  %4719 = vmatprep.subr.bf16.mxu0 %v8270_v26 }
 0x27d   :  { %v2049_v46 = vadd.f32 %v1889_v49, %v12821_v29  ;;  %v2658_v0 = vmul.f32 0.5, %v2387_v60  ;;  %v12822_v50 = vld [vmem:[#allocation34_spill] sm:$0xff]  ;;  %v12823_v12 = vld [vmem:[#allocation93_spill] sm:$0xff]  ;;  %v12824_v5 = vld [vmem:[#allocation24_spill] sm:$0xff]  ;;  %v11161_v28 = vpack.c.bf16 %v2659_v58, %v2654_v35  ;;  %v8687_v18 = vpop.eup %8686  ;;  %4578 = vmatprep.mubr.bf16.mxu1 %v12791_v4  ;;  %v1894_v47 = vmul.f32 %v11083_v56, %v11083_v56  ;;  %4911 = vmatpush1.bf16.msra.mxu1 %v8265_v10 }
 0x27e   :  { %v2053_v25 = vadd.f32 %v1893_v31, %v12822_v50  ;;  %v11159_v62 = vpack.c.bf16 %v12824_v5, %v12823_v12  ;;  %v8268_v63 = vld [vmem:[#allocation7 + $0x58] ss:$20 sps:$4 sm:$0xff]   ;;  %8702 = vlog2.f32 %v2204_v9  ;;  %v2208_v53 = vadd.f32 1e-30, %v2048_v36  ;;  %v8276_v60 = vld [vmem:[#allocation7 + $0x34] ss:$20 sps:$4 sm:$0xff]   ;;  %v11166_v31 = vpop.f32.mrf.mxu0  ;;  %v8689_v5 = vpop.eup %8688  ;;  %4912 = vmatprep.subr.bf16.mxu1 %v8273_v30 }
 0x27f   :  { %12826 = vst [vmem:[#allocation117_spill] sm:$0xff] %v11161_v28  ;;  %v8271_v1 = vld [vmem:[#allocation7 + $0x2d8] ss:$20 sps:$4 sm:$0xff]   ;;  %v2209_v49 = vadd.f32 1e-30, %v2049_v46  ;;  %v11168_v35 = vpack.c.bf16 %v2658_v0, %v2653_v6  ;;  %v1898_v58 = vmul.f32 %v11093_v45, %v11093_v45  ;;  %v8691_v36 = vpop.eup %8690  ;;  %4386 = vmatmul.mubr.bf16.gmra.mxu0 %v11127_v24  ;;  %v12828_v56 = vld [vmem:[#allocation32_spill] sm:$0xff]  ;;  %v1899_v29 = vmul.f32 %v11101_v23, %v11101_v23 }
 0x280   :  { %12825 = vst [vmem:[#allocation76_spill] sm:$0xff] %v11159_v62  ;;  %v2399_v40 = vmul.f32 0.6931472, %v8687_v18  ;;  %v2213_v3 = vadd.f32 1e-30, %v2053_v25  ;;  %8704 = vlog2.f32 %v2208_v53  ;;  %v2054_v10 = vadd.f32 %v1894_v47, %v12828_v56  ;;  %v11176_v6 = vpop.f32.mrf.mxu0  ;;  %v8693_v0 = vpop.eup %8692  ;;  %v12829_v45 = vld [vmem:[#allocation38_spill] sm:$0xff]  ;;  %4720 = vmatpush1.bf16.msra.mxu0 %v8268_v63 }
 0x281   :  { %12827 = vst [vmem:[#allocation79_spill] sm:$0xff] %v11168_v35  ;;  %v8279_v9 = vld [vmem:[#allocation7 + $0x2b4] ss:$20 sps:$4 sm:$0xff]   ;;  %v2397_v46 = vmul.f32 0.6931472, %v8685_v41  ;;  %8706 = vlog2.f32 %v2209_v49  ;;  %4395 = vmatprep.mubr.bf16.mxu0 %v11168_v35  ;;  %v2058_v26 = vadd.f32 %v1898_v58, %v12829_v45  ;;  %v12830_v53 = vld [vmem:[#allocation37_spill] sm:$0xff]  ;;  %4913 = vmatpush1.bf16.msra.mxu1 %v8271_v1  ;;  %v1903_v49 = vmul.f32 %v11111_v38, %v11111_v38 }
 0x282   :  { %v8274_v50 = vld [vmem:[#allocation7 + $0x30] ss:$20 sps:$4 sm:$0xff]   ;;  %v2664_v25 = vmul.f32 0.5, %v2399_v40  ;;  %v2409_v12 = vmul.f32 0.6931472, %v8691_v36  ;;  %8708 = vlog2.f32 %v2213_v3  ;;  %v2059_v47 = vadd.f32 %v1899_v29, %v12830_v53  ;;  %4721 = vmatprep.subr.bf16.mxu0 %v8276_v60  ;;  %v11181_v23 = vpop.f32.mrf.mxu0  ;;  %4914 = vmatprep.subr.bf16.mxu1 %v8279_v9  ;;  %v12831_v45 = vld [vmem:[#allocation119_spill] sm:$0xff] }
 0x283   :  { %v8277_v30 = vld [vmem:[#allocation7 + $0x2b0] ss:$20 sps:$4 sm:$0xff]   ;;  %v2214_v18 = vadd.f32 1e-30, %v2054_v10  ;;  %v2407_v56 = vmul.f32 0.6931472, %v8689_v5 }
 0x284   :  { %v8282_v41 = vld [vmem:[#allocation7 + $0xc] ss:$20 sps:$4 sm:$0xff]   ;;  %v2669_v33 = vmul.f32 0.5, %v2409_v12  ;;  %v2218_v40 = vadd.f32 1e-30, %v2058_v26  ;;  %v2663_v36 = vmul.f32 0.5, %v2397_v46  ;;  %v8695_v63 = vpop.eup %8694  ;;  %v11189_v1 = vpop.f32.mrf.mxu0  ;;  %4579 = vmatmul.mubr.bf16.gmra.mxu1 %v11135_v19  ;;  %4722 = vmatpush1.bf16.msra.mxu0 %v8274_v50 }
 0x285   :  { %v8285_v58 = vld [vmem:[#allocation7 + $0x28c] ss:$20 sps:$4 sm:$0xff]   ;;  %8710 = vlog2.f32 %v2214_v18  ;;  %v2219_v3 = vadd.f32 1e-30, %v2059_v47  ;;  %v2668_v10 = vmul.f32 0.5, %v2407_v56  ;;  %v8697_v60 = vpop.eup %8696  ;;  %4588 = vmatprep.mubr.bf16.mxu1 %v12791_v4  ;;  %v1904_v47 = vmul.f32 %v11118_v17, %v11118_v17  ;;  %4915 = vmatpush1.bf16.msra.mxu1 %v8277_v30  ;;  %v12837_v17 = vld [vmem:[#allocation40_spill] sm:$0xff] }
 0x286   :  { %v12832_v29 = vld [vmem:[#allocation31_spill] sm:$0xff]  ;;  %v2419_v53 = vmul.f32 0.6931472, %v8695_v63  ;;  %8712 = vlog2.f32 %v2218_v40  ;;  %v12834_v46 = vld [vmem:[#allocation42_spill] sm:$0xff]  ;;  %v11193_v38 = vpack.c.bf16 %v2669_v33, %v2664_v25  ;;  %v1908_v56 = vmul.f32 %v11129_v20, %v11129_v20  ;;  %v11202_v63 = vpop.f32.mrf.mxu0  ;;  %4723 = vmatprep.subr.bf16.mxu0 %v8282_v41  ;;  %4916 = vmatprep.subr.bf16.mxu1 %v8285_v58 }
 0x287   :  { %v11187_v5 = vpack.c.bf16 %v12832_v29, %v12831_v45  ;;  %v2063_v12 = vadd.f32 %v1903_v49, %v12834_v46  ;;  %v8280_v9 = vld [vmem:[#allocation7 + $0x8] ss:$20 sps:$4 sm:$0xff]   ;;  %v8699_v26 = vpop.eup %8698  ;;  %8714 = vlog2.f32 %v2219_v3  ;;  %v11196_v18 = vpack.c.bf16 %v2668_v10, %v2663_v36  ;;  %v8288_v33 = vld [vmem:[#allocation7 + $0x264] ss:$20 sps:$4 sm:$0xff]   ;;  %4396 = vmatmul.mubr.bf16.gmra.mxu0 %v11159_v62  ;;  %v8286_v41 = vld [vmem:[#allocation7 + $0x260] ss:$20 sps:$4 sm:$0xff]  }
 0x288   :  { %12835 = vst [vmem:[#allocation83_spill] sm:$0xff] %v11193_v38  ;;  %v8283_v40 = vld [vmem:[#allocation7 + $0x288] ss:$20 sps:$4 sm:$0xff]   ;;  %v8291_v25 = vld [vmem:[#allocation7 + $0x4e4] ss:$20 sps:$4 sm:$0xff]   ;;  %v2674_v50 = vmul.f32 0.5, %v2419_v53  ;;  %v1909_v3 = vmul.f32 %v11139_v43, %v11139_v43  ;;  %v2064_v10 = vadd.f32 %v1904_v47, %v12837_v17  ;;  %v11209_v19 = vpop.f32.mrf.mxu0  ;;  %v1913_v43 = vmul.f32 %v11147_v32, %v11147_v32  ;;  %4724 = vmatpush1.bf16.msra.mxu0 %v8280_v9 }
 0x289   :  { %12833 = vst [vmem:[#allocation80_spill] sm:$0xff] %v11187_v5  ;;  %12836 = vst [vmem:[#allocation82_spill] sm:$0xff] %v11196_v18  ;;  %v2429_v49 = vmul.f32 0.6931472, %v8699_v26  ;;  %v2223_v45 = vadd.f32 1e-30, %v2063_v12  ;;  %v8701_v36 = vpop.eup %8700  ;;  %4405 = vmatprep.mubr.bf16.mxu0 %v11196_v18  ;;  %4917 = vmatpush1.bf16.msra.mxu1 %v8283_v40 }
 0x28a   :  { %v12838_v20 = vld [vmem:[#allocation46_spill] sm:$0xff]  ;;  %v2417_v29 = vmul.f32 0.6931472, %v8693_v0  ;;  %v2427_v46 = vmul.f32 0.6931472, %v8697_v60  ;;  %v12839_v53 = vld [vmem:[#allocation41_spill] sm:$0xff]  ;;  %v11215_v0 = vpop.f32.mrf.mxu0  ;;  %4725 = vmatprep.subr.bf16.mxu0 %v8288_v33  ;;  %4918 = vmatprep.subr.bf16.mxu1 %v8291_v25  ;;  %v1914_v33 = vmul.f32 %v11153_v52, %v11153_v52 }
 0x28b   :  { %v2068_v30 = vadd.f32 %v1908_v56, %v12838_v20  ;;  %v2679_v35 = vmul.f32 0.5, %v2429_v49  ;;  %8716 = vlog2.f32 %v2223_v45  ;;  %v2069_v12 = vadd.f32 %v1909_v3, %v12839_v53  ;;  %v8289_v58 = vld [vmem:[#allocation7 + $0x4e0] ss:$20 sps:$4 sm:$0xff]   ;;  %v8703_v60 = vpop.eup %8702  ;;  %v12842_v3 = vld [vmem:[#allocation39_spill] sm:$0xff]  ;;  %v8294_v9 = vld [vmem:[#allocation7 + $0x23c] ss:$20 sps:$4 sm:$0xff]  }
 0x28c   :  { %v2224_v26 = vadd.f32 1e-30, %v2064_v10  ;;  %v2673_v17 = vmul.f32 0.5, %v2417_v29  ;;  %v2678_v56 = vmul.f32 0.5, %v2427_v46  ;;  %v12840_v20 = vld [vmem:[#allocation50_spill] sm:$0xff]  ;;  %v12841_v18 = vld [vmem:[#allocation36_spill] sm:$0xff]  ;;  %v11229_v29 = vpop.f32.mrf.mxu0  ;;  %4589 = vmatmul.mubr.bf16.gmra.mxu1 %v11161_v28  ;;  %4726 = vmatpush2.bf16.msra.mxu0 %v8286_v41 }
 0x28d   :  { %v2228_v47 = vadd.f32 1e-30, %v2068_v30  ;;  %v2229_v49 = vadd.f32 1e-30, %v2069_v12  ;;  %v2073_v45 = vadd.f32 %v1913_v43, %v12840_v20  ;;  %v11220_v53 = vpack.c.bf16 %v12842_v3, %v12841_v18  ;;  %v8297_v10 = vld [vmem:[#allocation7 + $0x4bc] ss:$20 sps:$4 sm:$0xff]   ;;  %v8705_v46 = vpop.eup %8704  ;;  %4598 = vmatprep.mubr.bf16.mxu1 %v12791_v4  ;;  %4919 = vmatpush2.bf16.msra.mxu1 %v8289_v58 }
 0x28e   :  { %v11222_v32 = vpack.c.bf16 %v2679_v35, %v2674_v50  ;;  %v11225_v30 = vadd.f32 1e-30, %v10996_v54  ;;  %v2439_v40 = vmul.f32 0.6931472, %v8703_v60  ;;  %8718 = vlog2.f32 %v2224_v26  ;;  %v8292_v25 = vld [vmem:[#allocation7 + $0x238] ss:$20 sps:$4 sm:$0xff]   ;;  %v8707_v12 = vpop.eup %8706  ;;  %4727 = vmatprep.subr.bf16.mxu0 %v8294_v9  ;;  %4920 = vmatprep.subr.bf16.mxu1 %v8297_v10 }
 0x28f   :  { %12843 = vst [vmem:[#allocation78_spill] sm:$0xff] %v11220_v53  ;;  %8720 = vlog2.f32 %v2228_v47  ;;  %v11232_v18 = vpack.c.bf16 %v2678_v56, %v2673_v17  ;;  %v1918_v35 = vmul.f32 %v11166_v31, %v11166_v31  ;;  %v1919_v54 = vmul.f32 %v11176_v6, %v11176_v6  ;;  %v8295_v50 = vld [vmem:[#allocation7 + $0x4b8] ss:$20 sps:$4 sm:$0xff]   ;;  %v11242_v17 = vpop.f32.mrf.mxu0  ;;  %v8300_v56 = vld [vmem:[#allocation7 + $0x214] ss:$20 sps:$4 sm:$0xff]   ;;  %v8709_v31 = vpop.eup %8708  ;;  %v12847_v6 = vld [vmem:[#allocation54_spill] sm:$0xff]  ;;  %4406 = vmatmul.mubr.bf16.gmra.mxu0 %v11187_v5 }
 0x290   :  { %12844 = vst [vmem:[#allocation77_spill] sm:$0xff] %v11222_v32  ;;  %8722 = vlog2.f32 %v2229_v49  ;;  %v11239_v52 = vadd.f32 1e-30, %v2073_v45  ;;  %v12846_v43 = vld [vmem:[#allocation49_spill] sm:$0xff]  ;;  %v2437_v47 = vmul.f32 0.6931472, %v8701_v36  ;;  %v1923_v58 = vmul.f32 %v11181_v23, %v11181_v23  ;;  %4728 = vmatpush2.bf16.msra.mxu0 %v8292_v25 }
 0x291   :  { %12845 = vst [vmem:[#allocation87_spill] sm:$0xff] %v11232_v18  ;;  %v2074_v26 = vadd.f32 %v1914_v33, %v12846_v43  ;;  %v2684_v60 = vmul.f32 0.5, %v2439_v40  ;;  %v2449_v20 = vmul.f32 0.6931472, %v8707_v12  ;;  %v2078_v41 = vadd.f32 %v1918_v35, %v12847_v6  ;;  %v8298_v28 = vld [vmem:[#allocation7 + $0x210] ss:$20 sps:$4 sm:$0xff]   ;;  %v11249_v43 = vpop.f32.mrf.mxu0  ;;  %4415 = vmatprep.mubr.bf16.mxu0 %v11232_v18  ;;  %4921 = vmatpush2.bf16.msra.mxu1 %v8295_v50 }
 0x292   :  { %v2079_v3 = vadd.f32 %v1919_v54, %v10703_v27  ;;  %v8303_v49 = vld [vmem:[#allocation7 + $0x494] ss:$20 sps:$4 sm:$0xff]   ;;  %v2447_v33 = vmul.f32 0.6931472, %v8705_v46  ;;  %v2683_v36 = vmul.f32 0.5, %v2437_v47  ;;  %v8711_v40 = vpop.eup %8710  ;;  %v12848_v9 = vld [vmem:[#allocation45_spill] sm:$0xff]  ;;  %4729 = vmatprep.subr.bf16.mxu0 %v8300_v56  ;;  %v1928_v25 = vmul.f32 %v11202_v63, %v11202_v63 }
 0x293   :  { %v2234_v45 = vadd.f32 1e-30, %v2074_v26  ;;  %v2689_v12 = vmul.f32 0.5, %v2449_v20  ;;  %v2238_v35 = vadd.f32 1e-30, %v2078_v41  ;;  %v12849_v10 = vld [vmem:[#allocation47_spill] sm:$0xff]  ;;  %v8713_v6 = vpop.eup %8712  ;;  %v11257_v23 = vpop.f32.mrf.mxu0  ;;  %4922 = vmatprep.subr.bf16.mxu1 %v8303_v49  ;;  %v1929_v49 = vmul.f32 %v11209_v19, %v11209_v19 }
 0x294   :  { %v2239_v27 = vadd.f32 1e-30, %v2079_v3  ;;  %v11254_v54 = vpack.c.bf16 %v12849_v10, %v12848_v9  ;;  %v2459_v26 = vmul.f32 0.6931472, %v8711_v40  ;;  %v2688_v46 = vmul.f32 0.5, %v2447_v33  ;;  %v12851_v47 = vld [vmem:[#allocation57_spill] sm:$0xff]  ;;  %v8715_v62 = vpop.eup %8714  ;;  %v11265_v40 = vpop.f32.mrf.mxu1  ;;  %4599 = vmatmul.mubr.bf16.gmra.mxu1 %v11193_v38  ;;  %4730 = vmatpush2.bf16.msra.mxu0 %v8298_v28 }
 0x295   :  { %8724 = vlog2.f32 %v2234_v45  ;;  %v2083_v5 = vadd.f32 %v1923_v58, %v12851_v47  ;;  %v8301_v20 = vld [vmem:[#allocation7 + $0x490] ss:$20 sps:$4 sm:$0xff]   ;;  %v11259_v41 = vpack.c.bf16 %v2689_v12, %v2684_v60  ;;  %v1924_v3 = vmul.f32 %v11189_v1, %v11189_v1  ;;  %v8306_v45 = vld [vmem:[#allocation7 + $0x1ec] ss:$20 sps:$4 sm:$0xff]   ;;  %v11272_v60 = vpop.f32.mrf.mxu0  ;;  %v8304_v12 = vld [vmem:[#allocation7 + $0x1e8] ss:$20 sps:$4 sm:$0xff]   ;;  %4608 = vmatprep.mubr.bf16.mxu1 %v12791_v4 }
 0x296   :  { %12850 = vst [vmem:[#allocation89_spill] sm:$0xff] %v11254_v54  ;;  %8726 = vlog2.f32 %v2238_v35  ;;  %v8309_v33 = vld [vmem:[#allocation7 + $0x46c] ss:$20 sps:$4 sm:$0xff]   ;;  %v11268_v58 = vmul.f32 0.6931472, %v10958_v22  ;;  %v11270_v56 = vpack.c.bf16 %v2688_v46, %v2683_v36  ;;  %v12854_v35 = vld [vmem:[#allocation61_spill] sm:$0xff]  ;;  %v11279_v10 = vpop.f32.mrf.mxu1  ;;  %4923 = vmatpush2.bf16.msra.mxu1 %v8301_v20  ;;  %v2089_v28 = vadd.f32 %v1929_v49, %v10741_v44  ;;  %4731 = vmatprep.subr.bf16.mxu0 %v8306_v45 }
 0x297   :  { %12852 = vst [vmem:[#allocation91_spill] sm:$0xff] %v11259_v41  ;;  %v2469_v50 = vmul.f32 0.6931472, %v8715_v62  ;;  %8728 = vlog2.f32 %v2239_v27  ;;  %v2243_v1 = vadd.f32 1e-30, %v2083_v5  ;;  %v2084_v63 = vadd.f32 %v1924_v3, %v10736_v51  ;;  %v11285_v51 = vpop.f32.mrf.mxu0  ;;  %4924 = vmatprep.subr.bf16.mxu1 %v8309_v33  ;;  %4416 = vmatmul.mubr.bf16.gmra.mxu0 %v11220_v53 }
 0x298   :  { %12853 = vst [vmem:[#allocation94_spill] sm:$0xff] %v11270_v56  ;;  %v2088_v9 = vadd.f32 %v1928_v25, %v12854_v35  ;;  %v8307_v22 = vld [vmem:[#allocation7 + $0x468] ss:$20 sps:$4 sm:$0xff]   ;;  %v8312_v62 = vld [vmem:[#allocation7 + $0x1c4] ss:$20 sps:$4 sm:$0xff]   ;;  %v11281_v36 = vpop.eup %8716  ;;  %8730 = vlog2.f32 %v11225_v30  ;;  %v2694_v47 = vmul.f32 0.5, %v2459_v26  ;;  %v11289_v3 = vpop.f32.mrf.mxu1  ;;  %4425 = vmatprep.mubr.bf16.mxu0 %v11270_v56  ;;  %v1934_v33 = vmul.f32 %v11229_v29, %v11229_v29  ;;  %4732 = vmatpush2.bf16.msra.mxu0 %v8304_v12 }
 0x299   :  { %v2699_v27 = vmul.f32 0.5, %v2469_v50  ;;  %v2457_v5 = vmul.f32 0.6931472, %v8709_v31  ;;  %v2467_v46 = vmul.f32 0.6931472, %v8713_v6  ;;  %8732 = vlog2.f32 %v11239_v52  ;;  %v12855_v6 = vld [vmem:[#allocation52_spill] sm:$0xff]  ;;  %v11298_v52 = vpop.f32.mrf.mxu0  ;;  %4733 = vmatprep.subr.bf16.mxu0 %v8312_v62 }
 0x29a   :  { %v2244_v19 = vadd.f32 1e-30, %v2084_v63  ;;  %v8315_v25 = vld [vmem:[#allocation7 + $0x444] ss:$20 sps:$4 sm:$0xff]   ;;  %v2248_v30 = vadd.f32 1e-30, %v2088_v9  ;;  %v1933_v31 = vmul.f32 %v11215_v0, %v11215_v0  ;;  %v11296_v26 = vpack.c.bf16 %v12855_v6, %v10711_v48  ;;  %v11308_v49 = vpop.f32.mrf.mxu1  ;;  %4925 = vmatpush2.bf16.msra.mxu1 %v8307_v22 }
 0x29b   :  { %v2698_v50 = vmul.f32 0.5, %v2467_v46  ;;  %v8719_v20 = vpop.eup %8718  ;;  %v2249_v44 = vadd.f32 1e-30, %v2089_v28  ;;  %v11301_v45 = vpack.c.bf16 %v2699_v27, %v2694_v47  ;;  %v8310_v63 = vld [vmem:[#allocation7 + $0x1c0] ss:$20 sps:$4 sm:$0xff]   ;;  %v11306_v0 = vmul.f32 0.5, %v10985_v42  ;;  %v11310_v46 = vpop.f32.mrf.mxu0  ;;  %4926 = vmatprep.subr.bf16.mxu1 %v8315_v25 }
 0x29c   :  { %12856 = vst [vmem:[#allocation18_spill] sm:$0xff] %v11296_v26  ;;  %8734 = vlog2.f32 %v2244_v19  ;;  %v8721_v35 = vpop.eup %8720  ;;  %v2479_v48 = vmul.f32 0.6931472, %v8719_v20  ;;  %v2693_v9 = vmul.f32 0.5, %v2457_v5  ;;  %12858 = vst [vmem:[#allocation84_spill] sm:$0xff] %v11308_v49  ;;  %v2094_v29 = vadd.f32 %v1934_v33, %v10791_v15  ;;  %v12860_v22 = vld [vmem:[#allocation97_spill] sm:$0xff]  ;;  %4609 = vmatmul.mubr.bf16.gmra.mxu1 %v11222_v32  ;;  %4734 = vmatpush2.bf16.msra.mxu0 %v8310_v63 }
 0x29d   :  { %12857 = vst [vmem:[#allocation86_spill] sm:$0xff] %v11301_v45  ;;  %8736 = vlog2.f32 %v2243_v1  ;;  %v8313_v27 = vld [vmem:[#allocation7 + $0x440] ss:$20 sps:$4 sm:$0xff]   ;;  %v8723_v47 = vpop.eup %8722  ;;  %v1938_v12 = vmul.f32 %v11242_v17, %v11242_v17  ;;  %v1939_v42 = vmul.f32 %v11249_v43, %v11249_v43  ;;  %v8318_v1 = vld [vmem:[#allocation7 + $0x19c] ss:$20 sps:$4 sm:$0xff]   ;;  %v2093_v62 = vadd.f32 %v1933_v31, %v12860_v22  ;;  %v11320_v6 = vpop.f32.mrf.mxu0  ;;  %4618 = vmatprep.mubr.bf16.mxu1 %v12791_v4 }
 0x29e   :  { %8738 = vlog2.f32 %v2249_v44  ;;  %v8321_v5 = vld [vmem:[#allocation7 + $0x41c] ss:$20 sps:$4 sm:$0xff]   ;;  %v2489_v19 = vmul.f32 0.6931472, %v8723_v47  ;;  %v11317_v28 = vpack.c.bf16 %v2698_v50, %v2693_v9  ;;  %v8316_v20 = vld [vmem:[#allocation7 + $0x198] ss:$20 sps:$4 sm:$0xff]   ;;  %v11331_v9 = vpop.f32.mrf.mxu1  ;;  %4927 = vmatpush2.bf16.msra.mxu1 %v8313_v27  ;;  %4735 = vmatprep.subr.bf16.mxu0 %v8318_v1  ;;  %v1944_v27 = vmul.f32 %v11272_v60, %v11272_v60 }
 0x29f   :  { %8740 = vlog2.f32 %v2248_v30  ;;  %v2254_v15 = vadd.f32 1e-30, %v2094_v29  ;;  %v12861_v44 = vld [vmem:[#allocation64_spill] sm:$0xff]  ;;  %v2099_v33 = vadd.f32 %v1939_v42, %v10809_v59  ;;  %v2487_v43 = vmul.f32 0.6931472, %v8721_v35  ;;  %12863 = vst [vmem:[#allocation22_spill] sm:$0xff] %v11331_v9  ;;  %v11333_v29 = vpop.f32.mrf.mxu0  ;;  %4928 = vmatprep.subr.bf16.mxu1 %v8321_v5  ;;  %4426 = vmatmul.mubr.bf16.gmra.mxu0 %v11254_v54 }
 0x2a0   :  { %12859 = vst [vmem:[#allocation19_spill] sm:$0xff] %v11317_v28  ;;  %v2098_v17 = vadd.f32 %v1938_v12, %v12861_v44  ;;  %v8319_v25 = vld [vmem:[#allocation7 + $0x418] ss:$20 sps:$4 sm:$0xff]   ;;  %v2704_v38 = vmul.f32 0.5, %v2479_v48  ;;  %v2709_v47 = vmul.f32 0.5, %v2489_v19  ;;  %v12862_v50 = vld [vmem:[#allocation56_spill] sm:$0xff]  ;;  %4435 = vmatprep.mubr.bf16.mxu0 %v11317_v28  ;;  %v1948_v5 = vmul.f32 %v11285_v51, %v11285_v51  ;;  %4736 = vmatpush2.bf16.msra.mxu0 %v8316_v20 }
 0x2a1   :  { %v2477_v30 = vmul.f32 0.6931472, %v11281_v36  ;;  %v11329_v31 = vpack.c.bf16 %v12862_v50, %v10777_v16  ;;  %v8324_v12 = vld [vmem:[#allocation7 + $0x174] ss:$20 sps:$4 sm:$0xff]   ;;  %8742 = vlog2.f32 %v2254_v15  ;;  %v2259_v42 = vadd.f32 1e-30, %v2099_v33  ;;  %v11344_v50 = vpop.f32.mrf.mxu1 }
 0x2a2   :  { %v8725_v59 = vpop.eup %8724  ;;  %v12864_v35 = vld [vmem:[#allocation95_spill] sm:$0xff]  ;;  %v2258_v48 = vadd.f32 1e-30, %v2098_v17  ;;  %v2708_v22 = vmul.f32 0.5, %v2487_v43  ;;  %v11340_v44 = vpack.c.bf16 %v2709_v47, %v2704_v38  ;;  %12866 = vst [vmem:[#allocation90_spill] sm:$0xff] %v11344_v50  ;;  %v1949_v17 = vmul.f32 %v11298_v52, %v11298_v52  ;;  %4929 = vmatpush2.bf16.msra.mxu1 %v8319_v25  ;;  %4737 = vmatprep.subr.bf16.mxu0 %v8324_v12  ;;  %v12869_v25 = vld [vmem:[#allocation100_spill] sm:$0xff] }
 0x2a3   :  { %v11337_v63 = vmul.f32 %v12864_v35, %v12864_v35  ;;  %v8327_v36 = vld [vmem:[#allocation7 + $0x3f4] ss:$20 sps:$4 sm:$0xff]   ;;  %v8727_v19 = vpop.eup %8726  ;;  %v2499_v16 = vmul.f32 0.6931472, %v8725_v59  ;;  %v1637_v35 = vpop.f32.mrf.mxu0  ;;  %v2585_v15 = vmul.f32 0.6931472, %v10970_v39  ;;  %8744 = vlog2.f32 %v2259_v42 }
 0x2a4   :  { %12865 = vst [vmem:[#allocation23_spill] sm:$0xff] %v11340_v44  ;;  %v8729_v32 = vpop.eup %8728  ;;  %v2253_v1 = vadd.f32 1e-30, %v2093_v62  ;;  %v8322_v38 = vld [vmem:[#allocation7 + $0x170] ss:$20 sps:$4 sm:$0xff]   ;;  %v2703_v60 = vmul.f32 0.5, %v2477_v30  ;;  %v1943_v43 = vmul.f32 %v11257_v23, %v11257_v23  ;;  %v11354_v47 = vpop.f32.mrf.mxu1  ;;  %8746 = vlog2.f32 %v2258_v48  ;;  %4930 = vmatprep.subr.bf16.mxu1 %v8327_v36  ;;  %4619 = vmatmul.mubr.bf16.gmra.mxu1 %v11259_v41 }
 0x2a5   :  { %v2509_v33 = vmul.f32 0.6931472, %v8729_v32  ;;  %12867 = vst [vmem:[#allocation92_spill] sm:$0xff] %v11354_v47  ;;  %v11356_v39 = vpop.f32.mrf.mxu0  ;;  %v8325_v62 = vld [vmem:[#allocation7 + $0x3f0] ss:$20 sps:$4 sm:$0xff]   ;;  %v8731_v59 = vpop.eup %8730  ;;  %v11359_v51 = vmul.f32 0.5, %v11268_v58  ;;  %v2104_v52 = vadd.f32 %v1944_v27, %v10838_v8  ;;  %v2109_v32 = vadd.f32 %v1949_v17, %v10853_v14  ;;  %4738 = vmatpush2.bf16.msra.mxu0 %v8322_v38  ;;  %4628 = vmatprep.mubr.bf16.mxu1 %v12791_v4 }
 0x2a6   :  { %v8330_v20 = vld [vmem:[#allocation7 + $0x14c] ss:$20 sps:$4 sm:$0xff]   ;;  %v8733_v23 = vpop.eup %8732  ;;  %v2714_v42 = vmul.f32 0.5, %v2499_v16  ;;  %v11363_v50 = vpack.c.bf16 %v2708_v22, %v2703_v60  ;;  %v2108_v12 = vadd.f32 %v1948_v5, %v12869_v25  ;;  %v11366_v9 = vpop.f32.mrf.mxu1  ;;  %v8328_v49 = vld [vmem:[#allocation7 + $0x148] ss:$20 sps:$4 sm:$0xff]   ;;  %v12870_v27 = vld [vmem:[#allocation60_spill] sm:$0xff]  ;;  %8748 = vlog2.f32 %v2253_v1  ;;  %4931 = vmatpush2.bf16.msra.mxu1 %v8325_v62 }
 0x2a7   :  { %v8333_v30 = vld [vmem:[#allocation7 + $0x3cc] ss:$20 sps:$4 sm:$0xff]   ;;  %v2719_v47 = vmul.f32 0.5, %v2509_v33  ;;  %v2264_v58 = vadd.f32 1e-30, %v2104_v52  ;;  %v1643_v17 = vpop.f32.mrf.mxu0  ;;  %v11373_v33 = vmul.f32 0.5, %v2585_v15  ;;  %v1958_v15 = vmul.f32 %v11333_v29, %v11333_v29  ;;  %4739 = vmatprep.subr.bf16.mxu0 %v8330_v20  ;;  %4436 = vmatmul.mubr.bf16.gmra.mxu0 %v11296_v26 }
 0x2a8   :  { %12868 = vst [vmem:[#allocation26_spill] sm:$0xff] %v11363_v50  ;;  %v2269_v48 = vadd.f32 1e-30, %v2109_v32  ;;  %v2507_v8 = vmul.f32 0.6931472, %v8727_v19  ;;  %v12871_v14 = vld [vmem:[#allocation62_spill] sm:$0xff]  ;;  %4932 = vmatprep.subr.bf16.mxu1 %v8333_v30  ;;  %v11386_v62 = vpop.f32.mrf.mxu1  ;;  %4445 = vmatprep.mubr.bf16.mxu0 %v11363_v50 }
 0x2a9   :  { %v11371_v36 = vpack.c.bf16 %v12871_v14, %v12870_v27  ;;  %v8735_v16 = vpop.eup %8734  ;;  %v12872_v22 = vld [vmem:[#allocation67_spill] sm:$0xff]  ;;  %v11377_v60 = vpack.c.bf16 %v2719_v47, %v2714_v42  ;;  %v8336_v32 = vld [vmem:[#allocation7 + $0x624] ss:$20 sps:$4 sm:$0xff]   ;;  %8750 = vlog2.f32 %v2264_v58  ;;  %v2497_v25 = vmul.f32 0.6931472, %v8733_v23  ;;  %12874 = vst [vmem:[#allocation30_spill] sm:$0xff] %v11386_v62  ;;  %v1645_v20 = vpop.f32.mrf.mxu0  ;;  %4740 = vmatpush2.bf16.msra.mxu0 %v8328_v49 }
 0x2aa   :  { %v2103_v5 = vadd.f32 %v1943_v43, %v12872_v22  ;;  %v8331_v52 = vld [vmem:[#allocation7 + $0x3c8] ss:$20 sps:$4 sm:$0xff]   ;;  %v8737_v19 = vpop.eup %8736  ;;  %v1954_v27 = vmul.f32 %v11320_v6, %v11320_v6  ;;  %v2519_v14 = vmul.f32 0.6931472, %v8735_v16  ;;  %v2268_v43 = vadd.f32 1e-30, %v2108_v12  ;;  %v11391_v22 = vpop.f32.mrf.mxu1  ;;  %5095 = vmatprep.subr.bf16.mxu0 %v8336_v32 }
 0x2ab   :  { %12873 = vst [vmem:[#allocation25_spill] sm:$0xff] %v11377_v60  ;;  %v8337_v1 = vld [vmem:[#allocation7 + $0x268] ss:$20 sps:$4 sm:$0xff]   ;;  %v8739_v38 = vpop.eup %8738  ;;  %v1953_v47 = vmul.f32 %v11310_v46, %v11310_v46  ;;  %v1959_v23 = vmul.f32 %v1637_v35, %v1637_v35  ;;  %8752 = vlog2.f32 %v2269_v48  ;;  %v2718_v6 = vmul.f32 0.5, %v2507_v8  ;;  %4933 = vmatpush2.bf16.msra.mxu1 %v8331_v52  ;;  %v12875_v62 = vld [vmem:[#allocation102_spill] sm:$0xff] }
 0x2ac   :  { %v8741_v42 = vpop.eup %8740  ;;  %v2529_v58 = vmul.f32 0.6931472, %v8739_v38  ;;  %v2114_v29 = vadd.f32 %v1954_v27, %v10880_v13  ;;  %v2595_v30 = vmul.f32 0.6931472, %v11003_v2  ;;  %v2605_v16 = vmul.f32 0.6931472, %v8731_v59  ;;  %7601 = vmatprep.subr.bf16.mxu1 %v8337_v1  ;;  %v11395_v49 = vpop.f32.mrf.mxu1  ;;  %4629 = vmatmul.mubr.bf16.gmra.mxu1 %v11301_v45 }
 0x2ad   :  { %v2263_v12 = vadd.f32 1e-30, %v2103_v5  ;;  %v2119_v46 = vadd.f32 %v1959_v23, %v10884_v37  ;;  %v2713_v38 = vmul.f32 0.5, %v2497_v25  ;;  %v2118_v48 = vadd.f32 %v1958_v15, %v12875_v62  ;;  %v12877_v5 = vld [vmem:[#allocation101_spill] sm:$0xff]  ;;  %v1647_v25 = vpop.f32.mrf.mxu0  ;;  %4638 = vmatprep.mubr.bf16.mxu1 %v12791_v4  ;;  %v8344_v45 = vld [vmem:[#allocation7 + $0x5d0] ss:$20 sps:$4 sm:$0xff]  }
 0x2ae   :  { %v2729_v35 = vmul.f32 0.5, %v2529_v58  ;;  %v2274_v41 = vadd.f32 1e-30, %v2114_v29  ;;  %v8743_v8 = vpop.eup %8742  ;;  %v2724_v13 = vmul.f32 0.5, %v2519_v14  ;;  %8754 = vlog2.f32 %v2268_v43 }
 0x2af   :  { %v2279_v2 = vadd.f32 1e-30, %v2119_v46  ;;  %v11399_v59 = vpack.c.bf16 %v10869_v57, %v10859_v34  ;;  %v11402_v37 = vpack.c.bf16 %v2718_v6, %v2713_v38  ;;  %v2113_v52 = vadd.f32 %v1953_v47, %v12877_v5  ;;  %v11408_v57 = vpop.f32.mrf.mxu1  ;;  %4446 = vmatmul.mubr.bf16.gmra.mxu0 %v11329_v31  ;;  %v12882_v5 = vld [vmem:[#allocation106_spill] sm:$0xff] }
 0x2b0   :  { %8756 = vlog2.f32 %v2274_v41  ;;  %v2527_v32 = vmul.f32 0.6931472, %v8741_v42  ;;  %v2539_v27 = vmul.f32 0.6931472, %v8743_v8  ;;  %v11406_v15 = vpack.c.bf16 %v2729_v35, %v2724_v13  ;;  %v8745_v14 = vpop.eup %8744 }
 0x2b1   :  { %12876 = vst [vmem:[#allocation27_spill] sm:$0xff] %v11402_v37  ;;  %8758 = vlog2.f32 %v2263_v12  ;;  %v1964_v1 = vmul.f32 %v1643_v17, %v1643_v17  ;;  %v2762_v43 = vmul.f32 0.5, %v2595_v30  ;;  %v2278_v34 = vadd.f32 1e-30, %v2118_v48  ;;  %v8747_v23 = vpop.eup %8746  ;;  %4455 = vmatprep.mubr.bf16.mxu0 %v11402_v37 }
 0x2b2   :  { %12878 = vst [vmem:[#allocation34_spill] sm:$0xff] %v11406_v15  ;;  %8760 = vlog2.f32 %v2279_v2  ;;  %v2517_v62 = vmul.f32 0.6931472, %v8737_v19  ;;  %v2767_v58 = vmul.f32 0.5, %v2605_v16  ;;  %v2549_v47 = vmul.f32 0.6931472, %v8745_v14  ;;  %v11420_v48 = vpop.f32.mrf.mxu1 }
 0x2b3   :  { %v2124_v41 = vadd.f32 %v1964_v1, %v10932_v55  ;;  %v1969_v42 = vmul.f32 %v1647_v25, %v1647_v25  ;;  %v2273_v6 = vadd.f32 1e-30, %v2113_v52  ;;  %v2728_v29 = vmul.f32 0.5, %v2527_v32  ;;  %v8749_v35 = vpop.eup %8748 }
 0x2b4   :  { %v1968_v17 = vmul.f32 %v1645_v20, %v1645_v20  ;;  %v11415_v30 = vpack.c.bf16 %v10911_v11, %v10902_v21  ;;  %v2734_v12 = vmul.f32 0.5, %v2539_v27  ;;  %v2739_v46 = vmul.f32 0.5, %v2549_v47  ;;  %4639 = vmatmul.mubr.bf16.gmra.mxu1 %v11340_v44 }
 0x2b5   :  { %v2284_v19 = vadd.f32 1e-30, %v2124_v41  ;;  %v2129_v16 = vadd.f32 %v1969_v42, %v11337_v63  ;;  %8762 = vlog2.f32 %v2278_v34  ;;  %v2723_v38 = vmul.f32 0.5, %v2517_v62  ;;  %4648 = vmatprep.mubr.bf16.mxu1 %v12791_v4 }
 0x2b6   :  { %v1963_v55 = vmul.f32 %v11356_v39, %v11356_v39  ;;  %v11424_v20 = vpack.c.bf16 %v11306_v0, %v10945_v7  ;;  %v8751_v8 = vpop.eup %8750  ;;  %v11426_v11 = vpack.c.bf16 %v2739_v46, %v2734_v12  ;;  %v11430_v63 = vpack.c.bf16 %v11373_v33, %v11359_v51  ;;  %v11435_v39 = vpop.f32.mrf.mxu1  ;;  %v12884_v51 = vld [vmem:[#allocation103_spill] sm:$0xff] }
 0x2b7   :  { %8764 = vlog2.f32 %v2284_v19  ;;  %v2289_v21 = vadd.f32 1e-30, %v2129_v16  ;;  %v2559_v13 = vmul.f32 0.6931472, %v8751_v8  ;;  %v11433_v2 = vpack.c.bf16 %v2728_v29, %v2723_v38  ;;  %4456 = vmatmul.mubr.bf16.gmra.mxu0 %v11371_v36 }
 0x2b8   :  { %12879 = vst [vmem:[#allocation93_spill] sm:$0xff] %v11424_v20  ;;  %12880 = vst [vmem:[#allocation24_spill] sm:$0xff] %v11426_v11  ;;  %v2128_v52 = vadd.f32 %v1968_v17, %v12882_v5  ;;  %v2547_v7 = vmul.f32 0.6931472, %v8747_v23  ;;  %v8753_v0 = vpop.eup %8752  ;;  %v11439_v32 = vpack.c.bf16 %v2767_v58, %v2762_v43  ;;  %v2123_v33 = vadd.f32 %v1963_v55, %v12884_v51  ;;  %v11442_v27 = vpop.f32.mrf.mxu1 }
 0x2b9   :  { %12881 = vst [vmem:[#allocation32_spill] sm:$0xff] %v11430_v63  ;;  %8766 = vlog2.f32 %v2289_v21  ;;  %v2569_v25 = vmul.f32 0.6931472, %v8753_v0  ;;  %v2537_v1 = vmul.f32 0.6931472, %v8749_v35  ;;  %v2744_v34 = vmul.f32 0.5, %v2559_v13  ;;  %4465 = vmatprep.mubr.bf16.mxu0 %v11433_v2 }
 0x2ba   :  { %12883 = vst [vmem:[#allocation38_spill] sm:$0xff] %v11439_v32  ;;  %8768 = vlog2.f32 %v2273_v6  ;;  %v2288_v23 = vadd.f32 1e-30, %v2128_v52  ;;  %v11446_v47 = vpop.f32.mrf.mxu1  ;;  %v2738_v41 = vmul.f32 0.5, %v2547_v7  ;;  %v2283_v6 = vadd.f32 1e-30, %v2123_v33 }
 0x2bb   :  { %v8755_v14 = vpop.eup %8754  ;;  %v2749_v62 = vmul.f32 0.5, %v2569_v25  ;;  %v2733_v29 = vmul.f32 0.5, %v2537_v1 }
 0x2bc   :  { %4649 = vmatmul.mubr.bf16.gmra.mxu1 %v11377_v60  ;;  %8770 = vlog2.f32 %v2288_v23  ;;  %v2567_v35 = vmul.f32 0.6931472, %v8755_v14  ;;  %v8342_v60 = vld [vmem:[#allocation7 + $0x240] ss:$20 sps:$4 sm:$0xff]  }
 0x2bd   :  { %v8757_v43 = vpop.eup %8756  ;;  %v11448_v17 = vpack.c.bf16 %v2749_v62, %v2744_v34  ;;  %v11451_v19 = vpack.c.bf16 %v2738_v41, %v2733_v29  ;;  %v11453_v16 = vpop.f32.mrf.mxu1  ;;  %4658 = vmatprep.mubr.bf16.mxu1 %v12791_v4  ;;  %8772 = vlog2.f32 %v2283_v6 }
 0x2be   :  { %v8759_v58 = vpop.eup %8758  ;;  %v2579_v42 = vmul.f32 0.6931472, %v8757_v43  ;;  %v2748_v7 = vmul.f32 0.5, %v2567_v35 }
 0x2bf   :  { %12885 = vst [vmem:[#allocation37_spill] sm:$0xff] %v11448_v17  ;;  %v8761_v12 = vpop.eup %8760  ;;  %v11456_v8 = vpop.f32.mrf.mxu1  ;;  %v2557_v21 = vmul.f32 0.6931472, %v8759_v58  ;;  %4466 = vmatmul.mubr.bf16.gmra.mxu0 %v11399_v59 }
 0x2c0   :  { %v2589_v46 = vmul.f32 0.6931472, %v8761_v12  ;;  %v2754_v38 = vmul.f32 0.5, %v2579_v42  ;;  %4475 = vmatprep.mubr.bf16.mxu0 %v11451_v19 }
 0x2c1   :  { %v11460_v52 = vpop.f32.mrf.mxu1  ;;  %v2743_v1 = vmul.f32 0.5, %v2557_v21 }
 0x2c2   :  { %v2759_v55 = vmul.f32 0.5, %v2589_v46  ;;  %v8763_v13 = vpop.eup %8762 }
 0x2c3   :  { %v11464_v33 = vpop.f32.mrf.mxu1  ;;  %v11467_v62 = vpack.c.bf16 %v2748_v7, %v2743_v1  ;;  %v2587_v23 = vmul.f32 0.6931472, %v8763_v13 }
 0x2c4   :  { %v8765_v5 = vpop.eup %8764  ;;  %v11462_v0 = vpack.c.bf16 %v2759_v55, %v2754_v38  ;;  %4659 = vmatmul.mubr.bf16.gmra.mxu1 %v11406_v15 }
 0x2c5   :  { %v2599_v25 = vmul.f32 0.6931472, %v8765_v5  ;;  %4668 = vmatprep.mubr.bf16.mxu1 %v12791_v4  ;;  %v2758_v12 = vmul.f32 0.5, %v2587_v23 }
 0x2c6   :  { %12886 = vst [vmem:[#allocation119_spill] sm:$0xff] %v11462_v0  ;;  %v8767_v51 = vpop.eup %8766  ;;  %v11470_v58 = vpop.f32.mrf.mxu1 }
 0x2c7   :  { %v8769_v14 = vpop.eup %8768  ;;  %v2609_v34 = vmul.f32 0.6931472, %v8767_v51  ;;  %v2764_v41 = vmul.f32 0.5, %v2599_v25  ;;  %4476 = vmatmul.mubr.bf16.gmra.mxu0 %v11415_v30 }
 0x2c8   :  { %v2577_v42 = vmul.f32 0.6931472, %v8769_v14  ;;  %4485 = vmatprep.mubr.bf16.mxu0 %v11467_v62  ;;  %v11476_v29 = vpop.f32.mrf.mxu1 }
 0x2c9   :  { %v2769_v43 = vmul.f32 0.5, %v2609_v34  ;;  %v8771_v46 = vpop.eup %8770 }
 0x2ca   :  { %v11478_v35 = vpop.f32.mrf.mxu1  ;;  %v2753_v38 = vmul.f32 0.5, %v2577_v42  ;;  %v8773_v55 = vpop.eup %8772  ;;  %v2607_v5 = vmul.f32 0.6931472, %v8771_v46  ;;  %v12890_v46 = vld [vmem:[#allocation116_spill] sm:$0xff] }
 0x2cb   :  { %v11473_v6 = vpack.c.bf16 %v2769_v43, %v2764_v41  ;;  %v2597_v7 = vmul.f32 0.6931472, %v8773_v55  ;;  %v8334_v55 = vld [vmem:[#allocation7 + $0x620] ss:$20 sps:$4 sm:$0xff]  }
 0x2cc   :  { %4669 = vmatmul.mubr.bf16.gmra.mxu1 %v11426_v11  ;;  %v11481_v21 = vpop.f32.mrf.mxu1  ;;  %v11483_v13 = vpack.c.bf16 %v2758_v12, %v2753_v38  ;;  %v2768_v51 = vmul.f32 0.5, %v2607_v5  ;;  %v8338_v11 = vld [vmem:[#allocation7 + $0x128] ss:$20 sps:$4 sm:$0xff]  }
 0x2cd   :  { %12887 = vst [vmem:[#allocation31_spill] sm:$0xff] %v11473_v6  ;;  %4678 = vmatprep.mubr.bf16.mxu1 %v12791_v4  ;;  %v2763_v14 = vmul.f32 0.5, %v2597_v7  ;;  %v8341_v7 = vld [vmem:[#allocation7 + $0x5fc] ss:$20 sps:$4 sm:$0xff]  }
 0x2ce   :  { %12888 = vst [vmem:[#allocation42_spill] sm:$0xff] %v11483_v13 }
 0x2cf   :  { %4486 = vmatmul.mubr.bf16.gmra.mxu0 %v11424_v20  ;;  %v11495_v23 = vpack.c.bf16 %v2768_v51, %v2763_v14  ;;  %v12893_v51 = vld [vmem:[#allocation110_spill] sm:$0xff] }
 0x2d0   :  { %v11487_v25 = vpop.f32.mrf.mxu1  ;;  %4495 = vmatprep.mubr.bf16.mxu0 %v11483_v13 }
 0x2d1   :  { %12889 = vst [vmem:[#allocation40_spill] sm:$0xff] %v11495_v23 }
 0x2d2   :  { %v11490_v1 = vpop.f32.mrf.mxu1 }
 0x2d4   :  { %v11492_v34 = vpop.f32.mrf.mxu1  ;;  %4679 = vmatmul.mubr.bf16.gmra.mxu1 %v11448_v17  ;;  %v8339_v17 = vld [vmem:[#allocation7 + $0x5f8] ss:$20 sps:$4 sm:$0xff]  }
 0x2d5   :  { %4688 = vmatprep.mubr.bf16.mxu1 %v12791_v4 }
 0x2d6   :  { %v11498_v41 = vpop.f32.mrf.mxu1 }
 0x2d7   :  { %4496 = vmatmul.mubr.bf16.gmra.mxu0 %v11430_v63 }
 0x2d8   :  { %4505 = vmatprep.mubr.bf16.mxu0 %v11495_v23 }
 0x2da   :  { %v11502_v43 = vpop.f32.mrf.mxu1 }
 0x2dc   :  { %4689 = vmatmul.mubr.bf16.gmra.mxu1 %v11462_v0  ;;  %v11505_v42 = vpop.f32.mrf.mxu1  ;;  %v12895_v0 = vld [vmem:[#allocation81_spill] sm:$0xff] }
 0x2dd   :  { %4698 = vmatprep.mubr.bf16.mxu1 %v12791_v4 }
 0x2de   :  { %v11508_v12 = vpop.f32.mrf.mxu1 }
 0x2df   :  { %4506 = vmatmul.mubr.bf16.gmra.mxu0 %v11439_v32 }
 0x2e0   :  { %4741 = vmatprep.mubr.bf16.mxu0 %v12890_v46  ;;  %v11512_v38 = vpop.f32.mrf.mxu1 }
 0x2e1   :  { %12891 = vst [vmem:[#allocation46_spill] sm:$0xff] %v11512_v38 }
 0x2e4   :  { %4699 = vmatmul.mubr.bf16.gmra.mxu1 %v11473_v6  ;;  %v8346_v6 = vld [vmem:[#allocation7 + $0x5d4] ss:$20 sps:$4 sm:$0xff]  }
 0x2e5   :  { %4934 = vmatprep.mubr.bf16.mxu1 %v11052_v61  ;;  %v11516_v5 = vpop.f32.mrf.mxu1  ;;  %v12898_v61 = vld [vmem:[#allocation113_spill] sm:$0xff] }
 0x2e6   :  { %12892 = vst [vmem:[#allocation41_spill] sm:$0xff] %v11516_v5  ;;  %v12899_v5 = vld [vmem:[#allocation73_spill] sm:$0xff] }
 0x2e7   :  { %4742 = vmatmul.mubr.bf16.vlgmr.msra.gmra.mxu0 %v12893_v51  ;;  %v11519_v14 = vpop.f32.mrf.mxu1  ;;  %v8343_v51 = vld [vmem:[#allocation7 + $0x100] ss:$20 sps:$4 sm:$0xff]  }
 0x2e8   :  { %12894 = vst [vmem:[#allocation50_spill] sm:$0xff] %v11519_v14  ;;  %4751 = vmatprep.mubr.bf16.mxu0 %v12895_v0  ;;  %5096 = vmatpush1.bf16.msra.mxu0 %v8334_v55  ;;  %v8351_v14 = vld [vmem:[#allocation7 + $0x5ac] ss:$20 sps:$4 sm:$0xff]  }
 0x2e9   :  { %v11522_v15 = vpop.f32.mrf.mxu1  ;;  %5097 = vmatprep.subr.bf16.mxu0 %v8341_v7  ;;  %v8347_v55 = vld [vmem:[#allocation7 + $0x218] ss:$20 sps:$4 sm:$0xff]   ;;  %v12900_v0 = vld [vmem:[#allocation118_spill] sm:$0xff]  ;;  %v12902_v7 = vld [vmem:[#allocation88_spill] sm:$0xff] }
 0x2ea   :  { %12896 = vst [vmem:[#allocation36_spill] sm:$0xff] %v11522_v15 }
 0x2eb   :  { %v11524_v44 = vpop.f32.mrf.mxu1 }
 0x2ec   :  { %12897 = vst [vmem:[#allocation39_spill] sm:$0xff] %v11524_v44  ;;  %4935 = vmatmul.mubr.bf16.vlgmr.msra.gmra.mxu1 %v12898_v61  ;;  %5098 = vmatpush1.bf16.msra.mxu0 %v8339_v17  ;;  %v8349_v44 = vld [vmem:[#allocation7 + $0x5a8] ss:$20 sps:$4 sm:$0xff]   ;;  %v8348_v17 = vld [vmem:[#allocation7 + $0xd8] ss:$20 sps:$4 sm:$0xff]  }
 0x2ed   :  { %4944 = vmatprep.mubr.bf16.mxu1 %v12899_v5  ;;  %7602 = vmatpush3.bf16.msra.mxu1 %v8338_v11  ;;  %v8352_v11 = vld [vmem:[#allocation7 + $0x1f0] ss:$20 sps:$4 sm:$0xff]  }
 0x2ee   :  { %7603 = vmatprep.subr.bf16.mxu1 %v8342_v60  ;;  %5099 = vmatprep.subr.bf16.mxu0 %v8346_v6  ;;  %v8356_v5 = vld [vmem:[#allocation7 + $0x584] ss:$20 sps:$4 sm:$0xff]   ;;  %v12905_v60 = vld [vmem:[#allocation72_spill] sm:$0xff] }
 0x2ef   :  { %4752 = vmatmul.mubr.bf16.gmra.mxu0 %v12900_v0  ;;  %v11529_v15 = vpop.f32.mrf.mxu1  ;;  %v8354_v6 = vld [vmem:[#allocation7 + $0x580] ss:$20 sps:$4 sm:$0xff]  }
 0x2f0   :  { %12901 = vst [vmem:[#allocation49_spill] sm:$0xff] %v11529_v15  ;;  %4761 = vmatprep.mubr.bf16.mxu0 %v12902_v7  ;;  %5100 = vmatpush1.bf16.msra.mxu0 %v8344_v45  ;;  %v12906_v0 = vld [vmem:[#allocation112_spill] sm:$0xff] }
 0x2f1   :  { %v11532_v38 = vpop.f32.mrf.mxu1  ;;  %7604 = vmatpush3.bf16.msra.mxu1 %v8343_v51  ;;  %5101 = vmatprep.subr.bf16.mxu0 %v8351_v14  ;;  %v8353_v45 = vld [vmem:[#allocation7 + $0xb0] ss:$20 sps:$4 sm:$0xff]   ;;  %v8357_v51 = vld [vmem:[#allocation7 + $0x1c8] ss:$20 sps:$4 sm:$0xff]  }
 0x2f2   :  { %12903 = vst [vmem:[#allocation54_spill] sm:$0xff] %v11532_v38  ;;  %7605 = vmatprep.subr.bf16.mxu1 %v8347_v55  ;;  %v8361_v7 = vld [vmem:[#allocation7 + $0x55c] ss:$20 sps:$4 sm:$0xff]  }
 0x2f3   :  { %v11534_v61 = vpop.f32.mrf.mxu1  ;;  %v12908_v14 = vld [vmem:[#allocation85_spill] sm:$0xff] }
 0x2f4   :  { %12904 = vst [vmem:[#allocation45_spill] sm:$0xff] %v11534_v61  ;;  %4945 = vmatmul.mubr.bf16.gmra.mxu1 %v12905_v60  ;;  %5102 = vmatpush1.bf16.msra.mxu0 %v8349_v44  ;;  %v12910_v38 = vld [vmem:[#allocation21_spill] sm:$0xff] }
 0x2f5   :  { %4954 = vmatprep.mubr.bf16.mxu1 %v12906_v0  ;;  %v11538_v15 = vpop.f32.mrf.mxu1  ;;  %7606 = vmatpush3.bf16.msra.mxu1 %v8348_v17  ;;  %v8359_v60 = vld [vmem:[#allocation7 + $0x558] ss:$20 sps:$4 sm:$0xff]   ;;  %v8358_v44 = vld [vmem:[#allocation7 + $0x88] ss:$20 sps:$4 sm:$0xff]   ;;  %v8362_v17 = vld [vmem:[#allocation7 + $0x1a0] ss:$20 sps:$4 sm:$0xff]  }
 0x2f6   :  { %12907 = vst [vmem:[#allocation47_spill] sm:$0xff] %v11538_v15  ;;  %7607 = vmatprep.subr.bf16.mxu1 %v8352_v11  ;;  %5103 = vmatprep.subr.bf16.mxu0 %v8356_v5  ;;  %v8366_v15 = vld [vmem:[#allocation7 + $0x534] ss:$20 sps:$4 sm:$0xff]   ;;  %v12912_v61 = vld [vmem:[#allocation105_spill] sm:$0xff]  ;;  %v8364_v11 = vld [vmem:[#allocation7 + $0x530] ss:$20 sps:$4 sm:$0xff]  }
 0x2f7   :  { %4762 = vmatmul.mubr.bf16.gmra.mxu0 %v12908_v14  ;;  %v12914_v14 = vld [vmem:[#allocation75_spill] sm:$0xff] }
 0x2f8   :  { %v11541_v55 = vpop.f32.mrf.mxu1  ;;  %4771 = vmatprep.mubr.bf16.mxu0 %v12910_v38  ;;  %5104 = vmatpush1.bf16.msra.mxu0 %v8354_v6  ;;  %v8363_v38 = vld [vmem:[#allocation7 + $0x60] ss:$20 sps:$4 sm:$0xff]  }
 0x2f9   :  { %12909 = vst [vmem:[#allocation57_spill] sm:$0xff] %v11541_v55  ;;  %7608 = vmatpush3.bf16.msra.mxu1 %v8353_v45  ;;  %5105 = vmatprep.subr.bf16.mxu0 %v8361_v7  ;;  %v8371_v6 = vld [vmem:[#allocation7 + $0x50c] ss:$20 sps:$4 sm:$0xff]   ;;  %v12915_v45 = vld [vmem:[#allocation20_spill] sm:$0xff] }
 0x2fa   :  { %v11544_v0 = vpop.f32.mrf.mxu1  ;;  %7609 = vmatprep.subr.bf16.mxu1 %v8357_v51  ;;  %v8367_v7 = vld [vmem:[#allocation7 + $0x178] ss:$20 sps:$4 sm:$0xff]  }
 0x2fb   :  { %12911 = vst [vmem:[#allocation61_spill] sm:$0xff] %v11544_v0  ;;  %v12916_v51 = vld [vmem:[#allocation29_spill] sm:$0xff] }
 0x2fc   :  { %4955 = vmatmul.mubr.bf16.gmra.mxu1 %v12912_v61  ;;  %v11547_v5 = vpop.f32.mrf.mxu1  ;;  %5106 = vmatpush1.bf16.msra.mxu0 %v8359_v60  ;;  %v8369_v61 = vld [vmem:[#allocation7 + $0x508] ss:$20 sps:$4 sm:$0xff]   ;;  %v8368_v60 = vld [vmem:[#allocation7 + $0x38] ss:$20 sps:$4 sm:$0xff]  }
 0x2fd   :  { %12913 = vst [vmem:[#allocation52_spill] sm:$0xff] %v11547_v5  ;;  %4964 = vmatprep.mubr.bf16.mxu1 %v12914_v14  ;;  %7610 = vmatpush3.bf16.msra.mxu1 %v8358_v44  ;;  %v8372_v44 = vld [vmem:[#allocation7 + $0x150] ss:$20 sps:$4 sm:$0xff]   ;;  %v8374_v14 = vld [vmem:[#allocation7 + $0x4e8] ss:$20 sps:$4 sm:$0xff]  }
 0x2fe   :  { %v11550_v55 = vpop.f32.mrf.mxu1  ;;  %7611 = vmatprep.subr.bf16.mxu1 %v8362_v17  ;;  %5107 = vmatprep.subr.bf16.mxu0 %v8366_v15  ;;  %v12917_v15 = vld [vmem:[#allocation79_spill] sm:$0xff] }
 0x2ff   :  { %4772 = vmatmul.mubr.bf16.gmra.mxu0 %v12915_v45 }
 0x300   :  { %4781 = vmatprep.mubr.bf16.mxu0 %v12916_v51  ;;  %5108 = vmatpush1.bf16.msra.mxu0 %v8364_v11  ;;  %v8373_v11 = vld [vmem:[#allocation7 + $0x10] ss:$20 sps:$4 sm:$0xff]   ;;  %v11562_v51 = vld [vmem:[#allocation7 + $0x628] ss:$20 sps:$4 sm:$0xff]  }
 0x301   :  { %v11554_v0 = vpop.f32.mrf.mxu1  ;;  %7612 = vmatpush3.bf16.msra.mxu1 %v8363_v38  ;;  %5109 = vmatprep.subr.bf16.mxu0 %v8371_v6  ;;  %v12918_v38 = vld [vmem:[#allocation28_spill] sm:$0xff] }
 0x302   :  { %7613 = vmatprep.subr.bf16.mxu1 %v8367_v7  ;;  %v12920_v7 = vld [vmem:[#allocation35_spill] sm:$0xff] }
 0x303   :  { %v11556_v5 = vpop.f32.mrf.mxu1 }
 0x304   :  { %4965 = vmatmul.mubr.bf16.gmra.mxu1 %v11127_v24  ;;  %5110 = vmatpush1.bf16.msra.mxu0 %v8369_v61  ;;  %v12923_v24 = vld [vmem:[#allocation82_spill] sm:$0xff] }
 0x305   :  { %4974 = vmatprep.mubr.bf16.mxu1 %v12917_v15  ;;  %v11560_v17 = vpop.f32.mrf.mxu1  ;;  %7614 = vmatpush3.bf16.msra.mxu1 %v8368_v60  ;;  %v12922_v15 = vld [vmem:[#allocation76_spill] sm:$0xff] }
 0x306   :  { %7615 = vmatprep.subr.bf16.mxu1 %v8372_v44  ;;  %7713 = vmatprep.subr.bf16.mxu0 %v8374_v14  ;;  %v12925_v14 = vld [vmem:[#allocation33_spill] sm:$0xff] }
 0x307   :  { %4782 = vmatmul.mubr.bf16.gmra.mxu0 %v12918_v38  ;;  %v11565_v6 = vpop.f32.mrf.mxu1  ;;  %v12927_v38 = vld [vmem:[#allocation44_spill] sm:$0xff] }
 0x308   :  { %12919 = vst [vmem:[#allocation97_spill] sm:$0xff] %v11565_v6  ;;  %4791 = vmatprep.mubr.bf16.mxu0 %v12920_v7 }
 0x309   :  { %7616 = vmatpush3.bf16.msra.mxu1 %v8373_v11  ;;  %v12930_v11 = vld [vmem:[#allocation80_spill] sm:$0xff] }
 0x30a   :  { %7873 = vmatprep.subr.bf16.mxu1 %v11562_v51 }
 0x30c   :  { %v11569_v61 = vpop.f32.mrf.mxu1  ;;  %4975 = vmatmul.mubr.bf16.gmra.mxu1 %v12922_v15  ;;  %v12932_v15 = vld [vmem:[#allocation43_spill] sm:$0xff] }
 0x30d   :  { %12921 = vst [vmem:[#allocation64_spill] sm:$0xff] %v11569_v61  ;;  %4984 = vmatprep.mubr.bf16.mxu1 %v12923_v24 }
 0x30e   :  { %v11573_v60 = vpop.f32.mrf.mxu1 }
 0x30f   :  { %12924 = vst [vmem:[#allocation56_spill] sm:$0xff] %v11573_v60  ;;  %4792 = vmatmul.mubr.bf16.gmra.mxu0 %v12925_v14  ;;  %v12934_v60 = vld [vmem:[#allocation51_spill] sm:$0xff] }
 0x310   :  { %v11576_v44 = vpop.f32.mrf.mxu1  ;;  %4801 = vmatprep.mubr.bf16.mxu0 %v12927_v38 }
 0x311   :  { %12926 = vst [vmem:[#allocation95_spill] sm:$0xff] %v11576_v44 }
 0x312   :  { %v11579_v6 = vpop.f32.mrf.mxu1 }
 0x313   :  { %12928 = vst [vmem:[#allocation100_spill] sm:$0xff] %v11579_v6  ;;  %v12952_v6 = vld [vmem:[#allocation90_spill] sm:$0xff] }
 0x314   :  { %v11581_v7 = vpop.f32.mrf.mxu1  ;;  %4985 = vmatmul.mubr.bf16.gmra.mxu1 %v12930_v11  ;;  %v12938_v11 = vld [vmem:[#allocation48_spill] sm:$0xff] }
 0x315   :  { %12929 = vst [vmem:[#allocation60_spill] sm:$0xff] %v11581_v7  ;;  %4994 = vmatprep.mubr.bf16.mxu1 %v11232_v18  ;;  %v12949_v7 = vld [vmem:[#allocation58_spill] sm:$0xff] }
 0x316   :  { %v11585_v61 = vpop.f32.mrf.mxu1 }
 0x317   :  { %12931 = vst [vmem:[#allocation62_spill] sm:$0xff] %v11585_v61  ;;  %4802 = vmatmul.mubr.bf16.gmra.mxu0 %v12932_v15  ;;  %v12940_v61 = vld [vmem:[#allocation55_spill] sm:$0xff] }
 0x318   :  { %v11588_v24 = vpop.f32.mrf.mxu1  ;;  %4811 = vmatprep.mubr.bf16.mxu0 %v12934_v60 }
 0x319   :  { %12933 = vst [vmem:[#allocation67_spill] sm:$0xff] %v11588_v24 }
 0x31a   :  { %v11591_v14 = vpop.f32.mrf.mxu1 }
 0x31b   :  { %12935 = vst [vmem:[#allocation102_spill] sm:$0xff] %v11591_v14  ;;  %v12948_v14 = vld [vmem:[#allocation84_spill] sm:$0xff] }
 0x31c   :  { %v11593_v44 = vpop.f32.mrf.mxu1  ;;  %4995 = vmatmul.mubr.bf16.gmra.mxu1 %v11220_v53 }
 0x31d   :  { %12936 = vst [vmem:[#allocation101_spill] sm:$0xff] %v11593_v44  ;;  %5004 = vmatprep.mubr.bf16.mxu1 %v11270_v56  ;;  %v12944_v56 = vld [vmem:[#allocation53_spill] sm:$0xff] }
 0x31e   :  { %v11597_v38 = vpop.f32.mrf.mxu1 }
 0x31f   :  { %12937 = vst [vmem:[#allocation106_spill] sm:$0xff] %v11597_v38  ;;  %4812 = vmatmul.mubr.bf16.gmra.mxu0 %v12938_v11  ;;  %v12946_v11 = vld [vmem:[#allocation59_spill] sm:$0xff] }
 0x320   :  { %v11600_v18 = vpop.f32.mrf.mxu1  ;;  %4821 = vmatprep.mubr.bf16.mxu0 %v12940_v61 }
 0x321   :  { %12939 = vst [vmem:[#allocation103_spill] sm:$0xff] %v11600_v18 }
 0x322   :  { %v11603_v15 = vpop.f32.mrf.mxu1 }
 0x323   :  { %12941 = vst [vmem:[#allocation116_spill] sm:$0xff] %v11603_v15 }
 0x324   :  { %v11605_v24 = vpop.f32.mrf.mxu1  ;;  %5005 = vmatmul.mubr.bf16.gmra.mxu1 %v11254_v54 }
 0x325   :  { %12942 = vst [vmem:[#allocation20_spill] sm:$0xff] %v11605_v24  ;;  %5014 = vmatprep.mubr.bf16.mxu1 %v11317_v28 }
 0x326   :  { %v11609_v60 = vpop.f32.mrf.mxu1 }
 0x327   :  { %12943 = vst [vmem:[#allocation120_spill] sm:$0xff] %v11609_v60  ;;  %v4357_v53 = vpop.f32.mrf.mxu0  ;;  %4822 = vmatmul.mubr.bf16.gmra.mxu0 %v12944_v56 }
 0x328   :  { %v11612_v38 = vpop.f32.mrf.mxu1  ;;  %4831 = vmatprep.mubr.bf16.mxu0 %v12946_v11  ;;  %v4358_v18 = vadd.f32 %v4357_v53, %v11265_v40 }
 0x329   :  { %12945 = vst [vmem:[#allocation121_spill] sm:$0xff] %v11612_v38  ;;  %v4359_v61 = vpop.f32.mrf.mxu0 }
 0x32a   :  { %v11616_v44 = vpop.f32.mrf.mxu1  ;;  %v4360_v24 = vadd.f32 %v4359_v61, %v11279_v10  ;;  %v12950_v10 = vld [vmem:[#allocation96_spill] sm:$0xff] }
 0x32b   :  { %12947 = vst [vmem:[#allocation122_spill] sm:$0xff] %v11616_v44  ;;  %v4361_v15 = vpop.f32.mrf.mxu0 }
 0x32c   :  { %v4550_v54 = vpop.f32.mrf.mxu1  ;;  %5015 = vmatmul.mubr.bf16.gmra.mxu1 %v11296_v26  ;;  %v4362_v56 = vadd.f32 %v4361_v15, %v11289_v3  ;;  %v12951_v26 = vld [vmem:[#allocation22_spill] sm:$0xff] }
 0x32d   :  { %v4551_v28 = vadd.f32 %v4550_v54, %v4358_v18  ;;  %5024 = vmatprep.mubr.bf16.mxu1 %v11363_v50  ;;  %v4363_v60 = vpop.f32.mrf.mxu0 }
 0x32e   :  { %v4552_v38 = vpop.f32.mrf.mxu1  ;;  %v4364_v53 = vadd.f32 %v4363_v60, %v12948_v14 }
 0x32f   :  { %5771 = vst [vmem:[#allocation10] sm:$0xff] %v4551_v28  ;;  %v4553_v11 = vadd.f32 %v4552_v38, %v4360_v24  ;;  %v4367_v40 = vpop.f32.mrf.mxu0  ;;  %4832 = vmatmul.mubr.bf16.gmra.mxu0 %v12949_v7 }
 0x330   :  { %v4554_v44 = vpop.f32.mrf.mxu1  ;;  %4841 = vmatprep.mubr.bf16.mxu0 %v12950_v10  ;;  %v4368_v18 = vadd.f32 %v4367_v40, %v12951_v26 }
 0x331   :  { %5772 = vst [vmem:[#allocation10 + $0x8] sm:$0xff] %v4553_v11  ;;  %v4555_v61 = vadd.f32 %v4554_v44, %v4362_v56  ;;  %v4369_v54 = vpop.f32.mrf.mxu0  ;;  %v12953_v11 = vld [vmem:[#allocation92_spill] sm:$0xff] }
 0x332   :  { %v4556_v50 = vpop.f32.mrf.mxu1  ;;  %v4370_v24 = vadd.f32 %v4369_v54, %v12952_v6 }
 0x333   :  { %5776 = vst [vmem:[#allocation10 + $0x28] sm:$0xff] %v4555_v61  ;;  %v11626_v3 = vpack.c.bf16 %v4555_v61, %v4551_v28  ;;  %v4557_v15 = vadd.f32 %v4556_v50, %v4364_v53  ;;  %v4371_v38 = vpop.f32.mrf.mxu0  ;;  %v12954_v50 = vld [vmem:[#allocation63_spill] sm:$0xff] }
 0x334   :  { %v4560_v60 = vpop.f32.mrf.mxu1  ;;  %5025 = vmatmul.mubr.bf16.gmra.mxu1 %v11329_v31  ;;  %v4372_v56 = vadd.f32 %v4371_v38, %v12953_v11  ;;  %v12955_v53 = vld [vmem:[#allocation99_spill] sm:$0xff] }
 0x335   :  { %5777 = vst [vmem:[#allocation10 + $0x30] sm:$0xff] %v4557_v15  ;;  %v4561_v14 = vadd.f32 %v4560_v60, %v4368_v18  ;;  %5034 = vmatprep.mubr.bf16.mxu1 %v11402_v37  ;;  %v4373_v44 = vpop.f32.mrf.mxu0  ;;  %v12956_v15 = vld [vmem:[#allocation30_spill] sm:$0xff] }
 0x336   :  { %v4562_v26 = vpop.f32.mrf.mxu1  ;;  %v4374_v28 = vadd.f32 %v4373_v44, %v11366_v9 }
 0x337   :  { %5781 = vst [vmem:[#allocation10 + $0x50] sm:$0xff] %v4561_v14  ;;  %v4563_v40 = vadd.f32 %v4562_v26, %v4370_v24  ;;  %v4377_v61 = vpop.f32.mrf.mxu0  ;;  %4842 = vmatmul.mubr.bf16.gmra.mxu0 %v12954_v50 }
 0x338   :  { %v4564_v6 = vpop.f32.mrf.mxu1  ;;  %4851 = vmatprep.mubr.bf16.mxu0 %v12955_v53  ;;  %v4378_v18 = vadd.f32 %v4377_v61, %v12956_v15 }
 0x339   :  { %5782 = vst [vmem:[#allocation10 + $0x58] sm:$0xff] %v4563_v40  ;;  %v4565_v54 = vadd.f32 %v4564_v6, %v4372_v56  ;;  %v4379_v60 = vpop.f32.mrf.mxu0 }
 0x33a   :  { %v4566_v37 = vpop.f32.mrf.mxu1  ;;  %v4380_v24 = vadd.f32 %v4379_v60, %v11391_v22 }
 0x33b   :  { %5786 = vst [vmem:[#allocation10 + $0x78] sm:$0xff] %v4565_v54  ;;  %v11636_v38 = vpack.c.bf16 %v4565_v54, %v4561_v14  ;;  %v4567_v11 = vadd.f32 %v4566_v37, %v4374_v28  ;;  %v4381_v26 = vpop.f32.mrf.mxu0  ;;  %v12957_v37 = vld [vmem:[#allocation98_spill] sm:$0xff] }
 0x33c   :  { %v4570_v9 = vpop.f32.mrf.mxu1  ;;  %5035 = vmatmul.mubr.bf16.gmra.mxu1 %v11371_v36  ;;  %v4382_v56 = vadd.f32 %v4381_v26, %v11395_v49  ;;  %v12958_v28 = vld [vmem:[#allocation66_spill] sm:$0xff] }
 0x33d   :  { %5787 = vst [vmem:[#allocation10 + $0x80] sm:$0xff] %v4567_v11  ;;  %v4571_v44 = vadd.f32 %v4570_v9, %v4378_v18  ;;  %5044 = vmatprep.mubr.bf16.mxu1 %v11433_v2  ;;  %v4383_v40 = vpop.f32.mrf.mxu0 }
 0x33e   :  { %v4572_v61 = vpop.f32.mrf.mxu1  ;;  %v4384_v14 = vadd.f32 %v4383_v40, %v11408_v57 }
 0x33f   :  { %5791 = vst [vmem:[#allocation10 + $0xa0] sm:$0xff] %v4571_v44  ;;  %v4573_v6 = vadd.f32 %v4572_v61, %v4380_v24  ;;  %v4387_v54 = vpop.f32.mrf.mxu0  ;;  %4852 = vmatmul.mubr.bf16.gmra.mxu0 %v12957_v37 }
 0x340   :  { %v4574_v22 = vpop.f32.mrf.mxu1  ;;  %4861 = vmatprep.mubr.bf16.mxu0 %v12958_v28  ;;  %v4388_v18 = vadd.f32 %v4387_v54, %v11420_v48 }
 0x341   :  { %5792 = vst [vmem:[#allocation10 + $0xa8] sm:$0xff] %v4573_v6  ;;  %v4575_v15 = vadd.f32 %v4574_v22, %v4382_v56  ;;  %v4389_v60 = vpop.f32.mrf.mxu0  ;;  %v12960_v22 = vld [vmem:[#allocation104_spill] sm:$0xff] }
 0x342   :  { %v4576_v11 = vpop.f32.mrf.mxu1  ;;  %v4390_v24 = vadd.f32 %v4389_v60, %v11435_v39 }
 0x343   :  { %5796 = vst [vmem:[#allocation10 + $0xc8] sm:$0xff] %v4575_v15  ;;  %v11646_v49 = vpack.c.bf16 %v4575_v15, %v4571_v44  ;;  %v4577_v26 = vadd.f32 %v4576_v11, %v4384_v14  ;;  %v4391_v9 = vpop.f32.mrf.mxu0  ;;  %v12959_v14 = vld [vmem:[#allocation65_spill] sm:$0xff] }
 0x344   :  { %v4580_v57 = vpop.f32.mrf.mxu1  ;;  %5045 = vmatmul.mubr.bf16.gmra.mxu1 %v11399_v59  ;;  %v4392_v56 = vadd.f32 %v4391_v9, %v11442_v27 }
 0x345   :  { %5797 = vst [vmem:[#allocation10 + $0xd0] sm:$0xff] %v4577_v26  ;;  %v4581_v40 = vadd.f32 %v4580_v57, %v4388_v18  ;;  %5054 = vmatprep.mubr.bf16.mxu1 %v11451_v19  ;;  %v4393_v61 = vpop.f32.mrf.mxu0 }
 0x346   :  { %v4582_v48 = vpop.f32.mrf.mxu1  ;;  %v4394_v44 = vadd.f32 %v4393_v61, %v11446_v47 }
 0x347   :  { %5801 = vst [vmem:[#allocation10 + $0xf0] sm:$0xff] %v4581_v40  ;;  %v4583_v6 = vadd.f32 %v4582_v48, %v4390_v24  ;;  %v4397_v54 = vpop.f32.mrf.mxu0  ;;  %4862 = vmatmul.mubr.bf16.gmra.mxu0 %v12959_v14 }
 0x348   :  { %v4584_v39 = vpop.f32.mrf.mxu1  ;;  %4871 = vmatprep.mubr.bf16.mxu0 %v12960_v22  ;;  %v4398_v18 = vadd.f32 %v4397_v54, %v11453_v16  ;;  %v12962_v54 = vld [vmem:[#allocation107_spill] sm:$0xff] }
 0x349   :  { %5802 = vst [vmem:[#allocation10 + $0xf8] sm:$0xff] %v4583_v6  ;;  %v4585_v15 = vadd.f32 %v4584_v39, %v4392_v56  ;;  %v4399_v60 = vpop.f32.mrf.mxu0 }
 0x34a   :  { %v4586_v11 = vpop.f32.mrf.mxu1  ;;  %v4400_v24 = vadd.f32 %v4399_v60, %v11456_v8 }
 0x34b   :  { %5806 = vst [vmem:[#allocation10 + $0x118] sm:$0xff] %v4585_v15  ;;  %v11656_v27 = vpack.c.bf16 %v4585_v15, %v4581_v40  ;;  %v4587_v26 = vadd.f32 %v4586_v11, %v4394_v44  ;;  %v4401_v9 = vpop.f32.mrf.mxu0  ;;  %v12961_v44 = vld [vmem:[#allocation68_spill] sm:$0xff] }
 0x34c   :  { %v4590_v47 = vpop.f32.mrf.mxu1  ;;  %5055 = vmatmul.mubr.bf16.gmra.mxu1 %v11415_v30  ;;  %v4402_v56 = vadd.f32 %v4401_v9, %v11460_v52 }
 0x34d   :  { %5807 = vst [vmem:[#allocation10 + $0x120] sm:$0xff] %v4587_v26  ;;  %v4591_v57 = vadd.f32 %v4590_v47, %v4398_v18  ;;  %5064 = vmatprep.mubr.bf16.mxu1 %v11467_v62  ;;  %v4403_v61 = vpop.f32.mrf.mxu0 }
 0x34e   :  { %v4592_v16 = vpop.f32.mrf.mxu1  ;;  %v4404_v40 = vadd.f32 %v4403_v61, %v11464_v33 }
 0x34f   :  { %5811 = vst [vmem:[#allocation10 + $0x140] sm:$0xff] %v4591_v57  ;;  %v4593_v48 = vadd.f32 %v4592_v16, %v4400_v24  ;;  %v4407_v6 = vpop.f32.mrf.mxu0  ;;  %4872 = vmatmul.mubr.bf16.gmra.mxu0 %v12961_v44 }
 0x350   :  { %v4594_v8 = vpop.f32.mrf.mxu1  ;;  %4881 = vmatprep.mubr.bf16.mxu0 %v12962_v54  ;;  %v4408_v15 = vadd.f32 %v4407_v6, %v11470_v58 }
 0x351   :  { %5812 = vst [vmem:[#allocation10 + $0x148] sm:$0xff] %v4593_v48  ;;  %v4595_v39 = vadd.f32 %v4594_v8, %v4402_v56  ;;  %v4409_v18 = vpop.f32.mrf.mxu0  ;;  %v12964_v48 = vld [vmem:[#allocation69_spill] sm:$0xff] }
 0x352   :  { %v4596_v60 = vpop.f32.mrf.mxu1  ;;  %v4410_v26 = vadd.f32 %v4409_v18, %v11476_v29 }
 0x353   :  { %5816 = vst [vmem:[#allocation10 + $0x168] sm:$0xff] %v4595_v39  ;;  %v11666_v52 = vpack.c.bf16 %v4595_v39, %v4591_v57  ;;  %v4597_v11 = vadd.f32 %v4596_v60, %v4404_v40  ;;  %v4411_v24 = vpop.f32.mrf.mxu0  ;;  %v12965_v40 = vld [vmem:[#allocation108_spill] sm:$0xff] }
 0x354   :  { %v4600_v33 = vpop.f32.mrf.mxu1  ;;  %5065 = vmatmul.mubr.bf16.gmra.mxu1 %v11424_v20  ;;  %v4412_v47 = vadd.f32 %v4411_v24, %v11478_v35 }
 0x355   :  { %12963 = vst [vmem:[#allocation84_spill] sm:$0xff] %v11666_v52  ;;  %5817 = vst [vmem:[#allocation10 + $0x170] sm:$0xff] %v4597_v11  ;;  %v4601_v9 = vadd.f32 %v4600_v33, %v4408_v15  ;;  %5074 = vmatprep.mubr.bf16.mxu1 %v11483_v13  ;;  %v4413_v56 = vpop.f32.mrf.mxu0  ;;  %v13038_v13 = vld [vmem:[#allocation37_spill] sm:$0xff] }
 0x356   :  { %v4602_v58 = vpop.f32.mrf.mxu1  ;;  %v4414_v57 = vadd.f32 %v4413_v56, %v11481_v21 }
 0x357   :  { %5821 = vst [vmem:[#allocation10 + $0x190] sm:$0xff] %v4601_v9  ;;  %v4603_v61 = vadd.f32 %v4602_v58, %v4410_v26  ;;  %v4417_v16 = vpop.f32.mrf.mxu0  ;;  %4882 = vmatmul.mubr.bf16.gmra.mxu0 %v12964_v48  ;;  %v12967_v58 = vld [vmem:[#allocation70_spill] sm:$0xff] }
 0x358   :  { %v4604_v29 = vpop.f32.mrf.mxu1  ;;  %4891 = vmatprep.mubr.bf16.mxu0 %v12965_v40  ;;  %v4418_v8 = vadd.f32 %v4417_v16, %v11487_v25 }
 0x359   :  { %5822 = vst [vmem:[#allocation10 + $0x198] sm:$0xff] %v4603_v61  ;;  %v4605_v6 = vadd.f32 %v4604_v29, %v4412_v47  ;;  %v4419_v39 = vpop.f32.mrf.mxu0 }
 0x35a   :  { %v4606_v15 = vpop.f32.mrf.mxu1  ;;  %v4420_v60 = vadd.f32 %v4419_v39, %v11490_v1 }
 0x35b   :  { %5826 = vst [vmem:[#allocation10 + $0x1b8] sm:$0xff] %v4605_v6  ;;  %v11676_v35 = vpack.c.bf16 %v4605_v6, %v4601_v9  ;;  %v4607_v18 = vadd.f32 %v4606_v15, %v4414_v57  ;;  %v4421_v11 = vpop.f32.mrf.mxu0  ;;  %v8376_v15 = vld [vmem:[#allocation7 + $0x3a8] ss:$20 sps:$4 sm:$0xff]  }
 0x35c   :  { %v4610_v21 = vpop.f32.mrf.mxu1  ;;  %5075 = vmatmul.mubr.bf16.gmra.mxu1 %v11430_v63  ;;  %v4422_v24 = vadd.f32 %v4421_v11, %v11492_v34  ;;  %v8377_v11 = vld [vmem:[#allocation7 + $0x4c0] ss:$20 sps:$4 sm:$0xff]  }
 0x35d   :  { %12966 = vst [vmem:[#allocation58_spill] sm:$0xff] %v11676_v35  ;;  %5827 = vst [vmem:[#allocation10 + $0x1c0] sm:$0xff] %v4607_v18  ;;  %v4611_v26 = vadd.f32 %v4610_v21, %v4418_v8  ;;  %5084 = vmatprep.mubr.bf16.mxu1 %v11495_v23  ;;  %v4423_v33 = vpop.f32.mrf.mxu0  ;;  %v13036_v23 = vld [vmem:[#allocation24_spill] sm:$0xff] }
 0x35e   :  { %v4612_v25 = vpop.f32.mrf.mxu1  ;;  %v4424_v9 = vadd.f32 %v4423_v33, %v11498_v41 }
 0x35f   :  { %5831 = vst [vmem:[#allocation10 + $0x1e0] sm:$0xff] %v4611_v26  ;;  %v4613_v47 = vadd.f32 %v4612_v25, %v4420_v60  ;;  %v4427_v56 = vpop.f32.mrf.mxu0  ;;  %4892 = vmatmul.mubr.bf16.gmra.mxu0 %v12967_v58 }
 0x360   :  { %v4614_v1 = vpop.f32.mrf.mxu1  ;;  %5127 = vmatprep.mubr.bf16.mxu0 %v12791_v4  ;;  %v4428_v57 = vadd.f32 %v4427_v56, %v11502_v43 }
 0x361   :  { %5832 = vst [vmem:[#allocation10 + $0x1e8] sm:$0xff] %v4613_v47  ;;  %v4615_v61 = vadd.f32 %v4614_v1, %v4422_v24  ;;  %v4429_v16 = vpop.f32.mrf.mxu0  ;;  %v12969_v24 = vld [vmem:[#allocation46_spill] sm:$0xff] }
 0x362   :  { %v4616_v29 = vpop.f32.mrf.mxu1  ;;  %v4430_v8 = vadd.f32 %v4429_v16, %v11505_v42  ;;  %v12970_v42 = vld [vmem:[#allocation71_spill] sm:$0xff] }
 0x363   :  { %5836 = vst [vmem:[#allocation10 + $0x208] sm:$0xff] %v4615_v61  ;;  %v11686_v34 = vpack.c.bf16 %v4615_v61, %v4611_v26  ;;  %v4617_v6 = vadd.f32 %v4616_v29, %v4424_v9  ;;  %v4431_v39 = vpop.f32.mrf.mxu0  ;;  %v8379_v9 = vld [vmem:[#allocation7 + $0x380] ss:$20 sps:$4 sm:$0xff]   ;;  %v8380_v16 = vld [vmem:[#allocation7 + $0x498] ss:$20 sps:$4 sm:$0xff]  }
 0x364   :  { %v4620_v41 = vpop.f32.mrf.mxu1  ;;  %5085 = vmatmul.mubr.bf16.gmra.mxu1 %v11439_v32  ;;  %v4432_v60 = vadd.f32 %v4431_v39, %v11508_v12  ;;  %v12990_v32 = vld [vmem:[#allocation85_spill] sm:$0xff] }
 0x365   :  { %12968 = vst [vmem:[#allocation96_spill] sm:$0xff] %v11686_v34  ;;  %5837 = vst [vmem:[#allocation10 + $0x210] sm:$0xff] %v4617_v6  ;;  %v4621_v18 = vadd.f32 %v4620_v41, %v4428_v57  ;;  %5320 = vmatprep.mubr.bf16.mxu1 %v12890_v46  ;;  %v4433_v43 = vpop.f32.mrf.mxu0  ;;  %v12971_v46 = vld [vmem:[#allocation41_spill] sm:$0xff]  ;;  %v8378_v57 = vld [vmem:[#allocation7 + $0x600] ss:$20 sps:$4 sm:$0xff]  }
 0x366   :  { %v4622_v21 = vpop.f32.mrf.mxu1  ;;  %v4434_v33 = vadd.f32 %v4433_v43, %v12969_v24  ;;  %v12974_v43 = vld [vmem:[#allocation110_spill] sm:$0xff] }
 0x367   :  { %5841 = vst [vmem:[#allocation10 + $0x230] sm:$0xff] %v4621_v18  ;;  %v4623_v26 = vadd.f32 %v4622_v21, %v4430_v8  ;;  %v4437_v25 = vpop.f32.mrf.mxu0  ;;  %5128 = vmatmul.mubr.bf16.vlgmr.msra.gmra.mxu0 %v12970_v42  ;;  %v12973_v8 = vld [vmem:[#allocation50_spill] sm:$0xff]  ;;  %v8382_v21 = vld [vmem:[#allocation7 + $0x358] ss:$20 sps:$4 sm:$0xff]  }
 0x368   :  { %v4624_v47 = vpop.f32.mrf.mxu1  ;;  %7714 = vmatpush3.bf16.msra.mxu0 %v8376_v15  ;;  %5137 = vmatprep.mubr.bf16.mxu0 %v12791_v4  ;;  %v4438_v1 = vadd.f32 %v4437_v25, %v12971_v46  ;;  %v12977_v46 = vld [vmem:[#allocation39_spill] sm:$0xff] }
 0x369   :  { %5842 = vst [vmem:[#allocation10 + $0x238] sm:$0xff] %v4623_v26  ;;  %v4625_v56 = vadd.f32 %v4624_v47, %v4432_v60  ;;  %v4439_v12 = vpop.f32.mrf.mxu0  ;;  %7715 = vmatprep.subr.bf16.mxu0 %v8377_v11  ;;  %v12975_v26 = vld [vmem:[#allocation81_spill] sm:$0xff]  ;;  %v12976_v11 = vld [vmem:[#allocation36_spill] sm:$0xff] }
 0x36a   :  { %v4626_v61 = vpop.f32.mrf.mxu1  ;;  %v4440_v39 = vadd.f32 %v4439_v12, %v12973_v8  ;;  %v12979_v8 = vld [vmem:[#allocation49_spill] sm:$0xff] }
 0x36b   :  { %5846 = vst [vmem:[#allocation10 + $0x258] sm:$0xff] %v4625_v56  ;;  %v11696_v29 = vpack.c.bf16 %v4625_v56, %v4621_v18  ;;  %v4627_v6 = vadd.f32 %v4626_v61, %v4434_v33  ;;  %v4441_v41 = vpop.f32.mrf.mxu0  ;;  %v8383_v18 = vld [vmem:[#allocation7 + $0x470] ss:$20 sps:$4 sm:$0xff]   ;;  %v8381_v33 = vld [vmem:[#allocation7 + $0x5d8] ss:$20 sps:$4 sm:$0xff]  }
 0x36c   :  { %v4630_v15 = vpop.f32.mrf.mxu1  ;;  %5321 = vmatmul.mubr.bf16.vlgmr.msra.gmra.mxu1 %v12974_v43  ;;  %7716 = vmatpush3.bf16.msra.mxu0 %v8379_v9  ;;  %v4442_v24 = vadd.f32 %v4441_v41, %v12976_v11  ;;  %v12978_v61 = vld [vmem:[#allocation111_spill] sm:$0xff] }
 0x36d   :  { %12972 = vst [vmem:[#allocation22_spill] sm:$0xff] %v11696_v29  ;;  %5847 = vst [vmem:[#allocation10 + $0x260] sm:$0xff] %v4627_v6  ;;  %v4631_v60 = vadd.f32 %v4630_v15, %v4438_v1  ;;  %5328 = vmatprep.mubr.bf16.mxu1 %v12975_v26  ;;  %7874 = vmatpush3.bf16.msra.mxu1 %v11562_v51  ;;  %v4443_v25 = vpop.f32.mrf.mxu0  ;;  %v8385_v51 = vld [vmem:[#allocation7 + $0x330] ss:$20 sps:$4 sm:$0xff]   ;;  %v8386_v43 = vld [vmem:[#allocation7 + $0x448] ss:$20 sps:$4 sm:$0xff]  }
 0x36e   :  { %v4632_v47 = vpop.f32.mrf.mxu1  ;;  %7875 = vmatprep.subr.bf16.mxu1 %v8378_v57  ;;  %7717 = vmatprep.subr.bf16.mxu0 %v8380_v16  ;;  %v4444_v12 = vadd.f32 %v4443_v25, %v12977_v46  ;;  %v12981_v25 = vld [vmem:[#allocation54_spill] sm:$0xff] }
 0x36f   :  { %5851 = vst [vmem:[#allocation10 + $0x280] sm:$0xff] %v4631_v60  ;;  %v4633_v56 = vadd.f32 %v4632_v47, %v4440_v39  ;;  %v4447_v9 = vpop.f32.mrf.mxu0  ;;  %5138 = vmatmul.mubr.bf16.gmra.mxu0 %v12978_v61  ;;  %v8384_v39 = vld [vmem:[#allocation7 + $0x5b0] ss:$20 sps:$4 sm:$0xff]  }
 0x370   :  { %v4634_v1 = vpop.f32.mrf.mxu1  ;;  %5147 = vmatprep.mubr.bf16.mxu0 %v12791_v4  ;;  %7718 = vmatpush3.bf16.msra.mxu0 %v8382_v21  ;;  %v4448_v41 = vadd.f32 %v4447_v9, %v12979_v8  ;;  %v12982_v29 = vld [vmem:[#allocation118_spill] sm:$0xff] }
 0x371   :  { %5852 = vst [vmem:[#allocation10 + $0x288] sm:$0xff] %v4633_v56  ;;  %v4635_v6 = vadd.f32 %v4634_v1, %v4442_v24  ;;  %v4449_v15 = vpop.f32.mrf.mxu0  ;;  %7876 = vmatpush3.bf16.msra.mxu1 %v8378_v57  ;;  %7719 = vmatprep.subr.bf16.mxu0 %v8383_v18  ;;  %v8388_v24 = vld [vmem:[#allocation7 + $0x308] ss:$20 sps:$4 sm:$0xff]   ;;  %v12983_v57 = vld [vmem:[#allocation88_spill] sm:$0xff] }
 0x372   :  { %v4636_v16 = vpop.f32.mrf.mxu1  ;;  %7877 = vmatprep.subr.bf16.mxu1 %v8381_v33  ;;  %v4450_v47 = vadd.f32 %v4449_v15, %v12981_v25  ;;  %v12984_v18 = vld [vmem:[#allocation45_spill] sm:$0xff]  ;;  %v8389_v8 = vld [vmem:[#allocation7 + $0x420] ss:$20 sps:$4 sm:$0xff]   ;;  %v12985_v15 = vld [vmem:[#allocation47_spill] sm:$0xff] }
 0x373   :  { %5856 = vst [vmem:[#allocation10 + $0x2a8] sm:$0xff] %v4635_v6  ;;  %v11707_v26 = vpack.c.bf16 %v4635_v6, %v4631_v60  ;;  %v4637_v11 = vadd.f32 %v4636_v16, %v4444_v12  ;;  %v4451_v46 = vpop.f32.mrf.mxu0  ;;  %v8387_v12 = vld [vmem:[#allocation7 + $0x588] ss:$20 sps:$4 sm:$0xff]  }
 0x374   :  { %v4640_v21 = vpop.f32.mrf.mxu1  ;;  %5329 = vmatmul.mubr.bf16.gmra.mxu1 %v12982_v29  ;;  %7720 = vmatpush3.bf16.msra.mxu0 %v8385_v51  ;;  %v4452_v9 = vadd.f32 %v4451_v46, %v12984_v18  ;;  %v12986_v51 = vld [vmem:[#allocation74_spill] sm:$0xff] }
 0x375   :  { %12980 = vst [vmem:[#allocation90_spill] sm:$0xff] %v11707_v26  ;;  %5857 = vst [vmem:[#allocation10 + $0x2b0] sm:$0xff] %v4637_v11  ;;  %v4641_v56 = vadd.f32 %v4640_v21, %v4448_v41  ;;  %5336 = vmatprep.mubr.bf16.mxu1 %v12983_v57  ;;  %v4453_v1 = vpop.f32.mrf.mxu0  ;;  %7878 = vmatpush3.bf16.msra.mxu1 %v8381_v33  ;;  %v8391_v41 = vld [vmem:[#allocation7 + $0x2e0] ss:$20 sps:$4 sm:$0xff]   ;;  %v12987_v33 = vld [vmem:[#allocation57_spill] sm:$0xff] }
 0x376   :  { %v4642_v60 = vpop.f32.mrf.mxu1  ;;  %7879 = vmatprep.subr.bf16.mxu1 %v8384_v39  ;;  %7721 = vmatprep.subr.bf16.mxu0 %v8386_v43  ;;  %v4454_v16 = vadd.f32 %v4453_v1, %v12985_v15  ;;  %v8392_v57 = vld [vmem:[#allocation7 + $0x3f8] ss:$20 sps:$4 sm:$0xff]  }
 0x377   :  { %5861 = vst [vmem:[#allocation10 + $0x2d0] sm:$0xff] %v4641_v56  ;;  %v4643_v6 = vadd.f32 %v4642_v60, %v4450_v47  ;;  %v4457_v29 = vpop.f32.mrf.mxu0  ;;  %5148 = vmatmul.mubr.bf16.gmra.mxu0 %v12986_v51  ;;  %v8390_v47 = vld [vmem:[#allocation7 + $0x560] ss:$20 sps:$4 sm:$0xff]   ;;  %v12989_v60 = vld [vmem:[#allocation61_spill] sm:$0xff] }
 0x378   :  { %v4644_v11 = vpop.f32.mrf.mxu1  ;;  %5157 = vmatprep.mubr.bf16.mxu0 %v12791_v4  ;;  %7722 = vmatpush3.bf16.msra.mxu0 %v8388_v24  ;;  %v4458_v46 = vadd.f32 %v4457_v29, %v12987_v33  ;;  %v8395_v33 = vld [vmem:[#allocation7 + $0x3d0] ss:$20 sps:$4 sm:$0xff]  }
 0x379   :  { %5862 = vst [vmem:[#allocation10 + $0x2d8] sm:$0xff] %v4643_v6  ;;  %v4645_v25 = vadd.f32 %v4644_v11, %v4452_v9  ;;  %v4459_v21 = vpop.f32.mrf.mxu0  ;;  %7880 = vmatpush3.bf16.msra.mxu1 %v8384_v39  ;;  %7723 = vmatprep.subr.bf16.mxu0 %v8389_v8  ;;  %v8394_v9 = vld [vmem:[#allocation7 + $0x2b8] ss:$20 sps:$4 sm:$0xff]   ;;  %v12992_v8 = vld [vmem:[#allocation52_spill] sm:$0xff] }
 0x37a   :  { %v4646_v43 = vpop.f32.mrf.mxu1  ;;  %7881 = vmatprep.subr.bf16.mxu1 %v8387_v12  ;;  %v4460_v15 = vadd.f32 %v4459_v21, %v12989_v60  ;;  %v12991_v39 = vld [vmem:[#allocation21_spill] sm:$0xff]  ;;  %v8396_v60 = vld [vmem:[#allocation7 + $0x510] ss:$20 sps:$4 sm:$0xff]  }
 0x37b   :  { %5866 = vst [vmem:[#allocation10 + $0x2f8] sm:$0xff] %v4645_v25  ;;  %v11717_v18 = vpack.c.bf16 %v4645_v25, %v4641_v56  ;;  %v4647_v1 = vadd.f32 %v4646_v43, %v4454_v16  ;;  %v4461_v26 = vpop.f32.mrf.mxu0  ;;  %v8393_v16 = vld [vmem:[#allocation7 + $0x538] ss:$20 sps:$4 sm:$0xff]  }
 0x37c   :  { %v4650_v24 = vpop.f32.mrf.mxu1  ;;  %5337 = vmatmul.mubr.bf16.gmra.mxu1 %v12990_v32  ;;  %7724 = vmatpush3.bf16.msra.mxu0 %v8391_v41  ;;  %v4462_v29 = vadd.f32 %v4461_v26, %v12992_v8  ;;  %v12993_v41 = vld [vmem:[#allocation115_spill] sm:$0xff] }
 0x37d   :  { %12988 = vst [vmem:[#allocation92_spill] sm:$0xff] %v11717_v18  ;;  %5867 = vst [vmem:[#allocation10 + $0x300] sm:$0xff] %v4647_v1  ;;  %v4651_v6 = vadd.f32 %v4650_v24, %v4458_v46  ;;  %5344 = vmatprep.mubr.bf16.mxu1 %v12991_v39  ;;  %v4463_v11 = vpop.f32.mrf.mxu0  ;;  %7882 = vmatpush3.bf16.msra.mxu1 %v8387_v12  ;;  %v8397_v46 = vld [vmem:[#allocation7 + $0x290] ss:$20 sps:$4 sm:$0xff]  }
 0x37e   :  { %v4652_v56 = vpop.f32.mrf.mxu1  ;;  %7883 = vmatprep.subr.bf16.mxu1 %v8390_v47  ;;  %7725 = vmatprep.subr.bf16.mxu0 %v8392_v57  ;;  %v4464_v21 = vadd.f32 %v4463_v11, %v11550_v55 }
 0x37f   :  { %5871 = vst [vmem:[#allocation10 + $0x320] sm:$0xff] %v4651_v6  ;;  %v4653_v25 = vadd.f32 %v4652_v56, %v4460_v15  ;;  %v4467_v32 = vpop.f32.mrf.mxu0  ;;  %5158 = vmatmul.mubr.bf16.gmra.mxu0 %v12993_v41  ;;  %v8403_v15 = vld [vmem:[#allocation8 + $0x124] ss:$20 sps:$4 sm:$0xff]  }
 0x380   :  { %v4654_v43 = vpop.f32.mrf.mxu1  ;;  %5167 = vmatprep.mubr.bf16.mxu0 %v12791_v4  ;;  %7726 = vmatpush3.bf16.msra.mxu0 %v8394_v9  ;;  %v4468_v12 = vadd.f32 %v4467_v32, %v11554_v0  ;;  %v12997_v32 = vld [vmem:[#allocation117_spill] sm:$0xff] }
 0x381   :  { %5872 = vst [vmem:[#allocation10 + $0x328] sm:$0xff] %v4653_v25  ;;  %v4655_v26 = vadd.f32 %v4654_v43, %v4462_v29  ;;  %v4469_v1 = vpop.f32.mrf.mxu0  ;;  %7884 = vmatpush3.bf16.msra.mxu1 %v8390_v47  ;;  %7727 = vmatprep.subr.bf16.mxu0 %v8395_v33  ;;  %v12995_v29 = vld [vmem:[#allocation29_spill] sm:$0xff] }
 0x382   :  { %v4656_v57 = vpop.f32.mrf.mxu1  ;;  %7885 = vmatprep.subr.bf16.mxu1 %v8393_v16  ;;  %v4470_v39 = vadd.f32 %v4469_v1, %v11556_v5  ;;  %v12996_v5 = vld [vmem:[#allocation97_spill] sm:$0xff] }
 0x383   :  { %5876 = vst [vmem:[#allocation10 + $0x348] sm:$0xff] %v4655_v26  ;;  %v11727_v55 = vpack.c.bf16 %v4655_v26, %v4651_v6  ;;  %v4657_v24 = vadd.f32 %v4656_v57, %v4464_v21  ;;  %v4471_v8 = vpop.f32.mrf.mxu0  ;;  %v8400_v6 = vld [vmem:[#allocation8 + $0x11c] ss:$20 sps:$4 sm:$0xff]  }
 0x384   :  { %v4660_v9 = vpop.f32.mrf.mxu1  ;;  %5345 = vmatmul.mubr.bf16.gmra.mxu1 %v12915_v45  ;;  %7728 = vmatpush3.bf16.msra.mxu0 %v8397_v46  ;;  %v4472_v47 = vadd.f32 %v4471_v8, %v11560_v17  ;;  %v12998_v46 = vld [vmem:[#allocation64_spill] sm:$0xff] }
 0x385   :  { %12994 = vst [vmem:[#allocation63_spill] sm:$0xff] %v11727_v55  ;;  %5877 = vst [vmem:[#allocation10 + $0x350] sm:$0xff] %v4657_v24  ;;  %v4661_v0 = vadd.f32 %v4660_v9, %v4468_v12  ;;  %5352 = vmatprep.mubr.bf16.mxu1 %v12995_v29  ;;  %v4473_v11 = vpop.f32.mrf.mxu0  ;;  %7886 = vmatpush3.bf16.msra.mxu1 %v8393_v16  ;;  %v13000_v57 = vld [vmem:[#allocation56_spill] sm:$0xff]  ;;  %v13002_v29 = vld [vmem:[#allocation35_spill] sm:$0xff] }
 0x386   :  { %v4662_v33 = vpop.f32.mrf.mxu1  ;;  %7887 = vmatprep.subr.bf16.mxu1 %v8396_v60  ;;  %6396 = vmatprep.subr.bf16.mxu0 %v8403_v15  ;;  %v4474_v25 = vadd.f32 %v4473_v11, %v12996_v5  ;;  %v13001_v8 = vld [vmem:[#allocation28_spill] sm:$0xff]  ;;  %v13035_v55 = vld [vmem:[#allocation34_spill] sm:$0xff] }
 0x387   :  { %5881 = vst [vmem:[#allocation10 + $0x370] sm:$0xff] %v4661_v0  ;;  %v4663_v56 = vadd.f32 %v4662_v33, %v4470_v39  ;;  %v4477_v21 = vpop.f32.mrf.mxu0  ;;  %5168 = vmatmul.mubr.bf16.gmra.mxu0 %v12997_v32 }
 0x388   :  { %v4664_v45 = vpop.f32.mrf.mxu1  ;;  %5177 = vmatprep.mubr.bf16.mxu0 %v12791_v4  ;;  %v4478_v17 = vadd.f32 %v4477_v21, %v12998_v46 }
 0x389   :  { %5882 = vst [vmem:[#allocation10 + $0x378] sm:$0xff] %v4663_v56  ;;  %v4665_v43 = vadd.f32 %v4664_v45, %v4472_v47  ;;  %v4479_v26 = vpop.f32.mrf.mxu0  ;;  %7888 = vmatpush3.bf16.msra.mxu1 %v8396_v60  ;;  %v13003_v47 = vld [vmem:[#allocation95_spill] sm:$0xff]  ;;  %v13004_v56 = vld [vmem:[#allocation100_spill] sm:$0xff] }
 0x38a   :  { %v4666_v16 = vpop.f32.mrf.mxu1  ;;  %6203 = vmatprep.subr.bf16.mxu1 %v8400_v6  ;;  %v4480_v15 = vadd.f32 %v4479_v26, %v13000_v57  ;;  %v13008_v57 = vld [vmem:[#allocation62_spill] sm:$0xff] }
 0x38b   :  { %5886 = vst [vmem:[#allocation10 + $0x398] sm:$0xff] %v4665_v43  ;;  %v11737_v12 = vpack.c.bf16 %v4665_v43, %v4661_v0  ;;  %v4667_v1 = vadd.f32 %v4666_v16, %v4474_v25  ;;  %v4481_v24 = vpop.f32.mrf.mxu0  ;;  %v13005_v25 = vld [vmem:[#allocation83_spill] sm:$0xff]  ;;  %v13006_v43 = vld [vmem:[#allocation60_spill] sm:$0xff] }
 0x38c   :  { %v4670_v39 = vpop.f32.mrf.mxu1  ;;  %5353 = vmatmul.mubr.bf16.gmra.mxu1 %v13001_v8  ;;  %v4482_v11 = vadd.f32 %v4481_v24, %v13003_v47  ;;  %v13009_v8 = vld [vmem:[#allocation33_spill] sm:$0xff]  ;;  %v13010_v47 = vld [vmem:[#allocation44_spill] sm:$0xff] }
 0x38d   :  { %12999 = vst [vmem:[#allocation99_spill] sm:$0xff] %v11737_v12  ;;  %5887 = vst [vmem:[#allocation10 + $0x3a0] sm:$0xff] %v4667_v1  ;;  %v4671_v9 = vadd.f32 %v4670_v39, %v4478_v17  ;;  %5360 = vmatprep.mubr.bf16.mxu1 %v13002_v29  ;;  %v4483_v33 = vpop.f32.mrf.mxu0 }
 0x38e   :  { %v4672_v60 = vpop.f32.mrf.mxu1  ;;  %v4484_v0 = vadd.f32 %v4483_v33, %v13004_v56  ;;  %v13011_v33 = vld [vmem:[#allocation67_spill] sm:$0xff] }
 0x38f   :  { %5891 = vst [vmem:[#allocation10 + $0x3c0] sm:$0xff] %v4671_v9  ;;  %v4673_v6 = vadd.f32 %v4672_v60, %v4480_v15  ;;  %v4487_v5 = vpop.f32.mrf.mxu0  ;;  %5178 = vmatmul.mubr.bf16.gmra.mxu0 %v13005_v25 }
 0x390   :  { %v4674_v21 = vpop.f32.mrf.mxu1  ;;  %5187 = vmatprep.mubr.bf16.mxu0 %v12791_v4  ;;  %v4488_v46 = vadd.f32 %v4487_v5, %v13006_v43  ;;  %v13012_v5 = vld [vmem:[#allocation102_spill] sm:$0xff] }
 0x391   :  { %5892 = vst [vmem:[#allocation10 + $0x3c8] sm:$0xff] %v4673_v6  ;;  %v4675_v45 = vadd.f32 %v4674_v21, %v4482_v11  ;;  %v4489_v17 = vpop.f32.mrf.mxu0 }
 0x392   :  { %v4676_v26 = vpop.f32.mrf.mxu1  ;;  %v4490_v15 = vadd.f32 %v4489_v17, %v13008_v57  ;;  %v13014_v17 = vld [vmem:[#allocation101_spill] sm:$0xff] }
 0x393   :  { %5896 = vst [vmem:[#allocation10 + $0x3e8] sm:$0xff] %v4675_v45  ;;  %v11747_v16 = vpack.c.bf16 %v4675_v45, %v4671_v9  ;;  %v4677_v1 = vadd.f32 %v4676_v26, %v4484_v0  ;;  %v4491_v24 = vpop.f32.mrf.mxu0  ;;  %v13013_v0 = vld [vmem:[#allocation77_spill] sm:$0xff] }
 0x394   :  { %v4680_v39 = vpop.f32.mrf.mxu1  ;;  %5361 = vmatmul.mubr.bf16.gmra.mxu1 %v13009_v8  ;;  %v4492_v11 = vadd.f32 %v4491_v24, %v13011_v33  ;;  %v13017_v33 = vld [vmem:[#allocation43_spill] sm:$0xff] }
 0x395   :  { %13007 = vst [vmem:[#allocation30_spill] sm:$0xff] %v11747_v16  ;;  %5897 = vst [vmem:[#allocation10 + $0x3f0] sm:$0xff] %v4677_v1  ;;  %v4681_v29 = vadd.f32 %v4680_v39, %v4488_v46  ;;  %5368 = vmatprep.mubr.bf16.mxu1 %v13010_v47  ;;  %v4493_v60 = vpop.f32.mrf.mxu0  ;;  %v13016_v39 = vld [vmem:[#allocation106_spill] sm:$0xff] }
 0x396   :  { %v4682_v6 = vpop.f32.mrf.mxu1  ;;  %v4494_v9 = vadd.f32 %v4493_v60, %v13012_v5  ;;  %v13028_v16 = vld [vmem:[#allocation122_spill] sm:$0xff] }
 0x397   :  { %5901 = vst [vmem:[#allocation10 + $0x410] sm:$0xff] %v4681_v29  ;;  %v4683_v56 = vadd.f32 %v4682_v6, %v4490_v15  ;;  %v4497_v21 = vpop.f32.mrf.mxu0  ;;  %5188 = vmatmul.mubr.bf16.gmra.mxu0 %v13013_v0  ;;  %v13018_v6 = vld [vmem:[#allocation51_spill] sm:$0xff] }
 0x398   :  { %v4684_v45 = vpop.f32.mrf.mxu1  ;;  %5197 = vmatprep.mubr.bf16.mxu0 %v12791_v4  ;;  %v4498_v46 = vadd.f32 %v4497_v21, %v13014_v17  ;;  %v13020_v17 = vld [vmem:[#allocation116_spill] sm:$0xff] }
 0x399   :  { %5902 = vst [vmem:[#allocation10 + $0x418] sm:$0xff] %v4683_v56  ;;  %v4685_v43 = vadd.f32 %v4684_v45, %v4492_v11  ;;  %v4499_v26 = vpop.f32.mrf.mxu0  ;;  %v13019_v56 = vld [vmem:[#allocation103_spill] sm:$0xff] }
 0x39a   :  { %v4686_v1 = vpop.f32.mrf.mxu1  ;;  %v4500_v15 = vadd.f32 %v4499_v26, %v13016_v39 }
 0x39b   :  { %5906 = vst [vmem:[#allocation10 + $0x438] sm:$0xff] %v4685_v43  ;;  %v11757_v57 = vpack.c.bf16 %v4685_v43, %v4681_v29  ;;  %v4687_v24 = vadd.f32 %v4686_v1, %v4494_v9  ;;  %v4501_v8 = vpop.f32.mrf.mxu0  ;;  %v13021_v9 = vld [vmem:[#allocation91_spill] sm:$0xff] }
 0x39c   :  { %v4690_v47 = vpop.f32.mrf.mxu1  ;;  %5369 = vmatmul.mubr.bf16.gmra.mxu1 %v13017_v33  ;;  %v4502_v11 = vadd.f32 %v4501_v8, %v13019_v56 }
 0x39d   :  { %13015 = vst [vmem:[#allocation98_spill] sm:$0xff] %v11757_v57  ;;  %5907 = vst [vmem:[#allocation10 + $0x440] sm:$0xff] %v4687_v24  ;;  %v4691_v60 = vadd.f32 %v4690_v47, %v4498_v46  ;;  %5376 = vmatprep.mubr.bf16.mxu1 %v13018_v6  ;;  %v4503_v5 = vpop.f32.mrf.mxu0  ;;  %v13022_v24 = vld [vmem:[#allocation20_spill] sm:$0xff]  ;;  %v13026_v57 = vld [vmem:[#allocation55_spill] sm:$0xff] }
 0x39e   :  { %v4692_v21 = vpop.f32.mrf.mxu1  ;;  %v4504_v29 = vadd.f32 %v4503_v5, %v13020_v17  ;;  %v13024_v6 = vld [vmem:[#allocation120_spill] sm:$0xff] }
 0x39f   :  { %5911 = vst [vmem:[#allocation10 + $0x460] sm:$0xff] %v4691_v60  ;;  %v4693_v45 = vadd.f32 %v4692_v21, %v4500_v15  ;;  %v4507_v43 = vpop.f32.mrf.mxu0  ;;  %5198 = vmatmul.mubr.bf16.gmra.mxu0 %v13021_v9  ;;  %v13025_v21 = vld [vmem:[#allocation48_spill] sm:$0xff] }
 0x3a0   :  { %v4694_v26 = vpop.f32.mrf.mxu1  ;;  %5207 = vmatprep.mubr.bf16.mxu0 %v12791_v4  ;;  %v4508_v46 = vadd.f32 %v4507_v43, %v13022_v24 }
 0x3a1   :  { %5912 = vst [vmem:[#allocation10 + $0x468] sm:$0xff] %v4693_v45  ;;  %v4695_v1 = vadd.f32 %v4694_v26, %v4502_v11  ;;  %v4509_v39 = vpop.f32.mrf.mxu0  ;;  %v13027_v45 = vld [vmem:[#allocation121_spill] sm:$0xff] }
 0x3a2   :  { %v4696_v47 = vpop.f32.mrf.mxu1  ;;  %v4510_v15 = vadd.f32 %v4509_v39, %v13024_v6 }
 0x3a3   :  { %5916 = vst [vmem:[#allocation10 + $0x488] sm:$0xff] %v4695_v1  ;;  %v11767_v8 = vpack.c.bf16 %v4695_v1, %v4691_v60  ;;  %v4697_v33 = vadd.f32 %v4696_v47, %v4504_v29  ;;  %v4511_v56 = vpop.f32.mrf.mxu0  ;;  %v13029_v29 = vld [vmem:[#allocation86_spill] sm:$0xff] }
 0x3a4   :  { %v4700_v5 = vpop.f32.mrf.mxu1  ;;  %5377 = vmatmul.mubr.bf16.gmra.mxu1 %v13025_v21  ;;  %v4512_v11 = vadd.f32 %v4511_v56, %v13027_v45  ;;  %v13031_v21 = vld [vmem:[#allocation53_spill] sm:$0xff] }
 0x3a5   :  { %13023 = vst [vmem:[#allocation66_spill] sm:$0xff] %v11767_v8  ;;  %5917 = vst [vmem:[#allocation10 + $0x490] sm:$0xff] %v4697_v33  ;;  %v4701_v17 = vadd.f32 %v4700_v5, %v4508_v46  ;;  %5384 = vmatprep.mubr.bf16.mxu1 %v13026_v57  ;;  %v4513_v26 = vpop.f32.mrf.mxu0 }
 0x3a6   :  { %v4702_v43 = vpop.f32.mrf.mxu1  ;;  %v4514_v60 = vadd.f32 %v4513_v26, %v13028_v16 }
 0x3a7   :  { %5921 = vst [vmem:[#allocation10 + $0x4b0] sm:$0xff] %v4701_v17  ;;  %v4703_v24 = vadd.f32 %v4702_v43, %v4510_v15  ;;  %v4743_v1 = vpop.f32.mrf.mxu0  ;;  %5208 = vmatmul.mubr.bf16.gmra.mxu0 %v13029_v29  ;;  %v13032_v15 = vld [vmem:[#allocation59_spill] sm:$0xff] }
 0x3a8   :  { %v4704_v39 = vpop.f32.mrf.mxu1  ;;  %5217 = vmatprep.mubr.bf16.mxu0 %v12791_v4 }
 0x3a9   :  { %5922 = vst [vmem:[#allocation10 + $0x4b8] sm:$0xff] %v4703_v24  ;;  %v4705_v47 = vadd.f32 %v4704_v39, %v4512_v11  ;;  %v4745_v33 = vpop.f32.mrf.mxu0  ;;  %v13033_v24 = vld [vmem:[#allocation23_spill] sm:$0xff] }
 0x3aa   :  { %v4706_v46 = vpop.f32.mrf.mxu1 }
 0x3ab   :  { %5926 = vst [vmem:[#allocation10 + $0x4d8] sm:$0xff] %v4705_v47  ;;  %v11776_v57 = vpack.c.bf16 %v4705_v47, %v4701_v17  ;;  %v4707_v6 = vadd.f32 %v4706_v46, %v4514_v60  ;;  %v4747_v56 = vpop.f32.mrf.mxu0 }
 0x3ac   :  { %v4936_v5 = vpop.f32.mrf.mxu1  ;;  %5385 = vmatmul.mubr.bf16.gmra.mxu1 %v13031_v21 }
 0x3ad   :  { %13030 = vst [vmem:[#allocation65_spill] sm:$0xff] %v11776_v57  ;;  %5927 = vst [vmem:[#allocation10 + $0x4e0] sm:$0xff] %v4707_v6  ;;  %v11779_v16 = vadd.f32 %v4936_v5, %v4743_v1  ;;  %5392 = vmatprep.mubr.bf16.mxu1 %v13032_v15  ;;  %v4749_v45 = vpop.f32.mrf.mxu0  ;;  %v13034_v57 = vld [vmem:[#allocation25_spill] sm:$0xff] }
 0x3ae   :  { %v4938_v26 = vpop.f32.mrf.mxu1 }
 0x3af   :  { %v11782_v43 = vadd.f32 %v4938_v26, %v4745_v33  ;;  %v4753_v11 = vpop.f32.mrf.mxu0  ;;  %5218 = vmatmul.mubr.bf16.gmra.mxu0 %v13033_v24 }
 0x3b0   :  { %v4940_v39 = vpop.f32.mrf.mxu1  ;;  %5227 = vmatprep.mubr.bf16.mxu0 %v12791_v4 }
 0x3b1   :  { %v11786_v17 = vadd.f32 %v4940_v39, %v4747_v56  ;;  %v4755_v60 = vpop.f32.mrf.mxu0 }
 0x3b2   :  { %v4942_v47 = vpop.f32.mrf.mxu1 }
 0x3b3   :  { %v11788_v46 = vadd.f32 %v4942_v47, %v4749_v45  ;;  %v4757_v1 = vpop.f32.mrf.mxu0 }
 0x3b4   :  { %v4946_v6 = vpop.f32.mrf.mxu1  ;;  %5393 = vmatmul.mubr.bf16.gmra.mxu1 %v12949_v7 }
 0x3b5   :  { %v11791_v5 = vadd.f32 %v4946_v6, %v4753_v11  ;;  %5400 = vmatprep.mubr.bf16.mxu1 %v12950_v10  ;;  %v4759_v33 = vpop.f32.mrf.mxu0 }
 0x3b6   :  { %v4948_v21 = vpop.f32.mrf.mxu1 }
 0x3b7   :  { %v11794_v15 = vadd.f32 %v4948_v21, %v4755_v60  ;;  %v4763_v26 = vpop.f32.mrf.mxu0  ;;  %5228 = vmatmul.mubr.bf16.gmra.mxu0 %v13034_v57 }
 0x3b8   :  { %v4950_v56 = vpop.f32.mrf.mxu1  ;;  %5237 = vmatprep.mubr.bf16.mxu0 %v12791_v4 }
 0x3b9   :  { %v11798_v45 = vadd.f32 %v4950_v56, %v4757_v1  ;;  %v4765_v39 = vpop.f32.mrf.mxu0 }
 0x3ba   :  { %v4952_v47 = vpop.f32.mrf.mxu1 }
 0x3bb   :  { %v11800_v8 = vadd.f32 %v4952_v47, %v4759_v33  ;;  %v4767_v7 = vpop.f32.mrf.mxu0 }
 0x3bc   :  { %v4956_v11 = vpop.f32.mrf.mxu1  ;;  %5401 = vmatmul.mubr.bf16.gmra.mxu1 %v12954_v50 }
 0x3bd   :  { %v11803_v10 = vadd.f32 %v4956_v11, %v4763_v26  ;;  %5408 = vmatprep.mubr.bf16.mxu1 %v12955_v53  ;;  %v4769_v60 = vpop.f32.mrf.mxu0 }
 0x3be   :  { %v4958_v6 = vpop.f32.mrf.mxu1 }
 0x3bf   :  { %v11806_v21 = vadd.f32 %v4958_v6, %v4765_v39  ;;  %v4773_v12 = vpop.f32.mrf.mxu0  ;;  %5238 = vmatmul.mubr.bf16.gmra.mxu0 %v13035_v55 }
 0x3c0   :  { %v4960_v1 = vpop.f32.mrf.mxu1  ;;  %5247 = vmatprep.mubr.bf16.mxu0 %v12791_v4 }
 0x3c1   :  { %v11810_v33 = vadd.f32 %v4960_v1, %v4767_v7  ;;  %v4775_v56 = vpop.f32.mrf.mxu0 }
 0x3c2   :  { %v4962_v47 = vpop.f32.mrf.mxu1 }
 0x3c3   :  { %v11812_v18 = vadd.f32 %v4962_v47, %v4769_v60  ;;  %v4777_v50 = vpop.f32.mrf.mxu0 }
 0x3c4   :  { %v4966_v26 = vpop.f32.mrf.mxu1  ;;  %5409 = vmatmul.mubr.bf16.gmra.mxu1 %v12957_v37 }
 0x3c5   :  { %v11815_v53 = vadd.f32 %v4966_v26, %v4773_v12  ;;  %5416 = vmatprep.mubr.bf16.mxu1 %v12958_v28  ;;  %v4779_v39 = vpop.f32.mrf.mxu0 }
 0x3c6   :  { %v4968_v11 = vpop.f32.mrf.mxu1 }
 0x3c7   :  { %v11818_v6 = vadd.f32 %v4968_v11, %v4775_v56  ;;  %v4783_v34 = vpop.f32.mrf.mxu0  ;;  %5248 = vmatmul.mubr.bf16.gmra.mxu0 %v13036_v23 }
 0x3c8   :  { %v4970_v7 = vpop.f32.mrf.mxu1  ;;  %5257 = vmatprep.mubr.bf16.mxu0 %v12791_v4 }
 0x3c9   :  { %v11822_v60 = vadd.f32 %v4970_v7, %v4777_v50  ;;  %v4785_v1 = vpop.f32.mrf.mxu0 }
 0x3ca   :  { %v4972_v47 = vpop.f32.mrf.mxu1 }
 0x3cb   :  { %v11824_v63 = vadd.f32 %v4972_v47, %v4779_v39  ;;  %v4787_v37 = vpop.f32.mrf.mxu0 }
 0x3cc   :  { %v4976_v12 = vpop.f32.mrf.mxu1  ;;  %5417 = vmatmul.mubr.bf16.gmra.mxu1 %v12959_v14 }
 0x3cd   :  { %v11827_v28 = vadd.f32 %v4976_v12, %v4783_v34  ;;  %5424 = vmatprep.mubr.bf16.mxu1 %v12960_v22  ;;  %v4789_v56 = vpop.f32.mrf.mxu0 }
 0x3ce   :  { %v4978_v26 = vpop.f32.mrf.mxu1 }
 0x3cf   :  { %v11830_v11 = vadd.f32 %v4978_v26, %v4785_v1  ;;  %v4793_v35 = vpop.f32.mrf.mxu0  ;;  %5258 = vmatmul.mubr.bf16.gmra.mxu0 %v13038_v13 }
 0x3d0   :  { %v4980_v50 = vpop.f32.mrf.mxu1  ;;  %5267 = vmatprep.mubr.bf16.mxu0 %v12791_v4 }
 0x3d1   :  { %13037 = vst [vmem:[#allocation104_spill] sm:$0xff] %v11830_v11  ;;  %v11834_v39 = vadd.f32 %v4980_v50, %v4787_v37  ;;  %v4795_v7 = vpop.f32.mrf.mxu0  ;;  %v13042_v11 = vld [vmem:[#allocation119_spill] sm:$0xff] }
 0x3d2   :  { %v4982_v47 = vpop.f32.mrf.mxu1 }
 0x3d3   :  { %v11836_v20 = vadd.f32 %v4982_v47, %v4789_v56  ;;  %v4797_v14 = vpop.f32.mrf.mxu0 }
 0x3d4   :  { %v4986_v34 = vpop.f32.mrf.mxu1  ;;  %5425 = vmatmul.mubr.bf16.gmra.mxu1 %v12961_v44 }
 0x3d5   :  { %13039 = vst [vmem:[#allocation68_spill] sm:$0xff] %v11836_v20  ;;  %v11839_v22 = vadd.f32 %v4986_v34, %v4793_v35  ;;  %5432 = vmatprep.mubr.bf16.mxu1 %v12962_v54  ;;  %v4799_v1 = vpop.f32.mrf.mxu0 }
 0x3d6   :  { %v4988_v12 = vpop.f32.mrf.mxu1 }
 0x3d7   :  { %13040 = vst [vmem:[#allocation107_spill] sm:$0xff] %v11839_v22  ;;  %v11842_v26 = vadd.f32 %v4988_v12, %v4795_v7  ;;  %v4803_v52 = vpop.f32.mrf.mxu0  ;;  %5268 = vmatmul.mubr.bf16.gmra.mxu0 %v13042_v11  ;;  %v13047_v22 = vld [vmem:[#allocation31_spill] sm:$0xff] }
 0x3d8   :  { %v4990_v37 = vpop.f32.mrf.mxu1  ;;  %5277 = vmatprep.mubr.bf16.mxu0 %v12791_v4 }
 0x3d9   :  { %13041 = vst [vmem:[#allocation69_spill] sm:$0xff] %v11842_v26  ;;  %v11846_v56 = vadd.f32 %v4990_v37, %v4797_v14  ;;  %v4805_v50 = vpop.f32.mrf.mxu0  ;;  %v13048_v37 = vld [vmem:[#allocation109_spill] sm:$0xff] }
 0x3da   :  { %v4992_v47 = vpop.f32.mrf.mxu1 }
 0x3db   :  { %13043 = vst [vmem:[#allocation108_spill] sm:$0xff] %v11846_v56  ;;  %v11848_v20 = vadd.f32 %v4992_v47, %v4799_v1  ;;  %v4807_v44 = vpop.f32.mrf.mxu0 }
 0x3dc   :  { %v4996_v35 = vpop.f32.mrf.mxu1  ;;  %5433 = vmatmul.mubr.bf16.gmra.mxu1 %v12964_v48 }
 0x3dd   :  { %13044 = vst [vmem:[#allocation70_spill] sm:$0xff] %v11848_v20  ;;  %v11851_v54 = vadd.f32 %v4996_v35, %v4803_v52  ;;  %5440 = vmatprep.mubr.bf16.mxu1 %v12965_v40  ;;  %v4809_v7 = vpop.f32.mrf.mxu0  ;;  %v8401_v40 = vld [vmem:[#allocation8 + $0x120] ss:$20 sps:$4 sm:$0xff]  }
 0x3de   :  { %v4998_v34 = vpop.f32.mrf.mxu1 }
 0x3df   :  { %13045 = vst [vmem:[#allocation46_spill] sm:$0xff] %v11851_v54  ;;  %v11854_v12 = vadd.f32 %v4998_v34, %v4805_v50  ;;  %v4813_v26 = vpop.f32.mrf.mxu0  ;;  %5278 = vmatmul.mubr.bf16.gmra.mxu0 %v13047_v22  ;;  %v8412_v34 = vld [vmem:[#allocation8 + $0xfc] ss:$20 sps:$4 sm:$0xff]  }
 0x3e0   :  { %v5000_v14 = vpop.f32.mrf.mxu1  ;;  %5481 = vmatprep.mubr.bf16.mxu0 %v13048_v37 }
 0x3e1   :  { %13046 = vst [vmem:[#allocation71_spill] sm:$0xff] %v11854_v12  ;;  %v11858_v1 = vadd.f32 %v5000_v14, %v4807_v44  ;;  %v4815_v47 = vpop.f32.mrf.mxu0  ;;  %v13053_v14 = vld [vmem:[#allocation113_spill] sm:$0xff] }
 0x3e2   :  { %v5002_v20 = vpop.f32.mrf.mxu1 }
 0x3e3   :  { %13049 = vst [vmem:[#allocation41_spill] sm:$0xff] %v11858_v1  ;;  %v11860_v56 = vadd.f32 %v5002_v20, %v4809_v7  ;;  %v4817_v52 = vpop.f32.mrf.mxu0  ;;  %v13054_v20 = vld [vmem:[#allocation73_spill] sm:$0xff] }
 0x3e4   :  { %v5006_v48 = vpop.f32.mrf.mxu1  ;;  %5441 = vmatmul.mubr.bf16.gmra.mxu1 %v12967_v58  ;;  %v8410_v7 = vld [vmem:[#allocation8 + $0xf8] ss:$20 sps:$4 sm:$0xff]  }
 0x3e5   :  { %13050 = vst [vmem:[#allocation50_spill] sm:$0xff] %v11860_v56  ;;  %v11863_v35 = vadd.f32 %v5006_v48, %v4813_v26  ;;  %7889 = vmatprep.mubr.bf16.mxu1 %v12970_v42  ;;  %v4819_v50 = vpop.f32.mrf.mxu0  ;;  %v8398_v58 = vld [vmem:[#allocation8 + $0x118] ss:$20 sps:$4 sm:$0xff]   ;;  %v8406_v42 = vld [vmem:[#allocation8 + $0xf4] ss:$20 sps:$4 sm:$0xff]  }
 0x3e6   :  { %v5008_v12 = vpop.f32.mrf.mxu1 }
 0x3e7   :  { %13051 = vst [vmem:[#allocation110_spill] sm:$0xff] %v11863_v35  ;;  %v11866_v54 = vadd.f32 %v5008_v12, %v4815_v47  ;;  %v4823_v44 = vpop.f32.mrf.mxu0  ;;  %5482 = vmatmul.mubr.bf16.vlgmr.msra.gmra.mxu0 %v13053_v14  ;;  %v8421_v35 = vld [vmem:[#allocation8 + $0xd4] ss:$20 sps:$4 sm:$0xff]   ;;  %v8419_v14 = vld [vmem:[#allocation8 + $0xd0] ss:$20 sps:$4 sm:$0xff]  }
 0x3e8   :  { %v5010_v37 = vpop.f32.mrf.mxu1  ;;  %5489 = vmatprep.mubr.bf16.mxu0 %v13054_v20  ;;  %6397 = vmatpush1.bf16.msra.mxu0 %v8401_v40  ;;  %v8404_v40 = vld [vmem:[#allocation8 + $0xf0] ss:$20 sps:$4 sm:$0xff]   ;;  %v8409_v20 = vld [vmem:[#allocation8 + $0xcc] ss:$20 sps:$4 sm:$0xff]  }
 0x3e9   :  { %13052 = vst [vmem:[#allocation81_spill] sm:$0xff] %v11866_v54  ;;  %v11870_v56 = vadd.f32 %v5010_v37, %v4817_v52  ;;  %v4825_v26 = vpop.f32.mrf.mxu0  ;;  %6398 = vmatprep.subr.bf16.mxu0 %v8412_v34  ;;  %v8430_v37 = vld [vmem:[#allocation8 + $0xac] ss:$20 sps:$4 sm:$0xff]  }
 0x3ea   :  { %v5012_v48 = vpop.f32.mrf.mxu1 }
 0x3eb   :  { %v11872_v1 = vadd.f32 %v5012_v48, %v4819_v50  ;;  %v4827_v12 = vpop.f32.mrf.mxu0 }
 0x3ec   :  { %v5016_v47 = vpop.f32.mrf.mxu1  ;;  %7890 = vmatmul.mubr.bf16.vlgmr.msra.gmra.mxu1 %v12978_v61  ;;  %6399 = vmatpush1.bf16.msra.mxu0 %v8410_v7  ;;  %v13059_v7 = vld [vmem:[#allocation112_spill] sm:$0xff] }
 0x3ed   :  { %13055 = vst [vmem:[#allocation36_spill] sm:$0xff] %v11872_v1  ;;  %v11875_v54 = vadd.f32 %v5016_v47, %v4823_v44  ;;  %7893 = vmatprep.mubr.bf16.mxu1 %v12986_v51  ;;  %6204 = vmatpush1.bf16.msra.mxu1 %v8398_v58  ;;  %v4829_v52 = vpop.f32.mrf.mxu0  ;;  %v13058_v1 = vld [vmem:[#allocation72_spill] sm:$0xff]  ;;  %v8428_v44 = vld [vmem:[#allocation8 + $0xa8] ss:$20 sps:$4 sm:$0xff]  }
 0x3ee   :  { %v5018_v34 = vpop.f32.mrf.mxu1  ;;  %6205 = vmatprep.subr.bf16.mxu1 %v8406_v42  ;;  %6400 = vmatprep.subr.bf16.mxu0 %v8421_v35  ;;  %v8407_v58 = vld [vmem:[#allocation8 + $0xc8] ss:$20 sps:$4 sm:$0xff]   ;;  %v8415_v42 = vld [vmem:[#allocation8 + $0xa4] ss:$20 sps:$4 sm:$0xff]  }
 0x3ef   :  { %13056 = vst [vmem:[#allocation39_spill] sm:$0xff] %v11875_v54  ;;  %v11878_v50 = vadd.f32 %v5018_v34, %v4825_v26  ;;  %v4833_v48 = vpop.f32.mrf.mxu0  ;;  %5490 = vmatmul.mubr.bf16.gmra.mxu0 %v13058_v1  ;;  %v8436_v35 = vld [vmem:[#allocation8 + $0x84] ss:$20 sps:$4 sm:$0xff]   ;;  %v8434_v1 = vld [vmem:[#allocation8 + $0x80] ss:$20 sps:$4 sm:$0xff]  }
 0x3f0   :  { %v5020_v61 = vpop.f32.mrf.mxu1  ;;  %5497 = vmatprep.mubr.bf16.mxu0 %v13059_v7  ;;  %6401 = vmatpush1.bf16.msra.mxu0 %v8419_v14  ;;  %v13062_v7 = vld [vmem:[#allocation105_spill] sm:$0xff] }
 0x3f1   :  { %13057 = vst [vmem:[#allocation111_spill] sm:$0xff] %v11878_v50  ;;  %v11882_v47 = vadd.f32 %v5020_v61, %v4827_v12  ;;  %v4835_v51 = vpop.f32.mrf.mxu0  ;;  %6206 = vmatpush1.bf16.msra.mxu1 %v8404_v40  ;;  %6402 = vmatprep.subr.bf16.mxu0 %v8430_v37  ;;  %v8413_v40 = vld [vmem:[#allocation8 + $0xa0] ss:$20 sps:$4 sm:$0xff]   ;;  %v8440_v37 = vld [vmem:[#allocation8 + $0x5c] ss:$20 sps:$4 sm:$0xff]  }
 0x3f2   :  { %v5022_v54 = vpop.f32.mrf.mxu1  ;;  %6207 = vmatprep.subr.bf16.mxu1 %v8409_v20  ;;  %v8418_v20 = vld [vmem:[#allocation8 + $0x7c] ss:$20 sps:$4 sm:$0xff]  }
 0x3f3   :  { %v11884_v26 = vadd.f32 %v5022_v54, %v4829_v52  ;;  %v4837_v34 = vpop.f32.mrf.mxu0 }
 0x3f4   :  { %v5026_v50 = vpop.f32.mrf.mxu1  ;;  %7894 = vmatmul.mubr.bf16.gmra.mxu1 %v12993_v41  ;;  %6403 = vmatpush1.bf16.msra.mxu0 %v8428_v44  ;;  %v13063_v44 = vld [vmem:[#allocation75_spill] sm:$0xff] }
 0x3f5   :  { %v11887_v14 = vadd.f32 %v5026_v50, %v4833_v48  ;;  %7897 = vmatprep.mubr.bf16.mxu1 %v12997_v32  ;;  %v4839_v12 = vpop.f32.mrf.mxu0  ;;  %6208 = vmatpush1.bf16.msra.mxu1 %v8407_v58  ;;  %v8438_v50 = vld [vmem:[#allocation8 + $0x58] ss:$20 sps:$4 sm:$0xff]  }
 0x3f6   :  { %v5028_v61 = vpop.f32.mrf.mxu1  ;;  %6209 = vmatprep.subr.bf16.mxu1 %v8415_v42  ;;  %6404 = vmatprep.subr.bf16.mxu0 %v8436_v35  ;;  %v8416_v58 = vld [vmem:[#allocation8 + $0x78] ss:$20 sps:$4 sm:$0xff]   ;;  %v8424_v42 = vld [vmem:[#allocation8 + $0x54] ss:$20 sps:$4 sm:$0xff]  }
 0x3f7   :  { %13060 = vst [vmem:[#allocation49_spill] sm:$0xff] %v11887_v14  ;;  %v11890_v54 = vadd.f32 %v5028_v61, %v4835_v51  ;;  %v4843_v52 = vpop.f32.mrf.mxu0  ;;  %5498 = vmatmul.mubr.bf16.gmra.mxu0 %v13062_v7  ;;  %v8444_v35 = vld [vmem:[#allocation8 + $0x34] ss:$20 sps:$4 sm:$0xff]   ;;  %v8442_v7 = vld [vmem:[#allocation8 + $0x30] ss:$20 sps:$4 sm:$0xff]  }
 0x3f8   :  { %v5030_v41 = vpop.f32.mrf.mxu1  ;;  %5505 = vmatprep.mubr.bf16.mxu0 %v13063_v44  ;;  %6405 = vmatpush1.bf16.msra.mxu0 %v8434_v1  ;;  %v13065_v44 = vld [vmem:[#allocation114_spill] sm:$0xff] }
 0x3f9   :  { %13061 = vst [vmem:[#allocation54_spill] sm:$0xff] %v11890_v54  ;;  %v11894_v48 = vadd.f32 %v5030_v41, %v4837_v34  ;;  %v4845_v32 = vpop.f32.mrf.mxu0  ;;  %6210 = vmatpush1.bf16.msra.mxu1 %v8413_v40  ;;  %6406 = vmatprep.subr.bf16.mxu0 %v8440_v37  ;;  %v8422_v40 = vld [vmem:[#allocation8 + $0x50] ss:$20 sps:$4 sm:$0xff]   ;;  %v8448_v37 = vld [vmem:[#allocation8 + $0xc] ss:$20 sps:$4 sm:$0xff]  }
 0x3fa   :  { %v5032_v14 = vpop.f32.mrf.mxu1  ;;  %6211 = vmatprep.subr.bf16.mxu1 %v8418_v20  ;;  %v8427_v20 = vld [vmem:[#allocation8 + $0x2c] ss:$20 sps:$4 sm:$0xff]  }
 0x3fb   :  { %v11896_v51 = vadd.f32 %v5032_v14, %v4839_v12  ;;  %v4847_v61 = vpop.f32.mrf.mxu0 }
 0x3fc   :  { %v5036_v54 = vpop.f32.mrf.mxu1  ;;  %7898 = vmatmul.mubr.bf16.gmra.mxu1 %v13005_v25  ;;  %6407 = vmatpush1.bf16.msra.mxu0 %v8438_v50  ;;  %v13066_v50 = vld [vmem:[#allocation79_spill] sm:$0xff] }
 0x3fd   :  { %v11899_v1 = vadd.f32 %v5036_v54, %v4843_v52  ;;  %7901 = vmatprep.mubr.bf16.mxu1 %v13013_v0  ;;  %v4849_v34 = vpop.f32.mrf.mxu0  ;;  %6212 = vmatpush1.bf16.msra.mxu1 %v8416_v58  ;;  %v8446_v54 = vld [vmem:[#allocation8 + $0x8] ss:$20 sps:$4 sm:$0xff]  }
 0x3fe   :  { %v5038_v41 = vpop.f32.mrf.mxu1  ;;  %6213 = vmatprep.subr.bf16.mxu1 %v8424_v42  ;;  %6408 = vmatprep.subr.bf16.mxu0 %v8444_v35  ;;  %v8425_v58 = vld [vmem:[#allocation8 + $0x28] ss:$20 sps:$4 sm:$0xff]   ;;  %v8433_v42 = vld [vmem:[#allocation8 + $0x4] ss:$20 sps:$4 sm:$0xff]  }
 0x3ff   :  { %13064 = vst [vmem:[#allocation118_spill] sm:$0xff] %v11899_v1  ;;  %v11902_v14 = vadd.f32 %v5038_v41, %v4845_v32  ;;  %v4853_v12 = vpop.f32.mrf.mxu0  ;;  %5506 = vmatmul.mubr.bf16.gmra.mxu0 %v13065_v44 }
 0x400   :  { %v5040_v25 = vpop.f32.mrf.mxu1  ;;  %5513 = vmatprep.mubr.bf16.mxu0 %v13066_v50  ;;  %6409 = vmatpush1.bf16.msra.mxu0 %v8442_v7  ;;  %v8431_v7 = vld [vmem:[#allocation8] ss:$20 sps:$4 sm:$0xff]  }
 0x401   :  { %v11906_v52 = vadd.f32 %v5040_v25, %v4847_v61  ;;  %v4855_v0 = vpop.f32.mrf.mxu0  ;;  %6214 = vmatpush1.bf16.msra.mxu1 %v8422_v40  ;;  %6410 = vmatprep.subr.bf16.mxu0 %v8448_v37  ;;  %v11914_v37 = vld [vmem:[#allocation8 + $0x128] ss:$20 sps:$4 sm:$0xff]   ;;  %v13068_v50 = vld [vmem:[#allocation82_spill] sm:$0xff] }
 0x402   :  { %v5042_v1 = vpop.f32.mrf.mxu1  ;;  %6215 = vmatprep.subr.bf16.mxu1 %v8427_v20 }
 0x403   :  { %v11908_v35 = vadd.f32 %v5042_v1, %v4849_v34  ;;  %v4857_v32 = vpop.f32.mrf.mxu0  ;;  %v13067_v34 = vld [vmem:[#allocation76_spill] sm:$0xff] }
 0x404   :  { %v5046_v41 = vpop.f32.mrf.mxu1  ;;  %7902 = vmatmul.mubr.bf16.gmra.mxu1 %v13021_v9  ;;  %6411 = vmatpush1.bf16.msra.mxu0 %v8446_v54 }
 0x405   :  { %v11911_v44 = vadd.f32 %v5046_v41, %v4853_v12  ;;  %7905 = vmatprep.mubr.bf16.mxu1 %v13029_v29  ;;  %v4859_v61 = vpop.f32.mrf.mxu0  ;;  %6216 = vmatpush1.bf16.msra.mxu1 %v8425_v58 }
 0x406   :  { %v5048_v40 = vpop.f32.mrf.mxu1  ;;  %6217 = vmatprep.subr.bf16.mxu1 %v8433_v42 }
 0x407   :  { %v11916_v20 = vadd.f32 %v5048_v40, %v4855_v0  ;;  %v4863_v1 = vpop.f32.mrf.mxu0  ;;  %5514 = vmatmul.mubr.bf16.gmra.mxu0 %v13067_v34 }
 0x408   :  { %v5050_v25 = vpop.f32.mrf.mxu1  ;;  %5521 = vmatprep.mubr.bf16.mxu0 %v13068_v50  ;;  %v13072_v50 = vld [vmem:[#allocation87_spill] sm:$0xff] }
 0x409   :  { %v11920_v9 = vadd.f32 %v5050_v25, %v4857_v32  ;;  %v4865_v12 = vpop.f32.mrf.mxu0  ;;  %6218 = vmatpush1.bf16.msra.mxu1 %v8431_v7  ;;  %v13071_v25 = vld [vmem:[#allocation80_spill] sm:$0xff] }
 0x40a   :  { %v5052_v29 = vpop.f32.mrf.mxu1  ;;  %7921 = vmatprep.subr.bf16.mxu1 %v11914_v37 }
 0x40b   :  { %13069 = vst [vmem:[#allocation88_spill] sm:$0xff] %v11920_v9  ;;  %v11923_v54 = vadd.f32 %v5052_v29, %v4859_v61  ;;  %v4867_v58 = vpop.f32.mrf.mxu0 }
 0x40c   :  { %v5056_v42 = vpop.f32.mrf.mxu1  ;;  %7906 = vmatmul.mubr.bf16.gmra.mxu1 %v13033_v24 }
 0x40d   :  { %13070 = vst [vmem:[#allocation45_spill] sm:$0xff] %v11923_v54  ;;  %v11926_v0 = vadd.f32 %v5056_v42, %v4863_v1  ;;  %7909 = vmatprep.mubr.bf16.mxu1 %v13034_v57  ;;  %v4869_v41 = vpop.f32.mrf.mxu0 }
 0x40e   :  { %v5058_v40 = vpop.f32.mrf.mxu1 }
 0x40f   :  { %v11929_v34 = vadd.f32 %v5058_v40, %v4865_v12  ;;  %v4873_v32 = vpop.f32.mrf.mxu0  ;;  %5522 = vmatmul.mubr.bf16.gmra.mxu0 %v13071_v25 }
 0x410   :  { %v5060_v7 = vpop.f32.mrf.mxu1  ;;  %5529 = vmatprep.mubr.bf16.mxu0 %v13072_v50  ;;  %v13075_v50 = vld [vmem:[#allocation78_spill] sm:$0xff] }
 0x411   :  { %v11933_v61 = vadd.f32 %v5060_v7, %v4867_v58  ;;  %v4875_v29 = vpop.f32.mrf.mxu0  ;;  %v13076_v7 = vld [vmem:[#allocation94_spill] sm:$0xff] }
 0x412   :  { %v5062_v54 = vpop.f32.mrf.mxu1 }
 0x413   :  { %13073 = vst [vmem:[#allocation47_spill] sm:$0xff] %v11933_v61  ;;  %v11935_v9 = vadd.f32 %v5062_v54, %v4869_v41  ;;  %v4877_v24 = vpop.f32.mrf.mxu0 }
 0x414   :  { %v5066_v1 = vpop.f32.mrf.mxu1  ;;  %7910 = vmatmul.mubr.bf16.gmra.mxu1 %v13035_v55 }
 0x415   :  { %13074 = vst [vmem:[#allocation74_spill] sm:$0xff] %v11935_v9  ;;  %v11938_v57 = vadd.f32 %v5066_v1, %v4873_v32  ;;  %7913 = vmatprep.mubr.bf16.mxu1 %v13036_v23  ;;  %v4879_v12 = vpop.f32.mrf.mxu0 }
 0x416   :  { %v5068_v42 = vpop.f32.mrf.mxu1 }
 0x417   :  { %v11941_v40 = vadd.f32 %v5068_v42, %v4875_v29  ;;  %v4883_v25 = vpop.f32.mrf.mxu0  ;;  %5530 = vmatmul.mubr.bf16.gmra.mxu0 %v13075_v50 }
 0x418   :  { %v5070_v58 = vpop.f32.mrf.mxu1  ;;  %5537 = vmatprep.mubr.bf16.mxu0 %v13076_v7  ;;  %v13079_v7 = vld [vmem:[#allocation89_spill] sm:$0xff] }
 0x419   :  { %v11945_v54 = vadd.f32 %v5070_v58, %v4877_v24  ;;  %v4885_v41 = vpop.f32.mrf.mxu0  ;;  %v13080_v58 = vld [vmem:[#allocation19_spill] sm:$0xff] }
 0x41a   :  { %v5072_v9 = vpop.f32.mrf.mxu1 }
 0x41b   :  { %13077 = vst [vmem:[#allocation57_spill] sm:$0xff] %v11945_v54  ;;  %v11947_v61 = vadd.f32 %v5072_v9, %v4879_v12  ;;  %v4887_v55 = vpop.f32.mrf.mxu0 }
 0x41c   :  { %v5076_v32 = vpop.f32.mrf.mxu1  ;;  %7914 = vmatmul.mubr.bf16.gmra.mxu1 %v13038_v13 }
 0x41d   :  { %13078 = vst [vmem:[#allocation61_spill] sm:$0xff] %v11947_v61  ;;  %v11950_v23 = vadd.f32 %v5076_v32, %v4883_v25  ;;  %7917 = vmatprep.mubr.bf16.mxu1 %v13042_v11  ;;  %v4889_v29 = vpop.f32.mrf.mxu0 }
 0x41e   :  { %v5078_v1 = vpop.f32.mrf.mxu1 }
 0x41f   :  { %v11953_v42 = vadd.f32 %v5078_v1, %v4885_v41  ;;  %v4893_v50 = vpop.f32.mrf.mxu0  ;;  %5538 = vmatmul.mubr.bf16.gmra.mxu0 %v13079_v7 }
 0x420   :  { %v5080_v24 = vpop.f32.mrf.mxu1  ;;  %5545 = vmatprep.mubr.bf16.mxu0 %v13080_v58  ;;  %v13083_v58 = vld [vmem:[#allocation18_spill] sm:$0xff] }
 0x421   :  { %v11957_v9 = vadd.f32 %v5080_v24, %v4887_v55  ;;  %v4895_v12 = vpop.f32.mrf.mxu0 }
 0x422   :  { %v5082_v61 = vpop.f32.mrf.mxu1 }
 0x423   :  { %v11959_v54 = vadd.f32 %v5082_v61, %v4889_v29  ;;  %v4897_v13 = vpop.f32.mrf.mxu0  ;;  %v13084_v61 = vld [vmem:[#allocation26_spill] sm:$0xff] }
 0x424   :  { %v5086_v25 = vpop.f32.mrf.mxu1  ;;  %7918 = vmatmul.mubr.bf16.gmra.mxu1 %v13047_v22 }
 0x425   :  { %13081 = vst [vmem:[#allocation85_spill] sm:$0xff] %v11959_v54  ;;  %v11962_v11 = vadd.f32 %v5086_v25, %v4893_v50  ;;  %v4899_v41 = vpop.f32.mrf.mxu0  ;;  %6235 = vmatprep.mubr.bf16.mxu1 %v12791_v4  ;;  %v8441_v25 = vld [vmem:[#allocation8 + $0x100] ss:$20 sps:$4 sm:$0xff]  }
 0x426   :  { %v5088_v32 = vpop.f32.mrf.mxu1 }
 0x427   :  { %13082 = vst [vmem:[#allocation21_spill] sm:$0xff] %v11962_v11  ;;  %v11965_v1 = vadd.f32 %v5088_v32, %v4895_v12  ;;  %v5129_v7 = vpop.f32.mrf.mxu0  ;;  %5546 = vmatmul.mubr.bf16.gmra.mxu0 %v13083_v58 }
 0x428   :  { %v5090_v55 = vpop.f32.mrf.mxu1  ;;  %v5130_v24 = vadd.f32 %v5129_v7, %v11779_v16  ;;  %5553 = vmatprep.mubr.bf16.mxu0 %v13084_v61 }
 0x429   :  { %v11970_v29 = vadd.f32 %v5090_v55, %v4897_v13  ;;  %v5131_v54 = vpop.f32.mrf.mxu0 }
 0x42a   :  { %v5092_v22 = vpop.f32.mrf.mxu1  ;;  %5773 = vst [vmem:[#allocation10 + $0x10] sm:$0xff] %v5130_v24  ;;  %v5132_v50 = vadd.f32 %v5131_v54, %v11782_v43  ;;  %v8445_v43 = vld [vmem:[#allocation8 + $0xd8] ss:$20 sps:$4 sm:$0xff]  }
 0x42b   :  { %v11973_v11 = vadd.f32 %v5092_v22, %v4899_v41  ;;  %v5133_v12 = vpop.f32.mrf.mxu0  ;;  %v13085_v24 = vld [vmem:[#allocation27_spill] sm:$0xff] }
 0x42c   :  { %v7617_v32 = vpop.f32.mrf.mxu1  ;;  %6236 = vmatmul.mubr.bf16.vlgmr.msra.gmra.mxu1 %v11626_v3  ;;  %5774 = vst [vmem:[#allocation10 + $0x18] sm:$0xff] %v5132_v50  ;;  %v5134_v58 = vadd.f32 %v5133_v12, %v11786_v17 }
 0x42d   :  { %7922 = vmatpush3.bf16.msra.mxu1 %v11914_v37  ;;  %v5135_v16 = vpop.f32.mrf.mxu0  ;;  %6245 = vmatprep.mubr.bf16.mxu1 %v12791_v4 }
 0x42e   :  { %v7618_v13 = vpop.f32.mrf.mxu1  ;;  %5778 = vst [vmem:[#allocation10 + $0x38] sm:$0xff] %v5134_v58  ;;  %v5136_v7 = vadd.f32 %v5135_v16, %v11788_v46  ;;  %7923 = vmatprep.subr.bf16.mxu1 %v8441_v25  ;;  %v8449_v46 = vld [vmem:[#allocation8 + $0xb0] ss:$20 sps:$4 sm:$0xff]  }
 0x42f   :  { %v11980_v54 = vadd.f32 %v7618_v13, %v7617_v32  ;;  %v5139_v41 = vpop.f32.mrf.mxu0  ;;  %5554 = vmatmul.mubr.bf16.gmra.mxu0 %v11329_v31 }
 0x430   :  { %v7620_v55 = vpop.f32.mrf.mxu1  ;;  %5779 = vst [vmem:[#allocation10 + $0x40] sm:$0xff] %v5136_v7  ;;  %v5140_v17 = vadd.f32 %v5139_v41, %v11791_v5  ;;  %5561 = vmatprep.mubr.bf16.mxu0 %v13085_v24 }
 0x431   :  { %v5141_v37 = vpop.f32.mrf.mxu0  ;;  %7924 = vmatpush3.bf16.msra.mxu1 %v8441_v25 }
 0x432   :  { %v7621_v61 = vpop.f32.mrf.mxu1  ;;  %5783 = vst [vmem:[#allocation10 + $0x60] sm:$0xff] %v5140_v17  ;;  %v5142_v22 = vadd.f32 %v5141_v37, %v11794_v15  ;;  %7925 = vmatprep.subr.bf16.mxu1 %v8445_v43  ;;  %v8450_v15 = vld [vmem:[#allocation8 + $0x88] ss:$20 sps:$4 sm:$0xff]  }
 0x433   :  { %v11986_v50 = vadd.f32 %v7621_v61, %v7620_v55  ;;  %v5143_v12 = vpop.f32.mrf.mxu0 }
 0x434   :  { %v7623_v32 = vpop.f32.mrf.mxu1  ;;  %6246 = vmatmul.mubr.bf16.gmra.mxu1 %v11636_v38  ;;  %5784 = vst [vmem:[#allocation10 + $0x68] sm:$0xff] %v5142_v22  ;;  %v5144_v31 = vadd.f32 %v5143_v12, %v11798_v45 }
 0x435   :  { %v5145_v5 = vpop.f32.mrf.mxu0  ;;  %6255 = vmatprep.mubr.bf16.mxu1 %v12791_v4  ;;  %7926 = vmatpush3.bf16.msra.mxu1 %v8445_v43 }
 0x436   :  { %v7624_v25 = vpop.f32.mrf.mxu1  ;;  %5788 = vst [vmem:[#allocation10 + $0x88] sm:$0xff] %v5144_v31  ;;  %v5146_v58 = vadd.f32 %v5145_v5, %v11800_v8  ;;  %7927 = vmatprep.subr.bf16.mxu1 %v8449_v46  ;;  %v8451_v8 = vld [vmem:[#allocation8 + $0x60] ss:$20 sps:$4 sm:$0xff]  }
 0x437   :  { %v11992_v16 = vadd.f32 %v7624_v25, %v7623_v32  ;;  %v5149_v13 = vpop.f32.mrf.mxu0  ;;  %5562 = vmatmul.mubr.bf16.gmra.mxu0 %v11371_v36 }
 0x438   :  { %v7626_v7 = vpop.f32.mrf.mxu1  ;;  %5789 = vst [vmem:[#allocation10 + $0x90] sm:$0xff] %v5146_v58  ;;  %v5150_v41 = vadd.f32 %v5149_v13, %v11803_v10  ;;  %5569 = vmatprep.mubr.bf16.mxu0 %v11433_v2 }
 0x439   :  { %v5151_v45 = vpop.f32.mrf.mxu0  ;;  %7928 = vmatpush3.bf16.msra.mxu1 %v8449_v46 }
 0x43a   :  { %v7627_v43 = vpop.f32.mrf.mxu1  ;;  %5793 = vst [vmem:[#allocation10 + $0xb0] sm:$0xff] %v5150_v41  ;;  %v5152_v55 = vadd.f32 %v5151_v45, %v11806_v21  ;;  %7929 = vmatprep.subr.bf16.mxu1 %v8450_v15  ;;  %v8452_v21 = vld [vmem:[#allocation8 + $0x38] ss:$20 sps:$4 sm:$0xff]  }
 0x43b   :  { %v11998_v17 = vadd.f32 %v7627_v43, %v7626_v7  ;;  %v5153_v24 = vpop.f32.mrf.mxu0 }
 0x43c   :  { %v7629_v37 = vpop.f32.mrf.mxu1  ;;  %6256 = vmatmul.mubr.bf16.gmra.mxu1 %v11646_v49  ;;  %5794 = vst [vmem:[#allocation10 + $0xb8] sm:$0xff] %v5152_v55  ;;  %v5154_v36 = vadd.f32 %v5153_v24, %v11810_v33  ;;  %v13086_v55 = vld [vmem:[#allocation104_spill] sm:$0xff] }
 0x43d   :  { %v5155_v10 = vpop.f32.mrf.mxu0  ;;  %6265 = vmatprep.mubr.bf16.mxu1 %v12791_v4  ;;  %7930 = vmatpush3.bf16.msra.mxu1 %v8450_v15 }
 0x43e   :  { %v7630_v2 = vpop.f32.mrf.mxu1  ;;  %5798 = vst [vmem:[#allocation10 + $0xd8] sm:$0xff] %v5154_v36  ;;  %v5156_v61 = vadd.f32 %v5155_v10, %v11812_v18  ;;  %7931 = vmatprep.subr.bf16.mxu1 %v8451_v8  ;;  %v8453_v18 = vld [vmem:[#allocation8 + $0x10] ss:$20 sps:$4 sm:$0xff]  }
 0x43f   :  { %v12004_v22 = vadd.f32 %v7630_v2, %v7629_v37  ;;  %v5159_v46 = vpop.f32.mrf.mxu0  ;;  %5570 = vmatmul.mubr.bf16.gmra.mxu0 %v11399_v59  ;;  %v13087_v36 = vld [vmem:[#allocation84_spill] sm:$0xff] }
 0x440   :  { %v7632_v12 = vpop.f32.mrf.mxu1  ;;  %5799 = vst [vmem:[#allocation10 + $0xe0] sm:$0xff] %v5156_v61  ;;  %v5160_v32 = vadd.f32 %v5159_v46, %v11815_v53  ;;  %5577 = vmatprep.mubr.bf16.mxu0 %v11451_v19  ;;  %v13089_v46 = vld [vmem:[#allocation93_spill] sm:$0xff] }
 0x441   :  { %v5161_v33 = vpop.f32.mrf.mxu0  ;;  %7932 = vmatpush3.bf16.msra.mxu1 %v8451_v8 }
 0x442   :  { %v7633_v31 = vpop.f32.mrf.mxu1  ;;  %5803 = vst [vmem:[#allocation10 + $0x100] sm:$0xff] %v5160_v32  ;;  %v5162_v5 = vadd.f32 %v5161_v33, %v11818_v6  ;;  %7933 = vmatprep.subr.bf16.mxu1 %v8452_v21  ;;  %v13090_v32 = vld [vmem:[#allocation107_spill] sm:$0xff] }
 0x443   :  { %v12010_v25 = vadd.f32 %v7633_v31, %v7632_v12  ;;  %v5163_v58 = vpop.f32.mrf.mxu0  ;;  %v13091_v31 = vld [vmem:[#allocation42_spill] sm:$0xff] }
 0x444   :  { %v7635_v15 = vpop.f32.mrf.mxu1  ;;  %6266 = vmatmul.mubr.bf16.gmra.mxu1 %v11656_v27  ;;  %5804 = vst [vmem:[#allocation10 + $0x108] sm:$0xff] %v5162_v5  ;;  %v5164_v59 = vadd.f32 %v5163_v58, %v11822_v60 }
 0x445   :  { %v5165_v53 = vpop.f32.mrf.mxu0  ;;  %6275 = vmatprep.mubr.bf16.mxu1 %v12791_v4  ;;  %7934 = vmatpush3.bf16.msra.mxu1 %v8452_v21 }
 0x446   :  { %v7636_v19 = vpop.f32.mrf.mxu1  ;;  %5808 = vst [vmem:[#allocation10 + $0x128] sm:$0xff] %v5164_v59  ;;  %v5166_v13 = vadd.f32 %v5165_v53, %v11824_v63  ;;  %7935 = vmatprep.subr.bf16.mxu1 %v8453_v18 }
 0x447   :  { %v12016_v6 = vadd.f32 %v7636_v19, %v7635_v15  ;;  %v5169_v7 = vpop.f32.mrf.mxu0  ;;  %5578 = vmatmul.mubr.bf16.gmra.mxu0 %v11415_v30  ;;  %v13093_v19 = vld [vmem:[#allocation58_spill] sm:$0xff] }
 0x448   :  { %v7638_v41 = vpop.f32.mrf.mxu1  ;;  %5809 = vst [vmem:[#allocation10 + $0x130] sm:$0xff] %v5166_v13  ;;  %v5170_v45 = vadd.f32 %v5169_v7, %v11827_v28  ;;  %5585 = vmatprep.mubr.bf16.mxu0 %v11467_v62  ;;  %v13088_v62 = vld [vmem:[#allocation68_spill] sm:$0xff] }
 0x449   :  { %v5171_v60 = vpop.f32.mrf.mxu0  ;;  %7936 = vmatpush3.bf16.msra.mxu1 %v8453_v18  ;;  %v13092_v18 = vld [vmem:[#allocation69_spill] sm:$0xff]  ;;  %v13094_v13 = vld [vmem:[#allocation108_spill] sm:$0xff] }
 0x44a   :  { %v7639_v43 = vpop.f32.mrf.mxu1  ;;  %5813 = vst [vmem:[#allocation10 + $0x150] sm:$0xff] %v5170_v45  ;;  %v5172_v8 = vadd.f32 %v5171_v60, %v13086_v55  ;;  %v13095_v60 = vld [vmem:[#allocation70_spill] sm:$0xff] }
 0x44b   :  { %v12022_v24 = vadd.f32 %v7639_v43, %v7638_v41  ;;  %v5173_v63 = vpop.f32.mrf.mxu0 }
 0x44c   :  { %v7641_v37 = vpop.f32.mrf.mxu1  ;;  %6276 = vmatmul.mubr.bf16.gmra.mxu1 %v13087_v36  ;;  %5814 = vst [vmem:[#allocation10 + $0x158] sm:$0xff] %v5172_v8  ;;  %v5174_v30 = vadd.f32 %v5173_v63, %v11834_v39  ;;  %v13096_v63 = vld [vmem:[#allocation32_spill] sm:$0xff] }
 0x44d   :  { %v5175_v10 = vpop.f32.mrf.mxu0  ;;  %6285 = vmatprep.mubr.bf16.mxu1 %v12791_v4 }
 0x44e   :  { %v7642_v28 = vpop.f32.mrf.mxu1  ;;  %5818 = vst [vmem:[#allocation10 + $0x178] sm:$0xff] %v5174_v30  ;;  %v5176_v2 = vadd.f32 %v5175_v10, %v13088_v62  ;;  %v13097_v30 = vld [vmem:[#allocation46_spill] sm:$0xff] }
 0x44f   :  { %v12028_v61 = vadd.f32 %v7642_v28, %v7641_v37  ;;  %v5179_v21 = vpop.f32.mrf.mxu0  ;;  %5586 = vmatmul.mubr.bf16.gmra.mxu0 %v13089_v46  ;;  %v13098_v28 = vld [vmem:[#allocation40_spill] sm:$0xff] }
 0x450   :  { %v7644_v12 = vpop.f32.mrf.mxu1  ;;  %5819 = vst [vmem:[#allocation10 + $0x180] sm:$0xff] %v5176_v2  ;;  %v5180_v33 = vadd.f32 %v5179_v21, %v13090_v32  ;;  %5593 = vmatprep.mubr.bf16.mxu0 %v13091_v31  ;;  %v13099_v21 = vld [vmem:[#allocation71_spill] sm:$0xff]  ;;  %v13100_v31 = vld [vmem:[#allocation96_spill] sm:$0xff] }
 0x451   :  { %v5181_v5 = vpop.f32.mrf.mxu0 }
 0x452   :  { %v7645_v39 = vpop.f32.mrf.mxu1  ;;  %5823 = vst [vmem:[#allocation10 + $0x1a0] sm:$0xff] %v5180_v33  ;;  %v5182_v58 = vadd.f32 %v5181_v5, %v13092_v18  ;;  %v13101_v5 = vld [vmem:[#allocation41_spill] sm:$0xff] }
 0x453   :  { %v12034_v15 = vadd.f32 %v7645_v39, %v7644_v12  ;;  %v5183_v59 = vpop.f32.mrf.mxu0 }
 0x454   :  { %v7647_v53 = vpop.f32.mrf.mxu1  ;;  %6286 = vmatmul.mubr.bf16.gmra.mxu1 %v13093_v19  ;;  %5824 = vst [vmem:[#allocation10 + $0x1a8] sm:$0xff] %v5182_v58  ;;  %v5184_v7 = vadd.f32 %v5183_v59, %v13094_v13  ;;  %v13102_v59 = vld [vmem:[#allocation50_spill] sm:$0xff] }
 0x455   :  { %v5185_v41 = vpop.f32.mrf.mxu0  ;;  %6295 = vmatprep.mubr.bf16.mxu1 %v12791_v4 }
 0x456   :  { %v7648_v45 = vpop.f32.mrf.mxu1  ;;  %5828 = vst [vmem:[#allocation10 + $0x1c8] sm:$0xff] %v5184_v7  ;;  %v5186_v43 = vadd.f32 %v5185_v41, %v13095_v60  ;;  %v13103_v41 = vld [vmem:[#allocation38_spill] sm:$0xff] }
 0x457   :  { %v12040_v55 = vadd.f32 %v7648_v45, %v7647_v53  ;;  %v5189_v8 = vpop.f32.mrf.mxu0  ;;  %5594 = vmatmul.mubr.bf16.gmra.mxu0 %v13096_v63  ;;  %v13104_v60 = vld [vmem:[#allocation110_spill] sm:$0xff] }
 0x458   :  { %v7650_v37 = vpop.f32.mrf.mxu1  ;;  %5829 = vst [vmem:[#allocation10 + $0x1d0] sm:$0xff] %v5186_v43  ;;  %v5190_v10 = vadd.f32 %v5189_v8, %v13097_v30  ;;  %5601 = vmatprep.mubr.bf16.mxu0 %v13098_v28 }
 0x459   :  { %v5191_v62 = vpop.f32.mrf.mxu0 }
 0x45a   :  { %v7651_v2 = vpop.f32.mrf.mxu1  ;;  %5833 = vst [vmem:[#allocation10 + $0x1f0] sm:$0xff] %v5190_v10  ;;  %v5192_v46 = vadd.f32 %v5191_v62, %v13099_v21 }
 0x45b   :  { %v12046_v12 = vadd.f32 %v7651_v2, %v7650_v37  ;;  %v5193_v32 = vpop.f32.mrf.mxu0  ;;  %v13105_v37 = vld [vmem:[#allocation81_spill] sm:$0xff]  ;;  %v13106_v2 = vld [vmem:[#allocation22_spill] sm:$0xff] }
 0x45c   :  { %v7653_v33 = vpop.f32.mrf.mxu1  ;;  %6296 = vmatmul.mubr.bf16.gmra.mxu1 %v13100_v31  ;;  %5834 = vst [vmem:[#allocation10 + $0x1f8] sm:$0xff] %v5192_v46  ;;  %v5194_v39 = vadd.f32 %v5193_v32, %v13101_v5 }
 0x45d   :  { %v5195_v18 = vpop.f32.mrf.mxu0  ;;  %6305 = vmatprep.mubr.bf16.mxu1 %v12791_v4 }
 0x45e   :  { %v7654_v58 = vpop.f32.mrf.mxu1  ;;  %5838 = vst [vmem:[#allocation10 + $0x218] sm:$0xff] %v5194_v39  ;;  %v5196_v53 = vadd.f32 %v5195_v18, %v13102_v59  ;;  %v13108_v59 = vld [vmem:[#allocation39_spill] sm:$0xff] }
 0x45f   :  { %v12052_v13 = vadd.f32 %v7654_v58, %v7653_v33  ;;  %v5199_v7 = vpop.f32.mrf.mxu0  ;;  %5602 = vmatmul.mubr.bf16.gmra.mxu0 %v13103_v41  ;;  %v13107_v33 = vld [vmem:[#allocation36_spill] sm:$0xff]  ;;  %v13109_v41 = vld [vmem:[#allocation111_spill] sm:$0xff] }
 0x460   :  { %v7656_v45 = vpop.f32.mrf.mxu1  ;;  %5839 = vst [vmem:[#allocation10 + $0x220] sm:$0xff] %v5196_v53  ;;  %v5200_v43 = vadd.f32 %v5199_v7, %v13104_v60  ;;  %6428 = vmatprep.mubr.bf16.mxu0 %v12791_v4 }
 0x461   :  { %v5201_v8 = vpop.f32.mrf.mxu0 }
 0x462   :  { %v7657_v63 = vpop.f32.mrf.mxu1  ;;  %5843 = vst [vmem:[#allocation10 + $0x240] sm:$0xff] %v5200_v43  ;;  %v5202_v30 = vadd.f32 %v5201_v8, %v13105_v37 }
 0x463   :  { %v12058_v10 = vadd.f32 %v7657_v63, %v7656_v45  ;;  %v5203_v28 = vpop.f32.mrf.mxu0  ;;  %v13110_v63 = vld [vmem:[#allocation90_spill] sm:$0xff] }
 0x464   :  { %v7659_v62 = vpop.f32.mrf.mxu1  ;;  %6306 = vmatmul.mubr.bf16.gmra.mxu1 %v13106_v2  ;;  %5844 = vst [vmem:[#allocation10 + $0x248] sm:$0xff] %v5202_v30  ;;  %v5204_v21 = vadd.f32 %v5203_v28, %v11870_v56 }
 0x465   :  { %v5205_v46 = vpop.f32.mrf.mxu0  ;;  %6315 = vmatprep.mubr.bf16.mxu1 %v12791_v4 }
 0x466   :  { %v7660_v32 = vpop.f32.mrf.mxu1  ;;  %5848 = vst [vmem:[#allocation10 + $0x268] sm:$0xff] %v5204_v21  ;;  %v5206_v5 = vadd.f32 %v5205_v46, %v13107_v33  ;;  %v13111_v33 = vld [vmem:[#allocation49_spill] sm:$0xff] }
 0x467   :  { %v12064_v39 = vadd.f32 %v7660_v32, %v7659_v62  ;;  %v5209_v18 = vpop.f32.mrf.mxu0  ;;  %6429 = vmatmul.mubr.bf16.vlgmr.msra.gmra.mxu0 %v11626_v3 }
 0x468   :  { %v7662_v58 = vpop.f32.mrf.mxu1  ;;  %5849 = vst [vmem:[#allocation10 + $0x270] sm:$0xff] %v5206_v5  ;;  %v5210_v53 = vadd.f32 %v5209_v18, %v13108_v59  ;;  %6438 = vmatprep.mubr.bf16.mxu0 %v12791_v4 }
 0x469   :  { %v5211_v7 = vpop.f32.mrf.mxu0 }
 0x46a   :  { %v7663_v56 = vpop.f32.mrf.mxu1  ;;  %5853 = vst [vmem:[#allocation10 + $0x290] sm:$0xff] %v5210_v53  ;;  %v5212_v45 = vadd.f32 %v5211_v7, %v13109_v41 }
 0x46b   :  { %v12070_v60 = vadd.f32 %v7663_v56, %v7662_v58  ;;  %v5213_v43 = vpop.f32.mrf.mxu0  ;;  %v13112_v58 = vld [vmem:[#allocation54_spill] sm:$0xff]  ;;  %v13113_v56 = vld [vmem:[#allocation92_spill] sm:$0xff] }
 0x46c   :  { %v7665_v8 = vpop.f32.mrf.mxu1  ;;  %6316 = vmatmul.mubr.bf16.gmra.mxu1 %v13110_v63  ;;  %5854 = vst [vmem:[#allocation10 + $0x298] sm:$0xff] %v5212_v45  ;;  %v5214_v37 = vadd.f32 %v5213_v43, %v11882_v47 }
 0x46d   :  { %v5215_v30 = vpop.f32.mrf.mxu0  ;;  %6325 = vmatprep.mubr.bf16.mxu1 %v12791_v4 }
 0x46e   :  { %v7666_v28 = vpop.f32.mrf.mxu1  ;;  %5858 = vst [vmem:[#allocation10 + $0x2b8] sm:$0xff] %v5214_v37  ;;  %v5216_v62 = vadd.f32 %v5215_v30, %v11884_v26 }
 0x46f   :  { %v12076_v21 = vadd.f32 %v7666_v28, %v7665_v8  ;;  %v5219_v46 = vpop.f32.mrf.mxu0  ;;  %6439 = vmatmul.mubr.bf16.gmra.mxu0 %v11636_v38 }
 0x470   :  { %v7668_v32 = vpop.f32.mrf.mxu1  ;;  %5859 = vst [vmem:[#allocation10 + $0x2c0] sm:$0xff] %v5216_v62  ;;  %v5220_v5 = vadd.f32 %v5219_v46, %v13111_v33  ;;  %6448 = vmatprep.mubr.bf16.mxu0 %v12791_v4  ;;  %v13114_v62 = vld [vmem:[#allocation118_spill] sm:$0xff] }
 0x471   :  { %v5221_v18 = vpop.f32.mrf.mxu0 }
 0x472   :  { %v7669_v47 = vpop.f32.mrf.mxu1  ;;  %5863 = vst [vmem:[#allocation10 + $0x2e0] sm:$0xff] %v5220_v5  ;;  %v5222_v59 = vadd.f32 %v5221_v18, %v13112_v58 }
 0x473   :  { %v12082_v53 = vadd.f32 %v7669_v47, %v7668_v32  ;;  %v5223_v7 = vpop.f32.mrf.mxu0  ;;  %v13115_v47 = vld [vmem:[#allocation63_spill] sm:$0xff] }
 0x474   :  { %v7671_v26 = vpop.f32.mrf.mxu1  ;;  %6326 = vmatmul.mubr.bf16.gmra.mxu1 %v13113_v56  ;;  %5864 = vst [vmem:[#allocation10 + $0x2e8] sm:$0xff] %v5222_v59  ;;  %v5224_v41 = vadd.f32 %v5223_v7, %v11894_v48 }
 0x475   :  { %v5225_v45 = vpop.f32.mrf.mxu0  ;;  %6335 = vmatprep.mubr.bf16.mxu1 %v12791_v4 }
 0x476   :  { %v7672_v43 = vpop.f32.mrf.mxu1  ;;  %5868 = vst [vmem:[#allocation10 + $0x308] sm:$0xff] %v5224_v41  ;;  %v5226_v8 = vadd.f32 %v5225_v45, %v11896_v51 }
 0x477   :  { %v12088_v37 = vadd.f32 %v7672_v43, %v7671_v26  ;;  %v5229_v30 = vpop.f32.mrf.mxu0  ;;  %6449 = vmatmul.mubr.bf16.gmra.mxu0 %v11646_v49 }
 0x478   :  { %v7674_v28 = vpop.f32.mrf.mxu1  ;;  %5869 = vst [vmem:[#allocation10 + $0x310] sm:$0xff] %v5226_v8  ;;  %v5230_v46 = vadd.f32 %v5229_v30, %v13114_v62  ;;  %6458 = vmatprep.mubr.bf16.mxu0 %v12791_v4 }
 0x479   :  { %v5231_v32 = vpop.f32.mrf.mxu0 }
 0x47a   :  { %v7675_v48 = vpop.f32.mrf.mxu1  ;;  %5873 = vst [vmem:[#allocation10 + $0x330] sm:$0xff] %v5230_v46  ;;  %v5232_v33 = vadd.f32 %v5231_v32, %v11902_v14  ;;  %v13116_v46 = vld [vmem:[#allocation99_spill] sm:$0xff]  ;;  %v13117_v32 = vld [vmem:[#allocation88_spill] sm:$0xff] }
 0x47b   :  { %v12094_v5 = vadd.f32 %v7675_v48, %v7674_v28  ;;  %v5233_v18 = vpop.f32.mrf.mxu0 }
 0x47c   :  { %v7677_v51 = vpop.f32.mrf.mxu1  ;;  %6336 = vmatmul.mubr.bf16.gmra.mxu1 %v13115_v47  ;;  %5874 = vst [vmem:[#allocation10 + $0x338] sm:$0xff] %v5232_v33  ;;  %v5234_v58 = vadd.f32 %v5233_v18, %v11906_v52  ;;  %v13118_v18 = vld [vmem:[#allocation45_spill] sm:$0xff] }
 0x47d   :  { %v5235_v59 = vpop.f32.mrf.mxu0  ;;  %6345 = vmatprep.mubr.bf16.mxu1 %v12791_v4 }
 0x47e   :  { %v7678_v7 = vpop.f32.mrf.mxu1  ;;  %5878 = vst [vmem:[#allocation10 + $0x358] sm:$0xff] %v5234_v58  ;;  %v5236_v26 = vadd.f32 %v5235_v59, %v11908_v35 }
 0x47f   :  { %v12100_v41 = vadd.f32 %v7678_v7, %v7677_v51  ;;  %v5239_v45 = vpop.f32.mrf.mxu0  ;;  %6459 = vmatmul.mubr.bf16.gmra.mxu0 %v11656_v27 }
 0x480   :  { %v7680_v14 = vpop.f32.mrf.mxu1  ;;  %5879 = vst [vmem:[#allocation10 + $0x360] sm:$0xff] %v5236_v26  ;;  %v5240_v43 = vadd.f32 %v5239_v45, %v11911_v44  ;;  %6468 = vmatprep.mubr.bf16.mxu0 %v12791_v4 }
 0x481   :  { %v5241_v8 = vpop.f32.mrf.mxu0 }
 0x482   :  { %v7681_v52 = vpop.f32.mrf.mxu1  ;;  %5883 = vst [vmem:[#allocation10 + $0x380] sm:$0xff] %v5240_v43  ;;  %v5242_v30 = vadd.f32 %v5241_v8, %v11916_v20 }
 0x483   :  { %v12106_v28 = vadd.f32 %v7681_v52, %v7680_v14  ;;  %v5243_v62 = vpop.f32.mrf.mxu0 }
 0x484   :  { %v7683_v35 = vpop.f32.mrf.mxu1  ;;  %6346 = vmatmul.mubr.bf16.gmra.mxu1 %v13116_v46  ;;  %5884 = vst [vmem:[#allocation10 + $0x388] sm:$0xff] %v5242_v30  ;;  %v5244_v48 = vadd.f32 %v5243_v62, %v13117_v32  ;;  %v13119_v30 = vld [vmem:[#allocation30_spill] sm:$0xff]  ;;  %v13120_v62 = vld [vmem:[#allocation47_spill] sm:$0xff] }
 0x485   :  { %v5245_v33 = vpop.f32.mrf.mxu0  ;;  %6355 = vmatprep.mubr.bf16.mxu1 %v12791_v4 }
 0x486   :  { %v7684_v44 = vpop.f32.mrf.mxu1  ;;  %5888 = vst [vmem:[#allocation10 + $0x3a8] sm:$0xff] %v5244_v48  ;;  %v5246_v51 = vadd.f32 %v5245_v33, %v13118_v18  ;;  %v13121_v48 = vld [vmem:[#allocation74_spill] sm:$0xff] }
 0x487   :  { %v12112_v58 = vadd.f32 %v7684_v44, %v7683_v35  ;;  %v5249_v59 = vpop.f32.mrf.mxu0  ;;  %6469 = vmatmul.mubr.bf16.gmra.mxu0 %v13087_v36 }
 0x488   :  { %v7686_v20 = vpop.f32.mrf.mxu1  ;;  %5889 = vst [vmem:[#allocation10 + $0x3b0] sm:$0xff] %v5246_v51  ;;  %v5250_v7 = vadd.f32 %v5249_v59, %v11926_v0  ;;  %6478 = vmatprep.mubr.bf16.mxu0 %v12791_v4 }
 0x489   :  { %v5251_v26 = vpop.f32.mrf.mxu0 }
 0x48a   :  { %v7687_v45 = vpop.f32.mrf.mxu1  ;;  %5893 = vst [vmem:[#allocation10 + $0x3d0] sm:$0xff] %v5250_v7  ;;  %v5252_v14 = vadd.f32 %v5251_v26, %v11929_v34 }
 0x48b   :  { %v12118_v43 = vadd.f32 %v7687_v45, %v7686_v20  ;;  %v5253_v8 = vpop.f32.mrf.mxu0 }
 0x48c   :  { %v7689_v52 = vpop.f32.mrf.mxu1  ;;  %6356 = vmatmul.mubr.bf16.gmra.mxu1 %v13119_v30  ;;  %5894 = vst [vmem:[#allocation10 + $0x3d8] sm:$0xff] %v5252_v14  ;;  %v5254_v35 = vadd.f32 %v5253_v8, %v13120_v62  ;;  %v13122_v8 = vld [vmem:[#allocation98_spill] sm:$0xff] }
 0x48d   :  { %v5255_v32 = vpop.f32.mrf.mxu0  ;;  %6365 = vmatprep.mubr.bf16.mxu1 %v12791_v4 }
 0x48e   :  { %v7690_v0 = vpop.f32.mrf.mxu1  ;;  %5898 = vst [vmem:[#allocation10 + $0x3f8] sm:$0xff] %v5254_v35  ;;  %v5256_v33 = vadd.f32 %v5255_v32, %v13121_v48  ;;  %v13124_v32 = vld [vmem:[#allocation61_spill] sm:$0xff] }
 0x48f   :  { %v12124_v44 = vadd.f32 %v7690_v0, %v7689_v52  ;;  %v5259_v18 = vpop.f32.mrf.mxu0  ;;  %6479 = vmatmul.mubr.bf16.gmra.mxu0 %v13093_v19  ;;  %v13123_v52 = vld [vmem:[#allocation57_spill] sm:$0xff] }
 0x490   :  { %v7692_v34 = vpop.f32.mrf.mxu1  ;;  %5899 = vst [vmem:[#allocation10 + $0x400] sm:$0xff] %v5256_v33  ;;  %v5260_v51 = vadd.f32 %v5259_v18, %v11938_v57  ;;  %6488 = vmatprep.mubr.bf16.mxu0 %v12791_v4 }
 0x491   :  { %v5261_v59 = vpop.f32.mrf.mxu0 }
 0x492   :  { %v7693_v20 = vpop.f32.mrf.mxu1  ;;  %5903 = vst [vmem:[#allocation10 + $0x420] sm:$0xff] %v5260_v51  ;;  %v5262_v7 = vadd.f32 %v5261_v59, %v11941_v40 }
 0x493   :  { %v12130_v26 = vadd.f32 %v7693_v20, %v7692_v34  ;;  %v5263_v45 = vpop.f32.mrf.mxu0 }
 0x494   :  { %v7695_v14 = vpop.f32.mrf.mxu1  ;;  %6366 = vmatmul.mubr.bf16.gmra.mxu1 %v13122_v8  ;;  %5904 = vst [vmem:[#allocation10 + $0x428] sm:$0xff] %v5262_v7  ;;  %v5264_v62 = vadd.f32 %v5263_v45, %v13123_v52 }
 0x495   :  { %v5265_v35 = vpop.f32.mrf.mxu0  ;;  %6375 = vmatprep.mubr.bf16.mxu1 %v12791_v4 }
 0x496   :  { %v7696_v57 = vpop.f32.mrf.mxu1  ;;  %5908 = vst [vmem:[#allocation10 + $0x448] sm:$0xff] %v5264_v62  ;;  %v5266_v0 = vadd.f32 %v5265_v35, %v13124_v32  ;;  %v13126_v35 = vld [vmem:[#allocation85_spill] sm:$0xff] }
 0x497   :  { %v12136_v48 = vadd.f32 %v7696_v57, %v7695_v14  ;;  %v5269_v33 = vpop.f32.mrf.mxu0  ;;  %6489 = vmatmul.mubr.bf16.gmra.mxu0 %v13100_v31  ;;  %v13125_v14 = vld [vmem:[#allocation66_spill] sm:$0xff] }
 0x498   :  { %v7698_v40 = vpop.f32.mrf.mxu1  ;;  %5909 = vst [vmem:[#allocation10 + $0x450] sm:$0xff] %v5266_v0  ;;  %v5270_v18 = vadd.f32 %v5269_v33, %v11950_v23  ;;  %6498 = vmatprep.mubr.bf16.mxu0 %v12791_v4  ;;  %v13127_v33 = vld [vmem:[#allocation21_spill] sm:$0xff] }
 0x499   :  { %v5271_v34 = vpop.f32.mrf.mxu0 }
 0x49a   :  { %v7699_v51 = vpop.f32.mrf.mxu1  ;;  %5913 = vst [vmem:[#allocation10 + $0x470] sm:$0xff] %v5270_v18  ;;  %v5272_v59 = vadd.f32 %v5271_v34, %v11953_v42 }
 0x49b   :  { %v12142_v20 = vadd.f32 %v7699_v51, %v7698_v40  ;;  %v5273_v7 = vpop.f32.mrf.mxu0 }
 0x49c   :  { %v7701_v45 = vpop.f32.mrf.mxu1  ;;  %6376 = vmatmul.mubr.bf16.gmra.mxu1 %v13125_v14  ;;  %5914 = vst [vmem:[#allocation10 + $0x478] sm:$0xff] %v5272_v59  ;;  %v5274_v52 = vadd.f32 %v5273_v7, %v11957_v9 }
 0x49d   :  { %v5275_v62 = vpop.f32.mrf.mxu0  ;;  %6385 = vmatprep.mubr.bf16.mxu1 %v12791_v4 }
 0x49e   :  { %v7702_v23 = vpop.f32.mrf.mxu1  ;;  %5918 = vst [vmem:[#allocation10 + $0x498] sm:$0xff] %v5274_v52  ;;  %v5276_v57 = vadd.f32 %v5275_v62, %v13126_v35 }
 0x49f   :  { %v12148_v32 = vadd.f32 %v7702_v23, %v7701_v45  ;;  %v5279_v0 = vpop.f32.mrf.mxu0  ;;  %6499 = vmatmul.mubr.bf16.gmra.mxu0 %v13106_v2  ;;  %v13128_v45 = vld [vmem:[#allocation65_spill] sm:$0xff] }
 0x4a0   :  { %v7704_v42 = vpop.f32.mrf.mxu1  ;;  %5919 = vst [vmem:[#allocation10 + $0x4a0] sm:$0xff] %v5276_v57  ;;  %v5280_v40 = vadd.f32 %v5279_v0, %v13127_v33  ;;  %6508 = vmatprep.mubr.bf16.mxu0 %v12791_v4 }
 0x4a1   :  { %v5281_v18 = vpop.f32.mrf.mxu0 }
 0x4a2   :  { %v7705_v9 = vpop.f32.mrf.mxu1  ;;  %5923 = vst [vmem:[#allocation10 + $0x4c0] sm:$0xff] %v5280_v40  ;;  %v5282_v34 = vadd.f32 %v5281_v18, %v11965_v1 }
 0x4a3   :  { %v12154_v51 = vadd.f32 %v7705_v9, %v7704_v42  ;;  %v5283_v59 = vpop.f32.mrf.mxu0 }
 0x4a4   :  { %v7707_v7 = vpop.f32.mrf.mxu1  ;;  %6386 = vmatmul.mubr.bf16.gmra.mxu1 %v13128_v45  ;;  %5924 = vst [vmem:[#allocation10 + $0x4c8] sm:$0xff] %v5282_v34  ;;  %v5284_v52 = vadd.f32 %v5283_v59, %v11970_v29 }
 0x4a5   :  { %7937 = vmatprep.mubr.bf16.mxu1 %v11626_v3  ;;  %v5285_v62 = vpop.f32.mrf.mxu0 }
 0x4a6   :  { %v7708_v23 = vpop.f32.mrf.mxu1  ;;  %5928 = vst [vmem:[#allocation10 + $0x4e8] sm:$0xff] %v5284_v52  ;;  %v5286_v35 = vadd.f32 %v5285_v62, %v11973_v11 }
 0x4a7   :  { %v12160_v57 = vadd.f32 %v7708_v23, %v7707_v7  ;;  %v7729_v0 = vpop.f32.mrf.mxu0  ;;  %6509 = vmatmul.mubr.bf16.gmra.mxu0 %v13110_v63 }
 0x4a8   :  { %v7710_v1 = vpop.f32.mrf.mxu1  ;;  %5929 = vst [vmem:[#allocation10 + $0x4f0] sm:$0xff] %v5286_v35  ;;  %6518 = vmatprep.mubr.bf16.mxu0 %v12791_v4 }
 0x4a9   :  { %v7730_v42 = vpop.f32.mrf.mxu0 }
 0x4aa   :  { %v7711_v33 = vpop.f32.mrf.mxu1  ;;  %v7731_v40 = vadd.f32 %v7730_v42, %v7729_v0 }
 0x4ab   :  { %v12164_v29 = vadd.f32 %v7711_v33, %v7710_v1  ;;  %v7732_v3 = vpop.f32.mrf.mxu0 }
 0x4ac   :  { %v7891_v18 = vpop.f32.mrf.mxu1  ;;  %7938 = vmatmul.mubr.bf16.vlgmr.msra.gmra.mxu1 %v11636_v38  ;;  %v5484_v11 = vadd.f32 %v7731_v40, %v11980_v54 }
 0x4ad   :  { %7941 = vmatprep.mubr.bf16.mxu1 %v11646_v49  ;;  %v7733_v9 = vpop.f32.mrf.mxu0 }
 0x4ae   :  { %v5644_v34 = vpop.f32.mrf.mxu1  ;;  %v7734_v59 = vadd.f32 %v7733_v9, %v7732_v3 }
 0x4af   :  { %v5645_v7 = vadd.f32 %v5644_v34, %v5484_v11  ;;  %v7735_v52 = vpop.f32.mrf.mxu0  ;;  %6519 = vmatmul.mubr.bf16.gmra.mxu0 %v13113_v56 }
 0x4b0   :  { %v7892_v62 = vpop.f32.mrf.mxu1  ;;  %v5487_v23 = vadd.f32 %v7734_v59, %v11986_v50  ;;  %6528 = vmatprep.mubr.bf16.mxu0 %v12791_v4 }
 0x4b1   :  { %5775 = vst [vmem:[#allocation10 + $0x20] sm:$0xff] %v5645_v7  ;;  %v7736_v35 = vpop.f32.mrf.mxu0 }
 0x4b2   :  { %v5647_v0 = vpop.f32.mrf.mxu1  ;;  %v7737_v38 = vadd.f32 %v7736_v35, %v7735_v52 }
 0x4b3   :  { %v5648_v1 = vadd.f32 %v5647_v0, %v5487_v23  ;;  %v7738_v54 = vpop.f32.mrf.mxu0 }
 0x4b4   :  { %v7895_v42 = vpop.f32.mrf.mxu1  ;;  %7942 = vmatmul.mubr.bf16.gmra.mxu1 %v11656_v27  ;;  %v5492_v49 = vadd.f32 %v7737_v38, %v11992_v16 }
 0x4b5   :  { %5780 = vst [vmem:[#allocation10 + $0x48] sm:$0xff] %v5648_v1  ;;  %7945 = vmatprep.mubr.bf16.mxu1 %v13087_v36  ;;  %v7739_v33 = vpop.f32.mrf.mxu0 }
 0x4b6   :  { %v5653_v40 = vadd.f32 %v7891_v18, %v5492_v49  ;;  %v5660_v3 = vpop.f32.mrf.mxu1  ;;  %v7740_v50 = vadd.f32 %v7739_v33, %v7738_v54 }
 0x4b7   :  { %v7741_v11 = vpop.f32.mrf.mxu0  ;;  %6529 = vmatmul.mubr.bf16.gmra.mxu0 %v13115_v47 }
 0x4b8   :  { %5785 = vst [vmem:[#allocation10 + $0x70] sm:$0xff] %v5653_v40  ;;  %v7896_v9 = vpop.f32.mrf.mxu1  ;;  %v5495_v34 = vadd.f32 %v7740_v50, %v11998_v17  ;;  %6538 = vmatprep.mubr.bf16.mxu0 %v12791_v4 }
 0x4b9   :  { %v7742_v59 = vpop.f32.mrf.mxu0 }
 0x4ba   :  { %v5656_v27 = vadd.f32 %v7892_v62, %v5495_v34  ;;  %v5663_v7 = vpop.f32.mrf.mxu1  ;;  %v7743_v16 = vadd.f32 %v7742_v59, %v7741_v11 }
 0x4bb   :  { %v7744_v52 = vpop.f32.mrf.mxu0 }
 0x4bc   :  { %5790 = vst [vmem:[#allocation10 + $0x98] sm:$0xff] %v5656_v27  ;;  %v12178_v36 = vpop.f32.mrf.mxu1  ;;  %7946 = vmatmul.mubr.bf16.gmra.mxu1 %v13093_v19  ;;  %v5500_v18 = vadd.f32 %v7743_v16, %v12004_v22 }
 0x4bd   :  { %7949 = vmatprep.mubr.bf16.mxu1 %v13100_v31  ;;  %v7745_v23 = vpop.f32.mrf.mxu0 }
 0x4be   :  { %v5661_v35 = vadd.f32 %v5660_v3, %v5500_v18  ;;  %v5676_v0 = vpop.f32.mrf.mxu1  ;;  %v7746_v17 = vadd.f32 %v7745_v23, %v7744_v52 }
 0x4bf   :  { %v7747_v38 = vpop.f32.mrf.mxu0  ;;  %6539 = vmatmul.mubr.bf16.gmra.mxu0 %v13116_v46 }
 0x4c0   :  { %5795 = vst [vmem:[#allocation10 + $0xc0] sm:$0xff] %v5661_v35  ;;  %v12184_v62 = vpop.f32.mrf.mxu1  ;;  %v5503_v1 = vadd.f32 %v7746_v17, %v12010_v25  ;;  %6548 = vmatprep.mubr.bf16.mxu0 %v12791_v4 }
 0x4c1   :  { %v7748_v54 = vpop.f32.mrf.mxu0 }
 0x4c2   :  { %v5664_v19 = vadd.f32 %v5663_v7, %v5503_v1  ;;  %v5679_v49 = vpop.f32.mrf.mxu1  ;;  %v7749_v22 = vadd.f32 %v7748_v54, %v7747_v38 }
 0x4c3   :  { %v7750_v33 = vpop.f32.mrf.mxu0 }
 0x4c4   :  { %5800 = vst [vmem:[#allocation10 + $0xe8] sm:$0xff] %v5664_v19  ;;  %v12188_v31 = vpop.f32.mrf.mxu1  ;;  %7950 = vmatmul.mubr.bf16.gmra.mxu1 %v13106_v2  ;;  %v5508_v40 = vadd.f32 %v7749_v22, %v12016_v6 }
 0x4c5   :  { %7953 = vmatprep.mubr.bf16.mxu1 %v13110_v63  ;;  %v7751_v3 = vpop.f32.mrf.mxu0 }
 0x4c6   :  { %v5669_v50 = vadd.f32 %v7895_v42, %v5508_v40  ;;  %v5692_v11 = vpop.f32.mrf.mxu1  ;;  %v7752_v25 = vadd.f32 %v7751_v3, %v7750_v33 }
 0x4c7   :  { %v7753_v34 = vpop.f32.mrf.mxu0  ;;  %6549 = vmatmul.mubr.bf16.gmra.mxu0 %v13119_v30 }
 0x4c8   :  { %5805 = vst [vmem:[#allocation10 + $0x110] sm:$0xff] %v5669_v50  ;;  %v12194_v59 = vpop.f32.mrf.mxu1  ;;  %v5511_v27 = vadd.f32 %v7752_v25, %v12022_v24  ;;  %6558 = vmatprep.mubr.bf16.mxu0 %v12791_v4 }
 0x4c9   :  { %v7754_v7 = vpop.f32.mrf.mxu0 }
 0x4ca   :  { %v5672_v2 = vadd.f32 %v7896_v9, %v5511_v27  ;;  %v5695_v16 = vpop.f32.mrf.mxu1  ;;  %v7755_v6 = vadd.f32 %v7754_v7, %v7753_v34 }
 0x4cb   :  { %v7756_v52 = vpop.f32.mrf.mxu0 }
 0x4cc   :  { %5810 = vst [vmem:[#allocation10 + $0x138] sm:$0xff] %v5672_v2  ;;  %v12198_v63 = vpop.f32.mrf.mxu1  ;;  %7954 = vmatmul.mubr.bf16.gmra.mxu1 %v13113_v56  ;;  %v5516_v42 = vadd.f32 %v7755_v6, %v12028_v61 }
 0x4cd   :  { %7957 = vmatprep.mubr.bf16.mxu1 %v13115_v47  ;;  %v7757_v18 = vpop.f32.mrf.mxu0 }
 0x4ce   :  { %v5677_v23 = vadd.f32 %v5676_v0, %v5516_v42  ;;  %v12203_v35 = vpop.f32.mrf.mxu1  ;;  %v7758_v24 = vadd.f32 %v7757_v18, %v7756_v52 }
 0x4cf   :  { %v7759_v17 = vpop.f32.mrf.mxu0  ;;  %6559 = vmatmul.mubr.bf16.gmra.mxu0 %v13122_v8 }
 0x4d0   :  { %5815 = vst [vmem:[#allocation10 + $0x160] sm:$0xff] %v5677_v23  ;;  %v12206_v9 = vpop.f32.mrf.mxu1  ;;  %v5519_v38 = vadd.f32 %v7758_v24, %v12034_v15  ;;  %6568 = vmatprep.mubr.bf16.mxu0 %v12791_v4 }
 0x4d1   :  { %v7760_v56 = vpop.f32.mrf.mxu0 }
 0x4d2   :  { %v5680_v1 = vadd.f32 %v5679_v49, %v5519_v38  ;;  %v12210_v61 = vpop.f32.mrf.mxu1  ;;  %v7761_v47 = vadd.f32 %v7760_v56, %v7759_v17 }
 0x4d3   :  { %v7762_v54 = vpop.f32.mrf.mxu0 }
 0x4d4   :  { %5820 = vst [vmem:[#allocation10 + $0x188] sm:$0xff] %v5680_v1  ;;  %v12212_v0 = vpop.f32.mrf.mxu1  ;;  %7958 = vmatmul.mubr.bf16.gmra.mxu1 %v13116_v46  ;;  %v5524_v19 = vadd.f32 %v7761_v47, %v12040_v55 }
 0x4d5   :  { %7961 = vmatprep.mubr.bf16.mxu1 %v13119_v30  ;;  %v7763_v22 = vpop.f32.mrf.mxu0 }
 0x4d6   :  { %v5685_v15 = vadd.f32 %v12178_v36, %v5524_v19  ;;  %v12218_v33 = vpop.f32.mrf.mxu1  ;;  %v7764_v40 = vadd.f32 %v7763_v22, %v7762_v54 }
 0x4d7   :  { %v7765_v49 = vpop.f32.mrf.mxu0  ;;  %6569 = vmatmul.mubr.bf16.gmra.mxu0 %v13125_v14 }
 0x4d8   :  { %5825 = vst [vmem:[#allocation10 + $0x1b0] sm:$0xff] %v5685_v15  ;;  %v12221_v3 = vpop.f32.mrf.mxu1  ;;  %v5527_v50 = vadd.f32 %v7764_v40, %v12046_v12  ;;  %6578 = vmatprep.mubr.bf16.mxu0 %v12791_v4 }
 0x4d9   :  { %v7766_v46 = vpop.f32.mrf.mxu0 }
 0x4da   :  { %v5688_v55 = vadd.f32 %v12184_v62, %v5527_v50  ;;  %v12226_v30 = vpop.f32.mrf.mxu1  ;;  %v7767_v25 = vadd.f32 %v7766_v46, %v7765_v49 }
 0x4db   :  { %v7768_v36 = vpop.f32.mrf.mxu0 }
 0x4dc   :  { %5830 = vst [vmem:[#allocation10 + $0x1d8] sm:$0xff] %v5688_v55  ;;  %v12228_v34 = vpop.f32.mrf.mxu1  ;;  %7962 = vmatmul.mubr.bf16.gmra.mxu1 %v13122_v8  ;;  %v5532_v27 = vadd.f32 %v7767_v25, %v12052_v13 }
 0x4dd   :  { %7965 = vmatprep.mubr.bf16.mxu1 %v13125_v14  ;;  %v7769_v7 = vpop.f32.mrf.mxu0 }
 0x4de   :  { %v5693_v12 = vadd.f32 %v5692_v11, %v5532_v27  ;;  %v12233_v2 = vpop.f32.mrf.mxu1  ;;  %v7770_v4 = vadd.f32 %v7769_v7, %v7768_v36 }
 0x4df   :  { %v7771_v6 = vpop.f32.mrf.mxu0  ;;  %6579 = vmatmul.mubr.bf16.gmra.mxu0 %v13128_v45 }
 0x4e0   :  { %5835 = vst [vmem:[#allocation10 + $0x200] sm:$0xff] %v5693_v12  ;;  %v12236_v62 = vpop.f32.mrf.mxu1  ;;  %v5535_v52 = vadd.f32 %v7770_v4, %v12058_v10 }
 0x4e1   :  { %v7772_v42 = vpop.f32.mrf.mxu0 }
 0x4e2   :  { %v5696_v18 = vadd.f32 %v5695_v16, %v5535_v52  ;;  %v12239_v8 = vpop.f32.mrf.mxu1  ;;  %v7773_v13 = vadd.f32 %v7772_v42, %v7771_v6 }
 0x4e3   :  { %v7774_v23 = vpop.f32.mrf.mxu0 }
 0x4e4   :  { %5840 = vst [vmem:[#allocation10 + $0x228] sm:$0xff] %v5696_v18  ;;  %v12241_v14 = vpop.f32.mrf.mxu1  ;;  %7966 = vmatmul.mubr.bf16.gmra.mxu1 %v13128_v45  ;;  %v5540_v11 = vadd.f32 %v7773_v13, %v12064_v39 }
 0x4e5   :  { %v7775_v24 = vpop.f32.mrf.mxu0 }
 0x4e6   :  { %v5701_v17 = vadd.f32 %v12188_v31, %v5540_v11  ;;  %v12246_v38 = vpop.f32.mrf.mxu1  ;;  %v7776_v56 = vadd.f32 %v7775_v24, %v7774_v23 }
 0x4e7   :  { %v7777_v10 = vpop.f32.mrf.mxu0 }
 0x4e8   :  { %5845 = vst [vmem:[#allocation10 + $0x250] sm:$0xff] %v5701_v17  ;;  %v12248_v16 = vpop.f32.mrf.mxu1  ;;  %v5543_v1 = vadd.f32 %v7776_v56, %v12070_v60 }
 0x4e9   :  { %v7778_v47 = vpop.f32.mrf.mxu0 }
 0x4ea   :  { %v5704_v54 = vadd.f32 %v12194_v59, %v5543_v1  ;;  %v12252_v19 = vpop.f32.mrf.mxu1  ;;  %v7779_v45 = vadd.f32 %v7778_v47, %v7777_v10 }
 0x4eb   :  { %v7780_v22 = vpop.f32.mrf.mxu0 }
 0x4ec   :  { %5850 = vst [vmem:[#allocation10 + $0x278] sm:$0xff] %v5704_v54  ;;  %v6237_v39 = vpop.f32.mrf.mxu1  ;;  %v5548_v31 = vadd.f32 %v7779_v45, %v12076_v21 }
 0x4ed   :  { %v6750_v15 = vmul.f32 1.442695, %v6237_v39  ;;  %v7781_v40 = vpop.f32.mrf.mxu0 }
 0x4ee   :  { %v5709_v49 = vadd.f32 %v12203_v35, %v5548_v31  ;;  %v6239_v50 = vpop.f32.mrf.mxu1  ;;  %v7782_v46 = vadd.f32 %v7781_v40, %v7780_v22 }
 0x4ef   :  { %8774 = vpow2.f32 %v6750_v15  ;;  %v6752_v55 = vmul.f32 1.442695, %v6239_v50  ;;  %v7783_v60 = vpop.f32.mrf.mxu0 }
 0x4f0   :  { %5855 = vst [vmem:[#allocation10 + $0x2a0] sm:$0xff] %v5709_v49  ;;  %v6241_v25 = vpop.f32.mrf.mxu1  ;;  %v5551_v59 = vadd.f32 %v7782_v46, %v12082_v53 }
 0x4f1   :  { %8776 = vpow2.f32 %v6752_v55  ;;  %v6760_v36 = vmul.f32 1.442695, %v6241_v25  ;;  %v7784_v27 = vpop.f32.mrf.mxu0 }
 0x4f2   :  { %v5712_v7 = vadd.f32 %v12210_v61, %v5551_v59  ;;  %v6243_v12 = vpop.f32.mrf.mxu1  ;;  %v7785_v21 = vadd.f32 %v7784_v27, %v7783_v60 }
 0x4f3   :  { %8778 = vpow2.f32 %v6760_v36  ;;  %v6762_v4 = vmul.f32 1.442695, %v6243_v12  ;;  %v7786_v6 = vpop.f32.mrf.mxu0 }
 0x4f4   :  { %5860 = vst [vmem:[#allocation10 + $0x2c8] sm:$0xff] %v5712_v7  ;;  %v6247_v35 = vpop.f32.mrf.mxu1  ;;  %v5556_v52 = vadd.f32 %v7785_v21, %v12088_v37 }
 0x4f5   :  { %8780 = vpow2.f32 %v6762_v4  ;;  %v6770_v42 = vmul.f32 1.442695, %v6247_v35  ;;  %v7787_v18 = vpop.f32.mrf.mxu0 }
 0x4f6   :  { %v5717_v13 = vadd.f32 %v12198_v63, %v5556_v52  ;;  %v6249_v53 = vpop.f32.mrf.mxu1  ;;  %v7788_v23 = vadd.f32 %v7787_v18, %v7786_v6 }
 0x4f7   :  { %8782 = vpow2.f32 %v6770_v42  ;;  %v6772_v11 = vmul.f32 1.442695, %v6249_v53  ;;  %v7789_v24 = vpop.f32.mrf.mxu0 }
 0x4f8   :  { %5865 = vst [vmem:[#allocation10 + $0x2f0] sm:$0xff] %v5717_v13  ;;  %v6251_v61 = vpop.f32.mrf.mxu1  ;;  %v5559_v17 = vadd.f32 %v7788_v23, %v12094_v5 }
 0x4f9   :  { %8784 = vpow2.f32 %v6772_v11  ;;  %v6780_v56 = vmul.f32 1.442695, %v6251_v61  ;;  %v7790_v10 = vpop.f32.mrf.mxu0 }
 0x4fa   :  { %v5720_v1 = vadd.f32 %v12206_v9, %v5559_v17  ;;  %v6253_v37 = vpop.f32.mrf.mxu1  ;;  %v7791_v47 = vadd.f32 %v7790_v10, %v7789_v24 }
 0x4fb   :  { %8786 = vpow2.f32 %v6780_v56  ;;  %v6782_v54 = vmul.f32 1.442695, %v6253_v37  ;;  %v7792_v45 = vpop.f32.mrf.mxu0 }
 0x4fc   :  { %v8775_v63 = vpop.eup %8774  ;;  %5870 = vst [vmem:[#allocation10 + $0x318] sm:$0xff] %v5720_v1  ;;  %v6257_v22 = vpop.f32.mrf.mxu1  ;;  %v5564_v39 = vadd.f32 %v7791_v47, %v12100_v41 }
 0x4fd   :  { %7070 = vst [vmem:[#allocation11] sm:$0xff] %v8775_v63  ;;  %8788 = vpow2.f32 %v6782_v54  ;;  %v6790_v31 = vmul.f32 1.442695, %v6257_v22  ;;  %v7793_v15 = vpop.f32.mrf.mxu0 }
 0x4fe   :  { %v8777_v5 = vpop.eup %8776  ;;  %v5725_v40 = vadd.f32 %v12218_v33, %v5564_v39  ;;  %v6259_v49 = vpop.f32.mrf.mxu1  ;;  %v7794_v50 = vadd.f32 %v7793_v15, %v7792_v45 }
 0x4ff   :  { %7071 = vst [vmem:[#allocation11 + $0x8] sm:$0xff] %v8777_v5  ;;  %8790 = vpow2.f32 %v6790_v31  ;;  %v6792_v9 = vmul.f32 1.442695, %v6259_v49  ;;  %v7795_v46 = vpop.f32.mrf.mxu0 }
 0x500   :  { %v8779_v55 = vpop.eup %8778  ;;  %5875 = vst [vmem:[#allocation10 + $0x340] sm:$0xff] %v5725_v40  ;;  %v6261_v60 = vpop.f32.mrf.mxu1  ;;  %v5567_v25 = vadd.f32 %v7794_v50, %v12106_v28 }
 0x501   :  { %7075 = vst [vmem:[#allocation11 + $0x28] sm:$0xff] %v8779_v55  ;;  %8792 = vpow2.f32 %v6792_v9  ;;  %v6800_v41 = vmul.f32 1.442695, %v6261_v60  ;;  %v7796_v59 = vpop.f32.mrf.mxu0 }
 0x502   :  { %v8781_v36 = vpop.eup %8780  ;;  %v5728_v27 = vadd.f32 %v12226_v30, %v5567_v25  ;;  %v6263_v7 = vpop.f32.mrf.mxu1  ;;  %v7797_v33 = vadd.f32 %v7796_v59, %v7795_v46 }
 0x503   :  { %7076 = vst [vmem:[#allocation11 + $0x30] sm:$0xff] %v8781_v36  ;;  %8794 = vpow2.f32 %v6800_v41  ;;  %v6802_v12 = vmul.f32 1.442695, %v6263_v7  ;;  %v7798_v21 = vpop.f32.mrf.mxu0 }
 0x504   :  { %v8783_v4 = vpop.eup %8782  ;;  %5880 = vst [vmem:[#allocation10 + $0x368] sm:$0xff] %v5728_v27  ;;  %v6267_v6 = vpop.f32.mrf.mxu1  ;;  %v5572_v35 = vadd.f32 %v7797_v33, %v12112_v58 }
 0x505   :  { %7080 = vst [vmem:[#allocation11 + $0x50] sm:$0xff] %v8783_v4  ;;  %8796 = vpow2.f32 %v6802_v12  ;;  %v6810_v28 = vmul.f32 1.442695, %v6267_v6  ;;  %v7799_v52 = vpop.f32.mrf.mxu0 }
 0x506   :  { %v8785_v42 = vpop.eup %8784  ;;  %v5733_v18 = vadd.f32 %v12212_v0, %v5572_v35  ;;  %v6269_v13 = vpop.f32.mrf.mxu1  ;;  %v7800_v30 = vadd.f32 %v7799_v52, %v7798_v21 }
 0x507   :  { %7081 = vst [vmem:[#allocation11 + $0x58] sm:$0xff] %v8785_v42  ;;  %8798 = vpow2.f32 %v6810_v28  ;;  %v6812_v53 = vmul.f32 1.442695, %v6269_v13  ;;  %v7801_v23 = vpop.f32.mrf.mxu0 }
 0x508   :  { %v8787_v11 = vpop.eup %8786  ;;  %5885 = vst [vmem:[#allocation10 + $0x390] sm:$0xff] %v5733_v18  ;;  %v6271_v24 = vpop.f32.mrf.mxu1  ;;  %v5575_v61 = vadd.f32 %v7800_v30, %v12118_v43 }
 0x509   :  { %7085 = vst [vmem:[#allocation11 + $0x78] sm:$0xff] %v8787_v11  ;;  %8800 = vpow2.f32 %v6812_v53  ;;  %v6820_v58 = vmul.f32 1.442695, %v6271_v24  ;;  %v7802_v17 = vpop.f32.mrf.mxu0 }
 0x50a   :  { %v8789_v56 = vpop.eup %8788  ;;  %v5736_v10 = vadd.f32 %v12221_v3, %v5575_v61  ;;  %v6273_v1 = vpop.f32.mrf.mxu1  ;;  %v7803_v0 = vadd.f32 %v7802_v17, %v7801_v23 }
 0x50b   :  { %7086 = vst [vmem:[#allocation11 + $0x80] sm:$0xff] %v8789_v56  ;;  %8802 = vpow2.f32 %v6820_v58  ;;  %v6822_v37 = vmul.f32 1.442695, %v6273_v1  ;;  %v7804_v47 = vpop.f32.mrf.mxu0 }
 0x50c   :  { %v8791_v54 = vpop.eup %8790  ;;  %5890 = vst [vmem:[#allocation10 + $0x3b8] sm:$0xff] %v5736_v10  ;;  %v6277_v45 = vpop.f32.mrf.mxu1  ;;  %v5580_v63 = vadd.f32 %v7803_v0, %v12124_v44 }
 0x50d   :  { %7090 = vst [vmem:[#allocation11 + $0xa0] sm:$0xff] %v8791_v54  ;;  %8804 = vpow2.f32 %v6822_v37  ;;  %v6830_v43 = vmul.f32 1.442695, %v6277_v45  ;;  %v7805_v22 = vpop.f32.mrf.mxu0 }
 0x50e   :  { %v8793_v39 = vpop.eup %8792  ;;  %v5741_v31 = vadd.f32 %v12233_v2, %v5580_v63  ;;  %v6279_v15 = vpop.f32.mrf.mxu1  ;;  %v7806_v3 = vadd.f32 %v7805_v22, %v7804_v47 }
 0x50f   :  { %7091 = vst [vmem:[#allocation11 + $0xa8] sm:$0xff] %v8793_v39  ;;  %8806 = vpow2.f32 %v6830_v43  ;;  %v6832_v5 = vmul.f32 1.442695, %v6279_v15  ;;  %v7807_v40 = vpop.f32.mrf.mxu0 }
 0x510   :  { %v8795_v49 = vpop.eup %8794  ;;  %5895 = vst [vmem:[#allocation10 + $0x3e0] sm:$0xff] %v5741_v31  ;;  %v6281_v50 = vpop.f32.mrf.mxu1  ;;  %v5583_v9 = vadd.f32 %v7806_v3, %v12130_v26 }
 0x511   :  { %7095 = vst [vmem:[#allocation11 + $0xc8] sm:$0xff] %v8795_v49  ;;  %8808 = vpow2.f32 %v6832_v5  ;;  %v6840_v44 = vmul.f32 1.442695, %v6281_v50  ;;  %v7808_v46 = vpop.f32.mrf.mxu0 }
 0x512   :  { %v8797_v55 = vpop.eup %8796  ;;  %v5744_v60 = vadd.f32 %v12239_v8, %v5583_v9  ;;  %v6283_v25 = vpop.f32.mrf.mxu1  ;;  %v7809_v2 = vadd.f32 %v7808_v46, %v7807_v40 }
 0x513   :  { %7096 = vst [vmem:[#allocation11 + $0xd0] sm:$0xff] %v8797_v55  ;;  %8810 = vpow2.f32 %v6840_v44  ;;  %v6842_v41 = vmul.f32 1.442695, %v6283_v25  ;;  %v7810_v59 = vpop.f32.mrf.mxu0 }
 0x514   :  { %v8799_v36 = vpop.eup %8798  ;;  %5900 = vst [vmem:[#allocation10 + $0x408] sm:$0xff] %v5744_v60  ;;  %v6287_v27 = vpop.f32.mrf.mxu1  ;;  %v5588_v7 = vadd.f32 %v7809_v2, %v12136_v48 }
 0x515   :  { %7100 = vst [vmem:[#allocation11 + $0xf0] sm:$0xff] %v8799_v36  ;;  %8812 = vpow2.f32 %v6842_v41  ;;  %v6850_v26 = vmul.f32 1.442695, %v6287_v27  ;;  %v7811_v33 = vpop.f32.mrf.mxu0 }
 0x516   :  { %v8801_v12 = vpop.eup %8800  ;;  %v5749_v21 = vadd.f32 %v12228_v34, %v5588_v7  ;;  %v6289_v4 = vpop.f32.mrf.mxu1  ;;  %v7812_v8 = vadd.f32 %v7811_v33, %v7810_v59 }
 0x517   :  { %7101 = vst [vmem:[#allocation11 + $0xf8] sm:$0xff] %v8801_v12  ;;  %8814 = vpow2.f32 %v6850_v26  ;;  %v6852_v6 = vmul.f32 1.442695, %v6289_v4  ;;  %v7813_v35 = vpop.f32.mrf.mxu0 }
 0x518   :  { %v8803_v28 = vpop.eup %8802  ;;  %5905 = vst [vmem:[#allocation10 + $0x430] sm:$0xff] %v5749_v21  ;;  %v6291_v52 = vpop.f32.mrf.mxu1  ;;  %v5591_v42 = vadd.f32 %v7812_v8, %v12142_v20 }
 0x519   :  { %7105 = vst [vmem:[#allocation11 + $0x118] sm:$0xff] %v8803_v28  ;;  %8816 = vpow2.f32 %v6852_v6  ;;  %v6860_v48 = vmul.f32 1.442695, %v6291_v52  ;;  %v7814_v18 = vpop.f32.mrf.mxu0 }
 0x51a   :  { %v8805_v13 = vpop.eup %8804  ;;  %v5752_v30 = vadd.f32 %v12236_v62, %v5591_v42  ;;  %v6293_v53 = vpop.f32.mrf.mxu1  ;;  %v7815_v34 = vadd.f32 %v7814_v18, %v7813_v35 }
 0x51b   :  { %7106 = vst [vmem:[#allocation11 + $0x120] sm:$0xff] %v8805_v13  ;;  %8818 = vpow2.f32 %v6860_v48  ;;  %v6862_v23 = vmul.f32 1.442695, %v6293_v53  ;;  %v7816_v11 = vpop.f32.mrf.mxu0 }
 0x51c   :  { %v8807_v24 = vpop.eup %8806  ;;  %5910 = vst [vmem:[#allocation10 + $0x458] sm:$0xff] %v5752_v30  ;;  %v6297_v61 = vpop.f32.mrf.mxu1  ;;  %v5596_v58 = vadd.f32 %v7815_v34, %v12148_v32 }
 0x51d   :  { %7110 = vst [vmem:[#allocation11 + $0x140] sm:$0xff] %v8807_v24  ;;  %8820 = vpow2.f32 %v6862_v23  ;;  %v6870_v20 = vmul.f32 1.442695, %v6297_v61  ;;  %v7817_v17 = vpop.f32.mrf.mxu0 }
 0x51e   :  { %v8809_v56 = vpop.eup %8808  ;;  %v5757_v10 = vadd.f32 %v12246_v38, %v5596_v58  ;;  %v6299_v1 = vpop.f32.mrf.mxu1  ;;  %v7818_v62 = vadd.f32 %v7817_v17, %v7816_v11 }
 0x51f   :  { %7111 = vst [vmem:[#allocation11 + $0x148] sm:$0xff] %v8809_v56  ;;  %8822 = vpow2.f32 %v6870_v20  ;;  %v6872_v0 = vmul.f32 1.442695, %v6299_v1  ;;  %v7819_v37 = vpop.f32.mrf.mxu0 }
 0x520   :  { %v8811_v47 = vpop.eup %8810  ;;  %5915 = vst [vmem:[#allocation10 + $0x480] sm:$0xff] %v5757_v10  ;;  %v6301_v54 = vpop.f32.mrf.mxu1  ;;  %v5599_v45 = vadd.f32 %v7818_v62, %v12154_v51 }
 0x521   :  { %7115 = vst [vmem:[#allocation11 + $0x168] sm:$0xff] %v8811_v47  ;;  %8824 = vpow2.f32 %v6872_v0  ;;  %v6880_v32 = vmul.f32 1.442695, %v6301_v54  ;;  %v7820_v63 = vpop.f32.mrf.mxu0 }
 0x522   :  { %v8813_v43 = vpop.eup %8812  ;;  %v5760_v22 = vadd.f32 %v12252_v19, %v5599_v45  ;;  %v6303_v39 = vpop.f32.mrf.mxu1  ;;  %v7821_v38 = vadd.f32 %v7820_v63, %v7819_v37 }
 0x523   :  { %7116 = vst [vmem:[#allocation11 + $0x170] sm:$0xff] %v8813_v43  ;;  %8826 = vpow2.f32 %v6880_v32  ;;  %v6882_v31 = vmul.f32 1.442695, %v6303_v39  ;;  %v7822_v15 = vpop.f32.mrf.mxu0 }
 0x524   :  { %v8815_v3 = vpop.eup %8814  ;;  %5920 = vst [vmem:[#allocation10 + $0x4a8] sm:$0xff] %v5760_v22  ;;  %v6307_v5 = vpop.f32.mrf.mxu1  ;;  %v5604_v40 = vadd.f32 %v7821_v38, %v12160_v57 }
 0x525   :  { %7120 = vst [vmem:[#allocation11 + $0x190] sm:$0xff] %v8815_v3  ;;  %8828 = vpow2.f32 %v6882_v31  ;;  %v6890_v51 = vmul.f32 1.442695, %v6307_v5  ;;  %v7823_v49 = vpop.f32.mrf.mxu0 }
 0x526   :  { %v8817_v50 = vpop.eup %8816  ;;  %v5765_v9 = vadd.f32 %v12241_v14, %v5604_v40  ;;  %v6309_v44 = vpop.f32.mrf.mxu1  ;;  %v7824_v19 = vadd.f32 %v7823_v49, %v7822_v15 }
 0x527   :  { %7121 = vst [vmem:[#allocation11 + $0x198] sm:$0xff] %v8817_v50  ;;  %8830 = vpow2.f32 %v6890_v51  ;;  %v6892_v46 = vmul.f32 1.442695, %v6309_v44  ;;  %v6430_v55 = vpop.f32.mrf.mxu0 }
 0x528   :  { %v8819_v60 = vpop.eup %8818  ;;  %5925 = vst [vmem:[#allocation10 + $0x4d0] sm:$0xff] %v5765_v9  ;;  %v6311_v25 = vpop.f32.mrf.mxu1  ;;  %v5607_v2 = vadd.f32 %v7824_v19, %v12164_v29  ;;  %v6754_v41 = vmul.f32 1.442695, %v6430_v55 }
 0x529   :  { %7125 = vst [vmem:[#allocation11 + $0x1b8] sm:$0xff] %v8819_v60  ;;  %8832 = vpow2.f32 %v6892_v46  ;;  %v6900_v57 = vmul.f32 1.442695, %v6311_v25  ;;  %v6432_v59 = vpop.f32.mrf.mxu0 }
 0x52a   :  { %v8821_v36 = vpop.eup %8820  ;;  %v5768_v27 = vadd.f32 %v12248_v16, %v5607_v2  ;;  %v6313_v14 = vpop.f32.mrf.mxu1  ;;  %8834 = vpow2.f32 %v6754_v41  ;;  %v6756_v7 = vmul.f32 1.442695, %v6432_v59 }
 0x52b   :  { %7126 = vst [vmem:[#allocation11 + $0x1c0] sm:$0xff] %v8821_v36  ;;  %8836 = vpow2.f32 %v6900_v57  ;;  %v6902_v26 = vmul.f32 1.442695, %v6313_v14  ;;  %v6434_v33 = vpop.f32.mrf.mxu0 }
 0x52c   :  { %v8823_v12 = vpop.eup %8822  ;;  %5930 = vst [vmem:[#allocation10 + $0x4f8] sm:$0xff] %v5768_v27  ;;  %v6317_v21 = vpop.f32.mrf.mxu1  ;;  %8838 = vpow2.f32 %v6756_v7  ;;  %v6764_v29 = vmul.f32 1.442695, %v6434_v33 }
 0x52d   :  { %7130 = vst [vmem:[#allocation11 + $0x1e0] sm:$0xff] %v8823_v12  ;;  %8840 = vpow2.f32 %v6902_v26  ;;  %v6910_v4 = vmul.f32 1.442695, %v6317_v21  ;;  %v6436_v8 = vpop.f32.mrf.mxu0 }
 0x52e   :  { %v8825_v6 = vpop.eup %8824  ;;  %v6319_v35 = vpop.f32.mrf.mxu1  ;;  %8842 = vpow2.f32 %v6764_v29  ;;  %v6766_v16 = vmul.f32 1.442695, %v6436_v8 }
 0x52f   :  { %7131 = vst [vmem:[#allocation11 + $0x1e8] sm:$0xff] %v8825_v6  ;;  %8844 = vpow2.f32 %v6910_v4  ;;  %v6912_v28 = vmul.f32 1.442695, %v6319_v35  ;;  %v6440_v52 = vpop.f32.mrf.mxu0 }
 0x530   :  { %v8827_v42 = vpop.eup %8826  ;;  %v6321_v48 = vpop.f32.mrf.mxu1  ;;  %8846 = vpow2.f32 %v6766_v16  ;;  %v6774_v18 = vmul.f32 1.442695, %v6440_v52 }
 0x531   :  { %7135 = vst [vmem:[#allocation11 + $0x208] sm:$0xff] %v8827_v42  ;;  %8848 = vpow2.f32 %v6912_v28  ;;  %v6920_v13 = vmul.f32 1.442695, %v6321_v48  ;;  %v6442_v30 = vpop.f32.mrf.mxu0 }
 0x532   :  { %v8829_v53 = vpop.eup %8828  ;;  %v6323_v34 = vpop.f32.mrf.mxu1  ;;  %8850 = vpow2.f32 %v6774_v18  ;;  %v6776_v23 = vmul.f32 1.442695, %v6442_v30 }
 0x533   :  { %7136 = vst [vmem:[#allocation11 + $0x210] sm:$0xff] %v8829_v53  ;;  %8852 = vpow2.f32 %v6920_v13  ;;  %v6922_v11 = vmul.f32 1.442695, %v6323_v34  ;;  %v6444_v24 = vpop.f32.mrf.mxu0 }
 0x534   :  { %v8831_v61 = vpop.eup %8830  ;;  %v6327_v58 = vpop.f32.mrf.mxu1  ;;  %8854 = vpow2.f32 %v6776_v23  ;;  %v6784_v20 = vmul.f32 1.442695, %v6444_v24 }
 0x535   :  { %7140 = vst [vmem:[#allocation11 + $0x230] sm:$0xff] %v8831_v61  ;;  %8856 = vpow2.f32 %v6922_v11  ;;  %v6930_v17 = vmul.f32 1.442695, %v6327_v58  ;;  %v6446_v56 = vpop.f32.mrf.mxu0 }
 0x536   :  { %v8833_v10 = vpop.eup %8832  ;;  %v6329_v1 = vpop.f32.mrf.mxu1  ;;  %8858 = vpow2.f32 %v6784_v20  ;;  %v6786_v62 = vmul.f32 1.442695, %v6446_v56 }
 0x537   :  { %v8835_v0 = vpop.eup %8834  ;;  %7141 = vst [vmem:[#allocation11 + $0x238] sm:$0xff] %v8833_v10  ;;  %8860 = vpow2.f32 %v6930_v17  ;;  %v6932_v37 = vmul.f32 1.442695, %v6329_v1  ;;  %v6450_v47 = vpop.f32.mrf.mxu0 }
 0x538   :  { %v8837_v54 = vpop.eup %8836  ;;  %7072 = vst [vmem:[#allocation11 + $0x10] sm:$0xff] %v8835_v0  ;;  %v6331_v45 = vpop.f32.mrf.mxu1  ;;  %8862 = vpow2.f32 %v6786_v62  ;;  %v6794_v32 = vmul.f32 1.442695, %v6450_v47 }
 0x539   :  { %v8839_v63 = vpop.eup %8838  ;;  %7145 = vst [vmem:[#allocation11 + $0x258] sm:$0xff] %v8837_v54  ;;  %8864 = vpow2.f32 %v6932_v37  ;;  %v6940_v43 = vmul.f32 1.442695, %v6331_v45  ;;  %v6452_v22 = vpop.f32.mrf.mxu0 }
 0x53a   :  { %v8841_v39 = vpop.eup %8840  ;;  %7073 = vst [vmem:[#allocation11 + $0x18] sm:$0xff] %v8839_v63  ;;  %v6333_v38 = vpop.f32.mrf.mxu1  ;;  %8866 = vpow2.f32 %v6794_v32  ;;  %v6796_v31 = vmul.f32 1.442695, %v6452_v22 }
 0x53b   :  { %v8843_v15 = vpop.eup %8842  ;;  %7146 = vst [vmem:[#allocation11 + $0x260] sm:$0xff] %v8841_v39  ;;  %8868 = vpow2.f32 %v6940_v43  ;;  %v6942_v3 = vmul.f32 1.442695, %v6333_v38  ;;  %v6454_v5 = vpop.f32.mrf.mxu0 }
 0x53c   :  { %v8845_v40 = vpop.eup %8844  ;;  %7077 = vst [vmem:[#allocation11 + $0x38] sm:$0xff] %v8843_v15  ;;  %v6337_v51 = vpop.f32.mrf.mxu1  ;;  %8870 = vpow2.f32 %v6796_v31  ;;  %v6804_v49 = vmul.f32 1.442695, %v6454_v5 }
 0x53d   :  { %v8847_v50 = vpop.eup %8846  ;;  %7150 = vst [vmem:[#allocation11 + $0x280] sm:$0xff] %v8845_v40  ;;  %8872 = vpow2.f32 %v6942_v3  ;;  %v6950_v9 = vmul.f32 1.442695, %v6337_v51  ;;  %v6456_v44 = vpop.f32.mrf.mxu0 }
 0x53e   :  { %v8849_v19 = vpop.eup %8848  ;;  %7078 = vst [vmem:[#allocation11 + $0x40] sm:$0xff] %v8847_v50  ;;  %v6339_v46 = vpop.f32.mrf.mxu1  ;;  %8874 = vpow2.f32 %v6804_v49  ;;  %v6806_v55 = vmul.f32 1.442695, %v6456_v44 }
 0x53f   :  { %9201 = shalt.err (!%p9198_p10)
}
 0x540   :  { %7241 = dma.vmem_to_hbm [thread:$0]  %s7236_s3, 20480, %s12302_s4, [#allocation4], %s9241_s21, %s9241_s21, %s9242_s22   ;;  %v8851_v60 = vpop.eup %8850  ;;  %7151 = vst [vmem:[#allocation11 + $0x288] sm:$0xff] %v8849_v19  ;;  %8876 = vpow2.f32 %v6950_v9  ;;  %v6952_v25 = vmul.f32 1.442695, %v6339_v46  ;;  %v6460_v2 = vpop.f32.mrf.mxu0 }
 0x541   :  { %v8853_v41 = vpop.eup %8852  ;;  %7082 = vst [vmem:[#allocation11 + $0x60] sm:$0xff] %v8851_v60  ;;  %v6341_v57 = vpop.f32.mrf.mxu1  ;;  %8878 = vpow2.f32 %v6806_v55  ;;  %v6814_v59 = vmul.f32 1.442695, %v6460_v2  ;;  %s9252_s4 = smov [#allocation11]  }
 0x542   :  { %v8855_v36 = vpop.eup %8854  ;;  %7155 = vst [vmem:[#allocation11 + $0x2a8] sm:$0xff] %v8853_v41  ;;  %8880 = vpow2.f32 %v6952_v25  ;;  %v6960_v27 = vmul.f32 1.442695, %v6341_v57  ;;  %v6462_v14 = vpop.f32.mrf.mxu0  ;;  %s7247_s20 = sshll.u32 %s9252_s4, 4  ;;  %s7248_s20 = int_to_ptr.vmem [resolvable:$true] %s7247_s20 }
 0x543   :  { %v8857_v7 = vpop.eup %8856  ;;  %7083 = vst [vmem:[#allocation11 + $0x68] sm:$0xff] %v8855_v36  ;;  %v6343_v26 = vpop.f32.mrf.mxu1  ;;  %8882 = vpow2.f32 %v6814_v59  ;;  %v6816_v33 = vmul.f32 1.442695, %v6462_v14  ;;  %s9210_s23 = scalar_lea.vmem %s7248_s20, 20480  ;;  %p9215_p12 = scmp.lt.s32.totalorder %s7248_s20, %s7248_s20 }
 0x544   :  { %v8859_v12 = vpop.eup %8858  ;;  %7156 = vst [vmem:[#allocation11 + $0x2b0] sm:$0xff] %v8857_v7  ;;  %8884 = vpow2.f32 %v6960_v27  ;;  %v6962_v21 = vmul.f32 1.442695, %v6343_v26  ;;  %v6464_v29 = vpop.f32.mrf.mxu0  ;;  %p9211_p11 = scmp.ne.s32.totalorder %s7248_s20, %s9210_s23  ;;  %p9216_p13 = scmp.lt.s32.totalorder %s9210_s23, %s9210_s23 }
 0x545   :  { %v8861_v4 = vpop.eup %8860  ;;  %7087 = vst [vmem:[#allocation11 + $0x88] sm:$0xff] %v8859_v12  ;;  %v6347_v8 = vpop.f32.mrf.mxu1  ;;  %8886 = vpow2.f32 %v6816_v33  ;;  %v6824_v6 = vmul.f32 1.442695, %v6464_v29 }
 0x546   :  { %v8863_v35 = vpop.eup %8862  ;;  %7160 = vst [vmem:[#allocation11 + $0x2d0] sm:$0xff] %v8861_v4  ;;  %8888 = vpow2.f32 %v6962_v21  ;;  %v6970_v16 = vmul.f32 1.442695, %v6347_v8  ;;  %v6466_v28 = vpop.f32.mrf.mxu0  ;;  %p9217_p0 = por %p9216_p13, %p9215_p12 }
 0x547   :  { %v8865_v52 = vpop.eup %8864  ;;  %7088 = vst [vmem:[#allocation11 + $0x90] sm:$0xff] %v8863_v35  ;;  %v6349_v42 = vpop.f32.mrf.mxu1  ;;  %8890 = vpow2.f32 %v6824_v6  ;;  %v6826_v48 = vmul.f32 1.442695, %v6466_v28 }
 0x548   :  { %v8867_v18 = vpop.eup %8866  ;;  %7161 = vst [vmem:[#allocation11 + $0x2d8] sm:$0xff] %v8865_v52  ;;  %8892 = vpow2.f32 %v6970_v16  ;;  %v6972_v13 = vmul.f32 1.442695, %v6349_v42  ;;  %v6470_v30 = vpop.f32.mrf.mxu0  ;;  %p9218_p1 = pnand %p9217_p0, %p9211_p11 }
 0x549   :  { %v8869_v53 = vpop.eup %8868  ;;  %7092 = vst [vmem:[#allocation11 + $0xb0] sm:$0xff] %v8867_v18  ;;  %v6351_v34 = vpop.f32.mrf.mxu1  ;;  %8894 = vpow2.f32 %v6826_v48  ;;  %v6834_v23 = vmul.f32 1.442695, %v6470_v30 }
 0x54a   :  { %v8871_v11 = vpop.eup %8870  ;;  %7165 = vst [vmem:[#allocation11 + $0x2f8] sm:$0xff] %v8869_v53  ;;  %8896 = vpow2.f32 %v6972_v13  ;;  %v6980_v24 = vmul.f32 1.442695, %v6351_v34  ;;  %v6472_v61 = vpop.f32.mrf.mxu0 }
 0x54b   :  { %v8873_v58 = vpop.eup %8872  ;;  %7093 = vst [vmem:[#allocation11 + $0xb8] sm:$0xff] %v8871_v11  ;;  %v6353_v20 = vpop.f32.mrf.mxu1  ;;  %8898 = vpow2.f32 %v6834_v23  ;;  %v6836_v17 = vmul.f32 1.442695, %v6472_v61 }
 0x54c   :  { %v8875_v56 = vpop.eup %8874  ;;  %7166 = vst [vmem:[#allocation11 + $0x300] sm:$0xff] %v8873_v58  ;;  %8900 = vpow2.f32 %v6980_v24  ;;  %v6982_v10 = vmul.f32 1.442695, %v6353_v20  ;;  %v6474_v1 = vpop.f32.mrf.mxu0 }
 0x54d   :  { %v8877_v62 = vpop.eup %8876  ;;  %7097 = vst [vmem:[#allocation11 + $0xd8] sm:$0xff] %v8875_v56  ;;  %v6357_v0 = vpop.f32.mrf.mxu1  ;;  %8902 = vpow2.f32 %v6836_v17  ;;  %v6844_v37 = vmul.f32 1.442695, %v6474_v1 }
 0x54e   :  { %v8879_v47 = vpop.eup %8878  ;;  %7170 = vst [vmem:[#allocation11 + $0x320] sm:$0xff] %v8877_v62  ;;  %8904 = vpow2.f32 %v6982_v10  ;;  %v6990_v54 = vmul.f32 1.442695, %v6357_v0  ;;  %v6476_v45 = vpop.f32.mrf.mxu0 }
 0x54f   :  { %v8881_v32 = vpop.eup %8880  ;;  %7098 = vst [vmem:[#allocation11 + $0xe0] sm:$0xff] %v8879_v47  ;;  %v6359_v63 = vpop.f32.mrf.mxu1  ;;  %8906 = vpow2.f32 %v6844_v37  ;;  %v6846_v43 = vmul.f32 1.442695, %v6476_v45 }
 0x550   :  { %v8883_v22 = vpop.eup %8882  ;;  %7171 = vst [vmem:[#allocation11 + $0x328] sm:$0xff] %v8881_v32  ;;  %8908 = vpow2.f32 %v6990_v54  ;;  %v6992_v39 = vmul.f32 1.442695, %v6359_v63  ;;  %v6480_v38 = vpop.f32.mrf.mxu0 }
 0x551   :  { %v8885_v31 = vpop.eup %8884  ;;  %7102 = vst [vmem:[#allocation11 + $0x100] sm:$0xff] %v8883_v22  ;;  %v6361_v15 = vpop.f32.mrf.mxu1  ;;  %8910 = vpow2.f32 %v6846_v43  ;;  %v6854_v3 = vmul.f32 1.442695, %v6480_v38 }
 0x552   :  { %v8887_v5 = vpop.eup %8886  ;;  %7175 = vst [vmem:[#allocation11 + $0x348] sm:$0xff] %v8885_v31  ;;  %8912 = vpow2.f32 %v6992_v39  ;;  %v7000_v40 = vmul.f32 1.442695, %v6361_v15  ;;  %v6482_v51 = vpop.f32.mrf.mxu0 }
 0x553   :  { %v8889_v49 = vpop.eup %8888  ;;  %7103 = vst [vmem:[#allocation11 + $0x108] sm:$0xff] %v8887_v5  ;;  %v6363_v50 = vpop.f32.mrf.mxu1  ;;  %8914 = vpow2.f32 %v6854_v3  ;;  %v6856_v9 = vmul.f32 1.442695, %v6482_v51 }
 0x554   :  { %v8891_v44 = vpop.eup %8890  ;;  %7176 = vst [vmem:[#allocation11 + $0x350] sm:$0xff] %v8889_v49  ;;  %8916 = vpow2.f32 %v7000_v40  ;;  %v7002_v19 = vmul.f32 1.442695, %v6363_v50  ;;  %v6484_v46 = vpop.f32.mrf.mxu0 }
 0x555   :  { %v8893_v55 = vpop.eup %8892  ;;  %7107 = vst [vmem:[#allocation11 + $0x128] sm:$0xff] %v8891_v44  ;;  %v6367_v60 = vpop.f32.mrf.mxu1  ;;  %8918 = vpow2.f32 %v6856_v9  ;;  %v6864_v25 = vmul.f32 1.442695, %v6484_v46 }
 0x556   :  { %v8895_v2 = vpop.eup %8894  ;;  %7180 = vst [vmem:[#allocation11 + $0x370] sm:$0xff] %v8893_v55  ;;  %8920 = vpow2.f32 %v7002_v19  ;;  %v7010_v41 = vmul.f32 1.442695, %v6367_v60  ;;  %v6486_v57 = vpop.f32.mrf.mxu0 }
 0x557   :  { %v8897_v59 = vpop.eup %8896  ;;  %7108 = vst [vmem:[#allocation11 + $0x130] sm:$0xff] %v8895_v2  ;;  %v6369_v36 = vpop.f32.mrf.mxu1  ;;  %8922 = vpow2.f32 %v6864_v25  ;;  %v6866_v27 = vmul.f32 1.442695, %v6486_v57 }
 0x558   :  { %v8899_v14 = vpop.eup %8898  ;;  %7181 = vst [vmem:[#allocation11 + $0x378] sm:$0xff] %v8897_v59  ;;  %8924 = vpow2.f32 %v7010_v41  ;;  %v7012_v7 = vmul.f32 1.442695, %v6369_v36  ;;  %v6490_v26 = vpop.f32.mrf.mxu0 }
 0x559   :  { %v8901_v33 = vpop.eup %8900  ;;  %7112 = vst [vmem:[#allocation11 + $0x150] sm:$0xff] %v8899_v14  ;;  %v6371_v12 = vpop.f32.mrf.mxu1  ;;  %8926 = vpow2.f32 %v6866_v27  ;;  %v6874_v21 = vmul.f32 1.442695, %v6490_v26 }
 0x55a   :  { %v8903_v29 = vpop.eup %8902  ;;  %7185 = vst [vmem:[#allocation11 + $0x398] sm:$0xff] %v8901_v33  ;;  %8928 = vpow2.f32 %v7012_v7  ;;  %v7020_v4 = vmul.f32 1.442695, %v6371_v12  ;;  %v6492_v8 = vpop.f32.mrf.mxu0 }
 0x55b   :  { %v8905_v6 = vpop.eup %8904  ;;  %7113 = vst [vmem:[#allocation11 + $0x158] sm:$0xff] %v8903_v29  ;;  %v6373_v35 = vpop.f32.mrf.mxu1  ;;  %8930 = vpow2.f32 %v6874_v21  ;;  %v6876_v16 = vmul.f32 1.442695, %v6492_v8 }
 0x55c   :  { %v8907_v28 = vpop.eup %8906  ;;  %7186 = vst [vmem:[#allocation11 + $0x3a0] sm:$0xff] %v8905_v6  ;;  %8932 = vpow2.f32 %v7020_v4  ;;  %v7022_v52 = vmul.f32 1.442695, %v6373_v35  ;;  %v6494_v42 = vpop.f32.mrf.mxu0 }
 0x55d   :  { %v8909_v48 = vpop.eup %8908  ;;  %7117 = vst [vmem:[#allocation11 + $0x178] sm:$0xff] %v8907_v28  ;;  %v6377_v18 = vpop.f32.mrf.mxu1  ;;  %8934 = vpow2.f32 %v6876_v16  ;;  %v6884_v13 = vmul.f32 1.442695, %v6494_v42 }
 0x55e   :  { %v8911_v30 = vpop.eup %8910  ;;  %7190 = vst [vmem:[#allocation11 + $0x3c0] sm:$0xff] %v8909_v48  ;;  %8936 = vpow2.f32 %v7022_v52  ;;  %v7030_v53 = vmul.f32 1.442695, %v6377_v18  ;;  %v6496_v34 = vpop.f32.mrf.mxu0 }
 0x55f   :  { %v8913_v23 = vpop.eup %8912  ;;  %7118 = vst [vmem:[#allocation11 + $0x180] sm:$0xff] %v8911_v30  ;;  %v6379_v11 = vpop.f32.mrf.mxu1  ;;  %8938 = vpow2.f32 %v6884_v13  ;;  %v6886_v24 = vmul.f32 1.442695, %v6496_v34 }
 0x560   :  { %v8915_v61 = vpop.eup %8914  ;;  %7191 = vst [vmem:[#allocation11 + $0x3c8] sm:$0xff] %v8913_v23  ;;  %8940 = vpow2.f32 %v7030_v53  ;;  %v7032_v58 = vmul.f32 1.442695, %v6379_v11  ;;  %v6500_v20 = vpop.f32.mrf.mxu0 }
 0x561   :  { %v8917_v17 = vpop.eup %8916  ;;  %7122 = vst [vmem:[#allocation11 + $0x1a0] sm:$0xff] %v8915_v61  ;;  %v6381_v56 = vpop.f32.mrf.mxu1  ;;  %8942 = vpow2.f32 %v6886_v24  ;;  %v6894_v10 = vmul.f32 1.442695, %v6500_v20 }
 0x562   :  { %v8919_v1 = vpop.eup %8918  ;;  %7195 = vst [vmem:[#allocation11 + $0x3e8] sm:$0xff] %v8917_v17  ;;  %8944 = vpow2.f32 %v7032_v58  ;;  %v7040_v62 = vmul.f32 1.442695, %v6381_v56  ;;  %v6502_v0 = vpop.f32.mrf.mxu0 }
 0x563   :  { %v8921_v37 = vpop.eup %8920  ;;  %7123 = vst [vmem:[#allocation11 + $0x1a8] sm:$0xff] %v8919_v1  ;;  %v6383_v47 = vpop.f32.mrf.mxu1  ;;  %8946 = vpow2.f32 %v6894_v10  ;;  %v6896_v54 = vmul.f32 1.442695, %v6502_v0 }
 0x564   :  { %v8923_v45 = vpop.eup %8922  ;;  %7196 = vst [vmem:[#allocation11 + $0x3f0] sm:$0xff] %v8921_v37  ;;  %8948 = vpow2.f32 %v7040_v62  ;;  %v7042_v32 = vmul.f32 1.442695, %v6383_v47  ;;  %v6504_v63 = vpop.f32.mrf.mxu0 }
 0x565   :  { %v8925_v43 = vpop.eup %8924  ;;  %7127 = vst [vmem:[#allocation11 + $0x1c8] sm:$0xff] %v8923_v45  ;;  %v6387_v22 = vpop.f32.mrf.mxu1  ;;  %8950 = vpow2.f32 %v6896_v54  ;;  %v6904_v39 = vmul.f32 1.442695, %v6504_v63 }
 0x566   :  { %v8927_v38 = vpop.eup %8926  ;;  %7200 = vst [vmem:[#allocation11 + $0x410] sm:$0xff] %v8925_v43  ;;  %8952 = vpow2.f32 %v7042_v32  ;;  %v7050_v31 = vmul.f32 1.442695, %v6387_v22  ;;  %v6506_v15 = vpop.f32.mrf.mxu0 }
 0x567   :  { %v8929_v3 = vpop.eup %8928  ;;  %7128 = vst [vmem:[#allocation11 + $0x1d0] sm:$0xff] %v8927_v38  ;;  %v6389_v5 = vpop.f32.mrf.mxu1  ;;  %8954 = vpow2.f32 %v6904_v39  ;;  %v6906_v40 = vmul.f32 1.442695, %v6506_v15 }
 0x568   :  { %v8931_v51 = vpop.eup %8930  ;;  %7201 = vst [vmem:[#allocation11 + $0x418] sm:$0xff] %v8929_v3  ;;  %8956 = vpow2.f32 %v7050_v31  ;;  %v7052_v49 = vmul.f32 1.442695, %v6389_v5  ;;  %v6510_v50 = vpop.f32.mrf.mxu0 }
 0x569   :  { %v8933_v9 = vpop.eup %8932  ;;  %7132 = vst [vmem:[#allocation11 + $0x1f0] sm:$0xff] %v8931_v51  ;;  %v6391_v44 = vpop.f32.mrf.mxu1  ;;  %8958 = vpow2.f32 %v6906_v40  ;;  %v6914_v19 = vmul.f32 1.442695, %v6510_v50 }
 0x56a   :  { %v8935_v46 = vpop.eup %8934  ;;  %7205 = vst [vmem:[#allocation11 + $0x438] sm:$0xff] %v8933_v9  ;;  %8960 = vpow2.f32 %v7052_v49  ;;  %v7060_v55 = vmul.f32 1.442695, %v6391_v44  ;;  %v6512_v60 = vpop.f32.mrf.mxu0 }
 0x56b   :  { %v8937_v25 = vpop.eup %8936  ;;  %7133 = vst [vmem:[#allocation11 + $0x1f8] sm:$0xff] %v8935_v46  ;;  %v6393_v2 = vpop.f32.mrf.mxu1  ;;  %8962 = vpow2.f32 %v6914_v19  ;;  %v6916_v41 = vmul.f32 1.442695, %v6512_v60 }
 0x56c   :  { %v8939_v57 = vpop.eup %8938  ;;  %7206 = vst [vmem:[#allocation11 + $0x440] sm:$0xff] %v8937_v25  ;;  %8964 = vpow2.f32 %v7060_v55  ;;  %v7062_v59 = vmul.f32 1.442695, %v6393_v2  ;;  %v6514_v36 = vpop.f32.mrf.mxu0 }
 0x56d   :  { %v8941_v27 = vpop.eup %8940  ;;  %7137 = vst [vmem:[#allocation11 + $0x218] sm:$0xff] %v8939_v57  ;;  %v7939_v14 = vpop.f32.mrf.mxu1  ;;  %8966 = vpow2.f32 %v6916_v41  ;;  %v6924_v7 = vmul.f32 1.442695, %v6514_v36 }
 0x56e   :  { %v8943_v26 = vpop.eup %8942  ;;  %7210 = vst [vmem:[#allocation11 + $0x460] sm:$0xff] %v8941_v27  ;;  %8968 = vpow2.f32 %v7062_v59  ;;  %v6778_v33 = vmul.f32 1.442695, %v7939_v14  ;;  %v6516_v12 = vpop.f32.mrf.mxu0 }
 0x56f   :  { %v8945_v21 = vpop.eup %8944  ;;  %7138 = vst [vmem:[#allocation11 + $0x220] sm:$0xff] %v8943_v26  ;;  %v6623_v29 = vpop.f32.mrf.mxu1  ;;  %8970 = vpow2.f32 %v6924_v7  ;;  %v6926_v4 = vmul.f32 1.442695, %v6516_v12 }
 0x570   :  { %v8947_v8 = vpop.eup %8946  ;;  %7211 = vst [vmem:[#allocation11 + $0x468] sm:$0xff] %v8945_v21  ;;  %8972 = vpow2.f32 %v6778_v33  ;;  %v6758_v6 = vmul.f32 1.442695, %v6623_v29  ;;  %v6520_v35 = vpop.f32.mrf.mxu0 }
 0x571   :  { %v8949_v16 = vpop.eup %8948  ;;  %7142 = vst [vmem:[#allocation11 + $0x240] sm:$0xff] %v8947_v8  ;;  %v7940_v28 = vpop.f32.mrf.mxu1  ;;  %8974 = vpow2.f32 %v6926_v4  ;;  %v6934_v52 = vmul.f32 1.442695, %v6520_v35 }
 0x572   :  { %v8951_v42 = vpop.eup %8950  ;;  %7215 = vst [vmem:[#allocation11 + $0x488] sm:$0xff] %v8949_v16  ;;  %8976 = vpow2.f32 %v6758_v6  ;;  %v6788_v48 = vmul.f32 1.442695, %v7940_v28  ;;  %v6522_v18 = vpop.f32.mrf.mxu0 }
 0x573   :  { %v8953_v13 = vpop.eup %8952  ;;  %7143 = vst [vmem:[#allocation11 + $0x248] sm:$0xff] %v8951_v42  ;;  %v6626_v30 = vpop.f32.mrf.mxu1  ;;  %8978 = vpow2.f32 %v6934_v52  ;;  %v6936_v53 = vmul.f32 1.442695, %v6522_v18 }
 0x574   :  { %v8955_v34 = vpop.eup %8954  ;;  %7216 = vst [vmem:[#allocation11 + $0x490] sm:$0xff] %v8953_v13  ;;  %8980 = vpow2.f32 %v6788_v48  ;;  %v6768_v23 = vmul.f32 1.442695, %v6626_v30  ;;  %v6524_v11 = vpop.f32.mrf.mxu0 }
 0x575   :  { %v8957_v24 = vpop.eup %8956  ;;  %7147 = vst [vmem:[#allocation11 + $0x268] sm:$0xff] %v8955_v34  ;;  %v7943_v61 = vpop.f32.mrf.mxu1  ;;  %8982 = vpow2.f32 %v6936_v53  ;;  %v6944_v58 = vmul.f32 1.442695, %v6524_v11 }
 0x576   :  { %v8959_v20 = vpop.eup %8958  ;;  %7220 = vst [vmem:[#allocation11 + $0x4b0] sm:$0xff] %v8957_v24  ;;  %8984 = vpow2.f32 %v6768_v23  ;;  %v6818_v17 = vmul.f32 1.442695, %v7943_v61  ;;  %v6526_v56 = vpop.f32.mrf.mxu0 }
 0x577   :  { %v8961_v10 = vpop.eup %8960  ;;  %7148 = vst [vmem:[#allocation11 + $0x270] sm:$0xff] %v8959_v20  ;;  %v6639_v1 = vpop.f32.mrf.mxu1  ;;  %8986 = vpow2.f32 %v6944_v58  ;;  %v6946_v62 = vmul.f32 1.442695, %v6526_v56 }
 0x578   :  { %v8963_v0 = vpop.eup %8962  ;;  %7221 = vst [vmem:[#allocation11 + $0x4b8] sm:$0xff] %v8961_v10  ;;  %8988 = vpow2.f32 %v6818_v17  ;;  %v6798_v37 = vmul.f32 1.442695, %v6639_v1  ;;  %v6530_v47 = vpop.f32.mrf.mxu0 }
 0x579   :  { %v8965_v54 = vpop.eup %8964  ;;  %7152 = vst [vmem:[#allocation11 + $0x290] sm:$0xff] %v8963_v0  ;;  %v7944_v45 = vpop.f32.mrf.mxu1  ;;  %8990 = vpow2.f32 %v6946_v62  ;;  %v6954_v32 = vmul.f32 1.442695, %v6530_v47 }
 0x57a   :  { %v8967_v63 = vpop.eup %8966  ;;  %7225 = vst [vmem:[#allocation11 + $0x4d8] sm:$0xff] %v8965_v54  ;;  %8992 = vpow2.f32 %v6798_v37  ;;  %v6828_v43 = vmul.f32 1.442695, %v7944_v45  ;;  %v6532_v22 = vpop.f32.mrf.mxu0 }
 0x57b   :  { %v8969_v39 = vpop.eup %8968  ;;  %7153 = vst [vmem:[#allocation11 + $0x298] sm:$0xff] %v8967_v63  ;;  %v6642_v38 = vpop.f32.mrf.mxu1  ;;  %8994 = vpow2.f32 %v6954_v32  ;;  %v6956_v31 = vmul.f32 1.442695, %v6532_v22 }
 0x57c   :  { %v8971_v15 = vpop.eup %8970  ;;  %7226 = vst [vmem:[#allocation11 + $0x4e0] sm:$0xff] %v8969_v39  ;;  %8996 = vpow2.f32 %v6828_v43  ;;  %v6808_v3 = vmul.f32 1.442695, %v6642_v38  ;;  %v6534_v5 = vpop.f32.mrf.mxu0 }
 0x57d   :  { %v8973_v40 = vpop.eup %8972  ;;  %7157 = vst [vmem:[#allocation11 + $0x2b8] sm:$0xff] %v8971_v15  ;;  %v7947_v51 = vpop.f32.mrf.mxu1  ;;  %8998 = vpow2.f32 %v6956_v31  ;;  %v6964_v49 = vmul.f32 1.442695, %v6534_v5 }
 0x57e   :  { %v8975_v50 = vpop.eup %8974  ;;  %7084 = vst [vmem:[#allocation11 + $0x70] sm:$0xff] %v8973_v40  ;;  %9000 = vpow2.f32 %v6808_v3  ;;  %v6858_v9 = vmul.f32 1.442695, %v7947_v51  ;;  %v6536_v44 = vpop.f32.mrf.mxu0 }
 0x57f   :  { %v8977_v19 = vpop.eup %8976  ;;  %7158 = vst [vmem:[#allocation11 + $0x2c0] sm:$0xff] %v8975_v50  ;;  %v6655_v46 = vpop.f32.mrf.mxu1  ;;  %9002 = vpow2.f32 %v6964_v49  ;;  %v6966_v55 = vmul.f32 1.442695, %v6536_v44 }
 0x580   :  { %v8979_v60 = vpop.eup %8978  ;;  %7074 = vst [vmem:[#allocation11 + $0x20] sm:$0xff] %v8977_v19  ;;  %9004 = vpow2.f32 %v6858_v9  ;;  %v6838_v25 = vmul.f32 1.442695, %v6655_v46  ;;  %v6540_v2 = vpop.f32.mrf.mxu0 }
 0x581   :  { %v8981_v41 = vpop.eup %8980  ;;  %7162 = vst [vmem:[#allocation11 + $0x2e0] sm:$0xff] %v8979_v60  ;;  %v7948_v57 = vpop.f32.mrf.mxu1  ;;  %9006 = vpow2.f32 %v6966_v55  ;;  %v6974_v59 = vmul.f32 1.442695, %v6540_v2 }
 0x582   :  { %v8983_v36 = vpop.eup %8982  ;;  %7089 = vst [vmem:[#allocation11 + $0x98] sm:$0xff] %v8981_v41  ;;  %9008 = vpow2.f32 %v6838_v25  ;;  %v6868_v27 = vmul.f32 1.442695, %v7948_v57  ;;  %v6542_v14 = vpop.f32.mrf.mxu0 }
 0x583   :  { %v8985_v7 = vpop.eup %8984  ;;  %7163 = vst [vmem:[#allocation11 + $0x2e8] sm:$0xff] %v8983_v36  ;;  %v6658_v26 = vpop.f32.mrf.mxu1  ;;  %9010 = vpow2.f32 %v6974_v59  ;;  %v6976_v33 = vmul.f32 1.442695, %v6542_v14 }
 0x584   :  { %v8987_v12 = vpop.eup %8986  ;;  %7079 = vst [vmem:[#allocation11 + $0x48] sm:$0xff] %v8985_v7  ;;  %9012 = vpow2.f32 %v6868_v27  ;;  %v6848_v21 = vmul.f32 1.442695, %v6658_v26  ;;  %v6544_v29 = vpop.f32.mrf.mxu0 }
 0x585   :  { %v8989_v4 = vpop.eup %8988  ;;  %7167 = vst [vmem:[#allocation11 + $0x308] sm:$0xff] %v8987_v12  ;;  %v7951_v8 = vpop.f32.mrf.mxu1  ;;  %9014 = vpow2.f32 %v6976_v33  ;;  %v6984_v6 = vmul.f32 1.442695, %v6544_v29 }
 0x586   :  { %v8991_v35 = vpop.eup %8990  ;;  %7104 = vst [vmem:[#allocation11 + $0x110] sm:$0xff] %v8989_v4  ;;  %9016 = vpow2.f32 %v6848_v21  ;;  %v6898_v16 = vmul.f32 1.442695, %v7951_v8  ;;  %v6546_v28 = vpop.f32.mrf.mxu0 }
 0x587   :  { %v8993_v52 = vpop.eup %8992  ;;  %7168 = vst [vmem:[#allocation11 + $0x310] sm:$0xff] %v8991_v35  ;;  %v6671_v42 = vpop.f32.mrf.mxu1  ;;  %9018 = vpow2.f32 %v6984_v6  ;;  %v6986_v48 = vmul.f32 1.442695, %v6546_v28 }
 0x588   :  { %v8995_v18 = vpop.eup %8994  ;;  %7094 = vst [vmem:[#allocation11 + $0xc0] sm:$0xff] %v8993_v52  ;;  %9020 = vpow2.f32 %v6898_v16  ;;  %v6878_v13 = vmul.f32 1.442695, %v6671_v42  ;;  %v6550_v30 = vpop.f32.mrf.mxu0 }
 0x589   :  { %v8997_v53 = vpop.eup %8996  ;;  %7172 = vst [vmem:[#allocation11 + $0x330] sm:$0xff] %v8995_v18  ;;  %v7952_v34 = vpop.f32.mrf.mxu1  ;;  %9022 = vpow2.f32 %v6986_v48  ;;  %v6994_v23 = vmul.f32 1.442695, %v6550_v30 }
 0x58a   :  { %v8999_v11 = vpop.eup %8998  ;;  %7109 = vst [vmem:[#allocation11 + $0x138] sm:$0xff] %v8997_v53  ;;  %9024 = vpow2.f32 %v6878_v13  ;;  %v6908_v24 = vmul.f32 1.442695, %v7952_v34  ;;  %v6552_v61 = vpop.f32.mrf.mxu0 }
 0x58b   :  { %v9001_v58 = vpop.eup %9000  ;;  %7173 = vst [vmem:[#allocation11 + $0x338] sm:$0xff] %v8999_v11  ;;  %v6674_v20 = vpop.f32.mrf.mxu1  ;;  %9026 = vpow2.f32 %v6994_v23  ;;  %v6996_v17 = vmul.f32 1.442695, %v6552_v61 }
 0x58c   :  { %v9003_v56 = vpop.eup %9002  ;;  %7099 = vst [vmem:[#allocation11 + $0xe8] sm:$0xff] %v9001_v58  ;;  %9028 = vpow2.f32 %v6908_v24  ;;  %v6888_v10 = vmul.f32 1.442695, %v6674_v20  ;;  %v6554_v1 = vpop.f32.mrf.mxu0 }
 0x58d   :  { %v9005_v62 = vpop.eup %9004  ;;  %7177 = vst [vmem:[#allocation11 + $0x358] sm:$0xff] %v9003_v56  ;;  %v7955_v0 = vpop.f32.mrf.mxu1  ;;  %9030 = vpow2.f32 %v6996_v17  ;;  %v7004_v37 = vmul.f32 1.442695, %v6554_v1 }
 0x58e   :  { %v9007_v47 = vpop.eup %9006  ;;  %7124 = vst [vmem:[#allocation11 + $0x1b0] sm:$0xff] %v9005_v62  ;;  %9032 = vpow2.f32 %v6888_v10  ;;  %v6938_v54 = vmul.f32 1.442695, %v7955_v0  ;;  %v6556_v45 = vpop.f32.mrf.mxu0 }
 0x58f   :  { %v9009_v32 = vpop.eup %9008  ;;  %7178 = vst [vmem:[#allocation11 + $0x360] sm:$0xff] %v9007_v47  ;;  %v6687_v63 = vpop.f32.mrf.mxu1  ;;  %9034 = vpow2.f32 %v7004_v37  ;;  %v7006_v43 = vmul.f32 1.442695, %v6556_v45 }
 0x590   :  { %v9011_v22 = vpop.eup %9010  ;;  %7114 = vst [vmem:[#allocation11 + $0x160] sm:$0xff] %v9009_v32  ;;  %9036 = vpow2.f32 %v6938_v54  ;;  %v6918_v39 = vmul.f32 1.442695, %v6687_v63  ;;  %v6560_v38 = vpop.f32.mrf.mxu0 }
 0x591   :  { %v9013_v31 = vpop.eup %9012  ;;  %7182 = vst [vmem:[#allocation11 + $0x380] sm:$0xff] %v9011_v22  ;;  %v7956_v15 = vpop.f32.mrf.mxu1  ;;  %9038 = vpow2.f32 %v7006_v43  ;;  %v7014_v3 = vmul.f32 1.442695, %v6560_v38 }
 0x592   :  { %v9015_v5 = vpop.eup %9014  ;;  %7129 = vst [vmem:[#allocation11 + $0x1d8] sm:$0xff] %v9013_v31  ;;  %9040 = vpow2.f32 %v6918_v39  ;;  %v6948_v40 = vmul.f32 1.442695, %v7956_v15  ;;  %v6562_v51 = vpop.f32.mrf.mxu0 }
 0x593   :  { %v9017_v49 = vpop.eup %9016  ;;  %7183 = vst [vmem:[#allocation11 + $0x388] sm:$0xff] %v9015_v5  ;;  %v6690_v50 = vpop.f32.mrf.mxu1  ;;  %9042 = vpow2.f32 %v7014_v3  ;;  %v7016_v9 = vmul.f32 1.442695, %v6562_v51 }
 0x594   :  { %v9019_v44 = vpop.eup %9018  ;;  %7119 = vst [vmem:[#allocation11 + $0x188] sm:$0xff] %v9017_v49  ;;  %9044 = vpow2.f32 %v6948_v40  ;;  %v6928_v19 = vmul.f32 1.442695, %v6690_v50  ;;  %v6564_v46 = vpop.f32.mrf.mxu0 }
 0x595   :  { %v9021_v55 = vpop.eup %9020  ;;  %7187 = vst [vmem:[#allocation11 + $0x3a8] sm:$0xff] %v9019_v44  ;;  %v7959_v60 = vpop.f32.mrf.mxu1  ;;  %9046 = vpow2.f32 %v7016_v9  ;;  %v7024_v25 = vmul.f32 1.442695, %v6564_v46 }
 0x596   :  { %v9023_v2 = vpop.eup %9022  ;;  %7144 = vst [vmem:[#allocation11 + $0x250] sm:$0xff] %v9021_v55  ;;  %9048 = vpow2.f32 %v6928_v19  ;;  %v6978_v41 = vmul.f32 1.442695, %v7959_v60  ;;  %v6566_v57 = vpop.f32.mrf.mxu0 }
 0x597   :  { %v9025_v59 = vpop.eup %9024  ;;  %7188 = vst [vmem:[#allocation11 + $0x3b0] sm:$0xff] %v9023_v2  ;;  %v6703_v36 = vpop.f32.mrf.mxu1  ;;  %9050 = vpow2.f32 %v7024_v25  ;;  %v7026_v27 = vmul.f32 1.442695, %v6566_v57 }
 0x598   :  { %v9027_v14 = vpop.eup %9026  ;;  %7134 = vst [vmem:[#allocation11 + $0x200] sm:$0xff] %v9025_v59  ;;  %9052 = vpow2.f32 %v6978_v41  ;;  %v6958_v7 = vmul.f32 1.442695, %v6703_v36  ;;  %v6570_v26 = vpop.f32.mrf.mxu0 }
 0x599   :  { %v9029_v33 = vpop.eup %9028  ;;  %7192 = vst [vmem:[#allocation11 + $0x3d0] sm:$0xff] %v9027_v14  ;;  %v7960_v12 = vpop.f32.mrf.mxu1  ;;  %9054 = vpow2.f32 %v7026_v27  ;;  %v7034_v21 = vmul.f32 1.442695, %v6570_v26 }
 0x59a   :  { %v9031_v29 = vpop.eup %9030  ;;  %7149 = vst [vmem:[#allocation11 + $0x278] sm:$0xff] %v9029_v33  ;;  %9056 = vpow2.f32 %v6958_v7  ;;  %v6988_v4 = vmul.f32 1.442695, %v7960_v12  ;;  %v6572_v8 = vpop.f32.mrf.mxu0 }
 0x59b   :  { %v9033_v6 = vpop.eup %9032  ;;  %7193 = vst [vmem:[#allocation11 + $0x3d8] sm:$0xff] %v9031_v29  ;;  %v6706_v35 = vpop.f32.mrf.mxu1  ;;  %9058 = vpow2.f32 %v7034_v21  ;;  %v7036_v16 = vmul.f32 1.442695, %v6572_v8 }
 0x59c   :  { %v9035_v28 = vpop.eup %9034  ;;  %7139 = vst [vmem:[#allocation11 + $0x228] sm:$0xff] %v9033_v6  ;;  %9060 = vpow2.f32 %v6988_v4  ;;  %v6968_v52 = vmul.f32 1.442695, %v6706_v35  ;;  %v6574_v42 = vpop.f32.mrf.mxu0 }
 0x59d   :  { %v9037_v48 = vpop.eup %9036  ;;  %7197 = vst [vmem:[#allocation11 + $0x3f8] sm:$0xff] %v9035_v28  ;;  %v7963_v18 = vpop.f32.mrf.mxu1  ;;  %9062 = vpow2.f32 %v7036_v16  ;;  %v7044_v13 = vmul.f32 1.442695, %v6574_v42 }
 0x59e   :  { %v9039_v30 = vpop.eup %9038  ;;  %7164 = vst [vmem:[#allocation11 + $0x2f0] sm:$0xff] %v9037_v48  ;;  %9064 = vpow2.f32 %v6968_v52  ;;  %v7018_v53 = vmul.f32 1.442695, %v7963_v18  ;;  %v6576_v34 = vpop.f32.mrf.mxu0 }
 0x59f   :  { %v9041_v23 = vpop.eup %9040  ;;  %7198 = vst [vmem:[#allocation11 + $0x400] sm:$0xff] %v9039_v30  ;;  %v6719_v11 = vpop.f32.mrf.mxu1  ;;  %9066 = vpow2.f32 %v7044_v13  ;;  %v7046_v24 = vmul.f32 1.442695, %v6576_v34 }
 0x5a0   :  { %v9043_v61 = vpop.eup %9042  ;;  %7154 = vst [vmem:[#allocation11 + $0x2a0] sm:$0xff] %v9041_v23  ;;  %9068 = vpow2.f32 %v7018_v53  ;;  %v6998_v58 = vmul.f32 1.442695, %v6719_v11  ;;  %v6580_v20 = vpop.f32.mrf.mxu0 }
 0x5a1   :  { %v9045_v17 = vpop.eup %9044  ;;  %7202 = vst [vmem:[#allocation11 + $0x420] sm:$0xff] %v9043_v61  ;;  %v7964_v56 = vpop.f32.mrf.mxu1  ;;  %9070 = vpow2.f32 %v7046_v24  ;;  %v7054_v10 = vmul.f32 1.442695, %v6580_v20 }
 0x5a2   :  { %v9047_v1 = vpop.eup %9046  ;;  %7169 = vst [vmem:[#allocation11 + $0x318] sm:$0xff] %v9045_v17  ;;  %9072 = vpow2.f32 %v6998_v58  ;;  %v7028_v62 = vmul.f32 1.442695, %v7964_v56  ;;  %v6582_v0 = vpop.f32.mrf.mxu0 }
 0x5a3   :  { %v9049_v37 = vpop.eup %9048  ;;  %7203 = vst [vmem:[#allocation11 + $0x428] sm:$0xff] %v9047_v1  ;;  %v6722_v47 = vpop.f32.mrf.mxu1  ;;  %9074 = vpow2.f32 %v7054_v10  ;;  %v7056_v54 = vmul.f32 1.442695, %v6582_v0 }
 0x5a4   :  { %v9051_v45 = vpop.eup %9050  ;;  %7159 = vst [vmem:[#allocation11 + $0x2c8] sm:$0xff] %v9049_v37  ;;  %9076 = vpow2.f32 %v7028_v62  ;;  %v7008_v32 = vmul.f32 1.442695, %v6722_v47  ;;  %v6584_v63 = vpop.f32.mrf.mxu0 }
 0x5a5   :  { %v9053_v43 = vpop.eup %9052  ;;  %7207 = vst [vmem:[#allocation11 + $0x448] sm:$0xff] %v9051_v45  ;;  %v7967_v22 = vpop.f32.mrf.mxu1  ;;  %9078 = vpow2.f32 %v7056_v54  ;;  %v7064_v39 = vmul.f32 1.442695, %v6584_v63 }
 0x5a6   :  { %v9055_v38 = vpop.eup %9054  ;;  %7184 = vst [vmem:[#allocation11 + $0x390] sm:$0xff] %v9053_v43  ;;  %9080 = vpow2.f32 %v7008_v32  ;;  %v7058_v31 = vmul.f32 1.442695, %v7967_v22  ;;  %v6586_v15 = vpop.f32.mrf.mxu0 }
 0x5a7   :  { %v9057_v3 = vpop.eup %9056  ;;  %7208 = vst [vmem:[#allocation11 + $0x450] sm:$0xff] %v9055_v38  ;;  %v6735_v5 = vpop.f32.mrf.mxu1  ;;  %9082 = vpow2.f32 %v7064_v39  ;;  %v7066_v40 = vmul.f32 1.442695, %v6586_v15 }
 0x5a8   :  { %v9059_v51 = vpop.eup %9058  ;;  %7174 = vst [vmem:[#allocation11 + $0x340] sm:$0xff] %v9057_v3  ;;  %9084 = vpow2.f32 %v7058_v31  ;;  %v7038_v49 = vmul.f32 1.442695, %v6735_v5 }
 0x5a9   :  { %v9061_v50 = vpop.eup %9060  ;;  %7212 = vst [vmem:[#allocation11 + $0x470] sm:$0xff] %v9059_v51  ;;  %v7968_v9 = vpop.f32.mrf.mxu1  ;;  %9086 = vpow2.f32 %v7066_v40 }
 0x5aa   :  { %v9063_v44 = vpop.eup %9062  ;;  %7189 = vst [vmem:[#allocation11 + $0x3b8] sm:$0xff] %v9061_v50  ;;  %9088 = vpow2.f32 %v7038_v49  ;;  %v7068_v19 = vmul.f32 1.442695, %v7968_v9 }
 0x5ab   :  { %v9065_v46 = vpop.eup %9064  ;;  %7213 = vst [vmem:[#allocation11 + $0x478] sm:$0xff] %v9063_v44  ;;  %v6738_v55 = vpop.f32.mrf.mxu1 }
 0x5ac   :  { %v9067_v60 = vpop.eup %9066  ;;  %7179 = vst [vmem:[#allocation11 + $0x368] sm:$0xff] %v9065_v46  ;;  %9090 = vpow2.f32 %v7068_v19  ;;  %v7048_v25 = vmul.f32 1.442695, %v6738_v55 }
 0x5ad   :  { %v9069_v2 = vpop.eup %9068  ;;  %7217 = vst [vmem:[#allocation11 + $0x498] sm:$0xff] %v9067_v60 }
 0x5ae   :  { %v9071_v41 = vpop.eup %9070  ;;  %7204 = vst [vmem:[#allocation11 + $0x430] sm:$0xff] %v9069_v2  ;;  %9092 = vpow2.f32 %v7048_v25 }
 0x5af   :  { %v9073_v57 = vpop.eup %9072  ;;  %7218 = vst [vmem:[#allocation11 + $0x4a0] sm:$0xff] %v9071_v41 }
 0x5b0   :  { %v9075_v59 = vpop.eup %9074  ;;  %7194 = vst [vmem:[#allocation11 + $0x3e0] sm:$0xff] %v9073_v57 }
 0x5b1   :  { %v9077_v36 = vpop.eup %9076  ;;  %7222 = vst [vmem:[#allocation11 + $0x4c0] sm:$0xff] %v9075_v59 }
 0x5b2   :  { %v9079_v27 = vpop.eup %9078  ;;  %7209 = vst [vmem:[#allocation11 + $0x458] sm:$0xff] %v9077_v36 }
 0x5b3   :  { %v9081_v14 = vpop.eup %9080  ;;  %7223 = vst [vmem:[#allocation11 + $0x4c8] sm:$0xff] %v9079_v27 }
 0x5b4   :  { %v9083_v7 = vpop.eup %9082  ;;  %7199 = vst [vmem:[#allocation11 + $0x408] sm:$0xff] %v9081_v14 }
 0x5b5   :  { %v9085_v26 = vpop.eup %9084  ;;  %7227 = vst [vmem:[#allocation11 + $0x4e8] sm:$0xff] %v9083_v7 }
 0x5b6   :  { %v9087_v33 = vpop.eup %9086  ;;  %7224 = vst [vmem:[#allocation11 + $0x4d0] sm:$0xff] %v9085_v26 }
 0x5b7   :  { %v9089_v12 = vpop.eup %9088  ;;  %7228 = vst [vmem:[#allocation11 + $0x4f0] sm:$0xff] %v9087_v33 }
 0x5b8   :  { %7214 = vst [vmem:[#allocation11 + $0x480] sm:$0xff] %v9089_v12 }
 0x5b9   :  { %v9091_v21 = vpop.eup %9090 }
 0x5ba   :  { %7229 = vst [vmem:[#allocation11 + $0x4f8] sm:$0xff] %v9091_v21 }
 0x5bb   :  { %v9093_v29 = vpop.eup %9092 }
 0x5bc   :  { %7219 = vst [vmem:[#allocation11 + $0x4a8] sm:$0xff] %v9093_v29 }
 0x5bd   :  { %9221 = shalt.err (!%p9218_p1)
}
 0x5be   :  { %7253 = dma.vmem_to_hbm [thread:$0]  %s7248_s20, 20480, %s12303_s5, [#allocation12], %s9241_s21, %s9241_s21, %s9242_s22  }
 0x5bf   :  { %9236 = dma.done.wait [#allocation4], 20480  }
 0x5c0   :  { %9237 = vsyncadd [#allocation4], 4294946816 }
 0x5c1   :  { %9238 = dma.done.wait [#allocation12], 20480  }
 0x5c2   :  { %9239 = vsyncadd [#allocation12], 4294946816 }
 0x5c3   :  { %7260 = vsyncpa [#allocation3], 1 }
 0x5c4   :  { %7261 = vsyncpa [#allocation6], 1 }
 0x5c5   :  { %7262 = vsyncpa [#allocation9], 1 }
 0x5c6   :  { %7263 = vsyncpa [#allocation4], 1 }
 0x5c7   :  { %7264 = vsyncpa [#allocation12], 1 }

</bundles_post_ra>
